<compile_context>
chip_gen: v7x
topology: tpu7x:2x2x1
jax: 0.10.0
libtpu: 0.0.40
codegen_flags: <defaults>
</compile_context>

<pallas_src>
import functools

import jax
import jax.numpy as jnp
from jax import lax
from jax.experimental import pallas as pl
from jax.experimental.pallas import tpu as pltpu

LANE = 128


def _round_up(x, m):
    return (x + m - 1) // m * m


# ----------------------------------------------------------------------------
# Kernel 1: fused psi_1 forward (3x RelConv+ReLU, cat, final linear) per graph
# ----------------------------------------------------------------------------

def psi1_fused_kernel(x_ref, acat_ref, wcat_ref, br_ref, wf_ref, bf_ref, o_ref,
                      xw_stage, hs_stage):
    """One graph per grid step. RelConv layer (PyG mean aggregation as dense operators):
         h_{l+1} = relu( A_in @ (h_l W1) + A_out @ (h_l W2) + h_l Wr + br )
       The three weight matmuls are fused into one h_l @ [W1 | W2 | Wr]; the two
       aggregations are fused into one [A_in | A_out] @ [XW1 ; XW2] (K = 2N) contraction
       via a VMEM staging buffer. Final layer (cat=True, lin=True):
         out = [x, h1, h2, h3] @ Wf + bf, done as ONE K=(L+1)*C dot from a staged bf16
       activation slab (numerically identical to concat + matmul, no lane shuffles)."""
    c = o_ref.shape[-1]                       # padded channel width (== LANE)
    n = o_ref.shape[-2]                       # padded node count
    num_layers = wcat_ref.shape[0]

    h_bf16 = x_ref[...]                       # [N_pad, c] bf16 (padded channels are zero)
    hs_stage[:, 0:c] = h_bf16                 # cat block 0 = x
    for l in range(num_layers):
        xw = jnp.dot(h_bf16, wcat_ref[l],
                     preferred_element_type=jnp.float32)              # [N_pad, 3c] f32
        # Stage [XW1 ; XW2] vertically (bf16) -> one fat K=2N aggregation dot on the MXU.
        xw_stage[0:n, :] = xw[:, 0:c].astype(jnp.bfloat16)
        xw_stage[n:2 * n, :] = xw[:, c:2 * c].astype(jnp.bfloat16)
        agg = jnp.dot(acat_ref[...], xw_stage[...],
                      preferred_element_type=jnp.float32)              # [N_pad, c] f32
        h = jnp.maximum(xw[:, 2 * c:3 * c] + br_ref[l] + agg, 0.0)
        h_bf16 = h.astype(jnp.bfloat16)                                # cast ONCE per layer
        hs_stage[:, (l + 1) * c:(l + 2) * c] = h_bf16

    # Final linear over the concatenated activations: single K=(L+1)*c contraction.
    out = bf_ref[...] + jnp.dot(hs_stage[...], wf_ref[...],
                                preferred_element_type=jnp.float32)
    o_ref[...] = out.astype(o_ref.dtype)                               # bf16 store


def run_psi1(x_stack, a_cat, wcat, br, wf, bf):
    n_graphs, n_pad, c_pad = x_stack.shape
    num_layers = wcat.shape[0]
    flops = n_graphs * (num_layers * (2 * n_pad * c_pad * 3 * c_pad
                                      + 2 * n_pad * (2 * n_pad) * c_pad)
                        + 2 * n_pad * (num_layers + 1) * c_pad * c_pad)
    bytes_accessed = (sum(int(a.size) * a.dtype.itemsize
                          for a in (x_stack, a_cat, wcat, br, wf, bf))
                      + n_graphs * n_pad * c_pad * 2)
    return pl.pallas_call(
        psi1_fused_kernel,
        out_shape=jax.ShapeDtypeStruct((n_graphs, n_pad, c_pad), jnp.bfloat16),
        grid=(n_graphs,),
        in_specs=[
            pl.BlockSpec((None, n_pad, c_pad), lambda g: (g, 0, 0)),       # x (bf16)
            pl.BlockSpec((None, n_pad, 2 * n_pad), lambda g: (g, 0, 0)),   # [A_in|A_out] bf16
            pl.BlockSpec(wcat.shape, lambda g: (0, 0, 0)),                 # shared weights
            pl.BlockSpec(br.shape, lambda g: (0, 0, 0)),
            pl.BlockSpec(wf.shape, lambda g: (0, 0)),
            pl.BlockSpec(bf.shape, lambda g: (0, 0)),
        ],
        out_specs=pl.BlockSpec((None, n_pad, c_pad), lambda g: (g, 0, 0)),
        scratch_shapes=[
            pltpu.VMEM((2 * n_pad, c_pad), jnp.bfloat16),                  # [XW1 ; XW2]
            pltpu.VMEM((n_pad, (num_layers + 1) * c_pad), jnp.bfloat16),   # [x,h1,h2,h3]
        ],
        compiler_params=pltpu.CompilerParams(
            dimension_semantics=("parallel",),          # 2 graphs -> 2 TCs on v7x
            vmem_limit_bytes=64 * 1024 * 1024),
        cost_estimate=pl.CostEstimate(flops=int(flops), transcendentals=0,
                                      bytes_accessed=int(bytes_accessed)),
    )(x_stack, a_cat, wcat, br, wf, bf)


# ----------------------------------------------------------------------------
# Kernel 2: dense correspondence scores S[i, j] = <h_s[i], h_t[j]>
# ----------------------------------------------------------------------------

def similarity_kernel(h_ref, s_ref):
    # h_ref is already bf16; contract the channel (last) dims of both operands directly
    # -> no XLU transpose, f32 accumulation.
    s_ref[...] = lax.dot_general(h_ref[0], h_ref[1],
                                 dimension_numbers=(((1,), (1,)), ((), ())),
                                 preferred_element_type=jnp.float32)


def run_similarity(h_all):
    n_pad = h_all.shape[1]
    return pl.pallas_call(
        similarity_kernel,
        out_shape=jax.ShapeDtypeStruct((n_pad, n_pad), jnp.float32),
        in_specs=[pl.BlockSpec(memory_space=pltpu.MemorySpace.VMEM)],
        out_specs=pl.BlockSpec(memory_space=pltpu.MemorySpace.VMEM),
    )(h_all)


# ----------------------------------------------------------------------------
# Kernel 3: scatter of precomputed top-k softmax probabilities (one-hot accumulate)
# ----------------------------------------------------------------------------

def topk_scatter_kernel(idx_ref, p_ref, o_ref, *, k):
    """S is NOT re-read here: lax.top_k values already yielded the probabilities.
       Fused compare + select + accumulate per selected column (pure VPU, no exp/max/sum)."""
    col = lax.broadcasted_iota(jnp.int32, o_ref.shape, 1)
    acc = jnp.where(idx_ref[:, 0:1] == col, p_ref[:, 0:1], 0.0)
    for m in range(1, k):
        acc = acc + jnp.where(idx_ref[:, m:m + 1] == col, p_ref[:, m:m + 1], 0.0)
    o_ref[...] = acc


def run_topk_scatter(idx_pad, p_pad, k, n_pad):
    return pl.pallas_call(
        functools.partial(topk_scatter_kernel, k=k),
        out_shape=jax.ShapeDtypeStruct((n_pad, n_pad), jnp.float32),
        in_specs=[pl.BlockSpec(memory_space=pltpu.MemorySpace.VMEM),
                  pl.BlockSpec(memory_space=pltpu.MemorySpace.VMEM)],
        out_specs=pl.BlockSpec(memory_space=pltpu.MemorySpace.VMEM),
    )(idx_pad, p_pad)


# ----------------------------------------------------------------------------
# Glue: parameters, edge_index -> dense mean-aggregation operators, forward
# ----------------------------------------------------------------------------

def init_relcnn_params(key, in_channels, out_channels, num_layers):
    """Synthetic init matching RelCNN's parameter shapes: num_layers x RelConv
       (lin1/lin2 [Cin,Cout] no bias, root [Cin,Cout] + bias), final Lin(Cin+L*Cout, Cout)."""
    params = {"convs": []}
    c_in = in_channels
    for _ in range(num_layers):
        key, k1, k2, k3, k4 = jax.random.split(key, 5)
        params["convs"].append(dict(
            w1=0.1 * jax.random.normal(k1, (c_in, out_channels), jnp.float32),
            w2=0.1 * jax.random.normal(k2, (c_in, out_channels), jnp.float32),
            wr=0.1 * jax.random.normal(k3, (c_in, out_channels), jnp.float32),
            br=0.1 * jax.random.normal(k4, (1, out_channels), jnp.float32),
        ))
        c_in = out_channels
    cat_dim = in_channels + num_layers * out_channels
    key, k5, k6 = jax.random.split(key, 3)
    params["final_w"] = 0.1 * jax.random.normal(k5, (cat_dim, out_channels), jnp.float32)
    params["final_b"] = 0.1 * jax.random.normal(k6, (1, out_channels), jnp.float32)
    return params


def pack_relcnn_params(params, in_channels, out_channels, c_pad):
    """Pack & zero-pad weights into lane-tile aligned blocks consumed by the fused kernel.
       Padded rows/cols are zero, so padded channels stay exactly zero through the network."""
    num_layers = len(params["convs"])
    wcat = jnp.zeros((num_layers, c_pad, 3 * c_pad), jnp.float32)
    br = jnp.zeros((num_layers, 1, c_pad), jnp.float32)
    c_in = in_channels
    for l, layer in enumerate(params["convs"]):
        wcat = wcat.at[l, :c_in, 0 * c_pad:0 * c_pad + out_channels].set(layer["w1"])
        wcat = wcat.at[l, :c_in, 1 * c_pad:1 * c_pad + out_channels].set(layer["w2"])
        wcat = wcat.at[l, :c_in, 2 * c_pad:2 * c_pad + out_channels].set(layer["wr"])
        br = br.at[l, 0, :out_channels].set(layer["br"][0])
        c_in = out_channels
    widths = [in_channels] + [out_channels] * num_layers
    wf = jnp.zeros(((num_layers + 1) * c_pad, c_pad), jnp.float32)
    row = 0
    for i, w in enumerate(widths):
        wf = wf.at[i * c_pad:i * c_pad + w, :out_channels].set(
            params["final_w"][row:row + w])
        row += w
    bf = jnp.zeros((1, c_pad), jnp.float32).at[0, :out_channels].set(params["final_b"][0])
    return dict(wcat=wcat.astype(jnp.bfloat16), br=br,
                wf=wf.astype(jnp.bfloat16), bf=bf)


def build_adj_cat_padded(edge_index, n_pad):
    """Dense mean-aggregation operators matching PyG MessagePassing(aggr='mean'):
       A_in[i,j]  = (#edges j->i)/in-deg(i),  A_out[i,k] = (#edges i->k)/out-deg(i).
       Isolated / padded nodes get all-zero rows. Returned as ONE [n_pad, 2*n_pad] bf16
       block ([A_in | A_out]) so the kernel does a single fat K=2N contraction."""
    src, dst = edge_index[0], edge_index[1]
    ones = jnp.ones(src.shape[0], dtype=jnp.float32)
    cnt_in = jnp.zeros((n_pad, n_pad), jnp.float32).at[dst, src].add(ones)
    a_in = cnt_in / jnp.maximum(cnt_in.sum(axis=1, keepdims=True), 1.0)
    cnt_out = jnp.zeros((n_pad, n_pad), jnp.float32).at[src, dst].add(ones)
    a_out = cnt_out / jnp.maximum(cnt_out.sum(axis=1, keepdims=True), 1.0)
    return jnp.concatenate([a_in, a_out], axis=-1).astype(jnp.bfloat16)


@functools.partial(jax.jit, static_argnames=("k",))
def graph_model_forward(packed, x1, x2, e1, e2, *, k):
    n_s, n_t = x1.shape[0], x2.shape[0]
    c_pad = packed["wcat"].shape[1]
    n_pad = _round_up(max(n_s, n_t), LANE)

    def pad_x(x):
        return (jnp.zeros((n_pad, c_pad), jnp.float32)
                .at[:x.shape[0], :x.shape[1]].set(x).astype(jnp.bfloat16))

    x_stack = jnp.stack([pad_x(x1), pad_x(x2)])                   # [2, n_pad, c_pad] bf16
    a_cat = jnp.stack([build_adj_cat_padded(e1, n_pad),
                       build_adj_cat_padded(e2, n_pad)])          # [2, n_pad, 2*n_pad] bf16

    # psi_1 for source + target graphs in one fused kernel (grid over graphs).
    h_all = run_psi1(x_stack, a_cat, packed["wcat"], packed["br"],
                     packed["wf"], packed["bf"])                  # [2, n_pad, c_pad] bf16

    s_pad = run_similarity(h_all)                                 # [n_pad, n_pad] f32

    # top-k correspondence selection (no Pallas TPU top-k primitive -> JAX glue).
    vals, idx = lax.top_k(s_pad[:n_s, :n_t], k)                   # [n_s, k] f32 / int32
    # Row softmax over the k selected scores, computed on the tiny [n_s, k] matrix in jnp
    # (vals[:, 0] is the row max since top_k sorts descending).
    p = jnp.exp(vals - vals[:, 0:1])
    p = p / jnp.sum(p, axis=-1, keepdims=True)
    idx_pad = jnp.zeros((n_pad, k), jnp.int32).at[:n_s, :].set(idx)
    p_pad = jnp.zeros((n_pad, k), jnp.float32).at[:n_s, :].set(p)  # padded rows: zero mass

    # TODO(synk): num_steps=None => DGMC refinement loop (psi_2 + consensus MLP) is skipped;
    # training-time negative sampling / ground-truth (y) injection disabled (eval forward);
    # S_L is returned densely instead of torch.sparse_coo_tensor.
    s_l_pad = run_topk_scatter(idx_pad, p_pad, k, n_pad)          # [n_pad, n_pad]
    return s_l_pad[:n_s, :n_t]


class GraphModelPallas:
    def __init__(self, in_channels, out_channels, k=25, key=jax.random.PRNGKey(42)):
        key1, _key2 = jax.random.split(key)
        raw = init_relcnn_params(key1, in_channels, out_channels, num_layers=3)
        c_pad = _round_up(max(in_channels, out_channels), LANE)
        self.psi_1 = pack_relcnn_params(raw, in_channels, out_channels, c_pad)
        # psi_2 = RelCNN(64,64,3) and the DGMC consensus MLP exist in the torch module but
        # only run inside the refinement loop; num_steps=None => never executed here.
        self.k = k

    def __call__(self, x1, x2, edge1, edge2, y):
        e1 = jnp.concatenate(edge1, axis=1)               # torch.cat(edge1, dim=1)
        e2 = jnp.concatenate(edge2, axis=1)               # torch.cat(edge2, dim=1)
        k = min(self.k, x2.shape[0])                      # k <= N_t, as in DGMC
        return graph_model_forward(self.psi_1, x1, x2, e1, e2, k=k)


# ----------------------------------------------------------------------------
# Example run
# ----------------------------------------------------------------------------

if __name__ == "__main__":
    key = jax.random.PRNGKey(0)
    in_channels, out_channels, k = 32, 64, 25
    n_s, n_t = 48, 40
    e_s, e_t = 96, 80

    k_x1, k_x2, k_e1a, k_e1b, k_e2a, k_e2b = jax.random.split(key, 6)
    x1 = jax.random.normal(k_x1, (n_s, in_channels), jnp.float32)
    x2 = jax.random.normal(k_x2, (n_t, in_channels), jnp.float32)
    # edge1 / edge2 are tuples of [2, E] edge-index tensors (concatenated in forward)
    edge1 = (jax.random.randint(k_e1a, (2, e_s), 0, n_s, jnp.int32),
             jax.random.randint(k_e1b, (2, e_s), 0, n_s, jnp.int32))
    edge2 = (jax.random.randint(k_e2a, (2, e_t), 0, n_t, jnp.int32),
             jax.random.randint(k_e2b, (2, e_t), 0, n_t, jnp.int32))
    y = jnp.stack([jnp.arange(16, dtype=jnp.int32),
                   jnp.arange(16, dtype=jnp.int32)])      # ground-truth pairs (unused, eval)

    model = GraphModelPallas(in_channels, out_channels, k=k)
    s_l = model(x1, x2, edge1, edge2, y)
    jax.block_until_ready(s_l)

    assert s_l.shape == (n_s, n_t)
    # each row's softmax over its k selected targets must sum to 1
    assert jnp.allclose(s_l.sum(axis=-1), 1.0, atol=1e-4)
    # exactly k nonzero entries per row
    assert int((s_l > 0).sum(axis=-1).min()) == k
    assert int((s_l > 0).sum(axis=-1).max()) == k

    print("KERNEL_OK")
</pallas_src>

<mosaic_0001>
module attributes {stable_mosaic.version = 11 : i64} {
  func.func private @main(%arg0: i32) attributes {dimension_semantics = [#tpu.dimension_semantics<core_parallel>], iteration_bounds = array<i64: 2>, tpu.core_type = #tpu.core_type<sc_scalar_subcore>, window_params = []} {
    return
  }
}

module attributes {stable_mosaic.version = 11 : i64} {
  func.func private @main(%arg0: i32) attributes {dimension_semantics = [#tpu.dimension_semantics<core_parallel>], iteration_bounds = array<i64: 2>, tpu.core_type = #tpu.core_type<sc_scalar_subcore>, window_params = []} {
    return
  }
}

module attributes {stable_mosaic.version = 11 : i64} {
  func.func @similarity_kernel(%arg0: memref<2x128x128xbf16, #tpu.memory_space<vmem>>, %arg1: memref<128x128xf32, #tpu.memory_space<vmem>>) attributes {dimension_semantics = [], scalar_prefetch = 0 : i64, scratch_operands = 0 : i64, tpu.core_type = #tpu.core_type<tc>} {
    %c0 = arith.constant 0 : index
    %c0_0 = arith.constant 0 : index
    %c0_1 = arith.constant 0 : index
    %0 = vector.load %arg0[%c0, %c0_0, %c0_1] : memref<2x128x128xbf16, #tpu.memory_space<vmem>>, vector<1x128x128xbf16>
    %1 = vector.shape_cast %0 : vector<1x128x128xbf16> to vector<128x128xbf16>
    %c1 = arith.constant 1 : index
    %c0_2 = arith.constant 0 : index
    %c0_3 = arith.constant 0 : index
    %2 = vector.load %arg0[%c1, %c0_2, %c0_3] : memref<2x128x128xbf16, #tpu.memory_space<vmem>>, vector<1x128x128xbf16>
    %3 = vector.shape_cast %2 : vector<1x128x128xbf16> to vector<128x128xbf16>
    %cst = arith.constant dense<0.000000e+00> : vector<128x128xf32>
    %4 = tpu.matmul %1, %3, %cst {dimension_numbers = #tpu.dot_dimension_numbers<[1], [1], [0], [0], [0, 0, 1, 0], [], []>} : vector<128x128xbf16>, vector<128x128xbf16>, vector<128x128xf32> -> vector<128x128xf32>
    %c0_4 = arith.constant 0 : index
    %c0_5 = arith.constant 0 : index
    %5 = vector.load %arg1[%c0_4, %c0_5] : memref<128x128xf32, #tpu.memory_space<vmem>>, vector<128x128xf32>
    tpu.vector_store %arg1[%c0_4, %c0_5], %4 {strides = array<i32>} : memref<128x128xf32, #tpu.memory_space<vmem>>, vector<128x128xf32>,
    return
  }
}

module attributes {stable_mosaic.version = 11 : i64} {
  func.func @psi1_fused_kernel(%arg0: i32, %arg1: memref<1x128x128xbf16, #tpu.memory_space<vmem>>, %arg2: memref<1x128x256xbf16, #tpu.memory_space<vmem>>, %arg3: memref<3x128x384xbf16, #tpu.memory_space<vmem>>, %arg4: memref<3x1x128xf32, #tpu.memory_space<vmem>>, %arg5: memref<512x128xbf16, #tpu.memory_space<vmem>>, %arg6: memref<1x128xf32, #tpu.memory_space<vmem>>, %arg7: memref<1x128x128xbf16, #tpu.memory_space<vmem>>, %arg8: memref<256x128xbf16, #tpu.memory_space<vmem>>, %arg9: memref<128x512xbf16, #tpu.memory_space<vmem>>) attributes {dimension_semantics = [#tpu.dimension_semantics<parallel>], iteration_bounds = array<i64: 2>, scalar_prefetch = 0 : i64, scratch_operands = 2 : i64, tpu.core_type = #tpu.core_type<tc>, window_params = [{transform_indices = @transform_0, window_bounds = array<i64: 1, 128, 128>}, {transform_indices = @transform_1, window_bounds = array<i64: 1, 128, 256>}, {pipeline_mode = #tpu.pipeline_mode<synchronous>, transform_indices = @transform_2, window_bounds = array<i64: 3, 128, 384>}, {pipeline_mode = #tpu.pipeline_mode<synchronous>, transform_indices = @transform_3, window_bounds = array<i64: 3, 1, 128>}, {pipeline_mode = #tpu.pipeline_mode<synchronous>, transform_indices = @transform_4, window_bounds = array<i64: 512, 128>}, {pipeline_mode = #tpu.pipeline_mode<synchronous>, transform_indices = @transform_5, window_bounds = array<i64: 1, 128>}, {transform_indices = @transform_6, window_bounds = array<i64: 1, 128, 128>}]} {
    %c0 = arith.constant 0 : index
    %c0_0 = arith.constant 0 : index
    %c0_1 = arith.constant 0 : index
    %0 = vector.load %arg1[%c0, %c0_0, %c0_1] : memref<1x128x128xbf16, #tpu.memory_space<vmem>>, vector<1x128x128xbf16>
    %1 = vector.shape_cast %0 : vector<1x128x128xbf16> to vector<128x128xbf16>
    %c0_2 = arith.constant 0 : index
    %c0_3 = arith.constant 0 : index
    %2 = vector.load %arg9[%c0_2, %c0_3] : memref<128x512xbf16, #tpu.memory_space<vmem>>, vector<128x128xbf16>
    tpu.vector_store %arg9[%c0_2, %c0_3], %1 {strides = array<i32>} : memref<128x512xbf16, #tpu.memory_space<vmem>>, vector<128x128xbf16>,
    %c0_4 = arith.constant 0 : index
    %c0_5 = arith.constant 0 : index
    %c0_6 = arith.constant 0 : index
    %3 = vector.load %arg3[%c0_4, %c0_5, %c0_6] : memref<3x128x384xbf16, #tpu.memory_space<vmem>>, vector<1x128x384xbf16>
    %4 = vector.shape_cast %3 : vector<1x128x384xbf16> to vector<128x384xbf16>
    %cst = arith.constant dense<0.000000e+00> : vector<128x384xf32>
    %5 = tpu.matmul %1, %4, %cst {dimension_numbers = #tpu.dot_dimension_numbers<[1], [0], [0], [1], [0, 0, 1, 1], [], []>} : vector<128x128xbf16>, vector<128x384xbf16>, vector<128x384xf32> -> vector<128x384xf32>
    %6 = vector.extract_strided_slice %5 {offsets = [0, 0], sizes = [128, 128], strides = [1, 1]} : vector<128x384xf32> to vector<128x128xf32>
    %7 = arith.truncf %6 : vector<128x128xf32> to vector<128x128xbf16>
    %c0_7 = arith.constant 0 : index
    %c0_8 = arith.constant 0 : index
    %8 = vector.load %arg8[%c0_7, %c0_8] : memref<256x128xbf16, #tpu.memory_space<vmem>>, vector<128x128xbf16>
    tpu.vector_store %arg8[%c0_7, %c0_8], %7 {strides = array<i32>} : memref<256x128xbf16, #tpu.memory_space<vmem>>, vector<128x128xbf16>,
    %9 = vector.extract_strided_slice %5 {offsets = [0, 128], sizes = [128, 128], strides = [1, 1]} : vector<128x384xf32> to vector<128x128xf32>
    %10 = arith.truncf %9 : vector<128x128xf32> to vector<128x128xbf16>
    %c128 = arith.constant 128 : index
    %c0_9 = arith.constant 0 : index
    %11 = vector.load %arg8[%c128, %c0_9] : memref<256x128xbf16, #tpu.memory_space<vmem>>, vector<128x128xbf16>
    tpu.vector_store %arg8[%c128, %c0_9], %10 {strides = array<i32>} : memref<256x128xbf16, #tpu.memory_space<vmem>>, vector<128x128xbf16>,
    %c0_10 = arith.constant 0 : index
    %c0_11 = arith.constant 0 : index
    %c0_12 = arith.constant 0 : index
    %12 = vector.load %arg2[%c0_10, %c0_11, %c0_12] : memref<1x128x256xbf16, #tpu.memory_space<vmem>>, vector<1x128x256xbf16>
    %13 = vector.shape_cast %12 : vector<1x128x256xbf16> to vector<128x256xbf16>
    %c0_13 = arith.constant 0 : index
    %c0_14 = arith.constant 0 : index
    %14 = vector.load %arg8[%c0_13, %c0_14] : memref<256x128xbf16, #tpu.memory_space<vmem>>, vector<256x128xbf16>
    %cst_15 = arith.constant dense<0.000000e+00> : vector<128x128xf32>
    %15 = tpu.matmul %13, %14, %cst_15 {dimension_numbers = #tpu.dot_dimension_numbers<[1], [0], [0], [1], [0, 0, 1, 1], [], []>} : vector<128x256xbf16>, vector<256x128xbf16>, vector<128x128xf32> -> vector<128x128xf32>
    %16 = vector.extract_strided_slice %5 {offsets = [0, 256], sizes = [128, 128], strides = [1, 1]} : vector<128x384xf32> to vector<128x128xf32>
    %c0_16 = arith.constant 0 : index
    %c0_17 = arith.constant 0 : index
    %c0_18 = arith.constant 0 : index
    %17 = vector.load %arg4[%c0_16, %c0_17, %c0_18] : memref<3x1x128xf32, #tpu.memory_space<vmem>>, vector<1x1x128xf32>
    %18 = vector.shape_cast %17 : vector<1x1x128xf32> to vector<1x128xf32>
    %19 = vector.broadcast %18 : vector<1x128xf32> to vector<128x128xf32>
    %20 = arith.addf %16, %19 : vector<128x128xf32>
    %21 = arith.addf %20, %15 : vector<128x128xf32>
    %cst_19 = arith.constant 0.000000e+00 : f32
    %22 = vector.broadcast %cst_19 : f32 to vector<128x128xf32>
    %23 = arith.maximumf %21, %22 : vector<128x128xf32>
    %24 = arith.truncf %23 : vector<128x128xf32> to vector<128x128xbf16>
    %c0_20 = arith.constant 0 : index
    %c128_21 = arith.constant 128 : index
    %25 = vector.load %arg9[%c0_20, %c128_21] : memref<128x512xbf16, #tpu.memory_space<vmem>>, vector<128x128xbf16>
    tpu.vector_store %arg9[%c0_20, %c128_21], %24 {strides = array<i32>} : memref<128x512xbf16, #tpu.memory_space<vmem>>, vector<128x128xbf16>,
    %c1 = arith.constant 1 : index
    %c0_22 = arith.constant 0 : index
    %c0_23 = arith.constant 0 : index
    %26 = vector.load %arg3[%c1, %c0_22, %c0_23] : memref<3x128x384xbf16, #tpu.memory_space<vmem>>, vector<1x128x384xbf16>
    %27 = vector.shape_cast %26 : vector<1x128x384xbf16> to vector<128x384xbf16>
    %cst_24 = arith.constant dense<0.000000e+00> : vector<128x384xf32>
    %28 = tpu.matmul %24, %27, %cst_24 {dimension_numbers = #tpu.dot_dimension_numbers<[1], [0], [0], [1], [0, 0, 1, 1], [], []>} : vector<128x128xbf16>, vector<128x384xbf16>, vector<128x384xf32> -> vector<128x384xf32>
    %29 = vector.extract_strided_slice %28 {offsets = [0, 0], sizes = [128, 128], strides = [1, 1]} : vector<128x384xf32> to vector<128x128xf32>
    %30 = arith.truncf %29 : vector<128x128xf32> to vector<128x128xbf16>
    %c0_25 = arith.constant 0 : index
    %c0_26 = arith.constant 0 : index
    %31 = vector.load %arg8[%c0_25, %c0_26] : memref<256x128xbf16, #tpu.memory_space<vmem>>, vector<128x128xbf16>
    tpu.vector_store %arg8[%c0_25, %c0_26], %30 {strides = array<i32>} : memref<256x128xbf16, #tpu.memory_space<vmem>>, vector<128x128xbf16>,
    %32 = vector.extract_strided_slice %28 {offsets = [0, 128], sizes = [128, 128], strides = [1, 1]} : vector<128x384xf32> to vector<128x128xf32>
    %33 = arith.truncf %32 : vector<128x128xf32> to vector<128x128xbf16>
    %c128_27 = arith.constant 128 : index
    %c0_28 = arith.constant 0 : index
    %34 = vector.load %arg8[%c128_27, %c0_28] : memref<256x128xbf16, #tpu.memory_space<vmem>>, vector<128x128xbf16>
    tpu.vector_store %arg8[%c128_27, %c0_28], %33 {strides = array<i32>} : memref<256x128xbf16, #tpu.memory_space<vmem>>, vector<128x128xbf16>,
    %c0_29 = arith.constant 0 : index
    %c0_30 = arith.constant 0 : index
    %c0_31 = arith.constant 0 : index
    %35 = vector.load %arg2[%c0_29, %c0_30, %c0_31] : memref<1x128x256xbf16, #tpu.memory_space<vmem>>, vector<1x128x256xbf16>
    %36 = vector.shape_cast %35 : vector<1x128x256xbf16> to vector<128x256xbf16>
    %c0_32 = arith.constant 0 : index
    %c0_33 = arith.constant 0 : index
    %37 = vector.load %arg8[%c0_32, %c0_33] : memref<256x128xbf16, #tpu.memory_space<vmem>>, vector<256x128xbf16>
    %cst_34 = arith.constant dense<0.000000e+00> : vector<128x128xf32>
    %38 = tpu.matmul %36, %37, %cst_34 {dimension_numbers = #tpu.dot_dimension_numbers<[1], [0], [0], [1], [0, 0, 1, 1], [], []>} : vector<128x256xbf16>, vector<256x128xbf16>, vector<128x128xf32> -> vector<128x128xf32>
    %39 = vector.extract_strided_slice %28 {offsets = [0, 256], sizes = [128, 128], strides = [1, 1]} : vector<128x384xf32> to vector<128x128xf32>
    %c1_35 = arith.constant 1 : index
    %c0_36 = arith.constant 0 : index
    %c0_37 = arith.constant 0 : index
    %40 = vector.load %arg4[%c1_35, %c0_36, %c0_37] : memref<3x1x128xf32, #tpu.memory_space<vmem>>, vector<1x1x128xf32>
    %41 = vector.shape_cast %40 : vector<1x1x128xf32> to vector<1x128xf32>
    %42 = vector.broadcast %41 : vector<1x128xf32> to vector<128x128xf32>
    %43 = arith.addf %39, %42 : vector<128x128xf32>
    %44 = arith.addf %43, %38 : vector<128x128xf32>
    %cst_38 = arith.constant 0.000000e+00 : f32
    %45 = vector.broadcast %cst_38 : f32 to vector<128x128xf32>
    %46 = arith.maximumf %44, %45 : vector<128x128xf32>
    %47 = arith.truncf %46 : vector<128x128xf32> to vector<128x128xbf16>
    %c0_39 = arith.constant 0 : index
    %c256 = arith.constant 256 : index
    %48 = vector.load %arg9[%c0_39, %c256] : memref<128x512xbf16, #tpu.memory_space<vmem>>, vector<128x128xbf16>
    tpu.vector_store %arg9[%c0_39, %c256], %47 {strides = array<i32>} : memref<128x512xbf16, #tpu.memory_space<vmem>>, vector<128x128xbf16>,
    %c2 = arith.constant 2 : index
    %c0_40 = arith.constant 0 : index
    %c0_41 = arith.constant 0 : index
    %49 = vector.load %arg3[%c2, %c0_40, %c0_41] : memref<3x128x384xbf16, #tpu.memory_space<vmem>>, vector<1x128x384xbf16>
    %50 = vector.shape_cast %49 : vector<1x128x384xbf16> to vector<128x384xbf16>
    %cst_42 = arith.constant dense<0.000000e+00> : vector<128x384xf32>
    %51 = tpu.matmul %47, %50, %cst_42 {dimension_numbers = #tpu.dot_dimension_numbers<[1], [0], [0], [1], [0, 0, 1, 1], [], []>} : vector<128x128xbf16>, vector<128x384xbf16>, vector<128x384xf32> -> vector<128x384xf32>
    %52 = vector.extract_strided_slice %51 {offsets = [0, 0], sizes = [128, 128], strides = [1, 1]} : vector<128x384xf32> to vector<128x128xf32>
    %53 = arith.truncf %52 : vector<128x128xf32> to vector<128x128xbf16>
    %c0_43 = arith.constant 0 : index
    %c0_44 = arith.constant 0 : index
    %54 = vector.load %arg8[%c0_43, %c0_44] : memref<256x128xbf16, #tpu.memory_space<vmem>>, vector<128x128xbf16>
    tpu.vector_store %arg8[%c0_43, %c0_44], %53 {strides = array<i32>} : memref<256x128xbf16, #tpu.memory_space<vmem>>, vector<128x128xbf16>,
    %55 = vector.extract_strided_slice %51 {offsets = [0, 128], sizes = [128, 128], strides = [1, 1]} : vector<128x384xf32> to vector<128x128xf32>
    %56 = arith.truncf %55 : vector<128x128xf32> to vector<128x128xbf16>
    %c128_45 = arith.constant 128 : index
    %c0_46 = arith.constant 0 : index
    %57 = vector.load %arg8[%c128_45, %c0_46] : memref<256x128xbf16, #tpu.memory_space<vmem>>, vector<128x128xbf16>
    tpu.vector_store %arg8[%c128_45, %c0_46], %56 {strides = array<i32>} : memref<256x128xbf16, #tpu.memory_space<vmem>>, vector<128x128xbf16>,
    %c0_47 = arith.constant 0 : index
    %c0_48 = arith.constant 0 : index
    %c0_49 = arith.constant 0 : index
    %58 = vector.load %arg2[%c0_47, %c0_48, %c0_49] : memref<1x128x256xbf16, #tpu.memory_space<vmem>>, vector<1x128x256xbf16>
    %59 = vector.shape_cast %58 : vector<1x128x256xbf16> to vector<128x256xbf16>
    %c0_50 = arith.constant 0 : index
    %c0_51 = arith.constant 0 : index
    %60 = vector.load %arg8[%c0_50, %c0_51] : memref<256x128xbf16, #tpu.memory_space<vmem>>, vector<256x128xbf16>
    %cst_52 = arith.constant dense<0.000000e+00> : vector<128x128xf32>
    %61 = tpu.matmul %59, %60, %cst_52 {dimension_numbers = #tpu.dot_dimension_numbers<[1], [0], [0], [1], [0, 0, 1, 1], [], []>} : vector<128x256xbf16>, vector<256x128xbf16>, vector<128x128xf32> -> vector<128x128xf32>
    %62 = vector.extract_strided_slice %51 {offsets = [0, 256], sizes = [128, 128], strides = [1, 1]} : vector<128x384xf32> to vector<128x128xf32>
    %c2_53 = arith.constant 2 : index
    %c0_54 = arith.constant 0 : index
    %c0_55 = arith.constant 0 : index
    %63 = vector.load %arg4[%c2_53, %c0_54, %c0_55] : memref<3x1x128xf32, #tpu.memory_space<vmem>>, vector<1x1x128xf32>
    %64 = vector.shape_cast %63 : vector<1x1x128xf32> to vector<1x128xf32>
    %65 = vector.broadcast %64 : vector<1x128xf32> to vector<128x128xf32>
    %66 = arith.addf %62, %65 : vector<128x128xf32>
    %67 = arith.addf %66, %61 : vector<128x128xf32>
    %cst_56 = arith.constant 0.000000e+00 : f32
    %68 = vector.broadcast %cst_56 : f32 to vector<128x128xf32>
    %69 = arith.maximumf %67, %68 : vector<128x128xf32>
    %70 = arith.truncf %69 : vector<128x128xf32> to vector<128x128xbf16>
    %c0_57 = arith.constant 0 : index
    %c384 = arith.constant 384 : index
    %71 = vector.load %arg9[%c0_57, %c384] : memref<128x512xbf16, #tpu.memory_space<vmem>>, vector<128x128xbf16>
    tpu.vector_store %arg9[%c0_57, %c384], %70 {strides = array<i32>} : memref<128x512xbf16, #tpu.memory_space<vmem>>, vector<128x128xbf16>,
    %c0_58 = arith.constant 0 : index
    %c0_59 = arith.constant 0 : index
    %72 = vector.load %arg6[%c0_58, %c0_59] : memref<1x128xf32, #tpu.memory_space<vmem>>, vector<1x128xf32>
    %c0_60 = arith.constant 0 : index
    %c0_61 = arith.constant 0 : index
    %73 = vector.load %arg9[%c0_60, %c0_61] : memref<128x512xbf16, #tpu.memory_space<vmem>>, vector<128x512xbf16>
    %c0_62 = arith.constant 0 : index
    %c0_63 = arith.constant 0 : index
    %74 = vector.load %arg5[%c0_62, %c0_63] : memref<512x128xbf16, #tpu.memory_space<vmem>>, vector<512x128xbf16>
    %cst_64 = arith.constant dense<0.000000e+00> : vector<128x128xf32>
    %75 = tpu.matmul %73, %74, %cst_64 {dimension_numbers = #tpu.dot_dimension_numbers<[1], [0], [0], [1], [0, 0, 1, 1], [], []>} : vector<128x512xbf16>, vector<512x128xbf16>, vector<128x128xf32> -> vector<128x128xf32>
    %76 = vector.broadcast %72 : vector<1x128xf32> to vector<128x128xf32>
    %77 = arith.addf %76, %75 : vector<128x128xf32>
    %78 = arith.truncf %77 : vector<128x128xf32> to vector<128x128xbf16>
    %c0_65 = arith.constant 0 : index
    %c0_66 = arith.constant 0 : index
    %c0_67 = arith.constant 0 : index
    %79 = vector.load %arg7[%c0_65, %c0_66, %c0_67] : memref<1x128x128xbf16, #tpu.memory_space<vmem>>, vector<1x128x128xbf16>
    %80 = vector.shape_cast %79 : vector<1x128x128xbf16> to vector<128x128xbf16>
    %81 = vector.shape_cast %78 : vector<128x128xbf16> to vector<1x128x128xbf16>
    tpu.vector_store %arg7[%c0_65, %c0_66, %c0_67], %81 {strides = array<i32>} : memref<1x128x128xbf16, #tpu.memory_space<vmem>>, vector<1x128x128xbf16>,
    return
  }
  func.func @transform_0(%arg0: i32) -> (i32, i32, i32) {
    %c0_i32 = arith.constant 0 : i32
    %c0_i32_0 = arith.constant 0 : i32
    %c0_i32_1 = arith.constant 0 : i32
    return %arg0, %c0_i32, %c0_i32_0 : i32, i32, i32
  }
  func.func @transform_1(%arg0: i32) -> (i32, i32, i32) {
    %c0_i32 = arith.constant 0 : i32
    %c0_i32_0 = arith.constant 0 : i32
    %c0_i32_1 = arith.constant 0 : i32
    return %arg0, %c0_i32, %c0_i32_0 : i32, i32, i32
  }
  func.func @transform_2(%arg0: i32) -> (i32, i32, i32) {
    %c0_i32 = arith.constant 0 : i32
    %c0_i32_0 = arith.constant 0 : i32
    %c0_i32_1 = arith.constant 0 : i32
    %c0_i32_2 = arith.constant 0 : i32
    return %c0_i32, %c0_i32_0, %c0_i32_1 : i32, i32, i32
  }
  func.func @transform_3(%arg0: i32) -> (i32, i32, i32) {
    %c0_i32 = arith.constant 0 : i32
    %c0_i32_0 = arith.constant 0 : i32
    %c0_i32_1 = arith.constant 0 : i32
    %c0_i32_2 = arith.constant 0 : i32
    return %c0_i32, %c0_i32_0, %c0_i32_1 : i32, i32, i32
  }
  func.func @transform_4(%arg0: i32) -> (i32, i32) {
    %c0_i32 = arith.constant 0 : i32
    %c0_i32_0 = arith.constant 0 : i32
    %c0_i32_1 = arith.constant 0 : i32
    return %c0_i32, %c0_i32_0 : i32, i32
  }
  func.func @transform_5(%arg0: i32) -> (i32, i32) {
    %c0_i32 = arith.constant 0 : i32
    %c0_i32_0 = arith.constant 0 : i32
    %c0_i32_1 = arith.constant 0 : i32
    return %c0_i32, %c0_i32_0 : i32, i32
  }
  func.func @transform_6(%arg0: i32) -> (i32, i32, i32) {
    %c0_i32 = arith.constant 0 : i32
    %c0_i32_0 = arith.constant 0 : i32
    %c0_i32_1 = arith.constant 0 : i32
    return %arg0, %c0_i32, %c0_i32_0 : i32, i32, i32
  }
}

module attributes {stable_mosaic.version = 11 : i64} {
  func.func @topk_scatter_kernel(%arg0: memref<128x25xi32, #tpu.memory_space<vmem>>, %arg1: memref<128x25xf32, #tpu.memory_space<vmem>>, %arg2: memref<128x128xf32, #tpu.memory_space<vmem>>) attributes {dimension_semantics = [], scalar_prefetch = 0 : i64, scratch_operands = 0 : i64, tpu.core_type = #tpu.core_type<tc>} {
    %0 = tpu.iota {dimensions = array<i32: 1>} : vector<128x128xi32>
    %c0 = arith.constant 0 : index
    %c0_0 = arith.constant 0 : index
    %1 = vector.load %arg0[%c0, %c0_0] : memref<128x25xi32, #tpu.memory_space<vmem>>, vector<128x1xi32>
    %2 = vector.broadcast %1 : vector<128x1xi32> to vector<128x128xi32>
    %3 = arith.cmpi eq, %2, %0 : vector<128x128xi32>
    %c0_1 = arith.constant 0 : index
    %c0_2 = arith.constant 0 : index
    %4 = vector.load %arg1[%c0_1, %c0_2] : memref<128x25xf32, #tpu.memory_space<vmem>>, vector<128x1xf32>
    %cst = arith.constant 0.000000e+00 : f32
    %5 = vector.shape_cast %4 : vector<128x1xf32> to vector<128x1xf32>
    %6 = vector.broadcast %5 : vector<128x1xf32> to vector<128x128xf32>
    %7 = vector.broadcast %cst : f32 to vector<128x128xf32>
    %8 = arith.select %3, %6, %7 : vector<128x128xi1>, vector<128x128xf32>
    %c0_3 = arith.constant 0 : index
    %c1 = arith.constant 1 : index
    %9 = vector.load %arg0[%c0_3, %c1] : memref<128x25xi32, #tpu.memory_space<vmem>>, vector<128x1xi32>
    %10 = vector.broadcast %9 : vector<128x1xi32> to vector<128x128xi32>
    %11 = arith.cmpi eq, %10, %0 : vector<128x128xi32>
    %c0_4 = arith.constant 0 : index
    %c1_5 = arith.constant 1 : index
    %12 = vector.load %arg1[%c0_4, %c1_5] : memref<128x25xf32, #tpu.memory_space<vmem>>, vector<128x1xf32>
    %cst_6 = arith.constant 0.000000e+00 : f32
    %13 = vector.shape_cast %12 : vector<128x1xf32> to vector<128x1xf32>
    %14 = vector.broadcast %13 : vector<128x1xf32> to vector<128x128xf32>
    %15 = vector.broadcast %cst_6 : f32 to vector<128x128xf32>
    %16 = arith.select %11, %14, %15 : vector<128x128xi1>, vector<128x128xf32>
    %17 = arith.addf %8, %16 : vector<128x128xf32>
    %c0_7 = arith.constant 0 : index
    %c2 = arith.constant 2 : index
    %18 = vector.load %arg0[%c0_7, %c2] : memref<128x25xi32, #tpu.memory_space<vmem>>, vector<128x1xi32>
    %19 = vector.broadcast %18 : vector<128x1xi32> to vector<128x128xi32>
    %20 = arith.cmpi eq, %19, %0 : vector<128x128xi32>
    %c0_8 = arith.constant 0 : index
    %c2_9 = arith.constant 2 : index
    %21 = vector.load %arg1[%c0_8, %c2_9] : memref<128x25xf32, #tpu.memory_space<vmem>>, vector<128x1xf32>
    %cst_10 = arith.constant 0.000000e+00 : f32
    %22 = vector.shape_cast %21 : vector<128x1xf32> to vector<128x1xf32>
    %23 = vector.broadcast %22 : vector<128x1xf32> to vector<128x128xf32>
    %24 = vector.broadcast %cst_10 : f32 to vector<128x128xf32>
    %25 = arith.select %20, %23, %24 : vector<128x128xi1>, vector<128x128xf32>
    %26 = arith.addf %17, %25 : vector<128x128xf32>
    %c0_11 = arith.constant 0 : index
    %c3 = arith.constant 3 : index
    %27 = vector.load %arg0[%c0_11, %c3] : memref<128x25xi32, #tpu.memory_space<vmem>>, vector<128x1xi32>
    %28 = vector.broadcast %27 : vector<128x1xi32> to vector<128x128xi32>
    %29 = arith.cmpi eq, %28, %0 : vector<128x128xi32>
    %c0_12 = arith.constant 0 : index
    %c3_13 = arith.constant 3 : index
    %30 = vector.load %arg1[%c0_12, %c3_13] : memref<128x25xf32, #tpu.memory_space<vmem>>, vector<128x1xf32>
    %cst_14 = arith.constant 0.000000e+00 : f32
    %31 = vector.shape_cast %30 : vector<128x1xf32> to vector<128x1xf32>
    %32 = vector.broadcast %31 : vector<128x1xf32> to vector<128x128xf32>
    %33 = vector.broadcast %cst_14 : f32 to vector<128x128xf32>
    %34 = arith.select %29, %32, %33 : vector<128x128xi1>, vector<128x128xf32>
    %35 = arith.addf %26, %34 : vector<128x128xf32>
    %c0_15 = arith.constant 0 : index
    %c4 = arith.constant 4 : index
    %36 = vector.load %arg0[%c0_15, %c4] : memref<128x25xi32, #tpu.memory_space<vmem>>, vector<128x1xi32>
    %37 = vector.broadcast %36 : vector<128x1xi32> to vector<128x128xi32>
    %38 = arith.cmpi eq, %37, %0 : vector<128x128xi32>
    %c0_16 = arith.constant 0 : index
    %c4_17 = arith.constant 4 : index
    %39 = vector.load %arg1[%c0_16, %c4_17] : memref<128x25xf32, #tpu.memory_space<vmem>>, vector<128x1xf32>
    %cst_18 = arith.constant 0.000000e+00 : f32
    %40 = vector.shape_cast %39 : vector<128x1xf32> to vector<128x1xf32>
    %41 = vector.broadcast %40 : vector<128x1xf32> to vector<128x128xf32>
    %42 = vector.broadcast %cst_18 : f32 to vector<128x128xf32>
    %43 = arith.select %38, %41, %42 : vector<128x128xi1>, vector<128x128xf32>
    %44 = arith.addf %35, %43 : vector<128x128xf32>
    %c0_19 = arith.constant 0 : index
    %c5 = arith.constant 5 : index
    %45 = vector.load %arg0[%c0_19, %c5] : memref<128x25xi32, #tpu.memory_space<vmem>>, vector<128x1xi32>
    %46 = vector.broadcast %45 : vector<128x1xi32> to vector<128x128xi32>
    %47 = arith.cmpi eq, %46, %0 : vector<128x128xi32>
    %c0_20 = arith.constant 0 : index
    %c5_21 = arith.constant 5 : index
    %48 = vector.load %arg1[%c0_20, %c5_21] : memref<128x25xf32, #tpu.memory_space<vmem>>, vector<128x1xf32>
    %cst_22 = arith.constant 0.000000e+00 : f32
    %49 = vector.shape_cast %48 : vector<128x1xf32> to vector<128x1xf32>
    %50 = vector.broadcast %49 : vector<128x1xf32> to vector<128x128xf32>
    %51 = vector.broadcast %cst_22 : f32 to vector<128x128xf32>
    %52 = arith.select %47, %50, %51 : vector<128x128xi1>, vector<128x128xf32>
    %53 = arith.addf %44, %52 : vector<128x128xf32>
    %c0_23 = arith.constant 0 : index
    %c6 = arith.constant 6 : index
    %54 = vector.load %arg0[%c0_23, %c6] : memref<128x25xi32, #tpu.memory_space<vmem>>, vector<128x1xi32>
    %55 = vector.broadcast %54 : vector<128x1xi32> to vector<128x128xi32>
    %56 = arith.cmpi eq, %55, %0 : vector<128x128xi32>
    %c0_24 = arith.constant 0 : index
    %c6_25 = arith.constant 6 : index
    %57 = vector.load %arg1[%c0_24, %c6_25] : memref<128x25xf32, #tpu.memory_space<vmem>>, vector<128x1xf32>
    %cst_26 = arith.constant 0.000000e+00 : f32
    %58 = vector.shape_cast %57 : vector<128x1xf32> to vector<128x1xf32>
    %59 = vector.broadcast %58 : vector<128x1xf32> to vector<128x128xf32>
    %60 = vector.broadcast %cst_26 : f32 to vector<128x128xf32>
    %61 = arith.select %56, %59, %60 : vector<128x128xi1>, vector<128x128xf32>
    %62 = arith.addf %53, %61 : vector<128x128xf32>
    %c0_27 = arith.constant 0 : index
    %c7 = arith.constant 7 : index
    %63 = vector.load %arg0[%c0_27, %c7] : memref<128x25xi32, #tpu.memory_space<vmem>>, vector<128x1xi32>
    %64 = vector.broadcast %63 : vector<128x1xi32> to vector<128x128xi32>
    %65 = arith.cmpi eq, %64, %0 : vector<128x128xi32>
    %c0_28 = arith.constant 0 : index
    %c7_29 = arith.constant 7 : index
    %66 = vector.load %arg1[%c0_28, %c7_29] : memref<128x25xf32, #tpu.memory_space<vmem>>, vector<128x1xf32>
    %cst_30 = arith.constant 0.000000e+00 : f32
    %67 = vector.shape_cast %66 : vector<128x1xf32> to vector<128x1xf32>
    %68 = vector.broadcast %67 : vector<128x1xf32> to vector<128x128xf32>
    %69 = vector.broadcast %cst_30 : f32 to vector<128x128xf32>
    %70 = arith.select %65, %68, %69 : vector<128x128xi1>, vector<128x128xf32>
    %71 = arith.addf %62, %70 : vector<128x128xf32>
    %c0_31 = arith.constant 0 : index
    %c8 = arith.constant 8 : index
    %72 = vector.load %arg0[%c0_31, %c8] : memref<128x25xi32, #tpu.memory_space<vmem>>, vector<128x1xi32>
    %73 = vector.broadcast %72 : vector<128x1xi32> to vector<128x128xi32>
    %74 = arith.cmpi eq, %73, %0 : vector<128x128xi32>
    %c0_32 = arith.constant 0 : index
    %c8_33 = arith.constant 8 : index
    %75 = vector.load %arg1[%c0_32, %c8_33] : memref<128x25xf32, #tpu.memory_space<vmem>>, vector<128x1xf32>
    %cst_34 = arith.constant 0.000000e+00 : f32
    %76 = vector.shape_cast %75 : vector<128x1xf32> to vector<128x1xf32>
    %77 = vector.broadcast %76 : vector<128x1xf32> to vector<128x128xf32>
    %78 = vector.broadcast %cst_34 : f32 to vector<128x128xf32>
    %79 = arith.select %74, %77, %78 : vector<128x128xi1>, vector<128x128xf32>
    %80 = arith.addf %71, %79 : vector<128x128xf32>
    %c0_35 = arith.constant 0 : index
    %c9 = arith.constant 9 : index
    %81 = vector.load %arg0[%c0_35, %c9] : memref<128x25xi32, #tpu.memory_space<vmem>>, vector<128x1xi32>
    %82 = vector.broadcast %81 : vector<128x1xi32> to vector<128x128xi32>
    %83 = arith.cmpi eq, %82, %0 : vector<128x128xi32>
    %c0_36 = arith.constant 0 : index
    %c9_37 = arith.constant 9 : index
    %84 = vector.load %arg1[%c0_36, %c9_37] : memref<128x25xf32, #tpu.memory_space<vmem>>, vector<128x1xf32>
    %cst_38 = arith.constant 0.000000e+00 : f32
    %85 = vector.shape_cast %84 : vector<128x1xf32> to vector<128x1xf32>
    %86 = vector.broadcast %85 : vector<128x1xf32> to vector<128x128xf32>
    %87 = vector.broadcast %cst_38 : f32 to vector<128x128xf32>
    %88 = arith.select %83, %86, %87 : vector<128x128xi1>, vector<128x128xf32>
    %89 = arith.addf %80, %88 : vector<128x128xf32>
    %c0_39 = arith.constant 0 : index
    %c10 = arith.constant 10 : index
    %90 = vector.load %arg0[%c0_39, %c10] : memref<128x25xi32, #tpu.memory_space<vmem>>, vector<128x1xi32>
    %91 = vector.broadcast %90 : vector<128x1xi32> to vector<128x128xi32>
    %92 = arith.cmpi eq, %91, %0 : vector<128x128xi32>
    %c0_40 = arith.constant 0 : index
    %c10_41 = arith.constant 10 : index
    %93 = vector.load %arg1[%c0_40, %c10_41] : memref<128x25xf32, #tpu.memory_space<vmem>>, vector<128x1xf32>
    %cst_42 = arith.constant 0.000000e+00 : f32
    %94 = vector.shape_cast %93 : vector<128x1xf32> to vector<128x1xf32>
    %95 = vector.broadcast %94 : vector<128x1xf32> to vector<128x128xf32>
    %96 = vector.broadcast %cst_42 : f32 to vector<128x128xf32>
    %97 = arith.select %92, %95, %96 : vector<128x128xi1>, vector<128x128xf32>
    %98 = arith.addf %89, %97 : vector<128x128xf32>
    %c0_43 = arith.constant 0 : index
    %c11 = arith.constant 11 : index
    %99 = vector.load %arg0[%c0_43, %c11] : memref<128x25xi32, #tpu.memory_space<vmem>>, vector<128x1xi32>
    %100 = vector.broadcast %99 : vector<128x1xi32> to vector<128x128xi32>
    %101 = arith.cmpi eq, %100, %0 : vector<128x128xi32>
    %c0_44 = arith.constant 0 : index
    %c11_45 = arith.constant 11 : index
    %102 = vector.load %arg1[%c0_44, %c11_45] : memref<128x25xf32, #tpu.memory_space<vmem>>, vector<128x1xf32>
    %cst_46 = arith.constant 0.000000e+00 : f32
    %103 = vector.shape_cast %102 : vector<128x1xf32> to vector<128x1xf32>
    %104 = vector.broadcast %103 : vector<128x1xf32> to vector<128x128xf32>
    %105 = vector.broadcast %cst_46 : f32 to vector<128x128xf32>
    %106 = arith.select %101, %104, %105 : vector<128x128xi1>, vector<128x128xf32>
    %107 = arith.addf %98, %106 : vector<128x128xf32>
    %c0_47 = arith.constant 0 : index
    %c12 = arith.constant 12 : index
    %108 = vector.load %arg0[%c0_47, %c12] : memref<128x25xi32, #tpu.memory_space<vmem>>, vector<128x1xi32>
    %109 = vector.broadcast %108 : vector<128x1xi32> to vector<128x128xi32>
    %110 = arith.cmpi eq, %109, %0 : vector<128x128xi32>
    %c0_48 = arith.constant 0 : index
    %c12_49 = arith.constant 12 : index
    %111 = vector.load %arg1[%c0_48, %c12_49] : memref<128x25xf32, #tpu.memory_space<vmem>>, vector<128x1xf32>
    %cst_50 = arith.constant 0.000000e+00 : f32
    %112 = vector.shape_cast %111 : vector<128x1xf32> to vector<128x1xf32>
    %113 = vector.broadcast %112 : vector<128x1xf32> to vector<128x128xf32>
    %114 = vector.broadcast %cst_50 : f32 to vector<128x128xf32>
    %115 = arith.select %110, %113, %114 : vector<128x128xi1>, vector<128x128xf32>
    %116 = arith.addf %107, %115 : vector<128x128xf32>
    %c0_51 = arith.constant 0 : index
    %c13 = arith.constant 13 : index
    %117 = vector.load %arg0[%c0_51, %c13] : memref<128x25xi32, #tpu.memory_space<vmem>>, vector<128x1xi32>
    %118 = vector.broadcast %117 : vector<128x1xi32> to vector<128x128xi32>
    %119 = arith.cmpi eq, %118, %0 : vector<128x128xi32>
    %c0_52 = arith.constant 0 : index
    %c13_53 = arith.constant 13 : index
    %120 = vector.load %arg1[%c0_52, %c13_53] : memref<128x25xf32, #tpu.memory_space<vmem>>, vector<128x1xf32>
    %cst_54 = arith.constant 0.000000e+00 : f32
    %121 = vector.shape_cast %120 : vector<128x1xf32> to vector<128x1xf32>
    %122 = vector.broadcast %121 : vector<128x1xf32> to vector<128x128xf32>
    %123 = vector.broadcast %cst_54 : f32 to vector<128x128xf32>
    %124 = arith.select %119, %122, %123 : vector<128x128xi1>, vector<128x128xf32>
    %125 = arith.addf %116, %124 : vector<128x128xf32>
    %c0_55 = arith.constant 0 : index
    %c14 = arith.constant 14 : index
    %126 = vector.load %arg0[%c0_55, %c14] : memref<128x25xi32, #tpu.memory_space<vmem>>, vector<128x1xi32>
    %127 = vector.broadcast %126 : vector<128x1xi32> to vector<128x128xi32>
    %128 = arith.cmpi eq, %127, %0 : vector<128x128xi32>
    %c0_56 = arith.constant 0 : index
    %c14_57 = arith.constant 14 : index
    %129 = vector.load %arg1[%c0_56, %c14_57] : memref<128x25xf32, #tpu.memory_space<vmem>>, vector<128x1xf32>
    %cst_58 = arith.constant 0.000000e+00 : f32
    %130 = vector.shape_cast %129 : vector<128x1xf32> to vector<128x1xf32>
    %131 = vector.broadcast %130 : vector<128x1xf32> to vector<128x128xf32>
    %132 = vector.broadcast %cst_58 : f32 to vector<128x128xf32>
    %133 = arith.select %128, %131, %132 : vector<128x128xi1>, vector<128x128xf32>
    %134 = arith.addf %125, %133 : vector<128x128xf32>
    %c0_59 = arith.constant 0 : index
    %c15 = arith.constant 15 : index
    %135 = vector.load %arg0[%c0_59, %c15] : memref<128x25xi32, #tpu.memory_space<vmem>>, vector<128x1xi32>
    %136 = vector.broadcast %135 : vector<128x1xi32> to vector<128x128xi32>
    %137 = arith.cmpi eq, %136, %0 : vector<128x128xi32>
    %c0_60 = arith.constant 0 : index
    %c15_61 = arith.constant 15 : index
    %138 = vector.load %arg1[%c0_60, %c15_61] : memref<128x25xf32, #tpu.memory_space<vmem>>, vector<128x1xf32>
    %cst_62 = arith.constant 0.000000e+00 : f32
    %139 = vector.shape_cast %138 : vector<128x1xf32> to vector<128x1xf32>
    %140 = vector.broadcast %139 : vector<128x1xf32> to vector<128x128xf32>
    %141 = vector.broadcast %cst_62 : f32 to vector<128x128xf32>
    %142 = arith.select %137, %140, %141 : vector<128x128xi1>, vector<128x128xf32>
    %143 = arith.addf %134, %142 : vector<128x128xf32>
    %c0_63 = arith.constant 0 : index
    %c16 = arith.constant 16 : index
    %144 = vector.load %arg0[%c0_63, %c16] : memref<128x25xi32, #tpu.memory_space<vmem>>, vector<128x1xi32>
    %145 = vector.broadcast %144 : vector<128x1xi32> to vector<128x128xi32>
    %146 = arith.cmpi eq, %145, %0 : vector<128x128xi32>
    %c0_64 = arith.constant 0 : index
    %c16_65 = arith.constant 16 : index
    %147 = vector.load %arg1[%c0_64, %c16_65] : memref<128x25xf32, #tpu.memory_space<vmem>>, vector<128x1xf32>
    %cst_66 = arith.constant 0.000000e+00 : f32
    %148 = vector.shape_cast %147 : vector<128x1xf32> to vector<128x1xf32>
    %149 = vector.broadcast %148 : vector<128x1xf32> to vector<128x128xf32>
    %150 = vector.broadcast %cst_66 : f32 to vector<128x128xf32>
    %151 = arith.select %146, %149, %150 : vector<128x128xi1>, vector<128x128xf32>
    %152 = arith.addf %143, %151 : vector<128x128xf32>
    %c0_67 = arith.constant 0 : index
    %c17 = arith.constant 17 : index
    %153 = vector.load %arg0[%c0_67, %c17] : memref<128x25xi32, #tpu.memory_space<vmem>>, vector<128x1xi32>
    %154 = vector.broadcast %153 : vector<128x1xi32> to vector<128x128xi32>
    %155 = arith.cmpi eq, %154, %0 : vector<128x128xi32>
    %c0_68 = arith.constant 0 : index
    %c17_69 = arith.constant 17 : index
    %156 = vector.load %arg1[%c0_68, %c17_69] : memref<128x25xf32, #tpu.memory_space<vmem>>, vector<128x1xf32>
    %cst_70 = arith.constant 0.000000e+00 : f32
    %157 = vector.shape_cast %156 : vector<128x1xf32> to vector<128x1xf32>
    %158 = vector.broadcast %157 : vector<128x1xf32> to vector<128x128xf32>
    %159 = vector.broadcast %cst_70 : f32 to vector<128x128xf32>
    %160 = arith.select %155, %158, %159 : vector<128x128xi1>, vector<128x128xf32>
    %161 = arith.addf %152, %160 : vector<128x128xf32>
    %c0_71 = arith.constant 0 : index
    %c18 = arith.constant 18 : index
    %162 = vector.load %arg0[%c0_71, %c18] : memref<128x25xi32, #tpu.memory_space<vmem>>, vector<128x1xi32>
    %163 = vector.broadcast %162 : vector<128x1xi32> to vector<128x128xi32>
    %164 = arith.cmpi eq, %163, %0 : vector<128x128xi32>
    %c0_72 = arith.constant 0 : index
    %c18_73 = arith.constant 18 : index
    %165 = vector.load %arg1[%c0_72, %c18_73] : memref<128x25xf32, #tpu.memory_space<vmem>>, vector<128x1xf32>
    %cst_74 = arith.constant 0.000000e+00 : f32
    %166 = vector.shape_cast %165 : vector<128x1xf32> to vector<128x1xf32>
    %167 = vector.broadcast %166 : vector<128x1xf32> to vector<128x128xf32>
    %168 = vector.broadcast %cst_74 : f32 to vector<128x128xf32>
    %169 = arith.select %164, %167, %168 : vector<128x128xi1>, vector<128x128xf32>
    %170 = arith.addf %161, %169 : vector<128x128xf32>
    %c0_75 = arith.constant 0 : index
    %c19 = arith.constant 19 : index
    %171 = vector.load %arg0[%c0_75, %c19] : memref<128x25xi32, #tpu.memory_space<vmem>>, vector<128x1xi32>
    %172 = vector.broadcast %171 : vector<128x1xi32> to vector<128x128xi32>
    %173 = arith.cmpi eq, %172, %0 : vector<128x128xi32>
    %c0_76 = arith.constant 0 : index
    %c19_77 = arith.constant 19 : index
    %174 = vector.load %arg1[%c0_76, %c19_77] : memref<128x25xf32, #tpu.memory_space<vmem>>, vector<128x1xf32>
    %cst_78 = arith.constant 0.000000e+00 : f32
    %175 = vector.shape_cast %174 : vector<128x1xf32> to vector<128x1xf32>
    %176 = vector.broadcast %175 : vector<128x1xf32> to vector<128x128xf32>
    %177 = vector.broadcast %cst_78 : f32 to vector<128x128xf32>
    %178 = arith.select %173, %176, %177 : vector<128x128xi1>, vector<128x128xf32>
    %179 = arith.addf %170, %178 : vector<128x128xf32>
    %c0_79 = arith.constant 0 : index
    %c20 = arith.constant 20 : index
    %180 = vector.load %arg0[%c0_79, %c20] : memref<128x25xi32, #tpu.memory_space<vmem>>, vector<128x1xi32>
    %181 = vector.broadcast %180 : vector<128x1xi32> to vector<128x128xi32>
    %182 = arith.cmpi eq, %181, %0 : vector<128x128xi32>
    %c0_80 = arith.constant 0 : index
    %c20_81 = arith.constant 20 : index
    %183 = vector.load %arg1[%c0_80, %c20_81] : memref<128x25xf32, #tpu.memory_space<vmem>>, vector<128x1xf32>
    %cst_82 = arith.constant 0.000000e+00 : f32
    %184 = vector.shape_cast %183 : vector<128x1xf32> to vector<128x1xf32>
    %185 = vector.broadcast %184 : vector<128x1xf32> to vector<128x128xf32>
    %186 = vector.broadcast %cst_82 : f32 to vector<128x128xf32>
    %187 = arith.select %182, %185, %186 : vector<128x128xi1>, vector<128x128xf32>
    %188 = arith.addf %179, %187 : vector<128x128xf32>
    %c0_83 = arith.constant 0 : index
    %c21 = arith.constant 21 : index
    %189 = vector.load %arg0[%c0_83, %c21] : memref<128x25xi32, #tpu.memory_space<vmem>>, vector<128x1xi32>
    %190 = vector.broadcast %189 : vector<128x1xi32> to vector<128x128xi32>
    %191 = arith.cmpi eq, %190, %0 : vector<128x128xi32>
    %c0_84 = arith.constant 0 : index
    %c21_85 = arith.constant 21 : index
    %192 = vector.load %arg1[%c0_84, %c21_85] : memref<128x25xf32, #tpu.memory_space<vmem>>, vector<128x1xf32>
    %cst_86 = arith.constant 0.000000e+00 : f32
    %193 = vector.shape_cast %192 : vector<128x1xf32> to vector<128x1xf32>
    %194 = vector.broadcast %193 : vector<128x1xf32> to vector<128x128xf32>
    %195 = vector.broadcast %cst_86 : f32 to vector<128x128xf32>
    %196 = arith.select %191, %194, %195 : vector<128x128xi1>, vector<128x128xf32>
    %197 = arith.addf %188, %196 : vector<128x128xf32>
    %c0_87 = arith.constant 0 : index
    %c22 = arith.constant 22 : index
    %198 = vector.load %arg0[%c0_87, %c22] : memref<128x25xi32, #tpu.memory_space<vmem>>, vector<128x1xi32>
    %199 = vector.broadcast %198 : vector<128x1xi32> to vector<128x128xi32>
    %200 = arith.cmpi eq, %199, %0 : vector<128x128xi32>
    %c0_88 = arith.constant 0 : index
    %c22_89 = arith.constant 22 : index
    %201 = vector.load %arg1[%c0_88, %c22_89] : memref<128x25xf32, #tpu.memory_space<vmem>>, vector<128x1xf32>
    %cst_90 = arith.constant 0.000000e+00 : f32
    %202 = vector.shape_cast %201 : vector<128x1xf32> to vector<128x1xf32>
    %203 = vector.broadcast %202 : vector<128x1xf32> to vector<128x128xf32>
    %204 = vector.broadcast %cst_90 : f32 to vector<128x128xf32>
    %205 = arith.select %200, %203, %204 : vector<128x128xi1>, vector<128x128xf32>
    %206 = arith.addf %197, %205 : vector<128x128xf32>
    %c0_91 = arith.constant 0 : index
    %c23 = arith.constant 23 : index
    %207 = vector.load %arg0[%c0_91, %c23] : memref<128x25xi32, #tpu.memory_space<vmem>>, vector<128x1xi32>
    %208 = vector.broadcast %207 : vector<128x1xi32> to vector<128x128xi32>
    %209 = arith.cmpi eq, %208, %0 : vector<128x128xi32>
    %c0_92 = arith.constant 0 : index
    %c23_93 = arith.constant 23 : index
    %210 = vector.load %arg1[%c0_92, %c23_93] : memref<128x25xf32, #tpu.memory_space<vmem>>, vector<128x1xf32>
    %cst_94 = arith.constant 0.000000e+00 : f32
    %211 = vector.shape_cast %210 : vector<128x1xf32> to vector<128x1xf32>
    %212 = vector.broadcast %211 : vector<128x1xf32> to vector<128x128xf32>
    %213 = vector.broadcast %cst_94 : f32 to vector<128x128xf32>
    %214 = arith.select %209, %212, %213 : vector<128x128xi1>, vector<128x128xf32>
    %215 = arith.addf %206, %214 : vector<128x128xf32>
    %c0_95 = arith.constant 0 : index
    %c24 = arith.constant 24 : index
    %216 = vector.load %arg0[%c0_95, %c24] : memref<128x25xi32, #tpu.memory_space<vmem>>, vector<128x1xi32>
    %217 = vector.broadcast %216 : vector<128x1xi32> to vector<128x128xi32>
    %218 = arith.cmpi eq, %217, %0 : vector<128x128xi32>
    %c0_96 = arith.constant 0 : index
    %c24_97 = arith.constant 24 : index
    %219 = vector.load %arg1[%c0_96, %c24_97] : memref<128x25xf32, #tpu.memory_space<vmem>>, vector<128x1xf32>
    %cst_98 = arith.constant 0.000000e+00 : f32
    %220 = vector.shape_cast %219 : vector<128x1xf32> to vector<128x1xf32>
    %221 = vector.broadcast %220 : vector<128x1xf32> to vector<128x128xf32>
    %222 = vector.broadcast %cst_98 : f32 to vector<128x128xf32>
    %223 = arith.select %218, %221, %222 : vector<128x128xi1>, vector<128x128xf32>
    %224 = arith.addf %215, %223 : vector<128x128xf32>
    %c0_99 = arith.constant 0 : index
    %c0_100 = arith.constant 0 : index
    %225 = vector.load %arg2[%c0_99, %c0_100] : memref<128x128xf32, #tpu.memory_space<vmem>>, vector<128x128xf32>
    tpu.vector_store %arg2[%c0_99, %c0_100], %224 {strides = array<i32>} : memref<128x128xf32, #tpu.memory_space<vmem>>, vector<128x128xf32>,
    return
  }
}

</mosaic_0001>

<bundles_post_ra>
// kernel: graph_model_forward.4
= control target key start
LH: loop header
LB: loop body
LE: loop exit
PB: predicated region body
PF: predicated region fallthrough
CT: control target
= control target key end

     0   :  { %6 = vsyncpa [#allocation3], 0  ;;  %s393_s6 = smov [#allocation2]   ;;  %s466_s0 = inlined_call_operand.hbm [shape: bf16[2,128,128], index: 0, kind: input, shape index: {}]   ;;  %s467_s1 = inlined_call_operand.vmem [shape: f32[128,128], index: 1, kind: output, shape index: {}]  }
   0x1   :  { %s12_s7 = sshll.u32 %s393_s6, 4  ;;  %s369_s10 = scalar_lea.hbm %s466_s0, 2048  ;;  %s13_s7 = int_to_ptr.vmem [resolvable:$true] %s12_s7 }
   0x2   :  { %p370_p0 = scmp.ne.s32.totalorder %s466_s0, %s369_s10  ;;  %p373_p1 = scmp.lt.u32.totalorder %s369_s10, %s466_s0 }
   0x4   :  { %p375_p2 = pnand %p373_p1, %p370_p0 }
   0x6   :  { %378 = shalt.err (!%p375_p2)
}
   0x7   :  { %s379_s15 = scalar_lea.vmem %s13_s7, 2048  ;;  %p384_p4 = scmp.lt.s32.totalorder %s13_s7, %s13_s7 }
   0x8   :  { %p380_p3 = scmp.ne.s32.totalorder %s13_s7, %s379_s15  ;;  %p385_p5 = scmp.lt.s32.totalorder %s379_s15, %s379_s15 }
   0xa   :  { %p386_p6 = por %p385_p5, %p384_p4 }
   0xc   :  { %p387_p7 = pnand %p386_p6, %p380_p3 }
   0xe   :  { %390 = shalt.err (!%p387_p7)
}
   0xf   :  { %s394_s16 = smov 64   ;;  %s395_s17 = smov 4  }
  0x10   :  { %18 = dma.hbm_to_vmem [thread:$0]  %s466_s0, 2048, %s13_s7, [#allocation3], %s394_s16, %s394_s16, %s395_s17  }
  0x11   :  { %391 = dma.done.wait [#allocation3], 2048  }
  0x12   :  { %392 = vsyncadd [#allocation3], 4294965248  ;;  %v353_v0 = vld [vmem:[#allocation2 + $0x40] sm:$0xff]   ;;  %v354_v1 = vld [vmem:[#allocation2 + $0x48] sm:$0xff]  }
  0x13   :  { %302 = vmatprep.subr.bf16.mxu0 %v353_v0  ;;  %334 = vmatprep.subr.bf16.mxu1 %v353_v0  ;;  %v355_v2 = vld [vmem:[#allocation2 + $0x50] sm:$0xff]   ;;  %v361_v3 = vld [vmem:[#allocation2] sm:$0xff]   ;;  %v356_v5 = vld [vmem:[#allocation2 + $0x58] sm:$0xff]  }
  0x14   :  { %303 = vmatpush3.bf16.xpose.msra.mxu0 %v353_v0  ;;  %342 = vmatpush3.bf16.xpose.msra.mxu1 %v353_v0  ;;  %v362_v4 = vld [vmem:[#allocation2 + $0x20] sm:$0xff]   ;;  %v358_v7 = vld [vmem:[#allocation2 + $0x68] sm:$0xff]   ;;  %v359_v8 = vld [vmem:[#allocation2 + $0x70] sm:$0xff]  }
  0x15   :  { %304 = vmatprep.subr.bf16.mxu0 %v354_v1  ;;  %335 = vmatprep.subr.bf16.mxu1 %v354_v1  ;;  %v357_v6 = vld [vmem:[#allocation2 + $0x60] sm:$0xff]   ;;  %v360_v9 = vld [vmem:[#allocation2 + $0x78] sm:$0xff]   ;;  %v363_v10 = vld [vmem:[#allocation2 + $0x8] sm:$0xff]  }
  0x16   :  { %318 = vmatprep.mubr.bf16.mxu0 %v361_v3  ;;  %326 = vmatprep.mubr.bf16.mxu1 %v362_v4  ;;  %v364_v11 = vld [vmem:[#allocation2 + $0x28] sm:$0xff]   ;;  %v365_v12 = vld [vmem:[#allocation2 + $0x10] sm:$0xff]   ;;  %v367_v14 = vld [vmem:[#allocation2 + $0x18] sm:$0xff]  }
  0x17   :  { %v366_v13 = vld [vmem:[#allocation2 + $0x30] sm:$0xff]   ;;  %v368_v15 = vld [vmem:[#allocation2 + $0x38] sm:$0xff]  }
  0x1c   :  { %305 = vmatpush3.bf16.xpose.msra.mxu0 %v354_v1  ;;  %343 = vmatpush3.bf16.xpose.msra.mxu1 %v354_v1 }
  0x1d   :  { %306 = vmatprep.subr.bf16.mxu0 %v355_v2  ;;  %336 = vmatprep.subr.bf16.mxu1 %v355_v2 }
  0x24   :  { %307 = vmatpush3.bf16.xpose.msra.mxu0 %v355_v2  ;;  %344 = vmatpush3.bf16.xpose.msra.mxu1 %v355_v2 }
  0x25   :  { %308 = vmatprep.subr.bf16.mxu0 %v356_v5  ;;  %337 = vmatprep.subr.bf16.mxu1 %v356_v5 }
  0x2c   :  { %309 = vmatpush3.bf16.xpose.msra.mxu0 %v356_v5  ;;  %345 = vmatpush3.bf16.xpose.msra.mxu1 %v356_v5 }
  0x2d   :  { %310 = vmatprep.subr.bf16.mxu0 %v357_v6  ;;  %338 = vmatprep.subr.bf16.mxu1 %v357_v6 }
  0x34   :  { %311 = vmatpush3.bf16.xpose.msra.mxu0 %v357_v6  ;;  %346 = vmatpush3.bf16.xpose.msra.mxu1 %v357_v6 }
  0x35   :  { %312 = vmatprep.subr.bf16.mxu0 %v358_v7  ;;  %339 = vmatprep.subr.bf16.mxu1 %v358_v7 }
  0x3c   :  { %313 = vmatpush3.bf16.xpose.msra.mxu0 %v358_v7  ;;  %347 = vmatpush3.bf16.xpose.msra.mxu1 %v358_v7 }
  0x3d   :  { %314 = vmatprep.subr.bf16.mxu0 %v359_v8  ;;  %340 = vmatprep.subr.bf16.mxu1 %v359_v8 }
  0x44   :  { %315 = vmatpush3.bf16.xpose.msra.mxu0 %v359_v8  ;;  %348 = vmatpush3.bf16.xpose.msra.mxu1 %v359_v8 }
  0x45   :  { %316 = vmatprep.subr.bf16.mxu0 %v360_v9  ;;  %341 = vmatprep.subr.bf16.mxu1 %v360_v9 }
  0x4c   :  { %317 = vmatpush3.bf16.xpose.msra.mxu0 %v360_v9  ;;  %349 = vmatpush3.bf16.xpose.msra.mxu1 %v360_v9 }
  0x53   :  { %319 = vmatmul.mubr.bf16.vlgmr.msra.gmra.mrb[0].mxu0 %v363_v10  ;;  %327 = vmatmul.mubr.bf16.vlgmr.msra.gmra.mrb[0].mxu1 %v364_v11 }
  0x54   :  { %322 = vmatprep.mubr.bf16.mxu0 %v365_v12  ;;  %330 = vmatprep.mubr.bf16.mxu1 %v366_v13 }
  0x5b   :  { %323 = vmatmul.mubr.bf16.gmra.mrb[4].mxu0 %v367_v14  ;;  %331 = vmatmul.mubr.bf16.gmra.mrb[4].mxu1 %v368_v15 }
 0x126   :  { %v320_v16 = vpop.f32.mrb[0].mxu0  ;;  %v328_v17 = vpop.f32.mrb[0].mxu1 }
 0x127   :  { %251 = vst [vmem:[%s467_s1 + $0x10] sm:$0xff] %v320_v16  ;;  %259 = vst [vmem:[%s467_s1 + $0x50] sm:$0xff] %v328_v17  ;;  %v186_v18 = vpop.f32.mrb[1].mxu0  ;;  %v218_v19 = vpop.f32.mrb[1].mxu1 }
 0x128   :  { %249 = vst [vmem:[%s467_s1] sm:$0xff] %v186_v18  ;;  %257 = vst [vmem:[%s467_s1 + $0x40] sm:$0xff] %v218_v19  ;;  %v321_v20 = vpop.f32.mrb[2].mxu0  ;;  %v329_v21 = vpop.f32.mrb[2].mxu1 }
 0x129   :  { %252 = vst [vmem:[%s467_s1 + $0x18] sm:$0xff] %v321_v20  ;;  %260 = vst [vmem:[%s467_s1 + $0x58] sm:$0xff] %v329_v21  ;;  %v189_v22 = vpop.f32.mrb[3].mxu0  ;;  %v221_v23 = vpop.f32.mrb[3].mxu1 }
 0x12a   :  { %250 = vst [vmem:[%s467_s1 + $0x8] sm:$0xff] %v189_v22  ;;  %258 = vst [vmem:[%s467_s1 + $0x48] sm:$0xff] %v221_v23 }
 0x12e   :  { %v324_v24 = vpop.f32.mrb[4].mxu0  ;;  %v332_v25 = vpop.f32.mrb[4].mxu1 }
 0x12f   :  { %255 = vst [vmem:[%s467_s1 + $0x30] sm:$0xff] %v324_v24  ;;  %263 = vst [vmem:[%s467_s1 + $0x70] sm:$0xff] %v332_v25  ;;  %v202_v26 = vpop.f32.mrb[5].mxu0  ;;  %v234_v27 = vpop.f32.mrb[5].mxu1 }
 0x130   :  { %253 = vst [vmem:[%s467_s1 + $0x20] sm:$0xff] %v202_v26  ;;  %261 = vst [vmem:[%s467_s1 + $0x60] sm:$0xff] %v234_v27  ;;  %v325_v28 = vpop.f32.mrb[6].mxu0  ;;  %v333_v29 = vpop.f32.mrb[6].mxu1 }
 0x131   :  { %256 = vst [vmem:[%s467_s1 + $0x38] sm:$0xff] %v325_v28  ;;  %264 = vst [vmem:[%s467_s1 + $0x78] sm:$0xff] %v333_v29  ;;  %v205_v30 = vpop.f32.mrb[7].mxu0  ;;  %v237_v31 = vpop.f32.mrb[7].mxu1 }
 0x132   :  { %254 = vst [vmem:[%s467_s1 + $0x28] sm:$0xff] %v205_v30  ;;  %262 = vst [vmem:[%s467_s1 + $0x68] sm:$0xff] %v237_v31 }
 0x133   :  { %269 = vsyncpa [#allocation3], 1 }

// kernel: graph_model_forward.3
= control target key start
LH: loop header
LB: loop body
LE: loop exit
PB: predicated region body
PF: predicated region fallthrough
CT: control target
= control target key end

     0   :  { %s5445_s0 = inlined_call_operand.hbm [shape: bf16[2,128,128], index: 0, kind: input, shape index: {}]   ;;  %s5446_s1 = inlined_call_operand.hbm [shape: bf16[2,128,256], index: 1, kind: input, shape index: {}]   ;;  %s5447_s2 = inlined_call_operand.hbm [shape: bf16[3,128,384], index: 2, kind: input, shape index: {}]   ;;  %s5448_s3 = inlined_call_operand.hbm [shape: f32[3,1,128], index: 3, kind: input, shape index: {}]   ;;  %s5449_s4 = inlined_call_operand.hbm [shape: bf16[512,128], index: 4, kind: input, shape index: {}]   ;;  %s5450_s5 = inlined_call_operand.hbm [shape: f32[1,128], index: 5, kind: input, shape index: {}]   ;;  %s5451_s6 = inlined_call_operand.hbm [shape: bf16[2,128,128], index: 6, kind: output, shape index: {}]  }
   0x1   :  { %5457 = sst [smem:[#allocation22_spill]] %s5445_s0 }
   0x2   :  { %5458 = sst [smem:[#allocation23_spill]] %s5447_s2 }
   0x3   :  { %5459 = sst [smem:[#allocation24_spill]] %s5448_s3 }
   0x4   :  { %5460 = sst [smem:[#allocation25_spill]] %s5449_s4 }
   0x5   :  { %11 = vsyncpa [#allocation5], 0 }
   0x6   :  { %13 = vsyncpa [#allocation5 + $0x1], 0 }
   0x7   :  { %14 = vsyncpa [#allocation8], 0 }
   0x8   :  { %16 = vsyncpa [#allocation8 + $0x1], 0 }
   0x9   :  { %17 = vsyncpa [#allocation11], 0 }
   0xa   :  { %18 = vsyncpa [#allocation14], 0 }
   0xb   :  { %19 = vsyncpa [#allocation6], 0 }
   0xc   :  { %21 = vsyncpa [#allocation6 + $0x1], 0  ;;  %s4578_s21 = smov 0   ;;  %s4580_s22 = smov 0  }
   0xd   :  { %s4582_s23 = smov 0   ;;  %s4584_s24 = smov 0  }
   0xe LB: > { %s4599_s25 = sadd.s32 4294967295, %s4523_s24   ;;  %s3222_s26 = sadd.s32 4294967294, %s4523_s24   ;;  %s4523_s24 = sphi %s4584_s24, %s5489_s24   ;;  %s4519_s23 = sphi %s4582_s23, %s5488_s23   ;;  %s4515_s22 = sphi %s4580_s22, %s5487_s22   ;;  %s4511_s21 = sphi %s4578_s21, %s5486_s21  }
   0xf   : > { %p47_p0 = scmp.ne.s32.totalorder %s4515_s22, %s4511_s21  ;;  %p5452_p1 = scmp.eq.s32.totalorder %s4599_s25, 0 }
  0x10   : > { %p187_p3 = scmp.eq.s32.totalorder %s3222_s26, 1  ;;  %p3223_p5 = scmp.ge.s32.totalorder %s4523_s24, 1 }
  0x11   : > { %p4608_p4 = por %p5452_p1, %p47_p0  ;;  %p194_p7 = scmp.lt.s32.totalorder %s4523_s24, 3 }
  0x12   : > { %p4613_p6 = por %p187_p3, %p47_p0  ;;  %s4525_s30 = smov [#allocation9]  }
  0x13   : > { %s5461_s27 = scalar_select %p4608_p4, 1, 0 }
  0x14   : > { %s5462_s28 = scalar_select %p4613_p6, 1, 0 }
  0x15   : > { %p4618_p8 = pnand %p3223_p5, %p194_p7  ;;  %s206_s7 = sshll.u32 %s4525_s30, 4  ;;  %s4622_s7 = int_to_ptr.vmem [resolvable:$true] %s206_s7 }
  0x16   : > { %s4526_s9 = smov [#allocation10]   ;;  %s5465_s2 = sld [smem:[#allocation23_spill]] }
  0x17   : > { %s5463_s29 = scalar_select %p4618_p8, 1, 0 }
  0x18   : > { %p3996_p9 = pneg %p4618_p8  ;;  %s219_s10 = sshll.u32 %s4526_s9, 4  ;;  %s4633_s10 = int_to_ptr.vmem [resolvable:$true] %s219_s10 }
  0x1a   : > { %p4629_p11 = pnand %p3996_p9, %p5452_p1 }
  0x1c   : > { %s4269_s13 = scalar_lea.hbm %s5465_s2, 9216  ;;  %p4643_p13 = pneg %p4629_p11 }
  0x1d   : > { %p4270_p12 = scmp.ne.s32.totalorder %s5465_s2, %s4269_s13  ;;  %p4276_p5 = scmp.lt.u32.totalorder %s4269_s13, %s5465_s2 }
  0x1f   : > { %p4272_p0 = pnand %p4643_p13, %p4270_p12 }
  0x21   : > { %p4273_p3 = pneg %p4272_p0 }
  0x23   : > { %p4278_p7 = pnand %p4276_p5, %p4273_p3 }
  0x25   : > { %4281 = shalt.err (!%p4278_p7)
}
  0x26   : > { %s4282_s19 = scalar_lea.vmem %s4622_s7, 9216  ;;  %p4290_p2 = scmp.lt.s32.totalorder %s4622_s7, %s4622_s7 }
  0x27   : > { %p4283_p9 = scmp.ne.s32.totalorder %s4622_s7, %s4282_s19  ;;  %p4291_p6 = scmp.lt.s32.totalorder %s4282_s19, %s4282_s19 }
  0x29   : > { %p4285_p10 = pnand %p4283_p9, %p4643_p13  ;;  %p4292_p12 = por %p4291_p6, %p4290_p2 }
  0x2b   : > { %p4286_p1 = pneg %p4285_p10 }
  0x2d   : > { %p4293_p0 = pnand %p4292_p12, %p4286_p1 }
  0x2f   : > { %4296 = shalt.err (!%p4293_p0)
}
  0x30   : > { %s4527_s20 = smov 192   ;;  %s4528_s26 = smov 12  }
  0x31   : > { %3999 = dma.hbm_to_vmem [thread:$0]  (!%p4629_p11), %s5465_s2, 9216, %s4622_s7, [#allocation8], %s4527_s20, %s4527_s20, %s4528_s26  }
  0x32   : > { %s5467_s3 = sld [smem:[#allocation24_spill]] }
  0x38   : > { %s4297_s13 = scalar_lea.hbm %s5467_s3, 48 }
  0x39   : > { %p4298_p2 = scmp.ne.s32.totalorder %s5467_s3, %s4297_s13  ;;  %p4304_p10 = scmp.lt.u32.totalorder %s4297_s13, %s5467_s3 }
  0x3b   : > { %p4300_p1 = pnand %p4298_p2, %p4643_p13 }
  0x3d   : > { %p4301_p6 = pneg %p4300_p1 }
  0x3f   : > { %p4306_p3 = pnand %p4304_p10, %p4301_p6 }
  0x41   : > { %4309 = shalt.err (!%p4306_p3)
}
  0x42   : > { %s4310_s7 = scalar_lea.vmem %s4633_s10, 48  ;;  %s4317_s19 = scalar_lea.vmem %s4633_s10, 64 }
  0x43   : > { %p4311_p5 = scmp.ne.s32.totalorder %s4633_s10, %s4310_s7  ;;  %p4318_p12 = scmp.lt.s32.totalorder %s4633_s10, %s4633_s10 }
  0x44   : > { %p4319_p0 = scmp.lt.s32.totalorder %s4317_s19, %s4310_s7 }
  0x45   : > { %p4313_p7 = pnand %p4311_p5, %p4643_p13 }
  0x46   : > { %p4320_p2 = por %p4319_p0, %p4318_p12 }
  0x47   : > { %p4314_p9 = pneg %p4313_p7 }
  0x49   : > { %p4321_p1 = pnand %p4320_p2, %p4314_p9 }
  0x4b   : > { %4324 = shalt.err (!%p4321_p1)
}
  0x4c   : > { %s4529_s20 = smov 16   ;;  %s4530_s26 = smov 1  }
  0x4d   : > { %4002 = dma.hbm_to_vmem [thread:$0]  (!%p4629_p11), %s5467_s3, 48, %s4633_s10, [#allocation11], %s4529_s20, %s4529_s20, %s4530_s26  }
  0x4e   : > { %s4531_s11 = smov [#allocation12]   ;;  %s5468_s4 = sld [smem:[#allocation25_spill]] }
  0x4f   : > { %s232_s12 = sshll.u32 %s4531_s11, 4  ;;  %s233_s12 = int_to_ptr.vmem [resolvable:$true] %s232_s12 }
  0x54   : > { %s4325_s15 = scalar_lea.hbm %s5468_s4, 4096 }
  0x55   : > { %p4326_p6 = scmp.ne.s32.totalorder %s5468_s4, %s4325_s15  ;;  %p4332_p5 = scmp.lt.u32.totalorder %s4325_s15, %s5468_s4 }
  0x57   : > { %p4328_p10 = pnand %p4326_p6, %p4643_p13 }
  0x59   : > { %p4329_p3 = pneg %p4328_p10 }
  0x5b   : > { %p4334_p7 = pnand %p4332_p5, %p4329_p3 }
  0x5d   : > { %4337 = shalt.err (!%p4334_p7)
}
  0x5e   : > { %s4338_s10 = scalar_lea.vmem %s233_s12, 4096  ;;  %p4346_p2 = scmp.lt.s32.totalorder %s233_s12, %s233_s12 }
  0x5f   : > { %p4339_p9 = scmp.ne.s32.totalorder %s233_s12, %s4338_s10  ;;  %p4347_p1 = scmp.lt.s32.totalorder %s4338_s10, %s4338_s10 }
  0x61   : > { %p4341_p12 = pnand %p4339_p9, %p4643_p13  ;;  %p4348_p4 = por %p4347_p1, %p4346_p2 }
  0x63   : > { %p4342_p0 = pneg %p4341_p12 }
  0x65   : > { %p4349_p8 = pnand %p4348_p4, %p4342_p0 }
  0x67   : > { %4352 = shalt.err (!%p4349_p8)
}
  0x68   : > { %s5455_s20 = smov 64   ;;  %s5456_s26 = smov 4  }
  0x69   : > { %4005 = dma.hbm_to_vmem [thread:$0]  (!%p4629_p11), %s5468_s4, 4096, %s233_s12, [#allocation11], %s5455_s20, %s5455_s20, %s5456_s26  }
  0x6a   : > { %s4534_s11 = smov [#allocation13]   ;;  %s4353_s17 = scalar_lea.hbm %s5450_s5, 16 }
  0x6b   : > { %s246_s13 = sshll.u32 %s4534_s11, 4  ;;  %p4354_p4 = scmp.ne.s32.totalorder %s5450_s5, %s4353_s17  ;;  %s247_s13 = int_to_ptr.vmem [resolvable:$true] %s246_s13 }
  0x6c   : > { %p4360_p10 = scmp.lt.u32.totalorder %s4353_s17, %s5450_s5 }
  0x6d   : > { %p4356_p8 = pnand %p4354_p4, %p4643_p13 }
  0x6f   : > { %p4357_p6 = pneg %p4356_p8 }
  0x71   : > { %p4362_p3 = pnand %p4360_p10, %p4357_p6 }
  0x73   : > { %4365 = shalt.err (!%p4362_p3)
}
  0x74   : > { %s4366_s12 = scalar_lea.vmem %s247_s13, 16  ;;  %s4373_s30 = scalar_lea.vmem %s247_s13, 32 }
  0x75   : > { %p4367_p5 = scmp.ne.s32.totalorder %s247_s13, %s4366_s12  ;;  %p4374_p12 = scmp.lt.s32.totalorder %s247_s13, %s247_s13 }
  0x76   : > { %p4375_p0 = scmp.lt.s32.totalorder %s4373_s30, %s4366_s12 }
  0x77   : > { %p4369_p7 = pnand %p4367_p5, %p4643_p13 }
  0x78   : > { %p4376_p2 = por %p4375_p0, %p4374_p12 }
  0x79   : > { %p4370_p9 = pneg %p4369_p7 }
  0x7b   : > { %p4377_p1 = pnand %p4376_p2, %p4370_p9 }
  0x7d   : > { %4380 = shalt.err (!%p4377_p1)
}
  0x7e   : > { %4008 = dma.hbm_to_vmem [thread:$0]  (!%p4629_p11), %s5450_s5, 16, %s247_s13, [#allocation14]  }
  0x7f   : > { %s4728_s16 = sadd.s32 1, %s4523_s24   ;;  %s34_s14 = sadd.s32 1, %s4519_s23 }
  0x80   : > { %s31_s8 = ssub.s32 %s4523_s24, %s4728_s16  ;;  %p41_p13 = scmp.ne.s32.totalorder %s4519_s23, %s4515_s22 }
  0x81   : > { %p32_p4 = scmp.eq.s32.totalorder %s31_s8, 0  ;;  %p42_p8 = scmp.eq.s32.totalorder %s4523_s24, 0 }
  0x82   : > { %p5469_p6 = scmp.eq.s32.totalorder %s4599_s25, 1  ;;  %p4024_p3 = scmp.lt.s32.totalorder %s4523_s24, 2 }
  0x83   : > { %s4744_s17 = scalar_select %p32_p4, %s4519_s23, %s34_s14  }
  0x84   : > { %p4738_p10 = por %p5469_p6, %p41_p13  ;;  %p43_p5 = por %p42_p8, %p41_p13 }
  0x85   : > { %s4747_s18 = sand.u32 1, %s4519_s23   ;;  %s3428_s7 = sshll.u32 %s4523_s24, 10 }
  0x86   : > { %s3229_s13 = sshll.u32 %s4747_s18, 6  ;;  %s5471_s0 = sld [smem:[#allocation22_spill]] }
  0x87   : > { %s261_s30 = scalar_lea.vmem [#allocation4], %s3229_s13  ;;  %p4758_p11 = pnand %p4024_p3, %p43_p5 }
  0x88   : > { %s268_s9 = sshll.u32 %s261_s30, 4  ;;  %s3232_s8 = sshll.u32 %s4747_s18, 7  ;;  %s4756_s9 = int_to_ptr.vmem [resolvable:$true] %s268_s9 }
  0x89   : > { %s258_s20 = scalar_lea.sflag [#allocation5], %s4747_s18  ;;  %p4383_p9 = pneg %p4758_p11 }
  0x8c   : > { %s4754_s12 = scalar_lea.hbm %s5471_s0, %s3428_s7  ;;  %s4386_s10 = scalar_lea.hbm %s5471_s0, 2048 }
  0x8d   : > { %s4381_s19 = scalar_lea.hbm %s4754_s12, 1024  ;;  %p4387_p2 = scmp.lt.u32.totalorder %s4754_s12, %s5471_s0 }
  0x8e   : > { %p4382_p7 = scmp.ne.s32.totalorder %s4754_s12, %s4381_s19  ;;  %p4388_p1 = scmp.lt.u32.totalorder %s4386_s10, %s4381_s19 }
  0x8f   : > { %p4390_p4 = scmp.lt.u32.totalorder %s4381_s19, %s4754_s12 }
  0x90   : > { %p4384_p12 = pnand %p4383_p9, %p4382_p7  ;;  %p4389_p13 = por %p4388_p1, %p4387_p2 }
  0x92   : > { %p4385_p0 = pneg %p4384_p12  ;;  %p4391_p8 = por %p4390_p4, %p4389_p13 }
  0x94   : > { %p4392_p6 = pnand %p4391_p8, %p4385_p0 }
  0x96   : > { %4395 = shalt.err (!%p4392_p6)
}
  0x97   : > { %s4396_s14 = scalar_lea.vmem %s4756_s9, 1024  ;;  %s4535_s13 = smov [#allocation4]  }
  0x98   : > { %p4397_p3 = scmp.ne.s32.totalorder %s4756_s9, %s4396_s14  ;;  %s4401_s7 = sshll.u32 %s4535_s13, 4  ;;  %s4402_s7 = int_to_ptr.vmem [resolvable:$false] %s4401_s7 }
  0x99   : > { %s4403_s26 = scalar_lea.vmem %s4402_s7, 2048  ;;  %p4404_p12 = scmp.lt.s32.totalorder %s4756_s9, %s4402_s7 }
  0x9a   : > { %p4399_p5 = pnand %p4397_p3, %p4383_p9  ;;  %p4405_p2 = scmp.lt.s32.totalorder %s4403_s26, %s4396_s14 }
  0x9c   : > { %p4400_p7 = pneg %p4399_p5  ;;  %p4406_p1 = por %p4405_p2, %p4404_p12 }
  0x9e   : > { %p4407_p13 = pnand %p4406_p1, %p4400_p7 }
  0xa0   : > { %4410 = shalt.err (!%p4407_p13)
}
  0xa1   : > { %s5473_s19 = smov 4   ;;  %s5474_s10 = smov 64  }
  0xa2   : > { %4012 = dma.hbm_to_vmem [thread:$0]  (!%p4758_p11), %s4754_s12, 1024, %s4756_s9, %s258_s20, %s5474_s10, %s5474_s10, %s5473_s19  }
  0xa3   : > { %s3429_s30 = sshll.u32 %s4523_s24, 11  ;;  %s282_s26 = scalar_lea.vmem [#allocation7], %s3232_s8 }
  0xa4   : > { %s4799_s7 = scalar_lea.hbm %s5446_s1, %s3429_s30  ;;  %s289_s0 = sshll.u32 %s282_s26, 4  ;;  %s4803_s0 = int_to_ptr.vmem [resolvable:$true] %s289_s0 }
  0xa5   : > { %s5475_s2 = sand.u32 1, %s4523_s24   ;;  %s4411_s4 = scalar_lea.hbm %s4799_s7, 2048 }
  0xa6   : > { %s4807_s3 = scalar_lea.sflag [#allocation8], %s5475_s2  ;;  %p4412_p0 = scmp.ne.s32.totalorder %s4799_s7, %s4411_s4 }
  0xa7   : > { %s4416_s18 = scalar_lea.hbm %s5446_s1, 4096  ;;  %p4417_p6 = scmp.lt.u32.totalorder %s4799_s7, %s5446_s1 }
  0xa8   : > { %p4414_p4 = pnand %p4412_p0, %p4383_p9  ;;  %p4418_p3 = scmp.lt.u32.totalorder %s4416_s18, %s4411_s4 }
  0xa9   : > { %p4420_p7 = scmp.lt.u32.totalorder %s4411_s4, %s4799_s7 }
  0xaa   : > { %p4415_p8 = pneg %p4414_p4  ;;  %p4419_p5 = por %p4418_p3, %p4417_p6 }
  0xac   : > { %p4421_p12 = por %p4420_p7, %p4419_p5 }
  0xae   : > { %p4422_p2 = pnand %p4421_p12, %p4415_p8 }
  0xb0   : > { %4425 = shalt.err (!%p4422_p2)
}
  0xb1   : > { %s4426_s2 = scalar_lea.vmem %s4803_s0, 2048  ;;  %s4536_s8 = smov [#allocation7]  }
  0xb2   : > { %p4427_p1 = scmp.ne.s32.totalorder %s4803_s0, %s4426_s2  ;;  %s4431_s10 = sshll.u32 %s4536_s8, 4  ;;  %s4432_s10 = int_to_ptr.vmem [resolvable:$false] %s4431_s10 }
  0xb3   : > { %s4433_s30 = scalar_lea.vmem %s4432_s10, 4096  ;;  %p4434_p4 = scmp.lt.s32.totalorder %s4803_s0, %s4432_s10 }
  0xb4   : > { %p4429_p13 = pnand %p4427_p1, %p4383_p9  ;;  %p4435_p6 = scmp.lt.s32.totalorder %s4433_s30, %s4426_s2 }
  0xb6   : > { %p4430_p0 = pneg %p4429_p13  ;;  %p4436_p3 = por %p4435_p6, %p4434_p4 }
  0xb8   : > { %p4437_p5 = pnand %p4436_p3, %p4430_p0 }
  0xba   : > { %4440 = shalt.err (!%p4437_p5)
}
  0xbb   : > { %s4537_s4 = smov 128   ;;  %s4538_s13 = smov 8  }
  0xbc   : > { %4015 = dma.hbm_to_vmem [thread:$0]  (!%p4758_p11), %s4799_s7, 2048, %s4803_s0, %s4807_s3, %s4537_s4, %s4537_s4, %s4538_s13  }
  0xbd   : > { %p5476_p9 = scmp.ne.s32.totalorder %s5463_s29, 0 }
  0xbe   : > { %s4836_s14 = sand.u32 (!%p5476_p9), 1, %s4515_s22   ;;  %p5477_p8 = scmp.ne.s32.totalorder (!%p5476_p9), %s5461_s27, 0 }
  0xbf   : > { %301 = sbr.rel (%p5476_p9) target bundleno = 2040 (0x7f8), region = 44  ;;  %s3236_s26 = sshll.u32 (!%p5476_p9), %s4836_s14, 6 }
  0xc0   : > { %s304_s20 = scalar_lea.sflag (!%p5476_p9), [#allocation5], %s4836_s14  ;;  %s4842_s12 = scalar_lea.vmem (!%p5476_p9), [#allocation4], %s3236_s26 }
  0xc6   : > { %4486 = dma.done.wait (%p5477_p8), %s304_s20, 1024  }
  0xc7   : > { %4488 = vsyncadd (%p5477_p8), %s304_s20, 4294966272  ;;  %s312_s0 = sand.u32 1, %s4599_s25   ;;  %s3237_s3 = sshll.u32 %s4836_s14, 7 }
  0xc8   : > { %s313_s29 = scalar_lea.sflag [#allocation8], %s312_s0  ;;  %s4850_s11 = scalar_lea.vmem [#allocation7], %s3237_s3 }
  0xc9   : > { %4490 = dma.done.wait (%p5477_p8), %s313_s29, 2048  }
  0xca   : > { %4492 = vsyncadd (%p5477_p8), %s313_s29, 4294965248  ;;  %p5478_p11 = scmp.eq.s32.totalorder %s4599_s25, 0 }
  0xcc   : > { %4494 = dma.done.wait (%p5478_p11), [#allocation8], 9216   ;;  %p5479_p7 = pmov %p5478_p11 }
  0xce   : > { %4496 = vsyncadd (%p5479_p7), [#allocation8], 4294958080  ;;  %p5480_p12 = pmov %p5479_p7 }
  0xcf   : > { %p5481_p2 = pmov %p5479_p7 }
  0xd0   : > { %4498 = dma.done.wait (%p5480_p12), [#allocation11], 4144  }
  0xd1   : > { %4500 = vsyncadd (%p5481_p2), [#allocation11], 4294963152  ;;  %p5482_p1 = pmov %p5481_p2 }
  0xd3   : > { %4502 = dma.done.wait (%p5482_p1), [#allocation14], 16   ;;  %p5483_p13 = pmov %p5482_p1 }
  0xd4   : > { %v4539_v0 = vmov 0   ;;  %v4077_v1 = vld [vmem:[#allocation9 + $0x4] ss:$12 sps:$4 sm:$0xff]   ;;  %v4079_v2 = vld [vmem:[#allocation9] ss:$12 sps:$4 sm:$0xff]   ;;  %v4104_v27 = vld [vmem:[%s4842_s12 + $0x18] sm:$0xff]  }
  0xd5   : > { %4504 = vsyncadd (%p5483_p13), [#allocation14], 4294967280  ;;  %631 = vmatprep.mubr.bf16.mxu0 %v4539_v0  ;;  %599 = vmatprep.subr.bf16.mxu0 %v4077_v1  ;;  %v4080_v3 = vld [vmem:[#allocation9 + $0x1c] ss:$12 sps:$4 sm:$0xff]   ;;  %v4082_v4 = vld [vmem:[#allocation9 + $0x18] ss:$12 sps:$4 sm:$0xff]  }
  0xd6   : > { %600 = vmatpush1.bf16.msra.mxu0 %v4079_v2  ;;  %v4083_v5 = vld [vmem:[#allocation9 + $0x34] ss:$12 sps:$4 sm:$0xff]   ;;  %v4085_v6 = vld [vmem:[#allocation9 + $0x30] ss:$12 sps:$4 sm:$0xff]   ;;  %v4086_v7 = vld [vmem:[#allocation9 + $0x4c] ss:$12 sps:$4 sm:$0xff]  }
  0xd7   : > { %601 = vmatprep.subr.bf16.mxu0 %v4080_v3  ;;  %v4088_v8 = vld [vmem:[#allocation9 + $0x48] ss:$12 sps:$4 sm:$0xff]   ;;  %v4101_v9 = vld [vmem:[%s4842_s12] sm:$0xff]   ;;  %v4097_v17 = vld [vmem:[#allocation9 + $0x90] ss:$12 sps:$4 sm:$0xff]   ;;  %s5356_s27 = scalar_lea.vmem [#allocation15], %s3236_s26 }
  0xd8   : > { %v4089_v10 = vld [vmem:[#allocation9 + $0x64] ss:$12 sps:$4 sm:$0xff]   ;;  %3878 = vmatprep.mubr.bf16.mxu1 %v4101_v9  ;;  %v4091_v11 = vld [vmem:[#allocation9 + $0x60] ss:$12 sps:$4 sm:$0xff]   ;;  %v4092_v12 = vld [vmem:[#allocation9 + $0x7c] ss:$12 sps:$4 sm:$0xff]  }
  0xd9   : > { %v4094_v13 = vld [vmem:[#allocation9 + $0x78] ss:$12 sps:$4 sm:$0xff]   ;;  %v4095_v14 = vld [vmem:[#allocation9 + $0x94] ss:$12 sps:$4 sm:$0xff]   ;;  %v4112_v21 = vld [vmem:[#allocation9 + $0x50] ss:$12 sps:$4 sm:$0xff]  }
  0xda   : > { %602 = vmatpush1.bf16.msra.mxu0 %v4082_v4  ;;  %v4109_v15 = vld [vmem:[#allocation9 + $0x8] ss:$12 sps:$4 sm:$0xff]   ;;  %v4110_v16 = vld [vmem:[#allocation9 + $0x20] ss:$12 sps:$4 sm:$0xff]   ;;  %v4111_v18 = vld [vmem:[#allocation9 + $0x38] ss:$12 sps:$4 sm:$0xff]  }
  0xdb   : > { %603 = vmatprep.subr.bf16.mxu0 %v4083_v5  ;;  %3862 = vmatprep.subr.bf16.mxu1 %v4109_v15  ;;  %v4098_v19 = vld [vmem:[#allocation9 + $0xac] ss:$12 sps:$4 sm:$0xff]   ;;  %v4100_v20 = vld [vmem:[#allocation9 + $0xa8] ss:$12 sps:$4 sm:$0xff]   ;;  %v4105_v28 = vld [vmem:[%s4842_s12 + $0x20] sm:$0xff]   ;;  %s3446_s7 = sshll.u32 %s4599_s25, 10 }
  0xdc   : > { %3863 = vmatpush3.bf16.msra.mxu1 %v4109_v15  ;;  %v4113_v22 = vld [vmem:[#allocation9 + $0x68] ss:$12 sps:$4 sm:$0xff]   ;;  %v4114_v23 = vld [vmem:[#allocation9 + $0x80] ss:$12 sps:$4 sm:$0xff]   ;;  %v4115_v25 = vld [vmem:[#allocation9 + $0x98] ss:$12 sps:$4 sm:$0xff]   ;;  %s5398_s2 = scalar_lea.hbm %s5451_s6, %s3446_s7 }
  0xdd   : > { %3864 = vmatprep.subr.bf16.mxu1 %v4110_v16  ;;  %v4102_v24 = vld [vmem:[%s4842_s12 + $0x8] sm:$0xff]   ;;  %v4103_v26 = vld [vmem:[%s4842_s12 + $0x10] sm:$0xff]   ;;  %v4108_v31 = vld [vmem:[%s4842_s12 + $0x38] sm:$0xff]   ;;  %s3088_s18 = sshll.u32 %s5356_s27, 4  ;;  %s3075_s8 = scalar_lea.sflag [#allocation6], %s4836_s14  ;;  %s5400_s18 = int_to_ptr.vmem [resolvable:$true] %s3088_s18 }
  0xde   : > { %604 = vmatpush1.bf16.msra.mxu0 %v4085_v6  ;;  %v4106_v29 = vld [vmem:[%s4842_s12 + $0x28] sm:$0xff]   ;;  %v4107_v30 = vld [vmem:[%s4842_s12 + $0x30] sm:$0xff]   ;;  %v4144_v37 = vld [vmem:[#allocation9 + $0xd8] ss:$12 sps:$4 sm:$0xff]   ;;  %s4441_s10 = scalar_lea.vmem %s5400_s18, 1024  ;;  %s4540_s25 = smov [#allocation15]  }
  0xdf   : > { %605 = vmatprep.subr.bf16.mxu0 %v4086_v7  ;;  %v4116_v32 = vld [vmem:[#allocation9 + $0xb0] ss:$12 sps:$4 sm:$0xff]   ;;  %v4886_v33 = vld [vmem:[%s4850_s11 + $0x4] ss:$8 sps:$4 sm:$0xff]   ;;  %v4149_v38 = vld [vmem:[#allocation9 + $0xf4] ss:$12 sps:$4 sm:$0xff]   ;;  %p4442_p0 = scmp.ne.s32.totalorder %s5400_s18, %s4441_s10 }
  0xe0   : > { %3865 = vmatpush3.bf16.msra.mxu1 %v4110_v16  ;;  %v4141_v34 = vld [vmem:[#allocation9 + $0xc0] ss:$12 sps:$4 sm:$0xff]   ;;  %v4143_v35 = vld [vmem:[#allocation9 + $0xc4] ss:$12 sps:$4 sm:$0xff]   ;;  %v4146_v36 = vld [vmem:[#allocation9 + $0xdc] ss:$12 sps:$4 sm:$0xff]  }
  0xe1   : > { %3866 = vmatprep.subr.bf16.mxu1 %v4111_v18  ;;  %v4147_v41 = vld [vmem:[#allocation9 + $0xf0] ss:$12 sps:$4 sm:$0xff]   ;;  %v4152_v43 = vld [vmem:[#allocation9 + $0x10c] ss:$12 sps:$4 sm:$0xff]   ;;  %v4150_v47 = vld [vmem:[#allocation9 + $0x108] ss:$12 sps:$4 sm:$0xff]   ;;  %p4443_p4 = pnand %p4442_p0, %p4738_p10 }
  0xe2   : > { %606 = vmatpush1.bf16.msra.mxu0 %v4088_v8  ;;  %v4155_v48 = vld [vmem:[#allocation9 + $0x124] ss:$12 sps:$4 sm:$0xff]   ;;  %v4153_v51 = vld [vmem:[#allocation9 + $0x120] ss:$12 sps:$4 sm:$0xff]   ;;  %v4159_v53 = vld [vmem:[#allocation9 + $0x13c] ss:$12 sps:$4 sm:$0xff]  }
  0xe3   : > { %607 = vmatprep.subr.bf16.mxu0 %v4089_v10  ;;  %v4157_v57 = vld [vmem:[#allocation9 + $0x138] ss:$12 sps:$4 sm:$0xff]   ;;  %p4444_p6 = pneg %p4443_p4  ;;  %s4445_s30 = sshll.u32 %s4540_s25, 4  ;;  %s4446_s30 = int_to_ptr.vmem [resolvable:$false] %s4445_s30 }
  0xe4   : > { %3867 = vmatpush3.bf16.msra.mxu1 %v4111_v18  ;;  %s4447_s4 = scalar_lea.vmem %s4446_s30, 2048  ;;  %p4448_p3 = scmp.lt.s32.totalorder %s5400_s18, %s4446_s30 }
  0xe5   : > { %3868 = vmatprep.subr.bf16.mxu1 %v4112_v21  ;;  %p4449_p5 = scmp.lt.s32.totalorder %s4447_s4, %s4441_s10 }
  0xe6   : > { %608 = vmatpush1.bf16.msra.mxu0 %v4091_v11 }
  0xe7   : > { %609 = vmatprep.subr.bf16.mxu0 %v4092_v12  ;;  %p4450_p9 = por %p4449_p5, %p4448_p3 }
  0xe8   : > { %3869 = vmatpush3.bf16.msra.mxu1 %v4112_v21 }
  0xe9   : > { %3870 = vmatprep.subr.bf16.mxu1 %v4113_v22  ;;  %p4451_p8 = pnand %p4450_p9, %p4444_p6 }
  0xea   : > { %610 = vmatpush1.bf16.msra.mxu0 %v4094_v13 }
  0xeb   : > { %611 = vmatprep.subr.bf16.mxu0 %v4095_v14 }
  0xec   : > { %3871 = vmatpush3.bf16.msra.mxu1 %v4113_v22 }
  0xed   : > { %3872 = vmatprep.subr.bf16.mxu1 %v4114_v23 }
  0xee   : > { %612 = vmatpush1.bf16.msra.mxu0 %v4097_v17 }
  0xef   : > { %613 = vmatprep.subr.bf16.mxu0 %v4098_v19 }
  0xf0   : > { %3873 = vmatpush3.bf16.msra.mxu1 %v4114_v23 }
  0xf1   : > { %3874 = vmatprep.subr.bf16.mxu1 %v4115_v25 }
  0xf2   : > { %614 = vmatpush1.bf16.msra.mxu0 %v4100_v20 }
  0xf3   : > { %1282 = vmatprep.subr.bf16.mxu0 %v4143_v35  ;;  %v4160_v35 = vld [vmem:[#allocation9 + $0xe0] ss:$12 sps:$4 sm:$0xff]  }
  0xf4   : > { %3875 = vmatpush3.bf16.msra.mxu1 %v4115_v25 }
  0xf5   : > { %632 = vmatmul.mubr.bf16.vlgmr.msra.gmra.mrb[0].mxu0 %v4101_v9  ;;  %3876 = vmatprep.subr.bf16.mxu1 %v4116_v32 }
  0xf6   : > { %641 = vmatprep.mubr.bf16.mxu0 %v4539_v0  ;;  %1283 = vmatpush1.bf16.msra.mxu0 %v4141_v34  ;;  %v4893_v34 = vld [vmem:[%s4850_s11 + $0x14] ss:$8 sps:$4 sm:$0xff]  }
  0xf7   : > { %1284 = vmatprep.subr.bf16.mxu0 %v4146_v36  ;;  %v4161_v36 = vld [vmem:[#allocation9 + $0xf8] ss:$12 sps:$4 sm:$0xff]  }
  0xf8   : > { %3877 = vmatpush3.bf16.msra.mxu1 %v4116_v32  ;;  %v4890_v32 = vld [vmem:[%s4850_s11] ss:$8 sps:$4 sm:$0xff]  }
  0xfa   : > { %1285 = vmatpush1.bf16.msra.mxu0 %v4144_v37  ;;  %v4898_v37 = vld [vmem:[%s4850_s11 + $0x10] ss:$8 sps:$4 sm:$0xff]  }
  0xfb   : > { %3879 = vmatmul.mubr.bf16.vlgmr.msra.gmra.mrb[0].mxu1 %v4102_v24  ;;  %1286 = vmatprep.subr.bf16.mxu0 %v4149_v38  ;;  %v4901_v38 = vld [vmem:[%s4850_s11 + $0x24] ss:$8 sps:$4 sm:$0xff]  }
  0xfc   : > { %3882 = vmatprep.mubr.bf16.mxu1 %v4103_v26 }
  0xfd   : > { %642 = vmatmul.mubr.bf16.gmra.mrb[4].mxu0 %v4102_v24 }
  0xfe   : > { %651 = vmatprep.mubr.bf16.mxu0 %v4539_v0  ;;  %1287 = vmatpush1.bf16.msra.mxu0 %v4147_v41  ;;  %v4914_v41 = vld [vmem:[%s4850_s11 + $0x30] ss:$8 sps:$4 sm:$0xff]  }
  0xff   : > { %1288 = vmatprep.subr.bf16.mxu0 %v4152_v43 }
 0x102   : > { %1289 = vmatpush1.bf16.msra.mxu0 %v4150_v47  ;;  %v4926_v47 = vld [vmem:[%s4850_s11 + $0x40] ss:$8 sps:$4 sm:$0xff]  }
 0x103   : > { %3883 = vmatmul.mubr.bf16.gmra.mrb[4].mxu1 %v4104_v27  ;;  %1290 = vmatprep.subr.bf16.mxu0 %v4155_v48  ;;  %v4929_v48 = vld [vmem:[%s4850_s11 + $0x54] ss:$8 sps:$4 sm:$0xff]  }
 0x104   : > { %3886 = vmatprep.mubr.bf16.mxu1 %v4105_v28 }
 0x105   : > { %652 = vmatmul.mubr.bf16.gmra.mrb[8].mxu0 %v4103_v26 }
 0x106   : > { %661 = vmatprep.mubr.bf16.mxu0 %v4539_v0  ;;  %1291 = vmatpush1.bf16.msra.mxu0 %v4153_v51 }
 0x107   : > { %1292 = vmatprep.subr.bf16.mxu0 %v4159_v53  ;;  %v4942_v53 = vld [vmem:[%s4850_s11 + $0x50] ss:$8 sps:$4 sm:$0xff]  }
 0x10a   : > { %1293 = vmatpush1.bf16.msra.mxu0 %v4157_v57 }
 0x10b   : > { %3887 = vmatmul.mubr.bf16.gmra.mrb[8].mxu1 %v4106_v29 }
 0x10c   : > { %3890 = vmatprep.mubr.bf16.mxu1 %v4107_v30 }
 0x10d   : > { %662 = vmatmul.mubr.bf16.gmra.mrb[12].mxu0 %v4104_v27 }
 0x10e   : > { %671 = vmatprep.mubr.bf16.mxu0 %v4539_v0 }
 0x113   : > { %3891 = vmatmul.mubr.bf16.gmra.mrb[12].mxu1 %v4108_v31 }
 0x114   : > { %985 = vmatprep.mubr.bf16.mxu1 %v4886_v33 }
 0x115   : > { %672 = vmatmul.mubr.bf16.gmra.mrb[16].mxu0 %v4105_v28 }
 0x116   : > { %681 = vmatprep.mubr.bf16.mxu0 %v4539_v0 }
 0x11d   : > { %682 = vmatmul.mubr.bf16.gmra.mrb[20].mxu0 %v4106_v29 }
 0x11e   : > { %691 = vmatprep.mubr.bf16.mxu0 %v4539_v0 }
 0x125   : > { %692 = vmatmul.mubr.bf16.gmra.mrb[24].mxu0 %v4107_v30 }
 0x126   : > { %701 = vmatprep.mubr.bf16.mxu0 %v4539_v0 }
 0x12d   : > { %702 = vmatmul.mubr.bf16.gmra.mrb[28].mxu0 %v4108_v31  ;;  %v4156_v31 = vld [vmem:[#allocation9 + $0xc8] ss:$12 sps:$4 sm:$0xff]  }
 0x12e   : > { %1314 = vmatprep.mubr.bf16.mxu0 %v4539_v0 }
 0x1c8   : > { %v633_v39 = vpop.f32.mrb[0].mxu0 }
 0x1c9   : > { %v635_v40 = vpop.f32.mrb[1].mxu0 }
 0x1ca   : > { %v637_v42 = vpop.f32.mrb[2].mxu0 }
 0x1cb   : > { %v809_v44 = vpack.c.bf16 %v637_v42, %v633_v39  ;;  %v639_v45 = vpop.f32.mrb[3].mxu0  ;;  %v4906_v39 = vld [vmem:[%s4850_s11 + $0x20] ss:$8 sps:$4 sm:$0xff]   ;;  %v4917_v42 = vld [vmem:[%s4850_s11 + $0x44] ss:$8 sps:$4 sm:$0xff]  }
 0x1cc   : > { %v825_v46 = vpack.c.bf16 %v639_v45, %v635_v40  ;;  %v4909_v40 = vld [vmem:[%s4850_s11 + $0x34] ss:$8 sps:$4 sm:$0xff]  }
 0x1ce   : > { %3510 = vmatprep.subr.bf16.mxu1 %v825_v46  ;;  %v4919_v43 = vpop.f32.mrb[0].mxu1 }
 0x1cf   : > { %3511 = vmatpush3.bf16.msra.mxu1 %v809_v44  ;;  %v746_v44 = vpop.f32.mrb[1].mxu1 }
 0x1d0   : > { %v643_v49 = vpop.f32.mrb[4].mxu0  ;;  %v4923_v45 = vpop.f32.mrb[2].mxu1 }
 0x1d1   : > { %v645_v50 = vpop.f32.mrb[5].mxu0  ;;  %v749_v46 = vpop.f32.mrb[3].mxu1 }
 0x1d2   : > { %v647_v52 = vpop.f32.mrb[6].mxu0 }
 0x1d3   : > { %v810_v54 = vpack.c.bf16 %v647_v52, %v643_v49  ;;  %v649_v55 = vpop.f32.mrb[7].mxu0 }
 0x1d4   : > { %v826_v56 = vpack.c.bf16 %v649_v55, %v645_v50 }
 0x1d6   : > { %3512 = vmatprep.subr.bf16.mxu1 %v826_v56  ;;  %v4931_v49 = vpop.f32.mrb[4].mxu1 }
 0x1d7   : > { %3513 = vmatpush3.bf16.msra.mxu1 %v810_v54  ;;  %v4934_v50 = vpop.f32.mrb[5].mxu1  ;;  %v4945_v54 = vld [vmem:[%s4850_s11 + $0x64] ss:$8 sps:$4 sm:$0xff]  }
 0x1d8   : > { %v653_v58 = vpop.f32.mrb[8].mxu0  ;;  %v4937_v51 = vpop.f32.mrb[6].mxu1 }
 0x1d9   : > { %v655_v59 = vpop.f32.mrb[9].mxu0  ;;  %v4939_v52 = vpop.f32.mrb[7].mxu1 }
 0x1da   : > { %v657_v60 = vpop.f32.mrb[10].mxu0 }
 0x1db   : > { %v811_v61 = vpack.c.bf16 %v657_v60, %v653_v58  ;;  %v659_v62 = vpop.f32.mrb[11].mxu0  ;;  %v4961_v60 = vld [vmem:[%s4850_s11 + $0x74] ss:$8 sps:$4 sm:$0xff]  }
 0x1dc   : > { %v827_v63 = vpack.c.bf16 %v659_v62, %v655_v59  ;;  %v4958_v59 = vld [vmem:[%s4850_s11 + $0x60] ss:$8 sps:$4 sm:$0xff]  }
 0x1de   : > { %3514 = vmatprep.subr.bf16.mxu1 %v827_v63  ;;  %v4947_v55 = vpop.f32.mrb[8].mxu1 }
 0x1df   : > { %3515 = vmatpush3.bf16.msra.mxu1 %v811_v61  ;;  %v4950_v56 = vpop.f32.mrb[9].mxu1 }
 0x1e0   : > { %v663_v1 = vpop.f32.mrb[12].mxu0  ;;  %v4953_v57 = vpop.f32.mrb[10].mxu1 }
 0x1e1   : > { %v665_v2 = vpop.f32.mrb[13].mxu0  ;;  %v4955_v58 = vpop.f32.mrb[11].mxu1 }
 0x1e2   : > { %v667_v3 = vpop.f32.mrb[14].mxu0 }
 0x1e3   : > { %v812_v4 = vpack.c.bf16 %v667_v3, %v663_v1  ;;  %v669_v5 = vpop.f32.mrb[15].mxu0  ;;  %v4165_v3 = vld [vmem:[#allocation9 + $0x110] ss:$12 sps:$4 sm:$0xff]  }
 0x1e4   : > { %v828_v6 = vpack.c.bf16 %v669_v5, %v665_v2  ;;  %v4974_v2 = vld [vmem:[%s4850_s11 + $0x70] ss:$8 sps:$4 sm:$0xff]   ;;  %v4164_v5 = vld [vmem:[#allocation9 + $0x154] ss:$12 sps:$4 sm:$0xff]  }
 0x1e5   : > { %1294 = vmatprep.subr.bf16.mxu0 %v4164_v5 }
 0x1e6   : > { %3516 = vmatprep.subr.bf16.mxu1 %v828_v6  ;;  %v4963_v61 = vpop.f32.mrb[12].mxu1  ;;  %v4166_v6 = vld [vmem:[#allocation9 + $0x128] ss:$12 sps:$4 sm:$0xff]  }
 0x1e7   : > { %3517 = vmatpush3.bf16.msra.mxu1 %v812_v4  ;;  %v4966_v62 = vpop.f32.mrb[13].mxu1  ;;  %v4162_v4 = vld [vmem:[#allocation9 + $0x150] ss:$12 sps:$4 sm:$0xff]  }
 0x1e8   : > { %v673_v7 = vpop.f32.mrb[16].mxu0  ;;  %v4969_v63 = vpop.f32.mrb[14].mxu1  ;;  %1295 = vmatpush1.bf16.msra.mxu0 %v4162_v4 }
 0x1e9   : > { %v675_v8 = vpop.f32.mrb[17].mxu0  ;;  %v4971_v1 = vpop.f32.mrb[15].mxu1 }
 0x1ea   : > { %v677_v9 = vpop.f32.mrb[18].mxu0 }
 0x1eb   : > { %v813_v10 = vpack.c.bf16 %v677_v9, %v673_v7  ;;  %v679_v11 = vpop.f32.mrb[19].mxu0  ;;  %v4169_v7 = vld [vmem:[#allocation9 + $0x16c] ss:$12 sps:$4 sm:$0xff]   ;;  %v4167_v9 = vld [vmem:[#allocation9 + $0x168] ss:$12 sps:$4 sm:$0xff]  }
 0x1ec   : > { %v829_v12 = vpack.c.bf16 %v679_v11, %v675_v8  ;;  %v4170_v8 = vld [vmem:[#allocation9 + $0x140] ss:$12 sps:$4 sm:$0xff]   ;;  %1296 = vmatprep.subr.bf16.mxu0 %v4169_v7  ;;  %v4172_v11 = vld [vmem:[#allocation9 + $0x170] ss:$12 sps:$4 sm:$0xff]  }
 0x1ed   : > { %1297 = vmatpush1.bf16.msra.mxu0 %v4167_v9 }
 0x1ee   : > { %3518 = vmatprep.subr.bf16.mxu1 %v829_v12  ;;  %v4977_v12 = vld [vmem:[#allocation10] ss:$0 sm:$0xff] }
 0x1ef   : > { %3519 = vmatpush3.bf16.msra.mxu1 %v813_v10  ;;  %v4171_v10 = vld [vmem:[#allocation9 + $0x158] ss:$12 sps:$4 sm:$0xff]  }
 0x1f0   : > { %v683_v13 = vpop.f32.mrb[20].mxu0 }
 0x1f1   : > { %v685_v14 = vpop.f32.mrb[21].mxu0 }
 0x1f2   : > { %v687_v15 = vpop.f32.mrb[22].mxu0 }
 0x1f3   : > { %v814_v16 = vpack.c.bf16 %v687_v15, %v683_v13  ;;  %v689_v17 = vpop.f32.mrb[23].mxu0  ;;  %v1057_v15 = vadd.f32 %v4977_v12, %v746_v44 }
 0x1f4   : > { %v830_v18 = vpack.c.bf16 %v689_v17, %v685_v14 }
 0x1f6   : > { %3520 = vmatprep.subr.bf16.mxu1 %v830_v18 }
 0x1f7   : > { %3521 = vmatpush3.bf16.msra.mxu1 %v814_v16 }
 0x1f8   : > { %v693_v19 = vpop.f32.mrb[24].mxu0 }
 0x1f9   : > { %v695_v20 = vpop.f32.mrb[25].mxu0 }
 0x1fa   : > { %v697_v21 = vpop.f32.mrb[26].mxu0 }
 0x1fb   : > { %v815_v22 = vpack.c.bf16 %v697_v21, %v693_v19  ;;  %v699_v23 = vpop.f32.mrb[27].mxu0  ;;  %v1058_v19 = vadd.f32 %v4977_v12, %v749_v46 }
 0x1fc   : > { %v831_v24 = vpack.c.bf16 %v699_v23, %v695_v20 }
 0x1fe   : > { %3522 = vmatprep.subr.bf16.mxu1 %v831_v24 }
 0x1ff   : > { %3523 = vmatpush3.bf16.msra.mxu1 %v815_v22 }
 0x200   : > { %v703_v25 = vpop.f32.mrb[28].mxu0 }
 0x201   : > { %v705_v26 = vpop.f32.mrb[29].mxu0 }
 0x202   : > { %v707_v27 = vpop.f32.mrb[30].mxu0 }
 0x203   : > { %v816_v28 = vpack.c.bf16 %v707_v27, %v703_v25  ;;  %v709_v29 = vpop.f32.mrb[31].mxu0  ;;  %v1059_v27 = vadd.f32 %v4919_v43, %v4977_v12 }
 0x204   : > { %v832_v30 = vpack.c.bf16 %v709_v29, %v705_v26 }
 0x206   : > { %3524 = vmatprep.subr.bf16.mxu1 %v832_v30 }
 0x207   : > { %3525 = vmatpush3.bf16.msra.mxu1 %v816_v28 }
 0x208   : > { %3894 = vmatprep.subr.bf16.mxu1 %v4156_v31 }
 0x20a   : > { %986 = vmatmul.mubr.bf16.vlgmr.msra.gmra.mrb[16].mxu1 %v4890_v32 }
 0x20b   : > { %993 = vmatprep.mubr.bf16.mxu1 %v4893_v34  ;;  %3895 = vmatpush3.bf16.msra.mxu1 %v4156_v31 }
 0x20c   : > { %3896 = vmatprep.subr.bf16.mxu1 %v4160_v35 }
 0x20f   : > { %3897 = vmatpush3.bf16.msra.mxu1 %v4160_v35  ;;  %v1060_v35 = vadd.f32 %v4923_v45, %v4977_v12 }
 0x210   : > { %3898 = vmatprep.subr.bf16.mxu1 %v4161_v36 }
 0x212   : > { %994 = vmatmul.mubr.bf16.gmra.mrb[20].mxu1 %v4898_v37 }
 0x213   : > { %1001 = vmatprep.mubr.bf16.mxu1 %v4901_v38  ;;  %3899 = vmatpush3.bf16.msra.mxu1 %v4161_v36 }
 0x214   : > { %3900 = vmatprep.subr.bf16.mxu1 %v4165_v3 }
 0x217   : > { %3901 = vmatpush3.bf16.msra.mxu1 %v4165_v3 }
 0x218   : > { %3902 = vmatprep.subr.bf16.mxu1 %v4166_v6 }
 0x21a   : > { %1002 = vmatmul.mubr.bf16.gmra.mrb[24].mxu1 %v4906_v39 }
 0x21b   : > { %1009 = vmatprep.mubr.bf16.mxu1 %v4909_v40  ;;  %3903 = vmatpush3.bf16.msra.mxu1 %v4166_v6  ;;  %v1061_v6 = vadd.f32 %v4977_v12, %v4934_v50 }
 0x21c   : > { %3904 = vmatprep.subr.bf16.mxu1 %v4170_v8 }
 0x21f   : > { %3905 = vmatpush3.bf16.msra.mxu1 %v4170_v8 }
 0x220   : > { %3906 = vmatprep.subr.bf16.mxu1 %v4171_v10 }
 0x222   : > { %1010 = vmatmul.mubr.bf16.gmra.mrb[28].mxu1 %v4914_v41 }
 0x223   : > { %1017 = vmatprep.mubr.bf16.mxu1 %v4917_v42  ;;  %3907 = vmatpush3.bf16.msra.mxu1 %v4171_v10  ;;  %v1062_v10 = vadd.f32 %v4977_v12, %v4939_v52 }
 0x224   : > { %3908 = vmatprep.subr.bf16.mxu1 %v4172_v11 }
 0x227   : > { %3909 = vmatpush3.bf16.msra.mxu1 %v4172_v11 }
 0x22a   : > { %1018 = vmatmul.mubr.bf16.gmra.mrb[32].mxu1 %v4926_v47 }
 0x22b   : > { %1025 = vmatprep.mubr.bf16.mxu1 %v4929_v48 }
 0x232   : > { %1026 = vmatmul.mubr.bf16.gmra.mrb[36].mxu1 %v4942_v53 }
 0x233   : > { %1033 = vmatprep.mubr.bf16.mxu1 %v4945_v54 }
 0x23a   : > { %1034 = vmatmul.mubr.bf16.gmra.mrb[40].mxu1 %v4958_v59 }
 0x23b   : > { %1041 = vmatprep.mubr.bf16.mxu1 %v4961_v60 }
 0x242   : > { %1042 = vmatmul.mubr.bf16.gmra.mrb[44].mxu1 %v4974_v2 }
 0x2dd   : > { %v3526_v13 = vpop.f32.mrb[16].mxu1 }
 0x2de   : > { %v3527_v14 = vpop.f32.mrb[17].mxu1 }
 0x2df   : > { %v3528_v16 = vadd.f32 %v3527_v14, %v3526_v13  ;;  %v3529_v17 = vpop.f32.mrb[18].mxu1 }
 0x2e0   : > { %v3530_v18 = vpop.f32.mrb[19].mxu1 }
 0x2e1   : > { %v1073_v20 = vadd.f32 %v3528_v16, %v1057_v15  ;;  %v3531_v21 = vadd.f32 %v3530_v18, %v3529_v17  ;;  %v1063_v18 = vadd.f32 %v4931_v49, %v4977_v12 }
 0x2e3   : > { %v1074_v22 = vadd.f32 %v3531_v21, %v1058_v19  ;;  %v1089_v23 = vmax.f32 %v1073_v20, 0.0 }
 0x2e5   : > { %v1090_v24 = vmax.f32 %v1074_v22, 0.0  ;;  %v3532_v25 = vpop.f32.mrb[20].mxu1  ;;  %v1064_v22 = vadd.f32 %v4937_v51, %v4977_v12 }
 0x2e6   : > { %v3533_v26 = vpop.f32.mrb[21].mxu1 }
 0x2e7   : > { %v4983_v28 = vpack.c.bf16 %v1090_v24, %v1089_v23  ;;  %v3534_v29 = vadd.f32 %v3533_v26, %v3532_v25  ;;  %v3535_v30 = vpop.f32.mrb[22].mxu1 }
 0x2e8   : > { %v3536_v31 = vpop.f32.mrb[23].mxu1 }
 0x2e9   : > { %v1075_v36 = vadd.f32 %v3534_v29, %v1059_v27  ;;  %v3537_v44 = vadd.f32 %v3536_v31, %v3535_v30  ;;  %1315 = vmatmul.mubr.bf16.vlgmr.msra.gmra.mrb[32].mxu0 %v4983_v28  ;;  %3910 = vmatprep.mubr.bf16.mxu1 %v4983_v28  ;;  %v1065_v30 = vadd.f32 %v4977_v12, %v4950_v56 }
 0x2ea   : > { %1324 = vmatprep.mubr.bf16.mxu0 %v4539_v0 }
 0x2eb   : > { %v1076_v46 = vadd.f32 %v3537_v44, %v1060_v35  ;;  %v1091_v3 = vmax.f32 %v1075_v36, 0.0  ;;  %v1066_v44 = vadd.f32 %v4977_v12, %v4955_v58 }
 0x2ed   : > { %v1092_v4 = vmax.f32 %v1076_v46, 0.0  ;;  %v3538_v43 = vpop.f32.mrb[24].mxu1 }
 0x2ee   : > { %v3539_v5 = vpop.f32.mrb[25].mxu1 }
 0x2ef   : > { %v3540_v7 = vadd.f32 %v3539_v5, %v3538_v43  ;;  %v3541_v8 = vpop.f32.mrb[26].mxu1  ;;  %v4992_v9 = vpack.c.bf16 %v1092_v4, %v1091_v3 }
 0x2f0   : > { %v3542_v45 = vpop.f32.mrb[27].mxu1 }
 0x2f1   : > { %v1077_v11 = vadd.f32 %v3540_v7, %v1061_v6  ;;  %v3543_v13 = vadd.f32 %v3542_v45, %v3541_v8  ;;  %1325 = vmatmul.mubr.bf16.gmra.mrb[36].mxu0 %v4992_v9  ;;  %3911 = vmatmul.mubr.bf16.vlgmr.msra.gmra.mrb[48].mxu1 %v4992_v9  ;;  %v1067_v7 = vadd.f32 %v4947_v55, %v4977_v12 }
 0x2f2   : > { %1334 = vmatprep.mubr.bf16.mxu0 %v4539_v0 }
 0x2f3   : > { %v1078_v14 = vadd.f32 %v3543_v13, %v1062_v10  ;;  %v1093_v15 = vmax.f32 %v1077_v11, 0.0  ;;  %v1068_v11 = vadd.f32 %v4953_v57, %v4977_v12 }
 0x2f5   : > { %v1094_v16 = vmax.f32 %v1078_v14, 0.0  ;;  %v3544_v50 = vpop.f32.mrb[28].mxu1 }
 0x2f6   : > { %v3545_v17 = vpop.f32.mrb[29].mxu1 }
 0x2f7   : > { %v3546_v19 = vadd.f32 %v3545_v17, %v3544_v50  ;;  %v3547_v20 = vpop.f32.mrb[30].mxu1  ;;  %v5001_v21 = vpack.c.bf16 %v1094_v16, %v1093_v15 }
 0x2f8   : > { %v3548_v52 = vpop.f32.mrb[31].mxu1 }
 0x2f9   : > { %v1079_v23 = vadd.f32 %v3546_v19, %v1063_v18  ;;  %v3549_v24 = vadd.f32 %v3548_v52, %v3547_v20  ;;  %1335 = vmatmul.mubr.bf16.gmra.mrb[40].mxu0 %v5001_v21  ;;  %3914 = vmatprep.mubr.bf16.mxu1 %v5001_v21  ;;  %v1069_v18 = vadd.f32 %v4977_v12, %v4966_v62 }
 0x2fa   : > { %1344 = vmatprep.mubr.bf16.mxu0 %v4539_v0 }
 0x2fb   : > { %v1080_v25 = vadd.f32 %v3549_v24, %v1064_v22  ;;  %v1095_v26 = vmax.f32 %v1079_v23, 0.0  ;;  %v1070_v22 = vadd.f32 %v4977_v12, %v4971_v1 }
 0x2fd   : > { %v1096_v27 = vmax.f32 %v1080_v25, 0.0  ;;  %v3550_v49 = vpop.f32.mrb[32].mxu1 }
 0x2fe   : > { %v3551_v29 = vpop.f32.mrb[33].mxu1 }
 0x2ff   : > { %v3552_v31 = vadd.f32 %v3551_v29, %v3550_v49  ;;  %v3553_v35 = vpop.f32.mrb[34].mxu1  ;;  %v5010_v36 = vpack.c.bf16 %v1096_v27, %v1095_v26  ;;  %v1071_v29 = vadd.f32 %v4963_v61, %v4977_v12 }
 0x300   : > { %v3554_v51 = vpop.f32.mrb[35].mxu1 }
 0x301   : > { %v1081_v46 = vadd.f32 %v3552_v31, %v1065_v30  ;;  %v3555_v3 = vadd.f32 %v3554_v51, %v3553_v35  ;;  %1345 = vmatmul.mubr.bf16.gmra.mrb[44].mxu0 %v5010_v36  ;;  %3915 = vmatmul.mubr.bf16.gmra.mrb[52].mxu1 %v5010_v36  ;;  %v1072_v51 = vadd.f32 %v4969_v63, %v4977_v12  ;;  %v4173_v63 = vld [vmem:[#allocation9 + $0x180] ss:$12 sps:$4 sm:$0xff]   ;;  %v4175_v12 = vld [vmem:[#allocation9 + $0x184] ss:$12 sps:$4 sm:$0xff]  }
 0x302   : > { %1354 = vmatprep.mubr.bf16.mxu0 %v4539_v0  ;;  %1966 = vmatprep.subr.bf16.mxu1 %v4175_v12 }
 0x303   : > { %v1082_v4 = vadd.f32 %v3555_v3, %v1066_v44  ;;  %v1097_v43 = vmax.f32 %v1081_v46, 0.0  ;;  %1967 = vmatpush1.bf16.msra.mxu1 %v4173_v63 }
 0x305   : > { %v1098_v5 = vmax.f32 %v1082_v4, 0.0  ;;  %v3556_v56 = vpop.f32.mrb[36].mxu1 }
 0x306   : > { %v3557_v6 = vpop.f32.mrb[37].mxu1 }
 0x307   : > { %v3558_v8 = vadd.f32 %v3557_v6, %v3556_v56  ;;  %v3559_v45 = vpop.f32.mrb[38].mxu1  ;;  %v5019_v10 = vpack.c.bf16 %v1098_v5, %v1097_v43  ;;  %v4178_v5 = vld [vmem:[#allocation9 + $0x19c] ss:$12 sps:$4 sm:$0xff]   ;;  %v4176_v56 = vld [vmem:[#allocation9 + $0x198] ss:$12 sps:$4 sm:$0xff]  }
 0x308   : > { %v3560_v58 = vpop.f32.mrb[39].mxu1  ;;  %1968 = vmatprep.subr.bf16.mxu1 %v4178_v5  ;;  %v4181_v6 = vld [vmem:[#allocation9 + $0x1b4] ss:$12 sps:$4 sm:$0xff]  }
 0x309   : > { %v1083_v13 = vadd.f32 %v3558_v8, %v1067_v7  ;;  %v3561_v14 = vadd.f32 %v3560_v58, %v3559_v45  ;;  %1355 = vmatmul.mubr.bf16.gmra.mrb[48].mxu0 %v5019_v10  ;;  %3918 = vmatprep.mubr.bf16.mxu1 %v5019_v10  ;;  %v4179_v45 = vld [vmem:[#allocation9 + $0x1b0] ss:$12 sps:$4 sm:$0xff]  }
 0x30a   : > { %1364 = vmatprep.mubr.bf16.mxu0 %v4539_v0  ;;  %1969 = vmatpush1.bf16.msra.mxu1 %v4176_v56 }
 0x30b   : > { %v1084_v15 = vadd.f32 %v3561_v14, %v1068_v11  ;;  %v1099_v16 = vmax.f32 %v1083_v13, 0.0  ;;  %1970 = vmatprep.subr.bf16.mxu1 %v4181_v6  ;;  %v4185_v11 = vld [vmem:[#allocation9 + $0x1cc] ss:$12 sps:$4 sm:$0xff]  }
 0x30d   : > { %v1100_v50 = vmax.f32 %v1084_v15, 0.0  ;;  %v3562_v55 = vpop.f32.mrb[40].mxu1  ;;  %v4183_v15 = vld [vmem:[#allocation9 + $0x1c8] ss:$12 sps:$4 sm:$0xff]  }
 0x30e   : > { %v3563_v17 = vpop.f32.mrb[41].mxu1  ;;  %1971 = vmatpush1.bf16.msra.mxu1 %v4179_v45 }
 0x30f   : > { %v3564_v19 = vadd.f32 %v3563_v17, %v3562_v55  ;;  %v3565_v20 = vpop.f32.mrb[42].mxu1  ;;  %v5028_v52 = vpack.c.bf16 %v1100_v50, %v1099_v16  ;;  %1972 = vmatprep.subr.bf16.mxu1 %v4185_v11  ;;  %v4189_v16 = vld [vmem:[#allocation9 + $0x1e4] ss:$12 sps:$4 sm:$0xff]  }
 0x310   : > { %v3566_v57 = vpop.f32.mrb[43].mxu1 }
 0x311   : > { %v1085_v23 = vadd.f32 %v3564_v19, %v1069_v18  ;;  %v3567_v24 = vadd.f32 %v3566_v57, %v3565_v20  ;;  %1365 = vmatmul.mubr.bf16.gmra.mrb[52].mxu0 %v5028_v52  ;;  %3919 = vmatmul.mubr.bf16.gmra.mrb[56].mxu1 %v5028_v52  ;;  %v4187_v19 = vld [vmem:[#allocation9 + $0x1e0] ss:$12 sps:$4 sm:$0xff]  }
 0x312   : > { %1374 = vmatprep.mubr.bf16.mxu0 %v4539_v0  ;;  %1973 = vmatpush1.bf16.msra.mxu1 %v4183_v15 }
 0x313   : > { %v1086_v25 = vadd.f32 %v3567_v24, %v1070_v22  ;;  %v1101_v26 = vmax.f32 %v1085_v23, 0.0  ;;  %1974 = vmatprep.subr.bf16.mxu1 %v4189_v16 }
 0x315   : > { %v1102_v27 = vmax.f32 %v1086_v25, 0.0  ;;  %v3568_v62 = vpop.f32.mrb[44].mxu1 }
 0x316   : > { %v3569_v49 = vpop.f32.mrb[45].mxu1  ;;  %1975 = vmatpush1.bf16.msra.mxu1 %v4187_v19 }
 0x317   : > { %v3570_v30 = vadd.f32 %v3569_v49, %v3568_v62  ;;  %v3571_v31 = vpop.f32.mrb[46].mxu1  ;;  %v5037_v35 = vpack.c.bf16 %v1102_v27, %v1101_v26 }
 0x318   : > { %v3572_v1 = vpop.f32.mrb[47].mxu1 }
 0x319   : > { %v1087_v44 = vadd.f32 %v3570_v30, %v1071_v29  ;;  %v3573_v46 = vadd.f32 %v3572_v1, %v3571_v31  ;;  %1375 = vmatmul.mubr.bf16.gmra.mrb[56].mxu0 %v5037_v35  ;;  %3922 = vmatprep.mubr.bf16.mxu1 %v5037_v35 }
 0x31a   : > { %1384 = vmatprep.mubr.bf16.mxu0 %v4539_v0 }
 0x31b   : > { %v1088_v3 = vadd.f32 %v3573_v46, %v1072_v51  ;;  %v1103_v4 = vmax.f32 %v1087_v44, 0.0 }
 0x31d   : > { %v1104_v43 = vmax.f32 %v1088_v3, 0.0 }
 0x31f   : > { %v5044_v61 = vpack.c.bf16 %v1104_v43, %v1103_v4 }
 0x321   : > { %1385 = vmatmul.mubr.bf16.gmra.mrb[60].mxu0 %v5044_v61  ;;  %3923 = vmatmul.mubr.bf16.gmra.mrb[60].mxu1 %v5044_v61 }
 0x322   : > { %1668 = vmatprep.mubr.bf16.mxu0 %v4886_v33  ;;  %1998 = vmatprep.mubr.bf16.mxu1 %v4539_v0 }
 0x3bc   : > { %v1316_v7 = vpop.f32.mrb[32].mxu0 }
 0x3bd   : > { %v1318_v8 = vpop.f32.mrb[33].mxu0 }
 0x3be   : > { %v1320_v58 = vpop.f32.mrb[34].mxu0 }
 0x3bf   : > { %v1492_v13 = vpack.c.bf16 %v1320_v58, %v1316_v7  ;;  %v1322_v14 = vpop.f32.mrb[35].mxu0 }
 0x3c0   : > { %v1508_v33 = vpack.c.bf16 %v1322_v14, %v1318_v8 }
 0x3c2   : > { %3590 = vmatprep.subr.bf16.mxu0 %v1508_v33 }
 0x3c3   : > { %3591 = vmatpush3.bf16.msra.mxu0 %v1492_v13 }
 0x3c4   : > { %v1326_v50 = vpop.f32.mrb[36].mxu0  ;;  %v5050_v55 = vpop.f32.mrb[48].mxu1 }
 0x3c5   : > { %v1328_v17 = vpop.f32.mrb[37].mxu0  ;;  %v5052_v18 = vpop.f32.mrb[49].mxu1 }
 0x3c6   : > { %v1330_v20 = vpop.f32.mrb[38].mxu0  ;;  %v5054_v57 = vpop.f32.mrb[50].mxu1 }
 0x3c7   : > { %v1493_v22 = vpack.c.bf16 %v1330_v20, %v1326_v50  ;;  %v1332_v23 = vpop.f32.mrb[39].mxu0  ;;  %v5056_v24 = vpop.f32.mrb[51].mxu1 }
 0x3c8   : > { %v1509_v25 = vpack.c.bf16 %v1332_v23, %v1328_v17 }
 0x3ca   : > { %3592 = vmatprep.subr.bf16.mxu0 %v1509_v25 }
 0x3cb   : > { %3593 = vmatpush3.bf16.msra.mxu0 %v1493_v22 }
 0x3cc   : > { %v1336_v26 = vpop.f32.mrb[40].mxu0 }
 0x3cd   : > { %v1338_v27 = vpop.f32.mrb[41].mxu0 }
 0x3ce   : > { %v1340_v62 = vpop.f32.mrb[42].mxu0 }
 0x3cf   : > { %v1494_v49 = vpack.c.bf16 %v1340_v62, %v1336_v26  ;;  %v1342_v29 = vpop.f32.mrb[43].mxu0 }
 0x3d0   : > { %v1510_v30 = vpack.c.bf16 %v1342_v29, %v1338_v27 }
 0x3d2   : > { %3594 = vmatprep.subr.bf16.mxu0 %v1510_v30 }
 0x3d3   : > { %3595 = vmatpush3.bf16.msra.mxu0 %v1494_v49 }
 0x3d4   : > { %v1346_v31 = vpop.f32.mrb[44].mxu0  ;;  %v5058_v1 = vpop.f32.mrb[52].mxu1 }
 0x3d5   : > { %v1348_v51 = vpop.f32.mrb[45].mxu0  ;;  %v5060_v44 = vpop.f32.mrb[53].mxu1 }
 0x3d6   : > { %v1350_v46 = vpop.f32.mrb[46].mxu0  ;;  %v5062_v3 = vpop.f32.mrb[54].mxu1 }
 0x3d7   : > { %v1495_v4 = vpack.c.bf16 %v1350_v46, %v1346_v31  ;;  %v1352_v43 = vpop.f32.mrb[47].mxu0  ;;  %v5064_v63 = vpop.f32.mrb[55].mxu1 }
 0x3d8   : > { %v1511_v12 = vpack.c.bf16 %v1352_v43, %v1348_v51 }
 0x3da   : > { %3596 = vmatprep.subr.bf16.mxu0 %v1511_v12 }
 0x3db   : > { %3597 = vmatpush3.bf16.msra.mxu0 %v1495_v4 }
 0x3dc   : > { %v1356_v5 = vpop.f32.mrb[48].mxu0 }
 0x3dd   : > { %v1358_v56 = vpop.f32.mrb[49].mxu0 }
 0x3de   : > { %v1360_v6 = vpop.f32.mrb[50].mxu0 }
 0x3df   : > { %v1496_v7 = vpack.c.bf16 %v1360_v6, %v1356_v5  ;;  %v1362_v8 = vpop.f32.mrb[51].mxu0  ;;  %v4182_v5 = vld [vmem:[#allocation9 + $0x188] ss:$12 sps:$4 sm:$0xff]   ;;  %v4190_v6 = vld [vmem:[#allocation9 + $0x1b8] ss:$12 sps:$4 sm:$0xff]  }
 0x3e0   : > { %v1512_v45 = vpack.c.bf16 %v1362_v8, %v1358_v56  ;;  %v4186_v56 = vld [vmem:[#allocation9 + $0x1a0] ss:$12 sps:$4 sm:$0xff]  }
 0x3e2   : > { %3598 = vmatprep.subr.bf16.mxu0 %v1512_v45 }
 0x3e3   : > { %3599 = vmatpush3.bf16.msra.mxu0 %v1496_v7 }
 0x3e4   : > { %v1366_v58 = vpop.f32.mrb[52].mxu0  ;;  %v5066_v11 = vpop.f32.mrb[56].mxu1 }
 0x3e5   : > { %v1368_v13 = vpop.f32.mrb[53].mxu0  ;;  %v5068_v14 = vpop.f32.mrb[57].mxu1 }
 0x3e6   : > { %v1370_v33 = vpop.f32.mrb[54].mxu0  ;;  %v5070_v15 = vpop.f32.mrb[58].mxu1 }
 0x3e7   : > { %v1497_v16 = vpack.c.bf16 %v1370_v33, %v1366_v58  ;;  %v1372_v50 = vpop.f32.mrb[55].mxu0  ;;  %v5072_v17 = vpop.f32.mrb[59].mxu1 }
 0x3e8   : > { %v1513_v19 = vpack.c.bf16 %v1372_v50, %v1368_v13 }
 0x3ea   : > { %3600 = vmatprep.subr.bf16.mxu0 %v1513_v19 }
 0x3eb   : > { %3601 = vmatpush3.bf16.msra.mxu0 %v1497_v16 }
 0x3ec   : > { %v1376_v20 = vpop.f32.mrb[56].mxu0 }
 0x3ed   : > { %v1378_v22 = vpop.f32.mrb[57].mxu0 }
 0x3ee   : > { %v1380_v23 = vpop.f32.mrb[58].mxu0 }
 0x3ef   : > { %v1498_v25 = vpack.c.bf16 %v1380_v23, %v1376_v20  ;;  %v1382_v26 = vpop.f32.mrb[59].mxu0 }
 0x3f0   : > { %v1514_v27 = vpack.c.bf16 %v1382_v26, %v1378_v22 }
 0x3f2   : > { %3602 = vmatprep.subr.bf16.mxu0 %v1514_v27 }
 0x3f3   : > { %3603 = vmatpush3.bf16.msra.mxu0 %v1498_v25 }
 0x3f4   : > { %v1386_v62 = vpop.f32.mrb[60].mxu0  ;;  %v5074_v49 = vpop.f32.mrb[60].mxu1 }
 0x3f5   : > { %v1388_v29 = vpop.f32.mrb[61].mxu0  ;;  %v5076_v30 = vpop.f32.mrb[61].mxu1 }
 0x3f6   : > { %v1390_v31 = vpop.f32.mrb[62].mxu0  ;;  %v5078_v51 = vpop.f32.mrb[62].mxu1 }
 0x3f7   : > { %v1499_v46 = vpack.c.bf16 %v1390_v31, %v1386_v62  ;;  %v1392_v4 = vpop.f32.mrb[63].mxu0  ;;  %v5080_v43 = vpop.f32.mrb[63].mxu1 }
 0x3f8   : > { %v1515_v12 = vpack.c.bf16 %v1392_v4, %v1388_v29 }
 0x3fa   : > { %3604 = vmatprep.subr.bf16.mxu0 %v1515_v12 }
 0x3fb   : > { %3605 = vmatpush3.bf16.msra.mxu0 %v1499_v46 }
 0x3fc   : > { %3926 = vmatprep.subr.bf16.mxu0 %v4182_v5 }
 0x3fe   : > { %1669 = vmatmul.mubr.bf16.vlgmr.msra.gmra.mrb[64].mxu0 %v4890_v32  ;;  %v4193_v32 = vld [vmem:[#allocation9 + $0x1fc] ss:$12 sps:$4 sm:$0xff]  }
 0x3ff   : > { %1676 = vmatprep.mubr.bf16.mxu0 %v4893_v34  ;;  %3927 = vmatpush3.bf16.msra.mxu0 %v4182_v5  ;;  %v4194_v34 = vld [vmem:[#allocation9 + $0x1d0] ss:$12 sps:$4 sm:$0xff]  }
 0x400   : > { %3928 = vmatprep.subr.bf16.mxu0 %v4186_v56  ;;  %1976 = vmatprep.subr.bf16.mxu1 %v4193_v32 }
 0x403   : > { %3929 = vmatpush3.bf16.msra.mxu0 %v4186_v56  ;;  %v4206_v56 = vld [vmem:[#allocation12] sm:$0xff]  }
 0x404   : > { %3930 = vmatprep.subr.bf16.mxu0 %v4190_v6 }
 0x406   : > { %1677 = vmatmul.mubr.bf16.gmra.mrb[68].mxu0 %v4898_v37  ;;  %v4191_v37 = vld [vmem:[#allocation9 + $0x1f8] ss:$12 sps:$4 sm:$0xff]  }
 0x407   : > { %1684 = vmatprep.mubr.bf16.mxu0 %v4901_v38  ;;  %3931 = vmatpush3.bf16.msra.mxu0 %v4190_v6  ;;  %v4197_v38 = vld [vmem:[#allocation9 + $0x214] ss:$12 sps:$4 sm:$0xff]  }
 0x408   : > { %3932 = vmatprep.subr.bf16.mxu0 %v4194_v34  ;;  %1977 = vmatpush1.bf16.msra.mxu1 %v4191_v37  ;;  %v4207_v37 = vld [vmem:[#allocation12 + $0x48] sm:$0xff]  }
 0x409   : > { %1978 = vmatprep.subr.bf16.mxu1 %v4197_v38 }
 0x40b   : > { %3933 = vmatpush3.bf16.msra.mxu0 %v4194_v34 }
 0x40e   : > { %1685 = vmatmul.mubr.bf16.gmra.mrb[72].mxu0 %v4906_v39  ;;  %v4198_v39 = vld [vmem:[#allocation9 + $0x1e8] ss:$12 sps:$4 sm:$0xff]  }
 0x40f   : > { %1692 = vmatprep.mubr.bf16.mxu0 %v4909_v40  ;;  %v4195_v40 = vld [vmem:[#allocation9 + $0x210] ss:$12 sps:$4 sm:$0xff]   ;;  %3934 = vmatprep.subr.bf16.mxu0 %v4198_v39 }
 0x410   : > { %1979 = vmatpush1.bf16.msra.mxu1 %v4195_v40  ;;  %3935 = vmatpush3.bf16.msra.mxu0 %v4198_v39 }
 0x416   : > { %1693 = vmatmul.mubr.bf16.gmra.mrb[76].mxu0 %v4914_v41  ;;  %v4201_v41 = vld [vmem:[#allocation9 + $0x22c] ss:$12 sps:$4 sm:$0xff]  }
 0x417   : > { %1700 = vmatprep.mubr.bf16.mxu0 %v4917_v42  ;;  %v4202_v42 = vld [vmem:[#allocation9 + $0x200] ss:$12 sps:$4 sm:$0xff]   ;;  %1980 = vmatprep.subr.bf16.mxu1 %v4201_v41 }
 0x418   : > { %3936 = vmatprep.subr.bf16.mxu0 %v4202_v42 }
 0x419   : > { %3937 = vmatpush3.bf16.msra.mxu0 %v4202_v42  ;;  %v4208_v42 = vld [vmem:[#allocation12 + $0x8] sm:$0xff]  }
 0x41e   : > { %1701 = vmatmul.mubr.bf16.gmra.mrb[80].mxu0 %v4926_v47  ;;  %v4199_v47 = vld [vmem:[#allocation9 + $0x228] ss:$12 sps:$4 sm:$0xff]  }
 0x41f   : > { %1708 = vmatprep.mubr.bf16.mxu0 %v4929_v48  ;;  %1981 = vmatpush1.bf16.msra.mxu1 %v4199_v47  ;;  %v4203_v48 = vld [vmem:[#allocation9 + $0x218] ss:$12 sps:$4 sm:$0xff]  }
 0x420   : > { %3938 = vmatprep.subr.bf16.mxu0 %v4203_v48  ;;  %v4209_v47 = vld [vmem:[#allocation12 + $0x50] sm:$0xff]  }
 0x421   : > { %3939 = vmatpush3.bf16.msra.mxu0 %v4203_v48 }
 0x426   : > { %1709 = vmatmul.mubr.bf16.gmra.mrb[84].mxu0 %v4942_v53  ;;  %v4204_v53 = vld [vmem:[#allocation9 + $0x230] ss:$12 sps:$4 sm:$0xff]  }
 0x427   : > { %1716 = vmatprep.mubr.bf16.mxu0 %v4945_v54  ;;  %3940 = vmatprep.subr.bf16.mxu0 %v4204_v53  ;;  %v4205_v54 = vld [vmem:[#allocation12 + $0x40] sm:$0xff]  }
 0x428   : > { %3941 = vmatpush3.bf16.msra.mxu0 %v4204_v53 }
 0x429   : > { %3734 = vmatprep.subr.bf16.mxu0 %v4205_v54 }
 0x42e   : > { %1717 = vmatmul.mubr.bf16.gmra.mrb[88].mxu0 %v4958_v59  ;;  %v5097_v59 = vld [vmem:[#allocation10 + $0x1] ss:$0 sm:$0xff] }
 0x42f   : > { %1724 = vmatprep.mubr.bf16.mxu0 %v4961_v60  ;;  %v1741_v7 = vadd.f32 %v5097_v59, %v5052_v18  ;;  %v1742_v13 = vadd.f32 %v5097_v59, %v5056_v24  ;;  %v1743_v25 = vadd.f32 %v5050_v55, %v5097_v59  ;;  %v1744_v29 = vadd.f32 %v5054_v57, %v5097_v59 }
 0x430   : > { %v1745_v6 = vadd.f32 %v5097_v59, %v5060_v44  ;;  %v1746_v39 = vadd.f32 %v5097_v59, %v5064_v63  ;;  %v1747_v63 = vadd.f32 %v5058_v1, %v5097_v59  ;;  %v4212_v1 = vld [vmem:[#allocation12 + $0x18] sm:$0xff]  }
 0x436   : > { %1725 = vmatmul.mubr.bf16.gmra.mrb[92].mxu0 %v4974_v2 }
 0x4d1   : > { %v3606_v60 = vpop.f32.mrb[64].mxu0 }
 0x4d2   : > { %v3607_v2 = vpop.f32.mrb[65].mxu0 }
 0x4d3   : > { %v3608_v8 = vadd.f32 %v3607_v2, %v3606_v60  ;;  %v3609_v45 = vpop.f32.mrb[66].mxu0  ;;  %v4210_v2 = vld [vmem:[#allocation12 + $0x10] sm:$0xff]  }
 0x4d4   : > { %v3610_v58 = vpop.f32.mrb[67].mxu0 }
 0x4d5   : > { %v1757_v33 = vadd.f32 %v3608_v8, %v1741_v7  ;;  %v3611_v16 = vadd.f32 %v3610_v58, %v3609_v45  ;;  %v4211_v58 = vld [vmem:[#allocation12 + $0x58] sm:$0xff]  }
 0x4d7   : > { %v1758_v50 = vadd.f32 %v3611_v16, %v1742_v13  ;;  %v1773_v19 = vmax.f32 %v1757_v33, 0.0  ;;  %v1748_v33 = vadd.f32 %v5062_v3, %v5097_v59  ;;  %v1749_v3 = vadd.f32 %v5097_v59, %v5068_v14  ;;  %v4216_v14 = vld [vmem:[#allocation12 + $0x28] sm:$0xff]  }
 0x4d9   : > { %v1774_v20 = vmax.f32 %v1758_v50, 0.0  ;;  %v3612_v22 = vpop.f32.mrb[68].mxu0 }
 0x4da   : > { %v3613_v23 = vpop.f32.mrb[69].mxu0 }
 0x4db   : > { %v5105_v26 = vpack.c.bf16 %v1774_v20, %v1773_v19  ;;  %v3614_v27 = vadd.f32 %v3613_v23, %v3612_v22  ;;  %v3615_v18 = vpop.f32.mrb[70].mxu0  ;;  %v4213_v20 = vld [vmem:[#allocation12 + $0x60] sm:$0xff]  }
 0x4dc   : > { %v3616_v62 = vpop.f32.mrb[71].mxu0 }
 0x4dd   : > { %v1759_v31 = vadd.f32 %v3614_v27, %v1743_v25  ;;  %v3617_v24 = vadd.f32 %v3616_v62, %v3615_v18  ;;  %1999 = vmatmul.mubr.bf16.vlgmr.msra.gmra.mrb[64].mxu1 %v5105_v26  ;;  %3942 = vmatprep.mubr.bf16.mxu0 %v5105_v26  ;;  %v4214_v18 = vld [vmem:[#allocation12 + $0x20] sm:$0xff]  }
 0x4de   : > { %2008 = vmatprep.mubr.bf16.mxu1 %v4539_v0 }
 0x4df   : > { %v1760_v46 = vadd.f32 %v3617_v24, %v1744_v29  ;;  %v1775_v4 = vmax.f32 %v1759_v31, 0.0  ;;  %v4215_v24 = vld [vmem:[#allocation12 + $0x68] sm:$0xff]  }
 0x4e1   : > { %v1776_v12 = vmax.f32 %v1760_v46, 0.0  ;;  %v3618_v55 = vpop.f32.mrb[72].mxu0 }
 0x4e2   : > { %v3619_v5 = vpop.f32.mrb[73].mxu0 }
 0x4e3   : > { %v3620_v32 = vadd.f32 %v3619_v5, %v3618_v55  ;;  %v3621_v34 = vpop.f32.mrb[74].mxu0  ;;  %v5114_v57 = vpack.c.bf16 %v1776_v12, %v1775_v4  ;;  %v1750_v4 = vadd.f32 %v5097_v59, %v5072_v17  ;;  %v1751_v17 = vadd.f32 %v5066_v11, %v5097_v59  ;;  %v4220_v11 = vld [vmem:[#allocation12 + $0x38] sm:$0xff]  }
 0x4e4   : > { %v3622_v38 = vpop.f32.mrb[75].mxu0 }
 0x4e5   : > { %v1761_v40 = vadd.f32 %v3620_v32, %v1745_v6  ;;  %v3623_v41 = vadd.f32 %v3622_v38, %v3621_v34  ;;  %2009 = vmatmul.mubr.bf16.gmra.mrb[68].mxu1 %v5114_v57  ;;  %3943 = vmatmul.mubr.bf16.vlgmr.msra.gmra.mrb[96].mxu0 %v5114_v57  ;;  %v4218_v38 = vld [vmem:[#allocation12 + $0x30] sm:$0xff]  }
 0x4e6   : > { %2018 = vmatprep.mubr.bf16.mxu1 %v4539_v0  ;;  %3735 = vmatpush3.bf16.msra.mxu0 %v4206_v56  ;;  %v4217_v56 = vld [vmem:[#allocation12 + $0x70] sm:$0xff]  }
 0x4e7   : > { %v1762_v44 = vadd.f32 %v3623_v41, %v1746_v39  ;;  %3736 = vmatprep.subr.bf16.mxu0 %v4207_v37  ;;  %v1777_v48 = vmax.f32 %v1761_v40, 0.0 }
 0x4e9   : > { %v1778_v53 = vmax.f32 %v1762_v44, 0.0  ;;  %v3624_v54 = vpop.f32.mrb[76].mxu0 }
 0x4ea   : > { %v3625_v60 = vpop.f32.mrb[77].mxu0  ;;  %3737 = vmatpush3.bf16.msra.mxu0 %v4208_v42  ;;  %v4219_v42 = vld [vmem:[#allocation12 + $0x78] sm:$0xff]  }
 0x4eb   : > { %v3626_v7 = vadd.f32 %v3625_v60, %v3624_v54  ;;  %v3627_v8 = vpop.f32.mrb[78].mxu0  ;;  %v5123_v45 = vpack.c.bf16 %v1778_v53, %v1777_v48  ;;  %3738 = vmatprep.subr.bf16.mxu0 %v4209_v47  ;;  %v1752_v47 = vadd.f32 %v5070_v15, %v5097_v59  ;;  %v1753_v15 = vadd.f32 %v5097_v59, %v5076_v30 }
 0x4ec   : > { %v3628_v13 = vpop.f32.mrb[79].mxu0 }
 0x4ed   : > { %v1763_v16 = vadd.f32 %v3626_v7, %v1747_v63  ;;  %v3629_v50 = vadd.f32 %v3628_v13, %v3627_v8  ;;  %2019 = vmatmul.mubr.bf16.gmra.mrb[72].mxu1 %v5123_v45  ;;  %3946 = vmatprep.mubr.bf16.mxu0 %v5123_v45 }
 0x4ee   : > { %2028 = vmatprep.mubr.bf16.mxu1 %v4539_v0  ;;  %3739 = vmatpush3.bf16.msra.mxu0 %v4210_v2 }
 0x4ef   : > { %v1764_v19 = vadd.f32 %v3629_v50, %v1748_v33  ;;  %3740 = vmatprep.subr.bf16.mxu0 %v4211_v58  ;;  %v1779_v22 = vmax.f32 %v1763_v16, 0.0  ;;  %v1754_v16 = vadd.f32 %v5097_v59, %v5080_v43 }
 0x4f1   : > { %v1780_v23 = vmax.f32 %v1764_v19, 0.0  ;;  %v3630_v25 = vpop.f32.mrb[80].mxu0 }
 0x4f2   : > { %v3631_v27 = vpop.f32.mrb[81].mxu0  ;;  %3741 = vmatpush3.bf16.msra.mxu0 %v4212_v1 }
 0x4f3   : > { %v3632_v62 = vadd.f32 %v3631_v27, %v3630_v25  ;;  %v3633_v29 = vpop.f32.mrb[82].mxu0  ;;  %v5132_v31 = vpack.c.bf16 %v1780_v23, %v1779_v22  ;;  %3742 = vmatprep.subr.bf16.mxu0 %v4213_v20  ;;  %v1755_v25 = vadd.f32 %v5074_v49, %v5097_v59 }
 0x4f4   : > { %v3634_v46 = vpop.f32.mrb[83].mxu0 }
 0x4f5   : > { %v1765_v12 = vadd.f32 %v3632_v62, %v1749_v3  ;;  %v3635_v55 = vadd.f32 %v3634_v46, %v3633_v29  ;;  %2029 = vmatmul.mubr.bf16.gmra.mrb[76].mxu1 %v5132_v31  ;;  %3947 = vmatmul.mubr.bf16.gmra.mrb[100].mxu0 %v5132_v31  ;;  %v1756_v62 = vadd.f32 %v5078_v51, %v5097_v59  ;;  %v4261_v51 = vld [vmem:[%s4842_s12] sm:$0xff]   ;;  %v4263_v59 = vld [vmem:[%s4842_s12 + $0x10] sm:$0xff]  }
 0x4f6   : > { %2038 = vmatprep.mubr.bf16.mxu1 %v4539_v0  ;;  %3743 = vmatpush3.bf16.msra.mxu0 %v4214_v18 }
 0x4f7   : > { %v1766_v5 = vadd.f32 %v3635_v55, %v1750_v4  ;;  %3744 = vmatprep.subr.bf16.mxu0 %v4215_v24  ;;  %v1781_v6 = vmax.f32 %v1765_v12, 0.0  ;;  %v4264_v55 = vld [vmem:[%s4842_s12 + $0x18] sm:$0xff]  }
 0x4f9   : > { %v1782_v32 = vmax.f32 %v1766_v5, 0.0  ;;  %v3636_v34 = vpop.f32.mrb[84].mxu0  ;;  %v4223_v5 = vld [vmem:[%s4850_s11 + $0x4] ss:$8 sps:$4 sm:$0xff]  }
 0x4fa   : > { %v3637_v37 = vpop.f32.mrb[85].mxu0  ;;  %3745 = vmatpush3.bf16.msra.mxu0 %v4216_v14  ;;  %v4267_v14 = vld [vmem:[%s4842_s12 + $0x30] sm:$0xff]  }
 0x4fb   : > { %v3638_v39 = vadd.f32 %v3637_v37, %v3636_v34  ;;  %v3639_v40 = vpop.f32.mrb[86].mxu0  ;;  %v5141_v41 = vpack.c.bf16 %v1782_v32, %v1781_v6  ;;  %3746 = vmatprep.subr.bf16.mxu0 %v4217_v56  ;;  %v5189_v56 = vld [vmem:[#allocation12 + $0x80] sm:$0xff]   ;;  %v5201_v32 = vld [vmem:[#allocation12 + $0x90] sm:$0xff]   ;;  %v5204_v37 = vld [vmem:[#allocation12 + $0xd8] sm:$0xff]  }
 0x4fc   : > { %v3640_v44 = vpop.f32.mrb[87].mxu0 }
 0x4fd   : > { %v1767_v48 = vadd.f32 %v3638_v39, %v1751_v17  ;;  %v3641_v53 = vadd.f32 %v3640_v44, %v3639_v40  ;;  %2039 = vmatmul.mubr.bf16.gmra.mrb[80].mxu1 %v5141_v41  ;;  %3950 = vmatprep.mubr.bf16.mxu0 %v5141_v41  ;;  %v5207_v40 = vld [vmem:[#allocation12 + $0x98] sm:$0xff]  }
 0x4fe   : > { %2048 = vmatprep.mubr.bf16.mxu1 %v4539_v0  ;;  %3747 = vmatpush3.bf16.msra.mxu0 %v4218_v38 }
 0x4ff   : > { %v1768_v54 = vadd.f32 %v3641_v53, %v1752_v47  ;;  %3748 = vmatprep.subr.bf16.mxu0 %v4219_v42  ;;  %v1783_v60 = vmax.f32 %v1767_v48, 0.0  ;;  %v5210_v42 = vld [vmem:[#allocation12 + $0xe0] sm:$0xff]  }
 0x501   : > { %v1784_v2 = vmax.f32 %v1768_v54, 0.0  ;;  %v3642_v63 = vpop.f32.mrb[88].mxu0 }
 0x502   : > { %v3643_v7 = vpop.f32.mrb[89].mxu0  ;;  %3749 = vmatpush3.bf16.msra.mxu0 %v4220_v11  ;;  %v5217_v11 = vld [vmem:[#allocation12 + $0xa0] sm:$0xff]  }
 0x503   : > { %v3644_v8 = vadd.f32 %v3643_v7, %v3642_v63  ;;  %v3645_v58 = vpop.f32.mrb[90].mxu0  ;;  %v5150_v13 = vpack.c.bf16 %v1784_v2, %v1783_v60 }
 0x504   : > { %v3646_v33 = vpop.f32.mrb[91].mxu0 }
 0x505   : > { %v1769_v50 = vadd.f32 %v3644_v8, %v1753_v15  ;;  %v3647_v1 = vadd.f32 %v3646_v33, %v3645_v58  ;;  %2049 = vmatmul.mubr.bf16.gmra.mrb[84].mxu1 %v5150_v13  ;;  %3951 = vmatmul.mubr.bf16.gmra.mrb[104].mxu0 %v5150_v13 }
 0x506   : > { %2058 = vmatprep.mubr.bf16.mxu1 %v4539_v0 }
 0x507   : > { %v1770_v19 = vadd.f32 %v3647_v1, %v1754_v16  ;;  %v1785_v20 = vmax.f32 %v1769_v50, 0.0 }
 0x509   : > { %v1786_v22 = vmax.f32 %v1770_v19, 0.0  ;;  %v3648_v30 = vpop.f32.mrb[92].mxu0 }
 0x50a   : > { %v3649_v23 = vpop.f32.mrb[93].mxu0 }
 0x50b   : > { %v3650_v27 = vadd.f32 %v3649_v23, %v3648_v30  ;;  %v3651_v18 = vpop.f32.mrb[94].mxu0  ;;  %v5159_v43 = vpack.c.bf16 %v1786_v22, %v1785_v20 }
 0x50c   : > { %v3652_v3 = vpop.f32.mrb[95].mxu0 }
 0x50d   : > { %v1771_v29 = vadd.f32 %v3650_v27, %v1755_v25  ;;  %v3653_v24 = vadd.f32 %v3652_v3, %v3651_v18  ;;  %2059 = vmatmul.mubr.bf16.gmra.mrb[88].mxu1 %v5159_v43  ;;  %3954 = vmatprep.mubr.bf16.mxu0 %v5159_v43 }
 0x50e   : > { %2068 = vmatprep.mubr.bf16.mxu1 %v4539_v0  ;;  %v4262_v0 = vld [vmem:[%s4842_s12 + $0x8] sm:$0xff]  }
 0x50f   : > { %v1772_v49 = vadd.f32 %v3653_v24, %v1756_v62  ;;  %v1787_v46 = vmax.f32 %v1771_v29, 0.0 }
 0x511   : > { %v1788_v4 = vmax.f32 %v1772_v49, 0.0 }
 0x513   : > { %v5166_v12 = vpack.c.bf16 %v1788_v4, %v1787_v46 }
 0x515   : > { %2069 = vmatmul.mubr.bf16.gmra.mrb[92].mxu1 %v5166_v12  ;;  %3955 = vmatmul.mubr.bf16.gmra.mrb[108].mxu0 %v5166_v12 }
 0x516   : > { %2810 = vmatprep.mubr.bf16.mxu0 %v4983_v28  ;;  %v4265_v28 = vld [vmem:[%s4842_s12 + $0x20] sm:$0xff]   ;;  %2352 = vmatprep.mubr.bf16.mxu1 %v4223_v5 }
 0x51d   : > { %2811 = vmatmul.mubr.bf16.vlgmr.msra.gmra.mrb[112].mxu0 %v4261_v51 }
 0x51e   : > { %2818 = vmatprep.mubr.bf16.mxu0 %v4992_v9  ;;  %v4266_v9 = vld [vmem:[%s4842_s12 + $0x28] sm:$0xff]  }
 0x525   : > { %2819 = vmatmul.mubr.bf16.gmra.mrb[116].mxu0 %v4262_v0 }
 0x526   : > { %2826 = vmatprep.mubr.bf16.mxu0 %v5001_v21  ;;  %v4268_v21 = vld [vmem:[%s4842_s12 + $0x38] sm:$0xff]  }
 0x52d   : > { %2827 = vmatmul.mubr.bf16.gmra.mrb[120].mxu0 %v4263_v59 }
 0x52e   : > { %2834 = vmatprep.mubr.bf16.mxu0 %v5010_v36  ;;  %v5187_v36 = vld [vmem:[#allocation12 + $0xc0] sm:$0xff]  }
 0x52f   : > { %3798 = vmatprep.subr.bf16.mxu0 %v5187_v36 }
 0x530   : > { %3799 = vmatpush3.bf16.msra.mxu0 %v5189_v56 }
 0x535   : > { %2835 = vmatmul.mubr.bf16.gmra.mrb[124].mxu0 %v4264_v55 }
 0x536   : > { %2842 = vmatprep.mubr.bf16.mxu0 %v5019_v10  ;;  %v5191_v10 = vld [vmem:[#allocation12 + $0xc8] sm:$0xff]  }
 0x537   : > { %3800 = vmatprep.subr.bf16.mxu0 %v5191_v10 }
 0x53d   : > { %2843 = vmatmul.mubr.bf16.gmra.mrb[128].mxu0 %v4265_v28 }
 0x53e   : > { %2850 = vmatprep.mubr.bf16.mxu0 %v5028_v52  ;;  %v5194_v52 = vld [vmem:[#allocation12 + $0x88] sm:$0xff]  }
 0x53f   : > { %3801 = vmatpush3.bf16.msra.mxu0 %v5194_v52 }
 0x545   : > { %2851 = vmatmul.mubr.bf16.gmra.mrb[132].mxu0 %v4266_v9 }
 0x546   : > { %2858 = vmatprep.mubr.bf16.mxu0 %v5037_v35  ;;  %v5198_v35 = vld [vmem:[#allocation12 + $0xd0] sm:$0xff]  }
 0x547   : > { %3802 = vmatprep.subr.bf16.mxu0 %v5198_v35 }
 0x548   : > { %3803 = vmatpush3.bf16.msra.mxu0 %v5201_v32 }
 0x549   : > { %3804 = vmatprep.subr.bf16.mxu0 %v5204_v37 }
 0x54c   : > { %3805 = vmatpush3.bf16.msra.mxu0 %v5207_v40 }
 0x54d   : > { %2859 = vmatmul.mubr.bf16.gmra.mrb[136].mxu0 %v4267_v14  ;;  %3806 = vmatprep.subr.bf16.mxu0 %v5210_v42 }
 0x54e   : > { %2866 = vmatprep.mubr.bf16.mxu0 %v5044_v61 }
 0x550   : > { %3807 = vmatpush3.bf16.msra.mxu0 %v5217_v11 }
 0x555   : > { %2867 = vmatmul.mubr.bf16.gmra.mrb[140].mxu0 %v4268_v21 }
 0x5b0   : > { %v2000_v61 = vpop.f32.mrb[64].mxu1 }
 0x5b1   : > { %v2002_v6 = vpop.f32.mrb[65].mxu1 }
 0x5b2   : > { %v2004_v34 = vpop.f32.mrb[66].mxu1 }
 0x5b3   : > { %v2176_v38 = vpack.c.bf16 %v2004_v34, %v2000_v61  ;;  %v2006_v17 = vpop.f32.mrb[67].mxu1 }
 0x5b4   : > { %v2192_v39 = vpack.c.bf16 %v2006_v17, %v2002_v6 }
 0x5b6   : > { %3670 = vmatprep.subr.bf16.mxu1 %v2192_v39 }
 0x5b7   : > { %3671 = vmatpush3.bf16.msra.mxu1 %v2176_v38 }
 0x5b8   : > { %v2010_v44 = vpop.f32.mrb[68].mxu1  ;;  %v5212_v47 = vpop.f32.mrb[96].mxu0 }
 0x5b9   : > { %v2012_v48 = vpop.f32.mrb[69].mxu1  ;;  %v5214_v53 = vpop.f32.mrb[97].mxu0 }
 0x5ba   : > { %v2014_v54 = vpop.f32.mrb[70].mxu1  ;;  %v5219_v60 = vpop.f32.mrb[98].mxu0 }
 0x5bb   : > { %v2177_v2 = vpack.c.bf16 %v2014_v54, %v2010_v44  ;;  %v2016_v63 = vpop.f32.mrb[71].mxu1  ;;  %v5222_v7 = vpop.f32.mrb[99].mxu0 }
 0x5bc   : > { %v2193_v15 = vpack.c.bf16 %v2016_v63, %v2012_v48 }
 0x5be   : > { %3672 = vmatprep.subr.bf16.mxu1 %v2193_v15 }
 0x5bf   : > { %3673 = vmatpush3.bf16.msra.mxu1 %v2177_v2 }
 0x5c0   : > { %v2020_v8 = vpop.f32.mrb[72].mxu1 }
 0x5c1   : > { %v2022_v58 = vpop.f32.mrb[73].mxu1 }
 0x5c2   : > { %v2024_v33 = vpop.f32.mrb[74].mxu1 }
 0x5c3   : > { %v2178_v16 = vpack.c.bf16 %v2024_v33, %v2020_v8  ;;  %v2026_v50 = vpop.f32.mrb[75].mxu1 }
 0x5c4   : > { %v2194_v1 = vpack.c.bf16 %v2026_v50, %v2022_v58 }
 0x5c6   : > { %3674 = vmatprep.subr.bf16.mxu1 %v2194_v1 }
 0x5c7   : > { %3675 = vmatpush3.bf16.msra.mxu1 %v2178_v16 }
 0x5c8   : > { %v2030_v19 = vpop.f32.mrb[76].mxu1  ;;  %v5225_v20 = vpop.f32.mrb[100].mxu0 }
 0x5c9   : > { %v2032_v22 = vpop.f32.mrb[77].mxu1  ;;  %v5227_v30 = vpop.f32.mrb[101].mxu0 }
 0x5ca   : > { %v2034_v23 = vpop.f32.mrb[78].mxu1  ;;  %v5229_v25 = vpop.f32.mrb[102].mxu0 }
 0x5cb   : > { %v2179_v27 = vpack.c.bf16 %v2034_v23, %v2030_v19  ;;  %v2036_v18 = vpop.f32.mrb[79].mxu1  ;;  %v5231_v3 = vpop.f32.mrb[103].mxu0  ;;  %v4221_v19 = vld [vmem:[%s4850_s11] ss:$8 sps:$4 sm:$0xff]   ;;  %v4226_v23 = vld [vmem:[%s4850_s11 + $0x10] ss:$8 sps:$4 sm:$0xff]  }
 0x5cc   : > { %v2195_v62 = vpack.c.bf16 %v2036_v18, %v2032_v22  ;;  %v4224_v22 = vld [vmem:[%s4850_s11 + $0x14] ss:$8 sps:$4 sm:$0xff]   ;;  %v4239_v18 = vld [vmem:[%s4850_s11 + $0x64] ss:$8 sps:$4 sm:$0xff]  }
 0x5ce   : > { %3676 = vmatprep.subr.bf16.mxu1 %v2195_v62  ;;  %v4244_v62 = vld [vmem:[%s4850_s11 + $0x70] ss:$8 sps:$4 sm:$0xff]  }
 0x5cf   : > { %3677 = vmatpush3.bf16.msra.mxu1 %v2179_v27  ;;  %v4227_v27 = vld [vmem:[%s4850_s11 + $0x24] ss:$8 sps:$4 sm:$0xff]  }
 0x5d0   : > { %v2040_v29 = vpop.f32.mrb[80].mxu1 }
 0x5d1   : > { %v2042_v24 = vpop.f32.mrb[81].mxu1 }
 0x5d2   : > { %v2044_v49 = vpop.f32.mrb[82].mxu1 }
 0x5d3   : > { %v2180_v46 = vpack.c.bf16 %v2044_v49, %v2040_v29  ;;  %v2046_v4 = vpop.f32.mrb[83].mxu1  ;;  %v4256_v29 = vld [vmem:[#allocation12 + $0xa8] sm:$0xff]   ;;  %v4258_v49 = vld [vmem:[#allocation12 + $0xb0] sm:$0xff]  }
 0x5d4   : > { %v2196_v51 = vpack.c.bf16 %v2046_v4, %v2042_v24  ;;  %v4257_v24 = vld [vmem:[#allocation12 + $0xf0] sm:$0xff]   ;;  %v4260_v4 = vld [vmem:[#allocation12 + $0xb8] sm:$0xff]  }
 0x5d6   : > { %3678 = vmatprep.subr.bf16.mxu1 %v2196_v51 }
 0x5d7   : > { %3679 = vmatpush3.bf16.msra.mxu1 %v2180_v46  ;;  %v4259_v46 = vld [vmem:[#allocation12 + $0xf8] sm:$0xff]  }
 0x5d8   : > { %v2050_v0 = vpop.f32.mrb[84].mxu1  ;;  %v5233_v59 = vpop.f32.mrb[104].mxu0 }
 0x5d9   : > { %v2052_v55 = vpop.f32.mrb[85].mxu1  ;;  %v5235_v28 = vpop.f32.mrb[105].mxu0 }
 0x5da   : > { %v2054_v9 = vpop.f32.mrb[86].mxu1  ;;  %v5237_v14 = vpop.f32.mrb[106].mxu0 }
 0x5db   : > { %v2181_v21 = vpack.c.bf16 %v2054_v9, %v2050_v0  ;;  %v2056_v5 = vpop.f32.mrb[87].mxu1  ;;  %v5239_v61 = vpop.f32.mrb[107].mxu0 }
 0x5dc   : > { %v2197_v6 = vpack.c.bf16 %v2056_v5, %v2052_v55 }
 0x5de   : > { %3680 = vmatprep.subr.bf16.mxu1 %v2197_v6 }
 0x5df   : > { %3681 = vmatpush3.bf16.msra.mxu1 %v2181_v21 }
 0x5e0   : > { %v2060_v34 = vpop.f32.mrb[88].mxu1 }
 0x5e1   : > { %v2062_v38 = vpop.f32.mrb[89].mxu1 }
 0x5e2   : > { %v2064_v17 = vpop.f32.mrb[90].mxu1 }
 0x5e3   : > { %v2182_v39 = vpack.c.bf16 %v2064_v17, %v2060_v34  ;;  %v2066_v44 = vpop.f32.mrb[91].mxu1 }
 0x5e4   : > { %v2198_v48 = vpack.c.bf16 %v2066_v44, %v2062_v38 }
 0x5e6   : > { %3682 = vmatprep.subr.bf16.mxu1 %v2198_v48 }
 0x5e7   : > { %3683 = vmatpush3.bf16.msra.mxu1 %v2182_v39 }
 0x5e8   : > { %v2070_v54 = vpop.f32.mrb[92].mxu1  ;;  %v5241_v2 = vpop.f32.mrb[108].mxu0 }
 0x5e9   : > { %v2072_v63 = vpop.f32.mrb[93].mxu1  ;;  %v5243_v15 = vpop.f32.mrb[109].mxu0 }
 0x5ea   : > { %v2074_v8 = vpop.f32.mrb[94].mxu1  ;;  %v5245_v58 = vpop.f32.mrb[110].mxu0 }
 0x5eb   : > { %v2183_v33 = vpack.c.bf16 %v2074_v8, %v2070_v54  ;;  %v2076_v16 = vpop.f32.mrb[95].mxu1  ;;  %v5247_v50 = vpop.f32.mrb[111].mxu0 }
 0x5ec   : > { %v2199_v1 = vpack.c.bf16 %v2076_v16, %v2072_v63 }
 0x5ee   : > { %3684 = vmatprep.subr.bf16.mxu1 %v2199_v1 }
 0x5ef   : > { %3685 = vmatpush3.bf16.msra.mxu1 %v2183_v33 }
 0x5f0   : > { %3958 = vmatprep.subr.bf16.mxu1 %v5187_v36  ;;  %v4229_v36 = vld [vmem:[%s4850_s11 + $0x20] ss:$8 sps:$4 sm:$0xff]   ;;  %v3750_v51 = vpop.f32.mrb[112].mxu0 }
 0x5f1   : > { %v3751_v0 = vpop.f32.mrb[113].mxu0 }
 0x5f2   : > { %2353 = vmatmul.mubr.bf16.vlgmr.msra.gmra.mrb[96].mxu1 %v4221_v19  ;;  %v5274_v55 = vadd.f32 %v3751_v0, %v3750_v51  ;;  %v3753_v9 = vpop.f32.mrb[114].mxu0 }
 0x5f3   : > { %2360 = vmatprep.mubr.bf16.mxu1 %v4224_v22  ;;  %3966 = vmatpush3.bf16.msra.mxu1 %v5189_v56  ;;  %v4230_v56 = vld [vmem:[%s4850_s11 + $0x34] ss:$8 sps:$4 sm:$0xff]   ;;  %v3754_v21 = vpop.f32.mrb[115].mxu0 }
 0x5f4   : > { %3959 = vmatprep.subr.bf16.mxu1 %v5191_v10  ;;  %v4232_v10 = vld [vmem:[%s4850_s11 + $0x30] ss:$8 sps:$4 sm:$0xff]   ;;  %v5276_v5 = vadd.f32 %v3754_v21, %v3753_v9 }
 0x5f7   : > { %3967 = vmatpush3.bf16.msra.mxu1 %v5194_v52  ;;  %v4233_v52 = vld [vmem:[%s4850_s11 + $0x44] ss:$8 sps:$4 sm:$0xff]  }
 0x5f8   : > { %3960 = vmatprep.subr.bf16.mxu1 %v5198_v35  ;;  %v4235_v35 = vld [vmem:[%s4850_s11 + $0x40] ss:$8 sps:$4 sm:$0xff]   ;;  %v3756_v6 = vpop.f32.mrb[116].mxu0 }
 0x5f9   : > { %v3757_v34 = vpop.f32.mrb[117].mxu0 }
 0x5fa   : > { %2361 = vmatmul.mubr.bf16.gmra.mrb[100].mxu1 %v4226_v23  ;;  %v5278_v38 = vadd.f32 %v3757_v34, %v3756_v6  ;;  %v3759_v17 = vpop.f32.mrb[118].mxu0 }
 0x5fb   : > { %2368 = vmatprep.mubr.bf16.mxu1 %v4227_v27  ;;  %3968 = vmatpush3.bf16.msra.mxu1 %v5201_v32  ;;  %v4236_v32 = vld [vmem:[%s4850_s11 + $0x54] ss:$8 sps:$4 sm:$0xff]   ;;  %v3760_v39 = vpop.f32.mrb[119].mxu0 }
 0x5fc   : > { %3961 = vmatprep.subr.bf16.mxu1 %v5204_v37  ;;  %v4238_v37 = vld [vmem:[%s4850_s11 + $0x50] ss:$8 sps:$4 sm:$0xff]   ;;  %v5280_v44 = vadd.f32 %v3760_v39, %v3759_v17 }
 0x5ff   : > { %3969 = vmatpush3.bf16.msra.mxu1 %v5207_v40  ;;  %v4241_v40 = vld [vmem:[%s4850_s11 + $0x60] ss:$8 sps:$4 sm:$0xff]  }
 0x600   : > { %3962 = vmatprep.subr.bf16.mxu1 %v5210_v42  ;;  %v4242_v42 = vld [vmem:[%s4850_s11 + $0x74] ss:$8 sps:$4 sm:$0xff]   ;;  %v3762_v48 = vpop.f32.mrb[120].mxu0 }
 0x601   : > { %v3763_v54 = vpop.f32.mrb[121].mxu0 }
 0x602   : > { %2369 = vmatmul.mubr.bf16.gmra.mrb[104].mxu1 %v4229_v36  ;;  %v5282_v63 = vadd.f32 %v3763_v54, %v3762_v48  ;;  %v3765_v8 = vpop.f32.mrb[122].mxu0  ;;  %v5306_v48 = vld [vmem:[#allocation10 + $0x2] ss:$0 sm:$0xff] }
 0x603   : > { %2376 = vmatprep.mubr.bf16.mxu1 %v4230_v56  ;;  %3970 = vmatpush3.bf16.msra.mxu1 %v5217_v11  ;;  %v4255_v11 = vld [vmem:[#allocation12 + $0xe8] sm:$0xff]   ;;  %v3766_v33 = vpop.f32.mrb[123].mxu0 }
 0x604   : > { %3808 = vmatprep.subr.bf16.mxu0 %v4255_v11  ;;  %3963 = vmatprep.subr.bf16.mxu1 %v4255_v11  ;;  %v5284_v16 = vadd.f32 %v3766_v33, %v3765_v8  ;;  %v2425_v33 = vadd.f32 %v5306_v48, %v5214_v53 }
 0x605   : > { %3809 = vmatpush3.bf16.msra.mxu0 %v4256_v29 }
 0x606   : > { %3810 = vmatprep.subr.bf16.mxu0 %v4257_v24 }
 0x607   : > { %3971 = vmatpush3.bf16.msra.mxu1 %v4256_v29 }
 0x608   : > { %3964 = vmatprep.subr.bf16.mxu1 %v4257_v24  ;;  %v3768_v1 = vpop.f32.mrb[124].mxu0 }
 0x609   : > { %3811 = vmatpush3.bf16.msra.mxu0 %v4258_v49  ;;  %v3769_v19 = vpop.f32.mrb[125].mxu0 }
 0x60a   : > { %2377 = vmatmul.mubr.bf16.gmra.mrb[108].mxu1 %v4232_v10  ;;  %3812 = vmatprep.subr.bf16.mxu0 %v4259_v46  ;;  %v5286_v22 = vadd.f32 %v3769_v19, %v3768_v1  ;;  %v3771_v23 = vpop.f32.mrb[126].mxu0 }
 0x60b   : > { %2384 = vmatprep.mubr.bf16.mxu1 %v4233_v52  ;;  %3972 = vmatpush3.bf16.msra.mxu1 %v4258_v49  ;;  %v3772_v27 = vpop.f32.mrb[127].mxu0 }
 0x60c   : > { %3965 = vmatprep.subr.bf16.mxu1 %v4259_v46  ;;  %v5288_v36 = vadd.f32 %v3772_v27, %v3771_v23  ;;  %v2426_v27 = vadd.f32 %v5306_v48, %v5222_v7 }
 0x60d   : > { %3813 = vmatpush3.bf16.msra.mxu0 %v4260_v4 }
 0x60f   : > { %3973 = vmatpush3.bf16.msra.mxu1 %v4260_v4 }
 0x610   : > { %v3774_v56 = vpop.f32.mrb[128].mxu0 }
 0x611   : > { %v3775_v10 = vpop.f32.mrb[129].mxu0 }
 0x612   : > { %2385 = vmatmul.mubr.bf16.gmra.mrb[112].mxu1 %v4235_v35  ;;  %v5290_v52 = vadd.f32 %v3775_v10, %v3774_v56  ;;  %v3777_v35 = vpop.f32.mrb[130].mxu0 }
 0x613   : > { %2392 = vmatprep.mubr.bf16.mxu1 %v4236_v32  ;;  %v3778_v32 = vpop.f32.mrb[131].mxu0 }
 0x61a   : > { %2393 = vmatmul.mubr.bf16.gmra.mrb[116].mxu1 %v4238_v37  ;;  %v5292_v37 = vadd.f32 %v3778_v32, %v3777_v35 }
 0x61b   : > { %2400 = vmatprep.mubr.bf16.mxu1 %v4239_v18  ;;  %v3780_v18 = vpop.f32.mrb[132].mxu0 }
 0x622   : > { %2401 = vmatmul.mubr.bf16.gmra.mrb[120].mxu1 %v4241_v40  ;;  %v3781_v40 = vpop.f32.mrb[133].mxu0 }
 0x623   : > { %2408 = vmatprep.mubr.bf16.mxu1 %v4242_v42  ;;  %v5294_v42 = vadd.f32 %v3781_v40, %v3780_v18 }
 0x62a   : > { %2409 = vmatmul.mubr.bf16.gmra.mrb[124].mxu1 %v4244_v62  ;;  %v3783_v62 = vpop.f32.mrb[134].mxu0 }
 0x62b   : > { %v3784_v11 = vpop.f32.mrb[135].mxu0 }
 0x62c   : > { %v5296_v29 = vadd.f32 %v3784_v11, %v3783_v62  ;;  %v3786_v24 = vpop.f32.mrb[136].mxu0  ;;  %v2427_v11 = vadd.f32 %v5212_v47, %v5306_v48  ;;  %v2429_v47 = vadd.f32 %v5306_v48, %v5227_v30  ;;  %v2431_v30 = vadd.f32 %v5225_v20, %v5306_v48 }
 0x62d   : > { %v3787_v49 = vpop.f32.mrb[137].mxu0  ;;  %v2433_v20 = vadd.f32 %v5306_v48, %v5235_v28  ;;  %v2435_v28 = vadd.f32 %v5233_v59, %v5306_v48  ;;  %v2437_v59 = vadd.f32 %v5306_v48, %v5243_v15  ;;  %v2439_v15 = vadd.f32 %v5241_v2, %v5306_v48 }
 0x62e   : > { %v5298_v46 = vadd.f32 %v3787_v49, %v3786_v24  ;;  %v3789_v4 = vpop.f32.mrb[138].mxu0 }
 0x62f   : > { %v3790_v51 = vpop.f32.mrb[139].mxu0 }
 0x630   : > { %v5300_v0 = vadd.f32 %v3790_v51, %v3789_v4  ;;  %v3792_v9 = vpop.f32.mrb[140].mxu0  ;;  %v2428_v51 = vadd.f32 %v5219_v60, %v5306_v48  ;;  %v2430_v60 = vadd.f32 %v5306_v48, %v5231_v3  ;;  %v2432_v3 = vadd.f32 %v5229_v25, %v5306_v48 }
 0x631   : > { %v3793_v21 = vpop.f32.mrb[141].mxu0  ;;  %v2434_v25 = vadd.f32 %v5306_v48, %v5239_v61  ;;  %v2436_v61 = vadd.f32 %v5237_v14, %v5306_v48  ;;  %v2438_v14 = vadd.f32 %v5306_v48, %v5247_v50  ;;  %v2440_v50 = vadd.f32 %v5245_v58, %v5306_v48 }
 0x632   : > { %v5302_v6 = vadd.f32 %v3793_v21, %v3792_v9  ;;  %v3795_v34 = vpop.f32.mrb[142].mxu0 }
 0x633   : > { %v3796_v17 = vpop.f32.mrb[143].mxu0 }
 0x634   : > { %v5304_v39 = vadd.f32 %v3796_v17, %v3795_v34 }
 0x6c5   : > { %v3686_v54 = vpop.f32.mrb[96].mxu1 }
 0x6c6   : > { %v3687_v8 = vpop.f32.mrb[97].mxu1 }
 0x6c7   : > { %v3688_v1 = vadd.f32 %v3687_v8, %v3686_v54  ;;  %v3689_v19 = vpop.f32.mrb[98].mxu1 }
 0x6c8   : > { %v3690_v23 = vpop.f32.mrb[99].mxu1 }
 0x6c9   : > { %v2441_v56 = vadd.f32 %v3688_v1, %v2425_v33  ;;  %v3691_v10 = vadd.f32 %v3690_v23, %v3689_v19 }
 0x6cb   : > { %v2442_v35 = vadd.f32 %v3691_v10, %v2426_v27  ;;  %v2457_v32 = vmax.f32 %v2441_v56, 0.0 }
 0x6cd   : > { %v2458_v18 = vmax.f32 %v2442_v35, 0.0  ;;  %v3692_v40 = vpop.f32.mrb[100].mxu1 }
 0x6ce   : > { %v3693_v62 = vpop.f32.mrb[101].mxu1 }
 0x6cf   : > { %v3694_v24 = vadd.f32 %v3693_v62, %v3692_v40  ;;  %v3695_v49 = vpop.f32.mrb[102].mxu1  ;;  %v2473_v4 = vpack.c.bf16 %v2458_v18, %v2457_v32 }
 0x6d0   : > { %v3696_v53 = vpop.f32.mrb[103].mxu1 }
 0x6d1   : > { %v2443_v9 = vadd.f32 %v3694_v24, %v2427_v11  ;;  %v3697_v21 = vadd.f32 %v3696_v53, %v3695_v49  ;;  %2907 = vmatprep.mubr.bf16.mxu0 %v2473_v4 }
 0x6d2   : > { %2908 = vmatmul.mubr.bf16.vlgmr.msra.gmra.mrb[144].mxu0 %v5105_v26 }
 0x6d3   : > { %v2444_v7 = vadd.f32 %v3697_v21, %v2428_v51  ;;  %v2459_v34 = vmax.f32 %v2443_v9, 0.0 }
 0x6d5   : > { %v2460_v17 = vmax.f32 %v2444_v7, 0.0  ;;  %v3698_v54 = vpop.f32.mrb[104].mxu1 }
 0x6d6   : > { %v3699_v8 = vpop.f32.mrb[105].mxu1 }
 0x6d7   : > { %v3700_v33 = vadd.f32 %v3699_v8, %v3698_v54  ;;  %v3701_v1 = vpop.f32.mrb[106].mxu1  ;;  %v2474_v19 = vpack.c.bf16 %v2460_v17, %v2459_v34 }
 0x6d8   : > { %v3702_v23 = vpop.f32.mrb[107].mxu1 }
 0x6d9   : > { %v2445_v27 = vadd.f32 %v3700_v33, %v2429_v47  ;;  %v3703_v56 = vadd.f32 %v3702_v23, %v3701_v1  ;;  %2915 = vmatprep.mubr.bf16.mxu0 %v2474_v19 }
 0x6da   : > { %2916 = vmatmul.mubr.bf16.gmra.mrb[148].mxu0 %v5114_v57 }
 0x6db   : > { %v2446_v26 = vadd.f32 %v3703_v56, %v2430_v60  ;;  %v2461_v10 = vmax.f32 %v2445_v27, 0.0 }
 0x6dd   : > { %v2462_v35 = vmax.f32 %v2446_v26, 0.0  ;;  %v3704_v32 = vpop.f32.mrb[108].mxu1 }
 0x6de   : > { %v3705_v18 = vpop.f32.mrb[109].mxu1 }
 0x6df   : > { %v3706_v40 = vadd.f32 %v3705_v18, %v3704_v32  ;;  %v3707_v62 = vpop.f32.mrb[110].mxu1  ;;  %v2475_v11 = vpack.c.bf16 %v2462_v35, %v2461_v10 }
 0x6e0   : > { %v3708_v24 = vpop.f32.mrb[111].mxu1 }
 0x6e1   : > { %v2447_v49 = vadd.f32 %v3706_v40, %v2431_v30  ;;  %v3709_v4 = vadd.f32 %v3708_v24, %v3707_v62  ;;  %2923 = vmatprep.mubr.bf16.mxu1 %v2475_v11 }
 0x6e2   : > { %2924 = vmatmul.mubr.bf16.vlgmr.msra.gmra.mrb[128].mxu1 %v5123_v45 }
 0x6e3   : > { %v2448_v57 = vadd.f32 %v3709_v4, %v2432_v3  ;;  %v2463_v53 = vmax.f32 %v2447_v49, 0.0 }
 0x6e5   : > { %v2464_v51 = vmax.f32 %v2448_v57, 0.0  ;;  %v3710_v9 = vpop.f32.mrb[112].mxu1 }
 0x6e6   : > { %v3711_v21 = vpop.f32.mrb[113].mxu1 }
 0x6e7   : > { %v3712_v7 = vadd.f32 %v3711_v21, %v3710_v9  ;;  %v3713_v34 = vpop.f32.mrb[114].mxu1  ;;  %v2476_v17 = vpack.c.bf16 %v2464_v51, %v2463_v53 }
 0x6e8   : > { %v3714_v54 = vpop.f32.mrb[115].mxu1 }
 0x6e9   : > { %v2449_v8 = vadd.f32 %v3712_v7, %v2433_v20  ;;  %v3715_v47 = vadd.f32 %v3714_v54, %v3713_v34  ;;  %2931 = vmatprep.mubr.bf16.mxu1 %v2476_v17 }
 0x6ea   : > { %2932 = vmatmul.mubr.bf16.gmra.mrb[132].mxu1 %v5132_v31 }
 0x6eb   : > { %v2450_v45 = vadd.f32 %v3715_v47, %v2434_v25  ;;  %v2465_v33 = vmax.f32 %v2449_v8, 0.0 }
 0x6ed   : > { %v2466_v1 = vmax.f32 %v2450_v45, 0.0  ;;  %v3716_v19 = vpop.f32.mrb[116].mxu1 }
 0x6ee   : > { %v3717_v23 = vpop.f32.mrb[117].mxu1 }
 0x6ef   : > { %v3718_v60 = vadd.f32 %v3717_v23, %v3716_v19  ;;  %v3719_v27 = vpop.f32.mrb[118].mxu1  ;;  %v2477_v56 = vpack.c.bf16 %v2466_v1, %v2465_v33  ;;  %v5349_v23 = vld [vmem:[#allocation13] ss:$0 sm:$0xff] }
 0x6f0   : > { %v3720_v26 = vpop.f32.mrb[119].mxu1 }
 0x6f1   : > { %v2451_v10 = vadd.f32 %v3718_v60, %v2435_v28  ;;  %v3721_v35 = vadd.f32 %v3720_v26, %v3719_v27  ;;  %2939 = vmatprep.mubr.bf16.mxu1 %v2477_v56 }
 0x6f2   : > { %2940 = vmatmul.mubr.bf16.gmra.mrb[136].mxu1 %v5141_v41 }
 0x6f3   : > { %v2452_v31 = vadd.f32 %v3721_v35, %v2436_v61  ;;  %v2467_v32 = vmax.f32 %v2451_v10, 0.0 }
 0x6f5   : > { %v2468_v18 = vmax.f32 %v2452_v31, 0.0  ;;  %v3722_v30 = vpop.f32.mrb[120].mxu1 }
 0x6f6   : > { %v3723_v40 = vpop.f32.mrb[121].mxu1 }
 0x6f7   : > { %v3724_v62 = vadd.f32 %v3723_v40, %v3722_v30  ;;  %v3725_v11 = vpop.f32.mrb[122].mxu1  ;;  %v2478_v24 = vpack.c.bf16 %v2468_v18, %v2467_v32 }
 0x6f8   : > { %v3726_v3 = vpop.f32.mrb[123].mxu1 }
 0x6f9   : > { %v2453_v49 = vadd.f32 %v3724_v62, %v2437_v59  ;;  %v3727_v4 = vadd.f32 %v3726_v3, %v3725_v11  ;;  %2947 = vmatprep.mubr.bf16.mxu1 %v2478_v24 }
 0x6fa   : > { %2948 = vmatmul.mubr.bf16.gmra.mrb[140].mxu1 %v5150_v13 }
 0x6fb   : > { %v2454_v41 = vadd.f32 %v3727_v4, %v2438_v14  ;;  %v2469_v57 = vmax.f32 %v2453_v49, 0.0 }
 0x6fd   : > { %v2470_v53 = vmax.f32 %v2454_v41, 0.0  ;;  %v3728_v51 = vpop.f32.mrb[124].mxu1 }
 0x6fe   : > { %v3729_v9 = vpop.f32.mrb[125].mxu1 }
 0x6ff   : > { %v3730_v21 = vadd.f32 %v3729_v9, %v3728_v51  ;;  %v3731_v20 = vpop.f32.mrb[126].mxu1  ;;  %v2479_v7 = vpack.c.bf16 %v2470_v53, %v2469_v57 }
 0x700   : > { %v3732_v34 = vpop.f32.mrb[127].mxu1 }
 0x701   : > { %v2455_v17 = vadd.f32 %v3730_v21, %v2439_v15  ;;  %v3733_v54 = vadd.f32 %v3732_v34, %v3731_v20  ;;  %2955 = vmatprep.mubr.bf16.mxu1 %v2479_v7 }
 0x702   : > { %2956 = vmatmul.mubr.bf16.gmra.mrb[144].mxu1 %v5159_v43 }
 0x703   : > { %v2456_v13 = vadd.f32 %v3733_v54, %v2440_v50  ;;  %v2471_v25 = vmax.f32 %v2455_v17, 0.0 }
 0x705   : > { %v2472_v8 = vmax.f32 %v2456_v13, 0.0 }
 0x707   : > { %v2480_v47 = vpack.c.bf16 %v2472_v8, %v2471_v25 }
 0x709   : > { %2963 = vmatprep.mubr.bf16.mxu1 %v2480_v47 }
 0x70a   : > { %2964 = vmatmul.mubr.bf16.gmra.mrb[148].mxu1 %v5166_v12 }
 0x7a5   : > { %v3814_v2 = vpop.f32.mrb[144].mxu0 }
 0x7a6   : > { %v3815_v45 = vpop.f32.mrb[145].mxu0 }
 0x7a7   : > { %v3816_v33 = vadd.f32 %v3815_v45, %v3814_v2  ;;  %v3817_v1 = vpop.f32.mrb[146].mxu0 }
 0x7a8   : > { %v3818_v19 = vpop.f32.mrb[147].mxu0 }
 0x7a9   : > { %v2910_v58 = vadd.f32 %v3816_v33, %v5274_v55  ;;  %v3819_v48 = vadd.f32 %v3818_v19, %v3817_v1 }
 0x7ab   : > { %v2913_v43 = vadd.f32 %v3819_v48, %v5276_v5  ;;  %v2978_v28 = vadd.f32 %v5349_v23, %v2910_v58 }
 0x7ad   : > { %v2979_v60 = vadd.f32 %v5349_v23, %v2913_v43  ;;  %v3820_v27 = vpop.f32.mrb[148].mxu0 }
 0x7ae   : > { %v3821_v56 = vpop.f32.mrb[149].mxu0 }
 0x7af   : > { %v3450_v12 = vpack.c.bf16 %v2979_v60, %v2978_v28  ;;  %v3822_v26 = vadd.f32 %v3821_v56, %v3820_v27  ;;  %v3823_v61 = vpop.f32.mrb[150].mxu0 }
 0x7b0   : > { %v3824_v10 = vpop.f32.mrb[151].mxu0 }
 0x7b1   : > { %3451 = vst [vmem:[%s5356_s27] sm:$0xff] %v3450_v12   ;;  %v2918_v55 = vadd.f32 %v3822_v26, %v5278_v38  ;;  %v3825_v35 = vadd.f32 %v3824_v10, %v3823_v61 }
 0x7b3   : > { %v2921_v5 = vadd.f32 %v3825_v35, %v5280_v44  ;;  %v2980_v31 = vadd.f32 %v5349_v23, %v2918_v55 }
 0x7b5   : > { %v2981_v32 = vadd.f32 %v5349_v23, %v2921_v5  ;;  %v3826_v18 = vpop.f32.mrb[128].mxu1 }
 0x7b6   : > { %v3827_v30 = vpop.f32.mrb[129].mxu1 }
 0x7b7   : > { %v3455_v40 = vpack.c.bf16 %v2981_v32, %v2980_v31  ;;  %v3828_v59 = vadd.f32 %v3827_v30, %v3826_v18  ;;  %v3829_v62 = vpop.f32.mrb[130].mxu1 }
 0x7b8   : > { %v3830_v11 = vpop.f32.mrb[131].mxu1 }
 0x7b9   : > { %3487 = vst [vmem:[%s5356_s27 + $0x8] sm:$0xff] %v3455_v40   ;;  %v2926_v24 = vadd.f32 %v3828_v59, %v5282_v63  ;;  %v3831_v3 = vadd.f32 %v3830_v11, %v3829_v62 }
 0x7bb   : > { %v2929_v38 = vadd.f32 %v3831_v3, %v5284_v16  ;;  %v2982_v14 = vadd.f32 %v5349_v23, %v2926_v24 }
 0x7bd   : > { %v2983_v44 = vadd.f32 %v5349_v23, %v2929_v38  ;;  %v3832_v49 = vpop.f32.mrb[132].mxu1 }
 0x7be   : > { %v3833_v4 = vpop.f32.mrb[133].mxu1 }
 0x7bf   : > { %v3460_v41 = vpack.c.bf16 %v2983_v44, %v2982_v14  ;;  %v3834_v57 = vadd.f32 %v3833_v4, %v3832_v49  ;;  %v3835_v53 = vpop.f32.mrb[134].mxu1 }
 0x7c0   : > { %v3836_v51 = vpop.f32.mrb[135].mxu1 }
 0x7c1   : > { %3488 = vst [vmem:[%s5356_s27 + $0x10] sm:$0xff] %v3460_v41   ;;  %v2934_v9 = vadd.f32 %v3834_v57, %v5286_v22  ;;  %v3837_v15 = vadd.f32 %v3836_v51, %v3835_v53 }
 0x7c3   : > { %v2937_v63 = vadd.f32 %v3837_v15, %v5288_v36  ;;  %v2984_v21 = vadd.f32 %v5349_v23, %v2934_v9 }
 0x7c5   : > { %v2985_v16 = vadd.f32 %v5349_v23, %v2937_v63  ;;  %v3838_v20 = vpop.f32.mrb[136].mxu1 }
 0x7c6   : > { %v3839_v7 = vpop.f32.mrb[137].mxu1 }
 0x7c7   : > { %v3465_v34 = vpack.c.bf16 %v2985_v16, %v2984_v21  ;;  %v3840_v50 = vadd.f32 %v3839_v7, %v3838_v20  ;;  %v3841_v17 = vpop.f32.mrb[138].mxu1 }
 0x7c8   : > { %v3842_v54 = vpop.f32.mrb[139].mxu1 }
 0x7c9   : > { %3489 = vst [vmem:[%s5356_s27 + $0x18] sm:$0xff] %v3465_v34   ;;  %v2942_v13 = vadd.f32 %v3840_v50, %v5290_v52  ;;  %v3843_v25 = vadd.f32 %v3842_v54, %v3841_v17 }
 0x7cb   : > { %v2945_v22 = vadd.f32 %v3843_v25, %v5292_v37  ;;  %v2986_v8 = vadd.f32 %v5349_v23, %v2942_v13 }
 0x7cd   : > { %v2987_v36 = vadd.f32 %v5349_v23, %v2945_v22  ;;  %v3844_v47 = vpop.f32.mrb[140].mxu1 }
 0x7ce   : > { %v3845_v2 = vpop.f32.mrb[141].mxu1 }
 0x7cf   : > { %v3470_v45 = vpack.c.bf16 %v2987_v36, %v2986_v8  ;;  %v3846_v33 = vadd.f32 %v3845_v2, %v3844_v47  ;;  %v3847_v1 = vpop.f32.mrb[142].mxu1 }
 0x7d0   : > { %v3848_v19 = vpop.f32.mrb[143].mxu1 }
 0x7d1   : > { %3490 = vst [vmem:[%s5356_s27 + $0x20] sm:$0xff] %v3470_v45   ;;  %v2950_v58 = vadd.f32 %v3846_v33, %v5294_v42  ;;  %v3849_v48 = vadd.f32 %v3848_v19, %v3847_v1 }
 0x7d3   : > { %v2953_v52 = vadd.f32 %v3849_v48, %v5296_v29  ;;  %v2988_v43 = vadd.f32 %v5349_v23, %v2950_v58 }
 0x7d5   : > { %v2989_v37 = vadd.f32 %v5349_v23, %v2953_v52  ;;  %v3850_v28 = vpop.f32.mrb[144].mxu1 }
 0x7d6   : > { %v3851_v60 = vpop.f32.mrb[145].mxu1 }
 0x7d7   : > { %v3475_v27 = vpack.c.bf16 %v2989_v37, %v2988_v43  ;;  %v3852_v56 = vadd.f32 %v3851_v60, %v3850_v28  ;;  %v3853_v12 = vpop.f32.mrb[146].mxu1 }
 0x7d8   : > { %v3854_v26 = vpop.f32.mrb[147].mxu1 }
 0x7d9   : > { %3491 = vst [vmem:[%s5356_s27 + $0x28] sm:$0xff] %v3475_v27   ;;  %v2958_v61 = vadd.f32 %v3852_v56, %v5298_v46  ;;  %v3855_v42 = vadd.f32 %v3854_v26, %v3853_v12 }
 0x7db   : > { %v2961_v10 = vadd.f32 %v3855_v42, %v5300_v0  ;;  %v2990_v29 = vadd.f32 %v5349_v23, %v2958_v61 }
 0x7dd   : > { %v2991_v55 = vadd.f32 %v5349_v23, %v2961_v10  ;;  %v3856_v35 = vpop.f32.mrb[148].mxu1 }
 0x7de   : > { %v3857_v5 = vpop.f32.mrb[149].mxu1 }
 0x7df   : > { %v3480_v31 = vpack.c.bf16 %v2991_v55, %v2990_v29  ;;  %v3858_v32 = vadd.f32 %v3857_v5, %v3856_v35  ;;  %v3859_v18 = vpop.f32.mrb[150].mxu1 }
 0x7e0   : > { %v3860_v30 = vpop.f32.mrb[151].mxu1 }
 0x7e1   : > { %3492 = vst [vmem:[%s5356_s27 + $0x30] sm:$0xff] %v3480_v31   ;;  %v2966_v46 = vadd.f32 %v3858_v32, %v5302_v6  ;;  %v3861_v40 = vadd.f32 %v3860_v30, %v3859_v18 }
 0x7e3   : > { %v2969_v59 = vadd.f32 %v3861_v40, %v5304_v39  ;;  %v2992_v0 = vadd.f32 %v5349_v23, %v2966_v46 }
 0x7e5   : > { %v2993_v62 = vadd.f32 %v5349_v23, %v2969_v59 }
 0x7e7   : > { %v3485_v6 = vpack.c.bf16 %v2993_v62, %v2992_v0 }
 0x7e9   : > { %3493 = vst [vmem:[%s5356_s27 + $0x38] sm:$0xff] %v3485_v6  }
 0x7ea   : > { %4454 = shalt.err (!%p4451_p8)
}
 0x7eb   : > { %s4455_s13 = scalar_lea.hbm %s5398_s2, 1024  ;;  %s4459_s12 = scalar_lea.hbm %s5451_s6, 2048 }
 0x7ec   : > { %p4456_p11 = scmp.ne.s32.totalorder %s5398_s2, %s4455_s13  ;;  %p4460_p2 = scmp.lt.u32.totalorder %s5398_s2, %s5451_s6 }
 0x7ed   : > { %p4461_p1 = scmp.lt.u32.totalorder %s4459_s12, %s4455_s13  ;;  %p4463_p0 = scmp.lt.u32.totalorder %s4455_s13, %s5398_s2 }
 0x7ee   : > { %p4457_p7 = pnand %p4456_p11, %p4738_p10 }
 0x7ef   : > { %p4462_p13 = por %p4461_p1, %p4460_p2 }
 0x7f0   : > { %p4458_p12 = pneg %p4457_p7 }
 0x7f1   : > { %p4464_p4 = por %p4463_p0, %p4462_p13 }
 0x7f3   : > { %p4465_p6 = pnand %p4464_p4, %p4458_p12 }
 0x7f5   : > { %4468 = shalt.err (!%p4465_p6)
}
 0x7f6   : > { %s4541_s29 = smov 64   ;;  %s4542_s11 = smov 4  }
 0x7f7   : > { %3994 = dma.vmem_to_hbm [thread:$0]  (%p4738_p10), %s5400_s18, 1024, %s5398_s2, %s3075_s8, %s4541_s29, %s4541_s29, %s4542_s11  }
 0x7f8 PF: > { %s3103_s27 = sand.u32 1, %s4511_s21   ;;  %p5484_p3 = scmp.ne.s32.totalorder %s5462_s28, 0 }
 0x7f9   : > { %p5485_p5 = scmp.ge.s32.totalorder %s4523_s24, 2  ;;  %s3104_s7 = scalar_lea.sflag [#allocation6], %s3103_s27 }
 0x7fb   : > { %p4017_p9 = pnand %p5485_p5, %p5484_p3 }
 0x7fd   : > { %4506 = dma.done.wait (!%p4017_p9), %s3104_s7, 1024  }
 0x7fe   : > { %4508 = vsyncadd (!%p4017_p9), %s3104_s7, 4294966272  ;;  %p24_p8 = scmp.ge.s32.totalorder %s4728_s16, 4   ;;  %s5486_s21 = smov %s4515_s22 }
 0x7ff   : > { %s5487_s22 = smov %s4519_s23  ;;  %s5488_s23 = smov %s4744_s17 }
 0x800   : > { %s5489_s24 = smov %s4728_s16  ;;  %26 = sbr.rel (!%p24_p8) target bundleno = 14 (0xe), region = 122 }
 0x807   :  { %3109 = vsyncpa [#allocation5], 1 }
 0x808   :  { %3111 = vsyncpa [#allocation5 + $0x1], 1 }
 0x809   :  { %3112 = vsyncpa [#allocation8], 1 }
 0x80a   :  { %3114 = vsyncpa [#allocation8 + $0x1], 1 }
 0x80b   :  { %3115 = vsyncpa [#allocation11], 1 }
 0x80c   :  { %3116 = vsyncpa [#allocation14], 1 }
 0x80d   :  { %3117 = vsyncpa [#allocation6], 1 }
 0x80e   :  { %3119 = vsyncpa [#allocation6 + $0x1], 1 }

// kernel: graph_model_forward.5
= control target key start
LH: loop header
LB: loop body
LE: loop exit
PB: predicated region body
PF: predicated region fallthrough
CT: control target
= control target key end

     0   :  { %v4253_v0 = vmov 0   ;;  %v4254_v33 = vmov 1   ;;  %v4255_v36 = vmov 2   ;;  %s9674_s0 = inlined_call_operand.vmem [shape: s32[128,25], index: 0, kind: input, shape index: {}]   ;;  %s9675_s1 = inlined_call_operand.vmem [shape: f32[128,25], index: 1, kind: input, shape index: {}]   ;;  %s9676_s2 = inlined_call_operand.vmem [shape: f32[128,128], index: 2, kind: output, shape index: {}]  }
   0x1   :  { %4091 = vset.pattern.permute.xlu1 %v4253_v0  ;;  %4090 = vset.pattern.permute.xlu0 %v4253_v0  ;;  %v4296_v1 = vld [vmem:[%s9674_s0 + $0x10] sm:$0xff]  ;;  %v4301_v2 = vld [vmem:[%s9674_s0] sm:$0xff]  ;;  %v4308_v3 = vld [vmem:[%s9674_s0 + $0x18] sm:$0xff] }
   0x2   :  { %36 = vperm.xlu1 %4091, %v4296_v1   ;;  %30 = vperm.xlu0 %4090, %v4301_v2   ;;  %v4313_v4 = vld [vmem:[%s9674_s0 + $0x8] sm:$0xff]  ;;  %v4325_v6 = vld [vmem:[%s9674_s0 + $0x20] sm:$0xff]  ;;  %v4332_v7 = vld [vmem:[%s9674_s0 + $0x38] sm:$0xff] }
   0x3   :  { %v4320_v5 = vld [vmem:[%s9674_s0 + $0x28] sm:$0xff]  ;;  %v4337_v8 = vld [vmem:[%s9674_s0 + $0x30] sm:$0xff]  ;;  %v4349_v10 = vld [vmem:[%s9674_s0 + $0x40] sm:$0xff] }
   0x4   :  { %v4344_v9 = vld [vmem:[%s9674_s0 + $0x48] sm:$0xff]  ;;  %v4356_v11 = vld [vmem:[%s9674_s0 + $0x58] sm:$0xff]  ;;  %v4361_v12 = vld [vmem:[%s9674_s0 + $0x50] sm:$0xff] }
   0x5   :  { %v4368_v13 = vld [vmem:[%s9674_s0 + $0x68] sm:$0xff]  ;;  %v4373_v14 = vld [vmem:[%s9674_s0 + $0x60] sm:$0xff]  ;;  %v4380_v15 = vld [vmem:[%s9674_s0 + $0x78] sm:$0xff] }
   0x6   :  { %39 = vperm.xlu1 %4091, %v4308_v3   ;;  %33 = vperm.xlu0 %4090, %v4313_v4   ;;  %v4385_v16 = vld [vmem:[%s9674_s0 + $0x70] sm:$0xff]  ;;  %v4392_v17 = vld [vmem:[%s9675_s1 + $0x8] sm:$0xff]  ;;  %v4397_v18 = vld [vmem:[%s9675_s1] sm:$0xff] }
   0x7   :  { %v4404_v19 = vld [vmem:[%s9675_s1 + $0x18] sm:$0xff]  ;;  %v4409_v20 = vld [vmem:[%s9675_s1 + $0x10] sm:$0xff]  ;;  %v4416_v21 = vld [vmem:[%s9675_s1 + $0x28] sm:$0xff] }
   0x8   :  { %v4421_v22 = vld [vmem:[%s9675_s1 + $0x20] sm:$0xff]  ;;  %v4428_v23 = vld [vmem:[%s9675_s1 + $0x38] sm:$0xff]  ;;  %v4433_v24 = vld [vmem:[%s9675_s1 + $0x30] sm:$0xff] }
   0x9   :  { %v4440_v25 = vld [vmem:[%s9675_s1 + $0x48] sm:$0xff]  ;;  %v4445_v26 = vld [vmem:[%s9675_s1 + $0x40] sm:$0xff]  ;;  %v4452_v27 = vld [vmem:[%s9675_s1 + $0x58] sm:$0xff] }
   0xa   :  { %45 = vperm.xlu1 %4091, %v4320_v5   ;;  %42 = vperm.xlu0 %4090, %v4325_v6   ;;  %v4457_v28 = vld [vmem:[%s9675_s1 + $0x50] sm:$0xff]  ;;  %v4464_v29 = vld [vmem:[%s9675_s1 + $0x68] sm:$0xff]  ;;  %v4469_v30 = vld [vmem:[%s9675_s1 + $0x60] sm:$0xff] }
   0xb   :  { %v4476_v31 = vld [vmem:[%s9675_s1 + $0x78] sm:$0xff]  ;;  %v4481_v32 = vld [vmem:[%s9675_s1 + $0x70] sm:$0xff] }
   0xe   :  { %51 = vperm.xlu1 %4091, %v4332_v7   ;;  %48 = vperm.xlu0 %4090, %v4337_v8  }
  0x12   :  { %57 = vperm.xlu1 %4091, %v4344_v9   ;;  %54 = vperm.xlu0 %4090, %v4349_v10  }
  0x16   :  { %63 = vperm.xlu1 %4091, %v4356_v11   ;;  %60 = vperm.xlu0 %4090, %v4361_v12  }
  0x1a   :  { %69 = vperm.xlu1 %4091, %v4368_v13   ;;  %66 = vperm.xlu0 %4090, %v4373_v14  }
  0x1e   :  { %75 = vperm.xlu1 %4091, %v4380_v15   ;;  %72 = vperm.xlu0 %4090, %v4385_v16  }
  0x22   :  { %116 = vperm.xlu1 %4091, %v4392_v17   ;;  %111 = vperm.xlu0 %4090, %v4397_v18  }
  0x26   :  { %126 = vperm.xlu1 %4091, %v4404_v19   ;;  %121 = vperm.xlu0 %4090, %v4409_v20  }
  0x2a   :  { %136 = vperm.xlu1 %4091, %v4416_v21   ;;  %131 = vperm.xlu0 %4090, %v4421_v22  }
  0x2e   :  { %146 = vperm.xlu1 %4091, %v4428_v23   ;;  %141 = vperm.xlu0 %4090, %v4433_v24  }
  0x32   :  { %156 = vperm.xlu1 %4091, %v4440_v25   ;;  %151 = vperm.xlu0 %4090, %v4445_v26  }
  0x36   :  { %166 = vperm.xlu1 %4091, %v4452_v27   ;;  %161 = vperm.xlu0 %4090, %v4457_v28  }
  0x3a   :  { %176 = vperm.xlu1 %4091, %v4464_v29   ;;  %171 = vperm.xlu0 %4090, %v4469_v30  }
  0x3e   :  { %186 = vperm.xlu1 %4091, %v4476_v31   ;;  %181 = vperm.xlu0 %4090, %v4481_v32  }
  0x42   :  { %4093 = vset.pattern.permute.xlu1 %v4254_v33  ;;  %4092 = vset.pattern.permute.xlu0 %v4254_v33 }
  0x43   :  { %209 = vperm.xlu1 %4093, %v4313_v4   ;;  %206 = vperm.xlu0 %4092, %v4301_v2  }
  0x47   :  { %212 = vperm.xlu1 %4093, %v4296_v1   ;;  %215 = vperm.xlu0 %4092, %v4308_v3  }
  0x4b   :  { %218 = vperm.xlu1 %4093, %v4325_v6   ;;  %221 = vperm.xlu0 %4092, %v4320_v5  }
  0x4f   :  { %224 = vperm.xlu1 %4093, %v4337_v8   ;;  %227 = vperm.xlu0 %4092, %v4332_v7  }
  0x53   :  { %230 = vperm.xlu1 %4093, %v4349_v10   ;;  %233 = vperm.xlu0 %4092, %v4344_v9  }
  0x57   :  { %236 = vperm.xlu1 %4093, %v4361_v12   ;;  %239 = vperm.xlu0 %4092, %v4356_v11  }
  0x5b   :  { %242 = vperm.xlu1 %4093, %v4373_v14   ;;  %245 = vperm.xlu0 %4092, %v4368_v13  }
  0x5f   :  { %248 = vperm.xlu1 %4093, %v4385_v16   ;;  %251 = vperm.xlu0 %4092, %v4380_v15  }
  0x63   :  { %270 = vperm.xlu1 %4093, %v4397_v18   ;;  %274 = vperm.xlu0 %4092, %v4392_v17  }
  0x67   :  { %278 = vperm.xlu1 %4093, %v4409_v20   ;;  %282 = vperm.xlu0 %4092, %v4404_v19  }
  0x6b   :  { %286 = vperm.xlu1 %4093, %v4421_v22   ;;  %290 = vperm.xlu0 %4092, %v4416_v21  }
  0x6f   :  { %294 = vperm.xlu1 %4093, %v4433_v24   ;;  %298 = vperm.xlu0 %4092, %v4428_v23  }
  0x73   :  { %302 = vperm.xlu1 %4093, %v4445_v26   ;;  %306 = vperm.xlu0 %4092, %v4440_v25  }
  0x77   :  { %310 = vperm.xlu1 %4093, %v4457_v28   ;;  %314 = vperm.xlu0 %4092, %v4452_v27  }
  0x7b   :  { %318 = vperm.xlu1 %4093, %v4469_v30   ;;  %322 = vperm.xlu0 %4092, %v4464_v29  }
  0x7f   :  { %326 = vperm.xlu1 %4093, %v4481_v32   ;;  %330 = vperm.xlu0 %4092, %v4476_v31  }
  0x81   :  { %v4517_v34 = vpop.permute.xlu1 %36  ;;  %v4519_v35 = vpop.permute.xlu0 %30 }
  0x83   :  { %4094 = vset.pattern.permute.xlu1 %v4255_v36  ;;  %4095 = vset.pattern.permute.xlu0 %v4255_v36 }
  0x84   :  { %366 = vperm.xlu1 %4094, %v4301_v2   ;;  %369 = vperm.xlu0 %4095, %v4313_v4  }
  0x85   :  { %v4523_v37 = vpop.permute.xlu1 %39  ;;  %v4525_v38 = vpop.permute.xlu0 %33 }
  0x88   :  { %372 = vperm.xlu1 %4094, %v4296_v1   ;;  %378 = vperm.xlu0 %4095, %v4325_v6  }
  0x89   :  { %v4529_v39 = vpop.permute.xlu1 %45  ;;  %v4531_v40 = vpop.permute.xlu0 %42 }
  0x8c   :  { %375 = vperm.xlu1 %4094, %v4308_v3   ;;  %384 = vperm.xlu0 %4095, %v4337_v8  }
  0x8d   :  { %v4535_v41 = vpop.permute.xlu1 %51  ;;  %v4537_v42 = vpop.permute.xlu0 %48 }
  0x90   :  { %381 = vperm.xlu1 %4094, %v4320_v5   ;;  %390 = vperm.xlu0 %4095, %v4349_v10  }
  0x91   :  { %v4541_v43 = vpop.permute.xlu1 %57  ;;  %v4543_v44 = vpop.permute.xlu0 %54 }
  0x94   :  { %387 = vperm.xlu1 %4094, %v4332_v7   ;;  %396 = vperm.xlu0 %4095, %v4361_v12  }
  0x95   :  { %v4547_v45 = vpop.permute.xlu1 %63  ;;  %v4549_v46 = vpop.permute.xlu0 %60 }
  0x98   :  { %393 = vperm.xlu1 %4094, %v4344_v9   ;;  %402 = vperm.xlu0 %4095, %v4373_v14  }
  0x99   :  { %v4553_v47 = vpop.permute.xlu1 %69  ;;  %v4555_v48 = vpop.permute.xlu0 %66 }
  0x9c   :  { %399 = vperm.xlu1 %4094, %v4356_v11   ;;  %408 = vperm.xlu0 %4095, %v4385_v16  }
  0x9d   :  { %v4559_v49 = vpop.permute.xlu1 %75  ;;  %v4561_v50 = vpop.permute.xlu0 %72 }
  0xa0   :  { %405 = vperm.xlu1 %4094, %v4368_v13   ;;  %430 = vperm.xlu0 %4095, %v4397_v18  }
  0xa1   :  { %v4565_v51 = vpop.permute.xlu1 %116  ;;  %v4567_v52 = vpop.permute.xlu0 %111 }
  0xa4   :  { %411 = vperm.xlu1 %4094, %v4380_v15   ;;  %438 = vperm.xlu0 %4095, %v4409_v20  }
  0xa5   :  { %v4571_v53 = vpop.permute.xlu1 %126  ;;  %v4573_v54 = vpop.permute.xlu0 %121 }
  0xa8   :  { %434 = vperm.xlu1 %4094, %v4392_v17   ;;  %446 = vperm.xlu0 %4095, %v4421_v22  }
  0xa9   :  { %v4577_v55 = vpop.permute.xlu1 %136  ;;  %v4579_v56 = vpop.permute.xlu0 %131 }
  0xac   :  { %442 = vperm.xlu1 %4094, %v4404_v19   ;;  %454 = vperm.xlu0 %4095, %v4433_v24  }
  0xad   :  { %v4583_v57 = vpop.permute.xlu1 %146  ;;  %v4585_v58 = vpop.permute.xlu0 %141 }
  0xb0   :  { %450 = vperm.xlu1 %4094, %v4416_v21   ;;  %462 = vperm.xlu0 %4095, %v4445_v26  }
  0xb1   :  { %v4589_v59 = vpop.permute.xlu1 %156  ;;  %v4591_v60 = vpop.permute.xlu0 %151 }
  0xb2   :  { %9927 = vst [vmem:[#allocation2_spill] sm:$0xff] %v4591_v60 }
  0xb4   :  { %458 = vperm.xlu1 %4094, %v4428_v23   ;;  %470 = vperm.xlu0 %4095, %v4457_v28  }
  0xb5   :  { %v4595_v61 = vpop.permute.xlu1 %166  ;;  %v4597_v62 = vpop.permute.xlu0 %161 }
  0xb6   :  { %9928 = vst [vmem:[#allocation3_spill] sm:$0xff] %v4595_v61  ;;  %9929 = vst [vmem:[#allocation4_spill] sm:$0xff] %v4597_v62  ;;  %v4256_v61 = vmov 3  }
  0xb8   :  { %466 = vperm.xlu1 %4094, %v4440_v25   ;;  %478 = vperm.xlu0 %4095, %v4469_v30  }
  0xb9   :  { %v4601_v63 = vpop.permute.xlu1 %176  ;;  %v4603_v0 = vpop.permute.xlu0 %171 }
  0xba   :  { %9930 = vst [vmem:[#allocation5_spill] sm:$0xff] %v4601_v63  ;;  %9931 = vst [vmem:[#allocation6_spill] sm:$0xff] %v4603_v0 }
  0xbc   :  { %474 = vperm.xlu1 %4094, %v4452_v27   ;;  %486 = vperm.xlu0 %4095, %v4481_v32  }
  0xbd   :  { %v4607_v33 = vpop.permute.xlu1 %186  ;;  %v4609_v36 = vpop.permute.xlu0 %181 }
  0xbe   :  { %9932 = vst [vmem:[#allocation7_spill] sm:$0xff] %v4607_v33  ;;  %9933 = vst [vmem:[#allocation8_spill] sm:$0xff] %v4609_v36 }
  0xc0   :  { %482 = vperm.xlu1 %4094, %v4464_v29   ;;  %4096 = vset.pattern.permute.xlu0 %v4256_v61 }
  0xc1   :  { %526 = vperm.xlu0 %4096, %v4301_v2  }
  0xc2   :  { %v4613_v62 = vpop.permute.xlu1 %209  ;;  %v4615_v60 = vpop.permute.xlu0 %206 }
  0xc3   :  { %9934 = vst [vmem:[#allocation9_spill] sm:$0xff] %v4613_v62  ;;  %9935 = vst [vmem:[#allocation10_spill] sm:$0xff] %v4615_v60 }
  0xc4   :  { %490 = vperm.xlu1 %4094, %v4476_v31  }
  0xc5   :  { %535 = vperm.xlu0 %4096, %v4308_v3  }
  0xc6   :  { %v4619_v0 = vpop.permute.xlu1 %212  ;;  %v4621_v63 = vpop.permute.xlu0 %215 }
  0xc7   :  { %9936 = vst [vmem:[#allocation11_spill] sm:$0xff] %v4619_v0  ;;  %9937 = vst [vmem:[#allocation12_spill] sm:$0xff] %v4621_v63 }
  0xc8   :  { %4097 = vset.pattern.permute.xlu1 %v4256_v61 }
  0xc9   :  { %529 = vperm.xlu1 %4097, %v4313_v4   ;;  %541 = vperm.xlu0 %4096, %v4320_v5  }
  0xca   :  { %v4625_v36 = vpop.permute.xlu1 %218  ;;  %v4627_v33 = vpop.permute.xlu0 %221 }
  0xcb   :  { %9938 = vst [vmem:[#allocation13_spill] sm:$0xff] %v4625_v36  ;;  %9939 = vst [vmem:[#allocation14_spill] sm:$0xff] %v4627_v33 }
  0xcd   :  { %532 = vperm.xlu1 %4097, %v4296_v1   ;;  %547 = vperm.xlu0 %4096, %v4332_v7  }
  0xce   :  { %v4631_v62 = vpop.permute.xlu1 %224  ;;  %v4633_v60 = vpop.permute.xlu0 %227 }
  0xcf   :  { %9940 = vst [vmem:[#allocation15_spill] sm:$0xff] %v4631_v62  ;;  %9941 = vst [vmem:[#allocation16_spill] sm:$0xff] %v4633_v60 }
  0xd1   :  { %538 = vperm.xlu1 %4097, %v4325_v6   ;;  %553 = vperm.xlu0 %4096, %v4344_v9  }
  0xd2   :  { %v4637_v61 = vpop.permute.xlu1 %230  ;;  %v4639_v0 = vpop.permute.xlu0 %233 }
  0xd3   :  { %9942 = vst [vmem:[#allocation17_spill] sm:$0xff] %v4637_v61  ;;  %9943 = vst [vmem:[#allocation18_spill] sm:$0xff] %v4639_v0 }
  0xd5   :  { %544 = vperm.xlu1 %4097, %v4337_v8   ;;  %559 = vperm.xlu0 %4096, %v4356_v11  }
  0xd6   :  { %v4643_v33 = vpop.permute.xlu1 %236  ;;  %v4645_v36 = vpop.permute.xlu0 %239 }
  0xd7   :  { %9944 = vst [vmem:[#allocation19_spill] sm:$0xff] %v4643_v33  ;;  %9945 = vst [vmem:[#allocation20_spill] sm:$0xff] %v4645_v36 }
  0xd9   :  { %550 = vperm.xlu1 %4097, %v4349_v10   ;;  %565 = vperm.xlu0 %4096, %v4368_v13  }
  0xda   :  { %v4649_v60 = vpop.permute.xlu1 %242  ;;  %v4651_v62 = vpop.permute.xlu0 %245 }
  0xdb   :  { %9946 = vst [vmem:[#allocation21_spill] sm:$0xff] %v4649_v60  ;;  %9947 = vst [vmem:[#allocation22_spill] sm:$0xff] %v4651_v62 }
  0xdd   :  { %556 = vperm.xlu1 %4097, %v4361_v12   ;;  %571 = vperm.xlu0 %4096, %v4380_v15  }
  0xde   :  { %v4655_v0 = vpop.permute.xlu1 %248  ;;  %v4657_v61 = vpop.permute.xlu0 %251 }
  0xdf   :  { %9948 = vst [vmem:[#allocation23_spill] sm:$0xff] %v4655_v0  ;;  %9949 = vst [vmem:[#allocation24_spill] sm:$0xff] %v4657_v61 }
  0xe1   :  { %562 = vperm.xlu1 %4097, %v4373_v14   ;;  %594 = vperm.xlu0 %4096, %v4392_v17  }
  0xe2   :  { %v4661_v36 = vpop.permute.xlu1 %270  ;;  %v4663_v33 = vpop.permute.xlu0 %274 }
  0xe3   :  { %9950 = vst [vmem:[#allocation25_spill] sm:$0xff] %v4661_v36  ;;  %9951 = vst [vmem:[#allocation26_spill] sm:$0xff] %v4663_v33 }
  0xe5   :  { %568 = vperm.xlu1 %4097, %v4385_v16   ;;  %602 = vperm.xlu0 %4096, %v4404_v19  }
  0xe6   :  { %v4667_v62 = vpop.permute.xlu1 %278  ;;  %v4669_v60 = vpop.permute.xlu0 %282 }
  0xe7   :  { %9952 = vst [vmem:[#allocation27_spill] sm:$0xff] %v4667_v62  ;;  %9953 = vst [vmem:[#allocation28_spill] sm:$0xff] %v4669_v60 }
  0xe9   :  { %590 = vperm.xlu1 %4097, %v4397_v18   ;;  %610 = vperm.xlu0 %4096, %v4416_v21  }
  0xea   :  { %v4673_v61 = vpop.permute.xlu1 %286  ;;  %v4675_v0 = vpop.permute.xlu0 %290 }
  0xeb   :  { %9954 = vst [vmem:[#allocation29_spill] sm:$0xff] %v4673_v61  ;;  %9955 = vst [vmem:[#allocation30_spill] sm:$0xff] %v4675_v0 }
  0xed   :  { %598 = vperm.xlu1 %4097, %v4409_v20   ;;  %618 = vperm.xlu0 %4096, %v4428_v23  }
  0xee   :  { %v4679_v33 = vpop.permute.xlu1 %294  ;;  %v4681_v36 = vpop.permute.xlu0 %298 }
  0xef   :  { %9956 = vst [vmem:[#allocation31_spill] sm:$0xff] %v4679_v33  ;;  %9957 = vst [vmem:[#allocation32_spill] sm:$0xff] %v4681_v36 }
  0xf1   :  { %606 = vperm.xlu1 %4097, %v4421_v22   ;;  %626 = vperm.xlu0 %4096, %v4440_v25  }
  0xf2   :  { %v4685_v60 = vpop.permute.xlu1 %302  ;;  %v4687_v62 = vpop.permute.xlu0 %306 }
  0xf3   :  { %9958 = vst [vmem:[#allocation33_spill] sm:$0xff] %v4685_v60  ;;  %9959 = vst [vmem:[#allocation34_spill] sm:$0xff] %v4687_v62 }
  0xf5   :  { %614 = vperm.xlu1 %4097, %v4433_v24   ;;  %634 = vperm.xlu0 %4096, %v4452_v27  }
  0xf6   :  { %v4691_v0 = vpop.permute.xlu1 %310  ;;  %v4693_v61 = vpop.permute.xlu0 %314 }
  0xf7   :  { %9960 = vst [vmem:[#allocation35_spill] sm:$0xff] %v4691_v0  ;;  %9961 = vst [vmem:[#allocation36_spill] sm:$0xff] %v4693_v61  ;;  %v4257_v0 = vmov 4  }
  0xf9   :  { %622 = vperm.xlu1 %4097, %v4445_v26   ;;  %642 = vperm.xlu0 %4096, %v4464_v29  }
  0xfa   :  { %v4697_v36 = vpop.permute.xlu1 %318  ;;  %v4699_v33 = vpop.permute.xlu0 %322 }
  0xfb   :  { %9962 = vst [vmem:[#allocation37_spill] sm:$0xff] %v4697_v36  ;;  %9963 = vst [vmem:[#allocation38_spill] sm:$0xff] %v4699_v33 }
  0xfd   :  { %630 = vperm.xlu1 %4097, %v4457_v28   ;;  %650 = vperm.xlu0 %4096, %v4476_v31  }
  0xfe   :  { %v4703_v62 = vpop.permute.xlu1 %326  ;;  %v4705_v60 = vpop.permute.xlu0 %330 }
  0xff   :  { %9964 = vst [vmem:[#allocation39_spill] sm:$0xff] %v4703_v62  ;;  %9965 = vst [vmem:[#allocation40_spill] sm:$0xff] %v4705_v60 }
 0x101   :  { %638 = vperm.xlu1 %4097, %v4469_v30   ;;  %4099 = vset.pattern.permute.xlu0 %v4257_v0 }
 0x102   :  { %689 = vperm.xlu0 %4099, %v4313_v4  }
 0x103   :  { %v4709_v61 = vpop.permute.xlu1 %366  ;;  %v4711_v63 = vpop.permute.xlu0 %369 }
 0x104   :  { %9966 = vst [vmem:[#allocation41_spill] sm:$0xff] %v4709_v61  ;;  %9967 = vst [vmem:[#allocation42_spill] sm:$0xff] %v4711_v63 }
 0x105   :  { %646 = vperm.xlu1 %4097, %v4481_v32  }
 0x106   :  { %698 = vperm.xlu0 %4099, %v4325_v6  }
 0x107   :  { %v4715_v33 = vpop.permute.xlu1 %372  ;;  %v4717_v36 = vpop.permute.xlu0 %378 }
 0x108   :  { %9968 = vst [vmem:[#allocation43_spill] sm:$0xff] %v4715_v33  ;;  %9969 = vst [vmem:[#allocation44_spill] sm:$0xff] %v4717_v36 }
 0x109   :  { %4098 = vset.pattern.permute.xlu1 %v4257_v0 }
 0x10a   :  { %686 = vperm.xlu1 %4098, %v4301_v2   ;;  %704 = vperm.xlu0 %4099, %v4337_v8  }
 0x10b   :  { %v4721_v60 = vpop.permute.xlu1 %375  ;;  %v4723_v62 = vpop.permute.xlu0 %384 }
 0x10c   :  { %9970 = vst [vmem:[#allocation45_spill] sm:$0xff] %v4721_v60  ;;  %9971 = vst [vmem:[#allocation46_spill] sm:$0xff] %v4723_v62 }
 0x10e   :  { %692 = vperm.xlu1 %4098, %v4296_v1   ;;  %710 = vperm.xlu0 %4099, %v4349_v10  }
 0x10f   :  { %v4727_v61 = vpop.permute.xlu1 %381  ;;  %v4729_v63 = vpop.permute.xlu0 %390 }
 0x110   :  { %9972 = vst [vmem:[#allocation47_spill] sm:$0xff] %v4727_v61  ;;  %9973 = vst [vmem:[#allocation48_spill] sm:$0xff] %v4729_v63 }
 0x112   :  { %695 = vperm.xlu1 %4098, %v4308_v3   ;;  %716 = vperm.xlu0 %4099, %v4361_v12  }
 0x113   :  { %v4733_v0 = vpop.permute.xlu1 %387  ;;  %v4735_v33 = vpop.permute.xlu0 %396 }
 0x114   :  { %9974 = vst [vmem:[#allocation49_spill] sm:$0xff] %v4733_v0  ;;  %9975 = vst [vmem:[#allocation50_spill] sm:$0xff] %v4735_v33 }
 0x116   :  { %701 = vperm.xlu1 %4098, %v4320_v5   ;;  %722 = vperm.xlu0 %4099, %v4373_v14  }
 0x117   :  { %v4739_v62 = vpop.permute.xlu1 %393  ;;  %v4741_v60 = vpop.permute.xlu0 %402 }
 0x118   :  { %9976 = vst [vmem:[#allocation51_spill] sm:$0xff] %v4739_v62  ;;  %9977 = vst [vmem:[#allocation52_spill] sm:$0xff] %v4741_v60 }
 0x11a   :  { %707 = vperm.xlu1 %4098, %v4332_v7   ;;  %728 = vperm.xlu0 %4099, %v4385_v16  }
 0x11b   :  { %v4745_v63 = vpop.permute.xlu1 %399  ;;  %v4747_v61 = vpop.permute.xlu0 %408 }
 0x11c   :  { %9978 = vst [vmem:[#allocation53_spill] sm:$0xff] %v4745_v63  ;;  %9979 = vst [vmem:[#allocation54_spill] sm:$0xff] %v4747_v61 }
 0x11e   :  { %713 = vperm.xlu1 %4098, %v4344_v9   ;;  %750 = vperm.xlu0 %4099, %v4397_v18  }
 0x11f   :  { %v4751_v33 = vpop.permute.xlu1 %405  ;;  %v4753_v0 = vpop.permute.xlu0 %430 }
 0x120   :  { %9980 = vst [vmem:[#allocation55_spill] sm:$0xff] %v4751_v33  ;;  %9981 = vst [vmem:[#allocation56_spill] sm:$0xff] %v4753_v0 }
 0x122   :  { %719 = vperm.xlu1 %4098, %v4356_v11   ;;  %758 = vperm.xlu0 %4099, %v4409_v20  }
 0x123   :  { %v4757_v60 = vpop.permute.xlu1 %411  ;;  %v4759_v62 = vpop.permute.xlu0 %438 }
 0x124   :  { %9982 = vst [vmem:[#allocation57_spill] sm:$0xff] %v4757_v60  ;;  %9983 = vst [vmem:[#allocation58_spill] sm:$0xff] %v4759_v62 }
 0x126   :  { %725 = vperm.xlu1 %4098, %v4368_v13   ;;  %766 = vperm.xlu0 %4099, %v4421_v22  }
 0x127   :  { %v4763_v61 = vpop.permute.xlu1 %434  ;;  %v4765_v63 = vpop.permute.xlu0 %446 }
 0x128   :  { %9984 = vst [vmem:[#allocation59_spill] sm:$0xff] %v4763_v61  ;;  %9985 = vst [vmem:[#allocation60_spill] sm:$0xff] %v4765_v63 }
 0x12a   :  { %731 = vperm.xlu1 %4098, %v4380_v15   ;;  %774 = vperm.xlu0 %4099, %v4433_v24  }
 0x12b   :  { %v4769_v33 = vpop.permute.xlu1 %442  ;;  %v4771_v0 = vpop.permute.xlu0 %454 }
 0x12c   :  { %9986 = vst [vmem:[#allocation61_spill] sm:$0xff] %v4769_v33  ;;  %9987 = vst [vmem:[#allocation62_spill] sm:$0xff] %v4771_v0 }
 0x12e   :  { %754 = vperm.xlu1 %4098, %v4392_v17   ;;  %782 = vperm.xlu0 %4099, %v4445_v26  }
 0x12f   :  { %v4775_v60 = vpop.permute.xlu1 %450  ;;  %v4777_v62 = vpop.permute.xlu0 %462 }
 0x130   :  { %9988 = vst [vmem:[#allocation63_spill] sm:$0xff] %v4775_v60  ;;  %9989 = vst [vmem:[#allocation64_spill] sm:$0xff] %v4777_v62 }
 0x132   :  { %762 = vperm.xlu1 %4098, %v4404_v19   ;;  %790 = vperm.xlu0 %4099, %v4457_v28  }
 0x133   :  { %v4781_v63 = vpop.permute.xlu1 %458  ;;  %v4783_v61 = vpop.permute.xlu0 %470 }
 0x134   :  { %9990 = vst [vmem:[#allocation65_spill] sm:$0xff] %v4781_v63  ;;  %9991 = vst [vmem:[#allocation66_spill] sm:$0xff] %v4783_v61  ;;  %v4258_v63 = vmov 5  }
 0x136   :  { %770 = vperm.xlu1 %4098, %v4416_v21   ;;  %798 = vperm.xlu0 %4099, %v4469_v30  }
 0x137   :  { %v4787_v0 = vpop.permute.xlu1 %466  ;;  %v4789_v33 = vpop.permute.xlu0 %478 }
 0x138   :  { %9992 = vst [vmem:[#allocation67_spill] sm:$0xff] %v4787_v0  ;;  %9993 = vst [vmem:[#allocation68_spill] sm:$0xff] %v4789_v33 }
 0x13a   :  { %778 = vperm.xlu1 %4098, %v4428_v23   ;;  %806 = vperm.xlu0 %4099, %v4481_v32  }
 0x13b   :  { %v4793_v62 = vpop.permute.xlu1 %474  ;;  %v4795_v60 = vpop.permute.xlu0 %486 }
 0x13c   :  { %9994 = vst [vmem:[#allocation69_spill] sm:$0xff] %v4793_v62  ;;  %9995 = vst [vmem:[#allocation70_spill] sm:$0xff] %v4795_v60 }
 0x13e   :  { %786 = vperm.xlu1 %4098, %v4440_v25   ;;  %4100 = vset.pattern.permute.xlu0 %v4258_v63 }
 0x13f   :  { %v4798_v61 = vpop.permute.xlu1 %482  ;;  %846 = vperm.xlu0 %4100, %v4301_v2  }
 0x140   :  { %9996 = vst [vmem:[#allocation71_spill] sm:$0xff] %v4798_v61  ;;  %v4801_v36 = vpop.permute.xlu0 %526 }
 0x141   :  { %9997 = vst [vmem:[#allocation72_spill] sm:$0xff] %v4801_v36 }
 0x142   :  { %794 = vperm.xlu1 %4098, %v4452_v27  }
 0x143   :  { %v4804_v33 = vpop.permute.xlu1 %490  ;;  %855 = vperm.xlu0 %4100, %v4308_v3  }
 0x144   :  { %9998 = vst [vmem:[#allocation73_spill] sm:$0xff] %v4804_v33  ;;  %v4807_v0 = vpop.permute.xlu0 %535 }
 0x145   :  { %9999 = vst [vmem:[#allocation74_spill] sm:$0xff] %v4807_v0 }
 0x146   :  { %802 = vperm.xlu1 %4098, %v4464_v29  }
 0x147   :  { %861 = vperm.xlu0 %4100, %v4320_v5  }
 0x148   :  { %v4811_v60 = vpop.permute.xlu1 %529  ;;  %v4813_v62 = vpop.permute.xlu0 %541 }
 0x149   :  { %10000 = vst [vmem:[#allocation75_spill] sm:$0xff] %v4811_v60  ;;  %10001 = vst [vmem:[#allocation76_spill] sm:$0xff] %v4813_v62 }
 0x14a   :  { %810 = vperm.xlu1 %4098, %v4476_v31  }
 0x14b   :  { %867 = vperm.xlu0 %4100, %v4332_v7  }
 0x14c   :  { %v4817_v36 = vpop.permute.xlu1 %532  ;;  %v4819_v61 = vpop.permute.xlu0 %547 }
 0x14d   :  { %10002 = vst [vmem:[#allocation77_spill] sm:$0xff] %v4817_v36  ;;  %10003 = vst [vmem:[#allocation78_spill] sm:$0xff] %v4819_v61 }
 0x14e   :  { %4101 = vset.pattern.permute.xlu1 %v4258_v63 }
 0x14f   :  { %849 = vperm.xlu1 %4101, %v4313_v4   ;;  %873 = vperm.xlu0 %4100, %v4344_v9  }
 0x150   :  { %v4823_v0 = vpop.permute.xlu1 %538  ;;  %v4825_v33 = vpop.permute.xlu0 %553 }
 0x151   :  { %10004 = vst [vmem:[#allocation79_spill] sm:$0xff] %v4823_v0  ;;  %10005 = vst [vmem:[#allocation80_spill] sm:$0xff] %v4825_v33 }
 0x153   :  { %852 = vperm.xlu1 %4101, %v4296_v1   ;;  %879 = vperm.xlu0 %4100, %v4356_v11  }
 0x154   :  { %v4829_v62 = vpop.permute.xlu1 %544  ;;  %v4831_v60 = vpop.permute.xlu0 %559 }
 0x155   :  { %10006 = vst [vmem:[#allocation81_spill] sm:$0xff] %v4829_v62  ;;  %10007 = vst [vmem:[#allocation82_spill] sm:$0xff] %v4831_v60 }
 0x157   :  { %858 = vperm.xlu1 %4101, %v4325_v6   ;;  %885 = vperm.xlu0 %4100, %v4368_v13  }
 0x158   :  { %v4835_v63 = vpop.permute.xlu1 %550  ;;  %v4837_v61 = vpop.permute.xlu0 %565 }
 0x159   :  { %10008 = vst [vmem:[#allocation83_spill] sm:$0xff] %v4835_v63  ;;  %10009 = vst [vmem:[#allocation84_spill] sm:$0xff] %v4837_v61 }
 0x15b   :  { %864 = vperm.xlu1 %4101, %v4337_v8   ;;  %891 = vperm.xlu0 %4100, %v4380_v15  }
 0x15c   :  { %v4841_v33 = vpop.permute.xlu1 %556  ;;  %v4843_v0 = vpop.permute.xlu0 %571 }
 0x15d   :  { %10010 = vst [vmem:[#allocation85_spill] sm:$0xff] %v4841_v33  ;;  %10011 = vst [vmem:[#allocation86_spill] sm:$0xff] %v4843_v0 }
 0x15f   :  { %870 = vperm.xlu1 %4101, %v4349_v10   ;;  %914 = vperm.xlu0 %4100, %v4392_v17  }
 0x160   :  { %v4847_v60 = vpop.permute.xlu1 %562  ;;  %v4849_v62 = vpop.permute.xlu0 %594 }
 0x161   :  { %10012 = vst [vmem:[#allocation87_spill] sm:$0xff] %v4847_v60  ;;  %10013 = vst [vmem:[#allocation88_spill] sm:$0xff] %v4849_v62 }
 0x163   :  { %876 = vperm.xlu1 %4101, %v4361_v12   ;;  %922 = vperm.xlu0 %4100, %v4404_v19  }
 0x164   :  { %v4853_v61 = vpop.permute.xlu1 %568  ;;  %v4855_v63 = vpop.permute.xlu0 %602 }
 0x165   :  { %10014 = vst [vmem:[#allocation89_spill] sm:$0xff] %v4853_v61  ;;  %10015 = vst [vmem:[#allocation90_spill] sm:$0xff] %v4855_v63 }
 0x167   :  { %882 = vperm.xlu1 %4101, %v4373_v14   ;;  %930 = vperm.xlu0 %4100, %v4416_v21  }
 0x168   :  { %v4859_v0 = vpop.permute.xlu1 %590  ;;  %v4861_v33 = vpop.permute.xlu0 %610 }
 0x169   :  { %10016 = vst [vmem:[#allocation91_spill] sm:$0xff] %v4859_v0  ;;  %10017 = vst [vmem:[#allocation92_spill] sm:$0xff] %v4861_v33 }
 0x16b   :  { %888 = vperm.xlu1 %4101, %v4385_v16   ;;  %938 = vperm.xlu0 %4100, %v4428_v23  }
 0x16c   :  { %v4865_v60 = vpop.permute.xlu1 %598  ;;  %v4867_v62 = vpop.permute.xlu0 %618 }
 0x16d   :  { %10018 = vst [vmem:[#allocation93_spill] sm:$0xff] %v4865_v60  ;;  %10019 = vst [vmem:[#allocation94_spill] sm:$0xff] %v4867_v62 }
 0x16f   :  { %910 = vperm.xlu1 %4101, %v4397_v18   ;;  %946 = vperm.xlu0 %4100, %v4440_v25  }
 0x170   :  { %v4871_v61 = vpop.permute.xlu1 %606  ;;  %v4873_v63 = vpop.permute.xlu0 %626 }
 0x171   :  { %10020 = vst [vmem:[#allocation95_spill] sm:$0xff] %v4871_v61  ;;  %10021 = vst [vmem:[#allocation96_spill] sm:$0xff] %v4873_v63 }
 0x173   :  { %918 = vperm.xlu1 %4101, %v4409_v20   ;;  %954 = vperm.xlu0 %4100, %v4452_v27  }
 0x174   :  { %v4877_v33 = vpop.permute.xlu1 %614  ;;  %v4879_v0 = vpop.permute.xlu0 %634 }
 0x175   :  { %10022 = vst [vmem:[#allocation97_spill] sm:$0xff] %v4877_v33  ;;  %10023 = vst [vmem:[#allocation98_spill] sm:$0xff] %v4879_v0  ;;  %v4259_v33 = vmov 6  }
 0x177   :  { %926 = vperm.xlu1 %4101, %v4421_v22   ;;  %962 = vperm.xlu0 %4100, %v4464_v29  }
 0x178   :  { %v4883_v62 = vpop.permute.xlu1 %622  ;;  %v4885_v60 = vpop.permute.xlu0 %642 }
 0x179   :  { %10024 = vst [vmem:[#allocation99_spill] sm:$0xff] %v4883_v62  ;;  %10025 = vst [vmem:[#allocation100_spill] sm:$0xff] %v4885_v60 }
 0x17b   :  { %934 = vperm.xlu1 %4101, %v4433_v24   ;;  %970 = vperm.xlu0 %4100, %v4476_v31  }
 0x17c   :  { %v4889_v63 = vpop.permute.xlu1 %630  ;;  %v4891_v61 = vpop.permute.xlu0 %650 }
 0x17d   :  { %10026 = vst [vmem:[#allocation101_spill] sm:$0xff] %v4889_v63  ;;  %10027 = vst [vmem:[#allocation102_spill] sm:$0xff] %v4891_v61 }
 0x17f   :  { %942 = vperm.xlu1 %4101, %v4445_v26   ;;  %4103 = vset.pattern.permute.xlu0 %v4259_v33 }
 0x180   :  { %v4894_v0 = vpop.permute.xlu1 %638  ;;  %1009 = vperm.xlu0 %4103, %v4313_v4  }
 0x181   :  { %10028 = vst [vmem:[#allocation103_spill] sm:$0xff] %v4894_v0  ;;  %v4897_v36 = vpop.permute.xlu0 %689 }
 0x182   :  { %10029 = vst [vmem:[#allocation104_spill] sm:$0xff] %v4897_v36 }
 0x183   :  { %950 = vperm.xlu1 %4101, %v4457_v28  }
 0x184   :  { %v4900_v60 = vpop.permute.xlu1 %646  ;;  %1018 = vperm.xlu0 %4103, %v4325_v6  }
 0x185   :  { %10030 = vst [vmem:[#allocation105_spill] sm:$0xff] %v4900_v60  ;;  %v4903_v62 = vpop.permute.xlu0 %698 }
 0x186   :  { %10031 = vst [vmem:[#allocation106_spill] sm:$0xff] %v4903_v62 }
 0x187   :  { %958 = vperm.xlu1 %4101, %v4469_v30  }
 0x188   :  { %1024 = vperm.xlu0 %4103, %v4337_v8  }
 0x189   :  { %v4907_v61 = vpop.permute.xlu1 %686  ;;  %v4909_v63 = vpop.permute.xlu0 %704 }
 0x18a   :  { %10032 = vst [vmem:[#allocation107_spill] sm:$0xff] %v4907_v61  ;;  %10033 = vst [vmem:[#allocation108_spill] sm:$0xff] %v4909_v63 }
 0x18b   :  { %966 = vperm.xlu1 %4101, %v4481_v32  }
 0x18c   :  { %1030 = vperm.xlu0 %4103, %v4349_v10  }
 0x18d   :  { %v4913_v36 = vpop.permute.xlu1 %692  ;;  %v4915_v0 = vpop.permute.xlu0 %710 }
 0x18e   :  { %10034 = vst [vmem:[#allocation109_spill] sm:$0xff] %v4913_v36  ;;  %10035 = vst [vmem:[#allocation110_spill] sm:$0xff] %v4915_v0 }
 0x18f   :  { %4102 = vset.pattern.permute.xlu1 %v4259_v33 }
 0x190   :  { %1006 = vperm.xlu1 %4102, %v4301_v2   ;;  %1036 = vperm.xlu0 %4103, %v4361_v12  }
 0x191   :  { %v4919_v62 = vpop.permute.xlu1 %695  ;;  %v4921_v60 = vpop.permute.xlu0 %716 }
 0x192   :  { %10036 = vst [vmem:[#allocation111_spill] sm:$0xff] %v4919_v62  ;;  %10037 = vst [vmem:[#allocation112_spill] sm:$0xff] %v4921_v60 }
 0x194   :  { %1012 = vperm.xlu1 %4102, %v4296_v1   ;;  %1042 = vperm.xlu0 %4103, %v4373_v14  }
 0x195   :  { %v4925_v63 = vpop.permute.xlu1 %701  ;;  %v4927_v61 = vpop.permute.xlu0 %722 }
 0x196   :  { %10038 = vst [vmem:[#allocation113_spill] sm:$0xff] %v4925_v63  ;;  %10039 = vst [vmem:[#allocation114_spill] sm:$0xff] %v4927_v61 }
 0x198   :  { %1015 = vperm.xlu1 %4102, %v4308_v3   ;;  %1048 = vperm.xlu0 %4103, %v4385_v16  }
 0x199   :  { %v4931_v33 = vpop.permute.xlu1 %707  ;;  %v4933_v0 = vpop.permute.xlu0 %728 }
 0x19a   :  { %10040 = vst [vmem:[#allocation115_spill] sm:$0xff] %v4931_v33  ;;  %10041 = vst [vmem:[#allocation116_spill] sm:$0xff] %v4933_v0 }
 0x19c   :  { %1021 = vperm.xlu1 %4102, %v4320_v5   ;;  %1070 = vperm.xlu0 %4103, %v4397_v18  }
 0x19d   :  { %v4937_v60 = vpop.permute.xlu1 %713  ;;  %v4939_v62 = vpop.permute.xlu0 %750 }
 0x19e   :  { %10042 = vst [vmem:[#allocation117_spill] sm:$0xff] %v4937_v60  ;;  %10043 = vst [vmem:[#allocation118_spill] sm:$0xff] %v4939_v62 }
 0x1a0   :  { %1027 = vperm.xlu1 %4102, %v4332_v7   ;;  %1078 = vperm.xlu0 %4103, %v4409_v20  }
 0x1a1   :  { %v4943_v61 = vpop.permute.xlu1 %719  ;;  %v4945_v63 = vpop.permute.xlu0 %758 }
 0x1a2   :  { %10044 = vst [vmem:[#allocation119_spill] sm:$0xff] %v4943_v61  ;;  %10045 = vst [vmem:[#allocation120_spill] sm:$0xff] %v4945_v63 }
 0x1a4   :  { %1033 = vperm.xlu1 %4102, %v4344_v9   ;;  %1086 = vperm.xlu0 %4103, %v4421_v22  }
 0x1a5   :  { %v4949_v0 = vpop.permute.xlu1 %725  ;;  %v4951_v33 = vpop.permute.xlu0 %766 }
 0x1a6   :  { %10046 = vst [vmem:[#allocation121_spill] sm:$0xff] %v4949_v0  ;;  %10047 = vst [vmem:[#allocation122_spill] sm:$0xff] %v4951_v33 }
 0x1a8   :  { %1039 = vperm.xlu1 %4102, %v4356_v11   ;;  %1094 = vperm.xlu0 %4103, %v4433_v24  }
 0x1a9   :  { %v4955_v60 = vpop.permute.xlu1 %731  ;;  %v4957_v62 = vpop.permute.xlu0 %774 }
 0x1aa   :  { %10048 = vst [vmem:[#allocation123_spill] sm:$0xff] %v4955_v60  ;;  %10049 = vst [vmem:[#allocation124_spill] sm:$0xff] %v4957_v62 }
 0x1ac   :  { %1045 = vperm.xlu1 %4102, %v4368_v13   ;;  %1102 = vperm.xlu0 %4103, %v4445_v26  }
 0x1ad   :  { %v4961_v61 = vpop.permute.xlu1 %754  ;;  %v4963_v63 = vpop.permute.xlu0 %782 }
 0x1ae   :  { %10050 = vst [vmem:[#allocation125_spill] sm:$0xff] %v4961_v61  ;;  %10051 = vst [vmem:[#allocation126_spill] sm:$0xff] %v4963_v63 }
 0x1b0   :  { %1051 = vperm.xlu1 %4102, %v4380_v15   ;;  %1110 = vperm.xlu0 %4103, %v4457_v28  }
 0x1b1   :  { %v4967_v0 = vpop.permute.xlu1 %762  ;;  %v4969_v33 = vpop.permute.xlu0 %790 }
 0x1b2   :  { %10052 = vst [vmem:[#allocation127_spill] sm:$0xff] %v4967_v0  ;;  %10053 = vst [vmem:[#allocation128_spill] sm:$0xff] %v4969_v33  ;;  %v4260_v0 = vmov 7  }
 0x1b4   :  { %1074 = vperm.xlu1 %4102, %v4392_v17   ;;  %1118 = vperm.xlu0 %4103, %v4469_v30  }
 0x1b5   :  { %v4973_v60 = vpop.permute.xlu1 %770  ;;  %v4975_v62 = vpop.permute.xlu0 %798 }
 0x1b6   :  { %10054 = vst [vmem:[#allocation129_spill] sm:$0xff] %v4973_v60  ;;  %10055 = vst [vmem:[#allocation130_spill] sm:$0xff] %v4975_v62 }
 0x1b8   :  { %1082 = vperm.xlu1 %4102, %v4404_v19   ;;  %1126 = vperm.xlu0 %4103, %v4481_v32  }
 0x1b9   :  { %v4979_v63 = vpop.permute.xlu1 %778  ;;  %v4981_v61 = vpop.permute.xlu0 %806 }
 0x1ba   :  { %10056 = vst [vmem:[#allocation131_spill] sm:$0xff] %v4979_v63  ;;  %10057 = vst [vmem:[#allocation132_spill] sm:$0xff] %v4981_v61 }
 0x1bc   :  { %1090 = vperm.xlu1 %4102, %v4416_v21   ;;  %4104 = vset.pattern.permute.xlu0 %v4260_v0 }
 0x1bd   :  { %v4984_v33 = vpop.permute.xlu1 %786  ;;  %1166 = vperm.xlu0 %4104, %v4301_v2  }
 0x1be   :  { %10058 = vst [vmem:[#allocation133_spill] sm:$0xff] %v4984_v33  ;;  %v4987_v36 = vpop.permute.xlu0 %846 }
 0x1bf   :  { %10059 = vst [vmem:[#allocation134_spill] sm:$0xff] %v4987_v36 }
 0x1c0   :  { %1098 = vperm.xlu1 %4102, %v4428_v23  }
 0x1c1   :  { %v4990_v62 = vpop.permute.xlu1 %794  ;;  %1175 = vperm.xlu0 %4104, %v4308_v3  }
 0x1c2   :  { %10060 = vst [vmem:[#allocation135_spill] sm:$0xff] %v4990_v62  ;;  %v4993_v60 = vpop.permute.xlu0 %855 }
 0x1c3   :  { %10061 = vst [vmem:[#allocation136_spill] sm:$0xff] %v4993_v60 }
 0x1c4   :  { %1106 = vperm.xlu1 %4102, %v4440_v25  }
 0x1c5   :  { %v4996_v61 = vpop.permute.xlu1 %802  ;;  %1181 = vperm.xlu0 %4104, %v4320_v5  }
 0x1c6   :  { %10062 = vst [vmem:[#allocation137_spill] sm:$0xff] %v4996_v61  ;;  %v4999_v63 = vpop.permute.xlu0 %861 }
 0x1c7   :  { %10063 = vst [vmem:[#allocation138_spill] sm:$0xff] %v4999_v63 }
 0x1c8   :  { %1114 = vperm.xlu1 %4102, %v4452_v27  }
 0x1c9   :  { %v5002_v2 = vpop.permute.xlu1 %810  ;;  %1187 = vperm.xlu0 %4104, %v4332_v7  }
 0x1ca   :  { %10064 = vst [vmem:[#allocation139_spill] sm:$0xff] %v5002_v2  ;;  %v5005_v36 = vpop.permute.xlu0 %867 }
 0x1cb   :  { %10065 = vst [vmem:[#allocation140_spill] sm:$0xff] %v5005_v36 }
 0x1cc   :  { %1122 = vperm.xlu1 %4102, %v4464_v29  }
 0x1cd   :  { %1193 = vperm.xlu0 %4104, %v4344_v9  }
 0x1ce   :  { %v5009_v3 = vpop.permute.xlu1 %849  ;;  %v5011_v60 = vpop.permute.xlu0 %873 }
 0x1cf   :  { %10066 = vst [vmem:[#allocation141_spill] sm:$0xff] %v5009_v3  ;;  %10067 = vst [vmem:[#allocation142_spill] sm:$0xff] %v5011_v60 }
 0x1d0   :  { %1130 = vperm.xlu1 %4102, %v4476_v31  }
 0x1d1   :  { %1199 = vperm.xlu0 %4104, %v4356_v11  }
 0x1d2   :  { %v5015_v5 = vpop.permute.xlu1 %852  ;;  %v5017_v63 = vpop.permute.xlu0 %879 }
 0x1d3   :  { %10068 = vst [vmem:[#allocation143_spill] sm:$0xff] %v5015_v5  ;;  %10069 = vst [vmem:[#allocation144_spill] sm:$0xff] %v5017_v63 }
 0x1d4   :  { %4105 = vset.pattern.permute.xlu1 %v4260_v0 }
 0x1d5   :  { %1169 = vperm.xlu1 %4105, %v4313_v4   ;;  %1205 = vperm.xlu0 %4104, %v4368_v13  }
 0x1d6   :  { %v5021_v7 = vpop.permute.xlu1 %858  ;;  %v5023_v9 = vpop.permute.xlu0 %885 }
 0x1d7   :  { %10070 = vst [vmem:[#allocation145_spill] sm:$0xff] %v5021_v7  ;;  %10071 = vst [vmem:[#allocation146_spill] sm:$0xff] %v5023_v9  ;;  %v5388_v9 = vld [vmem:[%s9675_s1] sm:$0xff] }
 0x1d9   :  { %1172 = vperm.xlu1 %4105, %v4296_v1   ;;  %1211 = vperm.xlu0 %4104, %v4380_v15  }
 0x1da   :  { %v5027_v60 = vpop.permute.xlu1 %864  ;;  %v5029_v11 = vpop.permute.xlu0 %891 }
 0x1db   :  { %10072 = vst [vmem:[#allocation147_spill] sm:$0xff] %v5027_v60  ;;  %10073 = vst [vmem:[#allocation148_spill] sm:$0xff] %v5029_v11  ;;  %v5377_v60 = vld [vmem:[%s9674_s0 + $0x70] sm:$0xff] }
 0x1dd   :  { %1178 = vperm.xlu1 %4105, %v4325_v6   ;;  %1234 = vperm.xlu0 %4104, %v4392_v17  }
 0x1de   :  { %v5033_v0 = vpop.permute.xlu1 %870  ;;  %v5035_v63 = vpop.permute.xlu0 %914 }
 0x1df   :  { %10074 = vst [vmem:[#allocation149_spill] sm:$0xff] %v5033_v0  ;;  %10075 = vst [vmem:[#allocation150_spill] sm:$0xff] %v5035_v63 }
 0x1e1   :  { %1184 = vperm.xlu1 %4105, %v4337_v8   ;;  %1242 = vperm.xlu0 %4104, %v4404_v19  }
 0x1e2   :  { %v5039_v13 = vpop.permute.xlu1 %876  ;;  %v5041_v1 = vpop.permute.xlu0 %922 }
 0x1e3   :  { %10076 = vst [vmem:[#allocation151_spill] sm:$0xff] %v5039_v13  ;;  %10077 = vst [vmem:[#allocation152_spill] sm:$0xff] %v5041_v1 }
 0x1e5   :  { %1190 = vperm.xlu1 %4105, %v4349_v10   ;;  %1250 = vperm.xlu0 %4104, %v4416_v21  }
 0x1e6   :  { %v5045_v15 = vpop.permute.xlu1 %882  ;;  %v5047_v11 = vpop.permute.xlu0 %930 }
 0x1e7   :  { %10078 = vst [vmem:[#allocation153_spill] sm:$0xff] %v5045_v15  ;;  %10079 = vst [vmem:[#allocation154_spill] sm:$0xff] %v5047_v11  ;;  %v5366_v11 = vld [vmem:[%s9674_s0 + $0x60] sm:$0xff] }
 0x1e9   :  { %1196 = vperm.xlu1 %4105, %v4361_v12   ;;  %1258 = vperm.xlu0 %4104, %v4428_v23  }
 0x1ea   :  { %v5051_v17 = vpop.permute.xlu1 %888  ;;  %v5053_v0 = vpop.permute.xlu0 %938 }
 0x1eb   :  { %10080 = vst [vmem:[#allocation155_spill] sm:$0xff] %v5051_v17  ;;  %10081 = vst [vmem:[#allocation156_spill] sm:$0xff] %v5053_v0  ;;  %v5355_v0 = vld [vmem:[%s9674_s0 + $0x50] sm:$0xff] }
 0x1ed   :  { %1202 = vperm.xlu1 %4105, %v4373_v14   ;;  %1266 = vperm.xlu0 %4104, %v4440_v25  }
 0x1ee   :  { %v5057_v19 = vpop.permute.xlu1 %910  ;;  %v5059_v13 = vpop.permute.xlu0 %946 }
 0x1ef   :  { %10082 = vst [vmem:[#allocation157_spill] sm:$0xff] %v5057_v19  ;;  %10083 = vst [vmem:[#allocation158_spill] sm:$0xff] %v5059_v13  ;;  %v5344_v19 = vld [vmem:[%s9674_s0 + $0x40] sm:$0xff] }
 0x1f1   :  { %1208 = vperm.xlu1 %4105, %v4385_v16   ;;  %1274 = vperm.xlu0 %4104, %v4452_v27   ;;  %v4261_v27 = vmov 8  }
 0x1f2   :  { %v5063_v21 = vpop.permute.xlu1 %918  ;;  %v5065_v15 = vpop.permute.xlu0 %954 }
 0x1f3   :  { %10084 = vst [vmem:[#allocation159_spill] sm:$0xff] %v5063_v21  ;;  %10085 = vst [vmem:[#allocation160_spill] sm:$0xff] %v5065_v15  ;;  %v5333_v21 = vld [vmem:[%s9674_s0 + $0x30] sm:$0xff] }
 0x1f5   :  { %1230 = vperm.xlu1 %4105, %v4397_v18   ;;  %1282 = vperm.xlu0 %4104, %v4464_v29  }
 0x1f6   :  { %v5069_v23 = vpop.permute.xlu1 %926  ;;  %v5071_v17 = vpop.permute.xlu0 %962 }
 0x1f7   :  { %10086 = vst [vmem:[#allocation161_spill] sm:$0xff] %v5069_v23  ;;  %10087 = vst [vmem:[#allocation162_spill] sm:$0xff] %v5071_v17 }
 0x1f9   :  { %1238 = vperm.xlu1 %4105, %v4409_v20   ;;  %1290 = vperm.xlu0 %4104, %v4476_v31  }
 0x1fa   :  { %v5075_v25 = vpop.permute.xlu1 %934  ;;  %v5077_v13 = vpop.permute.xlu0 %970 }
 0x1fb   :  { %10088 = vst [vmem:[#allocation163_spill] sm:$0xff] %v5075_v25  ;;  %10089 = vst [vmem:[#allocation164_spill] sm:$0xff] %v5077_v13 }
 0x1fd   :  { %1246 = vperm.xlu1 %4105, %v4421_v22   ;;  %4107 = vset.pattern.permute.xlu0 %v4261_v27 }
 0x1fe   :  { %v5080_v15 = vpop.permute.xlu1 %942  ;;  %1329 = vperm.xlu0 %4107, %v4313_v4  }
 0x1ff   :  { %10090 = vst [vmem:[#allocation165_spill] sm:$0xff] %v5080_v15  ;;  %v5083_v29 = vpop.permute.xlu0 %1009 }
 0x200   :  { %10091 = vst [vmem:[#allocation166_spill] sm:$0xff] %v5083_v29 }
 0x201   :  { %1254 = vperm.xlu1 %4105, %v4433_v24  }
 0x202   :  { %v5086_v17 = vpop.permute.xlu1 %950  ;;  %1338 = vperm.xlu0 %4107, %v4325_v6  }
 0x203   :  { %10092 = vst [vmem:[#allocation167_spill] sm:$0xff] %v5086_v17  ;;  %v5089_v31 = vpop.permute.xlu0 %1018 }
 0x204   :  { %10093 = vst [vmem:[#allocation168_spill] sm:$0xff] %v5089_v31 }
 0x205   :  { %1262 = vperm.xlu1 %4105, %v4445_v26  }
 0x206   :  { %v5092_v13 = vpop.permute.xlu1 %958  ;;  %1344 = vperm.xlu0 %4107, %v4337_v8  }
 0x207   :  { %10094 = vst [vmem:[#allocation169_spill] sm:$0xff] %v5092_v13  ;;  %v5095_v25 = vpop.permute.xlu0 %1024 }
 0x208   :  { %10095 = vst [vmem:[#allocation170_spill] sm:$0xff] %v5095_v25 }
 0x209   :  { %1270 = vperm.xlu1 %4105, %v4457_v28  }
 0x20a   :  { %v5098_v4 = vpop.permute.xlu1 %966  ;;  %1350 = vperm.xlu0 %4107, %v4349_v10   ;;  %v5118_v10 = vld [vmem:[%s9674_s0] sm:$0xff] }
 0x20b   :  { %10096 = vst [vmem:[#allocation171_spill] sm:$0xff] %v5098_v4  ;;  %v5101_v29 = vpop.permute.xlu0 %1030 }
 0x20c   :  { %10097 = vst [vmem:[#allocation172_spill] sm:$0xff] %v5101_v29 }
 0x20d   :  { %1278 = vperm.xlu1 %4105, %v4469_v30  }
 0x20e   :  { %1356 = vperm.xlu0 %4107, %v4361_v12  }
 0x20f   :  { %v5105_v6 = vpop.permute.xlu1 %1006  ;;  %v5107_v31 = vpop.permute.xlu0 %1036 }
 0x210   :  { %10098 = vst [vmem:[#allocation173_spill] sm:$0xff] %v5105_v6  ;;  %10099 = vst [vmem:[#allocation174_spill] sm:$0xff] %v5107_v31 }
 0x211   :  { %1286 = vperm.xlu1 %4105, %v4481_v32  }
 0x212   :  { %1362 = vperm.xlu0 %4107, %v4373_v14   ;;  %v5129_v14 = vld [vmem:[%s9674_s0 + $0x10] sm:$0xff] }
 0x213   :  { %v5111_v8 = vpop.permute.xlu1 %1012  ;;  %v5113_v25 = vpop.permute.xlu0 %1042 }
 0x214   :  { %10100 = vst [vmem:[#allocation175_spill] sm:$0xff] %v5111_v8  ;;  %10101 = vst [vmem:[#allocation176_spill] sm:$0xff] %v5113_v25 }
 0x215   :  { %4106 = vset.pattern.permute.xlu1 %v4261_v27 }
 0x216   :  { %1326 = vperm.xlu1 %4106, %v5118_v10   ;;  %1368 = vperm.xlu0 %4107, %v4385_v16   ;;  %v5140_v16 = vld [vmem:[%s9674_s0 + $0x18] sm:$0xff] }
 0x217   :  { %v5122_v12 = vpop.permute.xlu1 %1015  ;;  %v5124_v31 = vpop.permute.xlu0 %1048 }
 0x218   :  { %10102 = vst [vmem:[#allocation177_spill] sm:$0xff] %v5122_v12  ;;  %10103 = vst [vmem:[#allocation178_spill] sm:$0xff] %v5124_v31 }
 0x21a   :  { %1332 = vperm.xlu1 %4106, %v5129_v14   ;;  %1390 = vperm.xlu0 %4107, %v4397_v18   ;;  %v5151_v18 = vld [vmem:[%s9674_s0 + $0x28] sm:$0xff] }
 0x21b   :  { %v5133_v27 = vpop.permute.xlu1 %1021  ;;  %v5135_v25 = vpop.permute.xlu0 %1070 }
 0x21c   :  { %10104 = vst [vmem:[#allocation179_spill] sm:$0xff] %v5133_v27  ;;  %10105 = vst [vmem:[#allocation180_spill] sm:$0xff] %v5135_v25 }
 0x21e   :  { %1335 = vperm.xlu1 %4106, %v5140_v16   ;;  %1398 = vperm.xlu0 %4107, %v4409_v20   ;;  %v5162_v20 = vld [vmem:[%s9674_s0 + $0x38] sm:$0xff] }
 0x21f   :  { %v5144_v31 = vpop.permute.xlu1 %1027  ;;  %v5146_v12 = vpop.permute.xlu0 %1078 }
 0x220   :  { %10106 = vst [vmem:[#allocation181_spill] sm:$0xff] %v5144_v31  ;;  %10107 = vst [vmem:[#allocation182_spill] sm:$0xff] %v5146_v12 }
 0x222   :  { %1341 = vperm.xlu1 %4106, %v5151_v18   ;;  %1406 = vperm.xlu0 %4107, %v4421_v22   ;;  %v5173_v22 = vld [vmem:[%s9674_s0 + $0x48] sm:$0xff] }
 0x223   :  { %v5155_v27 = vpop.permute.xlu1 %1033  ;;  %v5157_v29 = vpop.permute.xlu0 %1086 }
 0x224   :  { %10108 = vst [vmem:[#allocation183_spill] sm:$0xff] %v5155_v27  ;;  %10109 = vst [vmem:[#allocation184_spill] sm:$0xff] %v5157_v29 }
 0x226   :  { %1347 = vperm.xlu1 %4106, %v5162_v20   ;;  %1414 = vperm.xlu0 %4107, %v4433_v24   ;;  %v5184_v24 = vld [vmem:[%s9674_s0 + $0x58] sm:$0xff] }
 0x227   :  { %v5166_v31 = vpop.permute.xlu1 %1039  ;;  %v5168_v12 = vpop.permute.xlu0 %1094 }
 0x228   :  { %10110 = vst [vmem:[#allocation185_spill] sm:$0xff] %v5166_v31  ;;  %10111 = vst [vmem:[#allocation186_spill] sm:$0xff] %v5168_v12 }
 0x22a   :  { %1353 = vperm.xlu1 %4106, %v5173_v22   ;;  %1422 = vperm.xlu0 %4107, %v4445_v26   ;;  %v5195_v26 = vld [vmem:[%s9674_s0 + $0x68] sm:$0xff] }
 0x22b   :  { %v5177_v27 = vpop.permute.xlu1 %1045  ;;  %v5179_v29 = vpop.permute.xlu0 %1102 }
 0x22c   :  { %10112 = vst [vmem:[#allocation187_spill] sm:$0xff] %v5177_v27  ;;  %10113 = vst [vmem:[#allocation188_spill] sm:$0xff] %v5179_v29 }
 0x22e   :  { %1359 = vperm.xlu1 %4106, %v5184_v24   ;;  %1430 = vperm.xlu0 %4107, %v4457_v28   ;;  %v5206_v28 = vld [vmem:[%s9674_s0 + $0x78] sm:$0xff] }
 0x22f   :  { %v5188_v31 = vpop.permute.xlu1 %1051  ;;  %v5190_v12 = vpop.permute.xlu0 %1110 }
 0x230   :  { %10114 = vst [vmem:[#allocation189_spill] sm:$0xff] %v5188_v31  ;;  %10115 = vst [vmem:[#allocation190_spill] sm:$0xff] %v5190_v12 }
 0x232   :  { %1365 = vperm.xlu1 %4106, %v5195_v26   ;;  %1438 = vperm.xlu0 %4107, %v4469_v30   ;;  %v5217_v30 = vld [vmem:[%s9675_s1 + $0x8] sm:$0xff] }
 0x233   :  { %v5199_v27 = vpop.permute.xlu1 %1074  ;;  %v5201_v29 = vpop.permute.xlu0 %1118 }
 0x234   :  { %10116 = vst [vmem:[#allocation191_spill] sm:$0xff] %v5199_v27  ;;  %10117 = vst [vmem:[#allocation192_spill] sm:$0xff] %v5201_v29  ;;  %v4262_v29 = vmov 9  }
 0x236   :  { %1371 = vperm.xlu1 %4106, %v5206_v28   ;;  %1446 = vperm.xlu0 %4107, %v4481_v32   ;;  %v5228_v32 = vld [vmem:[%s9675_s1 + $0x18] sm:$0xff] }
 0x237   :  { %v5210_v31 = vpop.permute.xlu1 %1082  ;;  %v5212_v12 = vpop.permute.xlu0 %1126 }
 0x238   :  { %10118 = vst [vmem:[#allocation193_spill] sm:$0xff] %v5210_v31  ;;  %10119 = vst [vmem:[#allocation194_spill] sm:$0xff] %v5212_v12 }
 0x23a   :  { %1394 = vperm.xlu1 %4106, %v5217_v30   ;;  %4108 = vset.pattern.permute.xlu0 %v4262_v29 }
 0x23b   :  { %v5220_v27 = vpop.permute.xlu1 %1090  ;;  %1486 = vperm.xlu0 %4108, %v5118_v10  }
 0x23c   :  { %10120 = vst [vmem:[#allocation195_spill] sm:$0xff] %v5220_v27  ;;  %v5223_v25 = vpop.permute.xlu0 %1166  ;;  %v5239_v27 = vld [vmem:[%s9675_s1 + $0x28] sm:$0xff] }
 0x23d   :  { %10121 = vst [vmem:[#allocation196_spill] sm:$0xff] %v5223_v25 }
 0x23e   :  { %1402 = vperm.xlu1 %4106, %v5228_v32  }
 0x23f   :  { %v5231_v12 = vpop.permute.xlu1 %1098  ;;  %1495 = vperm.xlu0 %4108, %v5140_v16  }
 0x240   :  { %10122 = vst [vmem:[#allocation197_spill] sm:$0xff] %v5231_v12  ;;  %v5234_v31 = vpop.permute.xlu0 %1175  ;;  %v5250_v12 = vld [vmem:[%s9675_s1 + $0x38] sm:$0xff] }
 0x241   :  { %10123 = vst [vmem:[#allocation198_spill] sm:$0xff] %v5234_v31 }
 0x242   :  { %1410 = vperm.xlu1 %4106, %v5239_v27  }
 0x243   :  { %v5242_v25 = vpop.permute.xlu1 %1106  ;;  %1501 = vperm.xlu0 %4108, %v5151_v18  }
 0x244   :  { %10124 = vst [vmem:[#allocation199_spill] sm:$0xff] %v5242_v25  ;;  %v5245_v8 = vpop.permute.xlu0 %1181  ;;  %v5261_v25 = vld [vmem:[%s9675_s1 + $0x48] sm:$0xff] }
 0x245   :  { %10125 = vst [vmem:[#allocation200_spill] sm:$0xff] %v5245_v8 }
 0x246   :  { %1418 = vperm.xlu1 %4106, %v5250_v12  }
 0x247   :  { %v5253_v31 = vpop.permute.xlu1 %1114  ;;  %1507 = vperm.xlu0 %4108, %v5162_v20  }
 0x248   :  { %10126 = vst [vmem:[#allocation201_spill] sm:$0xff] %v5253_v31  ;;  %v5256_v6 = vpop.permute.xlu0 %1187  ;;  %v5272_v31 = vld [vmem:[%s9675_s1 + $0x58] sm:$0xff] }
 0x249   :  { %10127 = vst [vmem:[#allocation202_spill] sm:$0xff] %v5256_v6 }
 0x24a   :  { %1426 = vperm.xlu1 %4106, %v5261_v25  }
 0x24b   :  { %v5264_v8 = vpop.permute.xlu1 %1122  ;;  %1513 = vperm.xlu0 %4108, %v5173_v22  }
 0x24c   :  { %10128 = vst [vmem:[#allocation203_spill] sm:$0xff] %v5264_v8  ;;  %v5267_v4 = vpop.permute.xlu0 %1193  ;;  %v5283_v8 = vld [vmem:[%s9675_s1 + $0x68] sm:$0xff] }
 0x24d   :  { %10129 = vst [vmem:[#allocation204_spill] sm:$0xff] %v5267_v4 }
 0x24e   :  { %1434 = vperm.xlu1 %4106, %v5272_v31  }
 0x24f   :  { %v5275_v6 = vpop.permute.xlu1 %1130  ;;  %1519 = vperm.xlu0 %4108, %v5184_v24  }
 0x250   :  { %10130 = vst [vmem:[#allocation205_spill] sm:$0xff] %v5275_v6  ;;  %v5278_v13 = vpop.permute.xlu0 %1199  ;;  %v5294_v6 = vld [vmem:[%s9675_s1 + $0x78] sm:$0xff] }
 0x251   :  { %10131 = vst [vmem:[#allocation206_spill] sm:$0xff] %v5278_v13 }
 0x252   :  { %1442 = vperm.xlu1 %4106, %v5283_v8  }
 0x253   :  { %1525 = vperm.xlu0 %4108, %v5195_v26  }
 0x254   :  { %v5287_v4 = vpop.permute.xlu1 %1169  ;;  %v5289_v17 = vpop.permute.xlu0 %1205 }
 0x255   :  { %10132 = vst [vmem:[#allocation207_spill] sm:$0xff] %v5287_v4  ;;  %10133 = vst [vmem:[#allocation208_spill] sm:$0xff] %v5289_v17  ;;  %v5305_v4 = vld [vmem:[%s9674_s0 + $0x8] sm:$0xff] }
 0x256   :  { %1450 = vperm.xlu1 %4106, %v5294_v6  }
 0x257   :  { %1531 = vperm.xlu0 %4108, %v5206_v28  }
 0x258   :  { %v5298_v13 = vpop.permute.xlu1 %1172  ;;  %v5300_v15 = vpop.permute.xlu0 %1211 }
 0x259   :  { %10134 = vst [vmem:[#allocation209_spill] sm:$0xff] %v5298_v13  ;;  %10135 = vst [vmem:[#allocation210_spill] sm:$0xff] %v5300_v15  ;;  %v5322_v15 = vld [vmem:[%s9674_s0 + $0x20] sm:$0xff] }
 0x25a   :  { %4109 = vset.pattern.permute.xlu1 %v4262_v29 }
 0x25b   :  { %1489 = vperm.xlu1 %4109, %v5305_v4   ;;  %1554 = vperm.xlu0 %4108, %v5217_v30  }
 0x25c   :  { %v5309_v17 = vpop.permute.xlu1 %1178  ;;  %v5311_v23 = vpop.permute.xlu0 %1234 }
 0x25d   :  { %10136 = vst [vmem:[#allocation211_spill] sm:$0xff] %v5309_v17  ;;  %10137 = vst [vmem:[#allocation212_spill] sm:$0xff] %v5311_v23 }
 0x25f   :  { %1492 = vperm.xlu1 %4109, %v5129_v14   ;;  %1562 = vperm.xlu0 %4108, %v5228_v32  }
 0x260   :  { %v5315_v13 = vpop.permute.xlu1 %1184  ;;  %v5317_v29 = vpop.permute.xlu0 %1242 }
 0x261   :  { %10138 = vst [vmem:[#allocation213_spill] sm:$0xff] %v5315_v13  ;;  %10139 = vst [vmem:[#allocation214_spill] sm:$0xff] %v5317_v29 }
 0x263   :  { %1498 = vperm.xlu1 %4109, %v5322_v15   ;;  %1570 = vperm.xlu0 %4108, %v5239_v27  }
 0x264   :  { %v5326_v17 = vpop.permute.xlu1 %1190  ;;  %v5328_v23 = vpop.permute.xlu0 %1250 }
 0x265   :  { %10140 = vst [vmem:[#allocation215_spill] sm:$0xff] %v5326_v17  ;;  %10141 = vst [vmem:[#allocation216_spill] sm:$0xff] %v5328_v23 }
 0x267   :  { %1504 = vperm.xlu1 %4109, %v5333_v21   ;;  %1578 = vperm.xlu0 %4108, %v5250_v12  }
 0x268   :  { %v5337_v13 = vpop.permute.xlu1 %1196  ;;  %v5339_v29 = vpop.permute.xlu0 %1258 }
 0x269   :  { %10142 = vst [vmem:[#allocation217_spill] sm:$0xff] %v5337_v13  ;;  %10143 = vst [vmem:[#allocation218_spill] sm:$0xff] %v5339_v29 }
 0x26b   :  { %1510 = vperm.xlu1 %4109, %v5344_v19   ;;  %1586 = vperm.xlu0 %4108, %v5261_v25  }
 0x26c   :  { %v5348_v17 = vpop.permute.xlu1 %1202  ;;  %v5350_v23 = vpop.permute.xlu0 %1266 }
 0x26d   :  { %10144 = vst [vmem:[#allocation219_spill] sm:$0xff] %v5348_v17  ;;  %10145 = vst [vmem:[#allocation220_spill] sm:$0xff] %v5350_v23 }
 0x26f   :  { %1516 = vperm.xlu1 %4109, %v5355_v0   ;;  %1594 = vperm.xlu0 %4108, %v5272_v31  }
 0x270   :  { %v5359_v13 = vpop.permute.xlu1 %1208  ;;  %v5361_v29 = vpop.permute.xlu0 %1274 }
 0x271   :  { %10146 = vst [vmem:[#allocation221_spill] sm:$0xff] %v5359_v13  ;;  %10147 = vst [vmem:[#allocation222_spill] sm:$0xff] %v5361_v29 }
 0x273   :  { %1522 = vperm.xlu1 %4109, %v5366_v11   ;;  %1602 = vperm.xlu0 %4108, %v5283_v8  }
 0x274   :  { %v5370_v17 = vpop.permute.xlu1 %1230  ;;  %v5372_v23 = vpop.permute.xlu0 %1282 }
 0x275   :  { %10148 = vst [vmem:[#allocation223_spill] sm:$0xff] %v5370_v17  ;;  %10149 = vst [vmem:[#allocation224_spill] sm:$0xff] %v5372_v23  ;;  %v4263_v23 = vmov 10  }
 0x277   :  { %1528 = vperm.xlu1 %4109, %v5377_v60   ;;  %1610 = vperm.xlu0 %4108, %v5294_v6  }
 0x278   :  { %v5381_v13 = vpop.permute.xlu1 %1238  ;;  %v5383_v29 = vpop.permute.xlu0 %1290 }
 0x279   :  { %10150 = vst [vmem:[#allocation225_spill] sm:$0xff] %v5381_v13  ;;  %10151 = vst [vmem:[#allocation226_spill] sm:$0xff] %v5383_v29  ;;  %v5399_v13 = vld [vmem:[%s9675_s1 + $0x10] sm:$0xff] }
 0x27b   :  { %1550 = vperm.xlu1 %4109, %v5388_v9   ;;  %4111 = vset.pattern.permute.xlu0 %v4263_v23 }
 0x27c   :  { %v5391_v17 = vpop.permute.xlu1 %1246  ;;  %1649 = vperm.xlu0 %4111, %v5305_v4  }
 0x27d   :  { %10152 = vst [vmem:[#allocation227_spill] sm:$0xff] %v5391_v17  ;;  %v5394_v7 = vpop.permute.xlu0 %1329  ;;  %v5410_v17 = vld [vmem:[%s9675_s1 + $0x20] sm:$0xff] }
 0x27e   :  { %10153 = vst [vmem:[#allocation228_spill] sm:$0xff] %v5394_v7 }
 0x27f   :  { %1558 = vperm.xlu1 %4109, %v5399_v13  }
 0x280   :  { %v5402_v29 = vpop.permute.xlu1 %1254  ;;  %1658 = vperm.xlu0 %4111, %v5322_v15  }
 0x281   :  { %10154 = vst [vmem:[#allocation229_spill] sm:$0xff] %v5402_v29  ;;  %v5405_v1 = vpop.permute.xlu0 %1338  ;;  %v5421_v29 = vld [vmem:[%s9675_s1 + $0x30] sm:$0xff] }
 0x282   :  { %10155 = vst [vmem:[#allocation230_spill] sm:$0xff] %v5405_v1 }
 0x283   :  { %1566 = vperm.xlu1 %4109, %v5410_v17  }
 0x284   :  { %v5413_v7 = vpop.permute.xlu1 %1262  ;;  %1664 = vperm.xlu0 %4111, %v5333_v21  }
 0x285   :  { %10156 = vst [vmem:[#allocation231_spill] sm:$0xff] %v5413_v7  ;;  %v5416_v5 = vpop.permute.xlu0 %1344  ;;  %v5432_v7 = vld [vmem:[%s9675_s1 + $0x40] sm:$0xff] }
 0x286   :  { %10157 = vst [vmem:[#allocation232_spill] sm:$0xff] %v5416_v5 }
 0x287   :  { %1574 = vperm.xlu1 %4109, %v5421_v29  }
 0x288   :  { %v5424_v1 = vpop.permute.xlu1 %1270  ;;  %1670 = vperm.xlu0 %4111, %v5344_v19  }
 0x289   :  { %10158 = vst [vmem:[#allocation233_spill] sm:$0xff] %v5424_v1  ;;  %v5427_v63 = vpop.permute.xlu0 %1350  ;;  %v5443_v1 = vld [vmem:[%s9675_s1 + $0x50] sm:$0xff] }
 0x28a   :  { %10159 = vst [vmem:[#allocation234_spill] sm:$0xff] %v5427_v63 }
 0x28b   :  { %1582 = vperm.xlu1 %4109, %v5432_v7  }
 0x28c   :  { %v5435_v5 = vpop.permute.xlu1 %1278  ;;  %1676 = vperm.xlu0 %4111, %v5355_v0  }
 0x28d   :  { %10160 = vst [vmem:[#allocation235_spill] sm:$0xff] %v5435_v5  ;;  %v5438_v36 = vpop.permute.xlu0 %1356  ;;  %v5454_v5 = vld [vmem:[%s9675_s1 + $0x60] sm:$0xff] }
 0x28e   :  { %10161 = vst [vmem:[#allocation236_spill] sm:$0xff] %v5438_v36 }
 0x28f   :  { %1590 = vperm.xlu1 %4109, %v5443_v1  }
 0x290   :  { %v5446_v63 = vpop.permute.xlu1 %1286  ;;  %1682 = vperm.xlu0 %4111, %v5366_v11  }
 0x291   :  { %10162 = vst [vmem:[#allocation237_spill] sm:$0xff] %v5446_v63  ;;  %v5449_v3 = vpop.permute.xlu0 %1362  ;;  %v5465_v63 = vld [vmem:[%s9675_s1 + $0x70] sm:$0xff] }
 0x292   :  { %10163 = vst [vmem:[#allocation238_spill] sm:$0xff] %v5449_v3 }
 0x293   :  { %1598 = vperm.xlu1 %4109, %v5454_v5  }
 0x294   :  { %1688 = vperm.xlu0 %4111, %v5377_v60  }
 0x295   :  { %v5458_v36 = vpop.permute.xlu1 %1326  ;;  %v5460_v2 = vpop.permute.xlu0 %1368 }
 0x296   :  { %10164 = vst [vmem:[#allocation239_spill] sm:$0xff] %v5458_v36  ;;  %10165 = vst [vmem:[#allocation240_spill] sm:$0xff] %v5460_v2 }
 0x297   :  { %1606 = vperm.xlu1 %4109, %v5465_v63  }
 0x298   :  { %1710 = vperm.xlu0 %4111, %v5388_v9  }
 0x299   :  { %v5469_v3 = vpop.permute.xlu1 %1332  ;;  %v5471_v61 = vpop.permute.xlu0 %1390 }
 0x29a   :  { %10166 = vst [vmem:[#allocation241_spill] sm:$0xff] %v5469_v3  ;;  %10167 = vst [vmem:[#allocation242_spill] sm:$0xff] %v5471_v61 }
 0x29b   :  { %4110 = vset.pattern.permute.xlu1 %v4263_v23 }
 0x29c   :  { %1646 = vperm.xlu1 %4110, %v5118_v10   ;;  %1718 = vperm.xlu0 %4111, %v5399_v13  }
 0x29d   :  { %v5475_v36 = vpop.permute.xlu1 %1335  ;;  %v5477_v2 = vpop.permute.xlu0 %1398 }
 0x29e   :  { %10168 = vst [vmem:[#allocation243_spill] sm:$0xff] %v5475_v36  ;;  %10169 = vst [vmem:[#allocation244_spill] sm:$0xff] %v5477_v2 }
 0x2a0   :  { %1652 = vperm.xlu1 %4110, %v5129_v14   ;;  %1726 = vperm.xlu0 %4111, %v5410_v17  }
 0x2a1   :  { %v5481_v62 = vpop.permute.xlu1 %1341  ;;  %v5483_v33 = vpop.permute.xlu0 %1406 }
 0x2a2   :  { %10170 = vst [vmem:[#allocation245_spill] sm:$0xff] %v5481_v62  ;;  %10171 = vst [vmem:[#allocation246_spill] sm:$0xff] %v5483_v33 }
 0x2a4   :  { %1655 = vperm.xlu1 %4110, %v5140_v16   ;;  %1734 = vperm.xlu0 %4111, %v5421_v29  }
 0x2a5   :  { %v5487_v23 = vpop.permute.xlu1 %1347  ;;  %v5489_v61 = vpop.permute.xlu0 %1414 }
 0x2a6   :  { %10172 = vst [vmem:[#allocation247_spill] sm:$0xff] %v5487_v23  ;;  %10173 = vst [vmem:[#allocation248_spill] sm:$0xff] %v5489_v61 }
 0x2a8   :  { %1661 = vperm.xlu1 %4110, %v5151_v18   ;;  %1742 = vperm.xlu0 %4111, %v5432_v7  }
 0x2a9   :  { %v5493_v36 = vpop.permute.xlu1 %1353  ;;  %v5495_v2 = vpop.permute.xlu0 %1422 }
 0x2aa   :  { %10174 = vst [vmem:[#allocation249_spill] sm:$0xff] %v5493_v36  ;;  %10175 = vst [vmem:[#allocation250_spill] sm:$0xff] %v5495_v2 }
 0x2ac   :  { %1667 = vperm.xlu1 %4110, %v5162_v20   ;;  %1750 = vperm.xlu0 %4111, %v5443_v1  }
 0x2ad   :  { %v5499_v62 = vpop.permute.xlu1 %1359  ;;  %v5501_v33 = vpop.permute.xlu0 %1430 }
 0x2ae   :  { %10176 = vst [vmem:[#allocation251_spill] sm:$0xff] %v5499_v62  ;;  %10177 = vst [vmem:[#allocation252_spill] sm:$0xff] %v5501_v33  ;;  %v4264_v62 = vmov 11  }
 0x2b0   :  { %1673 = vperm.xlu1 %4110, %v5173_v22   ;;  %1758 = vperm.xlu0 %4111, %v5454_v5  }
 0x2b1   :  { %v5505_v23 = vpop.permute.xlu1 %1365  ;;  %v5507_v61 = vpop.permute.xlu0 %1438 }
 0x2b2   :  { %10178 = vst [vmem:[#allocation253_spill] sm:$0xff] %v5505_v23  ;;  %10179 = vst [vmem:[#allocation254_spill] sm:$0xff] %v5507_v61 }
 0x2b4   :  { %1679 = vperm.xlu1 %4110, %v5184_v24   ;;  %1766 = vperm.xlu0 %4111, %v5465_v63  }
 0x2b5   :  { %v5511_v36 = vpop.permute.xlu1 %1371  ;;  %v5513_v2 = vpop.permute.xlu0 %1446 }
 0x2b6   :  { %10180 = vst [vmem:[#allocation255_spill] sm:$0xff] %v5511_v36  ;;  %10181 = vst [vmem:[#allocation256_spill] sm:$0xff] %v5513_v2 }
 0x2b8   :  { %1685 = vperm.xlu1 %4110, %v5195_v26   ;;  %4112 = vset.pattern.permute.xlu0 %v4264_v62 }
 0x2b9   :  { %v5516_v33 = vpop.permute.xlu1 %1394  ;;  %1806 = vperm.xlu0 %4112, %v5118_v10  }
 0x2ba   :  { %10182 = vst [vmem:[#allocation257_spill] sm:$0xff] %v5516_v33  ;;  %v5519_v3 = vpop.permute.xlu0 %1486 }
 0x2bb   :  { %10183 = vst [vmem:[#allocation258_spill] sm:$0xff] %v5519_v3 }
 0x2bc   :  { %1691 = vperm.xlu1 %4110, %v5206_v28  }
 0x2bd   :  { %v5522_v23 = vpop.permute.xlu1 %1402  ;;  %1815 = vperm.xlu0 %4112, %v5140_v16  }
 0x2be   :  { %10184 = vst [vmem:[#allocation259_spill] sm:$0xff] %v5522_v23  ;;  %v5525_v61 = vpop.permute.xlu0 %1495 }
 0x2bf   :  { %10185 = vst [vmem:[#allocation260_spill] sm:$0xff] %v5525_v61 }
 0x2c0   :  { %1714 = vperm.xlu1 %4110, %v5217_v30  }
 0x2c1   :  { %v5528_v36 = vpop.permute.xlu1 %1410  ;;  %1821 = vperm.xlu0 %4112, %v5151_v18  }
 0x2c2   :  { %10186 = vst [vmem:[#allocation261_spill] sm:$0xff] %v5528_v36  ;;  %v5531_v2 = vpop.permute.xlu0 %1501 }
 0x2c3   :  { %10187 = vst [vmem:[#allocation262_spill] sm:$0xff] %v5531_v2 }
 0x2c4   :  { %1722 = vperm.xlu1 %4110, %v5228_v32  }
 0x2c5   :  { %v5534_v33 = vpop.permute.xlu1 %1418  ;;  %1827 = vperm.xlu0 %4112, %v5162_v20  }
 0x2c6   :  { %10188 = vst [vmem:[#allocation263_spill] sm:$0xff] %v5534_v33  ;;  %v5537_v3 = vpop.permute.xlu0 %1507 }
 0x2c7   :  { %10189 = vst [vmem:[#allocation264_spill] sm:$0xff] %v5537_v3 }
 0x2c8   :  { %1730 = vperm.xlu1 %4110, %v5239_v27  }
 0x2c9   :  { %v5540_v23 = vpop.permute.xlu1 %1426  ;;  %1833 = vperm.xlu0 %4112, %v5173_v22  }
 0x2ca   :  { %10190 = vst [vmem:[#allocation265_spill] sm:$0xff] %v5540_v23  ;;  %v5543_v61 = vpop.permute.xlu0 %1513 }
 0x2cb   :  { %10191 = vst [vmem:[#allocation266_spill] sm:$0xff] %v5543_v61 }
 0x2cc   :  { %1738 = vperm.xlu1 %4110, %v5250_v12  }
 0x2cd   :  { %v5546_v36 = vpop.permute.xlu1 %1434  ;;  %1839 = vperm.xlu0 %4112, %v5184_v24  }
 0x2ce   :  { %10192 = vst [vmem:[#allocation267_spill] sm:$0xff] %v5546_v36  ;;  %v5549_v2 = vpop.permute.xlu0 %1519 }
 0x2cf   :  { %10193 = vst [vmem:[#allocation268_spill] sm:$0xff] %v5549_v2 }
 0x2d0   :  { %1746 = vperm.xlu1 %4110, %v5261_v25  }
 0x2d1   :  { %v5552_v33 = vpop.permute.xlu1 %1442  ;;  %1845 = vperm.xlu0 %4112, %v5195_v26  }
 0x2d2   :  { %10194 = vst [vmem:[#allocation269_spill] sm:$0xff] %v5552_v33  ;;  %v5555_v3 = vpop.permute.xlu0 %1525 }
 0x2d3   :  { %10195 = vst [vmem:[#allocation270_spill] sm:$0xff] %v5555_v3 }
 0x2d4   :  { %1754 = vperm.xlu1 %4110, %v5272_v31  }
 0x2d5   :  { %v5558_v23 = vpop.permute.xlu1 %1450  ;;  %1851 = vperm.xlu0 %4112, %v5206_v28  }
 0x2d6   :  { %10196 = vst [vmem:[#allocation271_spill] sm:$0xff] %v5558_v23  ;;  %v5561_v61 = vpop.permute.xlu0 %1531 }
 0x2d7   :  { %10197 = vst [vmem:[#allocation272_spill] sm:$0xff] %v5561_v61 }
 0x2d8   :  { %1762 = vperm.xlu1 %4110, %v5283_v8  }
 0x2d9   :  { %1874 = vperm.xlu0 %4112, %v5217_v30  }
 0x2da   :  { %v5565_v2 = vpop.permute.xlu1 %1489  ;;  %v5567_v36 = vpop.permute.xlu0 %1554 }
 0x2db   :  { %10198 = vst [vmem:[#allocation273_spill] sm:$0xff] %v5565_v2  ;;  %10199 = vst [vmem:[#allocation274_spill] sm:$0xff] %v5567_v36 }
 0x2dc   :  { %1770 = vperm.xlu1 %4110, %v5294_v6  }
 0x2dd   :  { %1882 = vperm.xlu0 %4112, %v5228_v32  }
 0x2de   :  { %v5571_v3 = vpop.permute.xlu1 %1492  ;;  %v5573_v33 = vpop.permute.xlu0 %1562 }
 0x2df   :  { %10200 = vst [vmem:[#allocation275_spill] sm:$0xff] %v5571_v3  ;;  %10201 = vst [vmem:[#allocation276_spill] sm:$0xff] %v5573_v33 }
 0x2e0   :  { %4113 = vset.pattern.permute.xlu1 %v4264_v62 }
 0x2e1   :  { %1809 = vperm.xlu1 %4113, %v5305_v4   ;;  %1890 = vperm.xlu0 %4112, %v5239_v27  }
 0x2e2   :  { %v5577_v61 = vpop.permute.xlu1 %1498  ;;  %v5579_v23 = vpop.permute.xlu0 %1570 }
 0x2e3   :  { %10202 = vst [vmem:[#allocation277_spill] sm:$0xff] %v5577_v61  ;;  %10203 = vst [vmem:[#allocation278_spill] sm:$0xff] %v5579_v23 }
 0x2e5   :  { %1812 = vperm.xlu1 %4113, %v5129_v14   ;;  %1898 = vperm.xlu0 %4112, %v5250_v12  }
 0x2e6   :  { %v5583_v36 = vpop.permute.xlu1 %1504  ;;  %v5585_v2 = vpop.permute.xlu0 %1578 }
 0x2e7   :  { %10204 = vst [vmem:[#allocation279_spill] sm:$0xff] %v5583_v36  ;;  %10205 = vst [vmem:[#allocation280_spill] sm:$0xff] %v5585_v2 }
 0x2e9   :  { %1818 = vperm.xlu1 %4113, %v5322_v15   ;;  %1906 = vperm.xlu0 %4112, %v5261_v25  }
 0x2ea   :  { %v5589_v62 = vpop.permute.xlu1 %1510  ;;  %v5591_v3 = vpop.permute.xlu0 %1586 }
 0x2eb   :  { %10206 = vst [vmem:[#allocation281_spill] sm:$0xff] %v5589_v62  ;;  %10207 = vst [vmem:[#allocation282_spill] sm:$0xff] %v5591_v3 }
 0x2ed   :  { %1824 = vperm.xlu1 %4113, %v5333_v21   ;;  %1914 = vperm.xlu0 %4112, %v5272_v31  }
 0x2ee   :  { %v5595_v61 = vpop.permute.xlu1 %1516  ;;  %v5597_v23 = vpop.permute.xlu0 %1594 }
 0x2ef   :  { %10208 = vst [vmem:[#allocation283_spill] sm:$0xff] %v5595_v61  ;;  %10209 = vst [vmem:[#allocation284_spill] sm:$0xff] %v5597_v23  ;;  %v4265_v61 = vmov 12  }
 0x2f1   :  { %1830 = vperm.xlu1 %4113, %v5344_v19   ;;  %1922 = vperm.xlu0 %4112, %v5283_v8  }
 0x2f2   :  { %v5601_v36 = vpop.permute.xlu1 %1522  ;;  %v5603_v2 = vpop.permute.xlu0 %1602 }
 0x2f3   :  { %10210 = vst [vmem:[#allocation285_spill] sm:$0xff] %v5601_v36  ;;  %10211 = vst [vmem:[#allocation286_spill] sm:$0xff] %v5603_v2 }
 0x2f5   :  { %1836 = vperm.xlu1 %4113, %v5355_v0   ;;  %1930 = vperm.xlu0 %4112, %v5294_v6  }
 0x2f6   :  { %v5607_v62 = vpop.permute.xlu1 %1528  ;;  %v5609_v3 = vpop.permute.xlu0 %1610 }
 0x2f7   :  { %10212 = vst [vmem:[#allocation287_spill] sm:$0xff] %v5607_v62  ;;  %10213 = vst [vmem:[#allocation288_spill] sm:$0xff] %v5609_v3 }
 0x2f9   :  { %1842 = vperm.xlu1 %4113, %v5366_v11   ;;  %4115 = vset.pattern.permute.xlu0 %v4265_v61 }
 0x2fa   :  { %v5612_v23 = vpop.permute.xlu1 %1550  ;;  %1969 = vperm.xlu0 %4115, %v5305_v4  }
 0x2fb   :  { %10214 = vst [vmem:[#allocation289_spill] sm:$0xff] %v5612_v23  ;;  %v5615_v33 = vpop.permute.xlu0 %1649 }
 0x2fc   :  { %10215 = vst [vmem:[#allocation290_spill] sm:$0xff] %v5615_v33 }
 0x2fd   :  { %1848 = vperm.xlu1 %4113, %v5377_v60  }
 0x2fe   :  { %v5618_v36 = vpop.permute.xlu1 %1558  ;;  %1978 = vperm.xlu0 %4115, %v5322_v15  }
 0x2ff   :  { %10216 = vst [vmem:[#allocation291_spill] sm:$0xff] %v5618_v36  ;;  %v5621_v2 = vpop.permute.xlu0 %1658 }
 0x300   :  { %10217 = vst [vmem:[#allocation292_spill] sm:$0xff] %v5621_v2 }
 0x301   :  { %1870 = vperm.xlu1 %4113, %v5388_v9  }
 0x302   :  { %v5624_v62 = vpop.permute.xlu1 %1566  ;;  %1984 = vperm.xlu0 %4115, %v5333_v21  }
 0x303   :  { %10218 = vst [vmem:[#allocation293_spill] sm:$0xff] %v5624_v62  ;;  %v5627_v3 = vpop.permute.xlu0 %1664 }
 0x304   :  { %10219 = vst [vmem:[#allocation294_spill] sm:$0xff] %v5627_v3 }
 0x305   :  { %1878 = vperm.xlu1 %4113, %v5399_v13  }
 0x306   :  { %v5630_v23 = vpop.permute.xlu1 %1574  ;;  %1990 = vperm.xlu0 %4115, %v5344_v19  }
 0x307   :  { %10220 = vst [vmem:[#allocation295_spill] sm:$0xff] %v5630_v23  ;;  %v5633_v33 = vpop.permute.xlu0 %1670 }
 0x308   :  { %10221 = vst [vmem:[#allocation296_spill] sm:$0xff] %v5633_v33 }
 0x309   :  { %1886 = vperm.xlu1 %4113, %v5410_v17  }
 0x30a   :  { %v5636_v36 = vpop.permute.xlu1 %1582  ;;  %1996 = vperm.xlu0 %4115, %v5355_v0  }
 0x30b   :  { %10222 = vst [vmem:[#allocation297_spill] sm:$0xff] %v5636_v36  ;;  %v5639_v2 = vpop.permute.xlu0 %1676 }
 0x30c   :  { %10223 = vst [vmem:[#allocation298_spill] sm:$0xff] %v5639_v2 }
 0x30d   :  { %1894 = vperm.xlu1 %4113, %v5421_v29  }
 0x30e   :  { %v5642_v62 = vpop.permute.xlu1 %1590  ;;  %2002 = vperm.xlu0 %4115, %v5366_v11  }
 0x30f   :  { %10224 = vst [vmem:[#allocation299_spill] sm:$0xff] %v5642_v62  ;;  %v5645_v3 = vpop.permute.xlu0 %1682 }
 0x310   :  { %10225 = vst [vmem:[#allocation300_spill] sm:$0xff] %v5645_v3 }
 0x311   :  { %1902 = vperm.xlu1 %4113, %v5432_v7  }
 0x312   :  { %v5648_v23 = vpop.permute.xlu1 %1598  ;;  %2008 = vperm.xlu0 %4115, %v5377_v60  }
 0x313   :  { %10226 = vst [vmem:[#allocation301_spill] sm:$0xff] %v5648_v23  ;;  %v5651_v33 = vpop.permute.xlu0 %1688 }
 0x314   :  { %10227 = vst [vmem:[#allocation302_spill] sm:$0xff] %v5651_v33 }
 0x315   :  { %1910 = vperm.xlu1 %4113, %v5443_v1  }
 0x316   :  { %v5654_v36 = vpop.permute.xlu1 %1606  ;;  %2030 = vperm.xlu0 %4115, %v5388_v9  }
 0x317   :  { %10228 = vst [vmem:[#allocation303_spill] sm:$0xff] %v5654_v36  ;;  %v5657_v2 = vpop.permute.xlu0 %1710 }
 0x318   :  { %10229 = vst [vmem:[#allocation304_spill] sm:$0xff] %v5657_v2 }
 0x319   :  { %1918 = vperm.xlu1 %4113, %v5454_v5  }
 0x31a   :  { %2038 = vperm.xlu0 %4115, %v5399_v13  }
 0x31b   :  { %v5661_v3 = vpop.permute.xlu1 %1646  ;;  %v5663_v62 = vpop.permute.xlu0 %1718 }
 0x31c   :  { %10230 = vst [vmem:[#allocation305_spill] sm:$0xff] %v5661_v3  ;;  %10231 = vst [vmem:[#allocation306_spill] sm:$0xff] %v5663_v62 }
 0x31d   :  { %1926 = vperm.xlu1 %4113, %v5465_v63  }
 0x31e   :  { %2046 = vperm.xlu0 %4115, %v5410_v17  }
 0x31f   :  { %v5667_v33 = vpop.permute.xlu1 %1652  ;;  %v5669_v23 = vpop.permute.xlu0 %1726 }
 0x320   :  { %10232 = vst [vmem:[#allocation307_spill] sm:$0xff] %v5667_v33  ;;  %10233 = vst [vmem:[#allocation308_spill] sm:$0xff] %v5669_v23 }
 0x321   :  { %4114 = vset.pattern.permute.xlu1 %v4265_v61 }
 0x322   :  { %1966 = vperm.xlu1 %4114, %v5118_v10   ;;  %2054 = vperm.xlu0 %4115, %v5421_v29  }
 0x323   :  { %v5673_v2 = vpop.permute.xlu1 %1655  ;;  %v5675_v36 = vpop.permute.xlu0 %1734 }
 0x324   :  { %10234 = vst [vmem:[#allocation309_spill] sm:$0xff] %v5673_v2  ;;  %10235 = vst [vmem:[#allocation310_spill] sm:$0xff] %v5675_v36 }
 0x326   :  { %1972 = vperm.xlu1 %4114, %v5129_v14   ;;  %2062 = vperm.xlu0 %4115, %v5432_v7  }
 0x327   :  { %v5679_v62 = vpop.permute.xlu1 %1661  ;;  %v5681_v3 = vpop.permute.xlu0 %1742 }
 0x328   :  { %10236 = vst [vmem:[#allocation311_spill] sm:$0xff] %v5679_v62  ;;  %10237 = vst [vmem:[#allocation312_spill] sm:$0xff] %v5681_v3 }
 0x32a   :  { %1975 = vperm.xlu1 %4114, %v5140_v16   ;;  %2070 = vperm.xlu0 %4115, %v5443_v1  }
 0x32b   :  { %v5685_v61 = vpop.permute.xlu1 %1667  ;;  %v5687_v23 = vpop.permute.xlu0 %1750 }
 0x32c   :  { %10238 = vst [vmem:[#allocation313_spill] sm:$0xff] %v5685_v61  ;;  %10239 = vst [vmem:[#allocation314_spill] sm:$0xff] %v5687_v23  ;;  %v4266_v61 = vmov 13  }
 0x32e   :  { %1981 = vperm.xlu1 %4114, %v5151_v18   ;;  %2078 = vperm.xlu0 %4115, %v5454_v5  }
 0x32f   :  { %v5691_v2 = vpop.permute.xlu1 %1673  ;;  %v5693_v36 = vpop.permute.xlu0 %1758 }
 0x330   :  { %10240 = vst [vmem:[#allocation315_spill] sm:$0xff] %v5691_v2  ;;  %10241 = vst [vmem:[#allocation316_spill] sm:$0xff] %v5693_v36 }
 0x332   :  { %1987 = vperm.xlu1 %4114, %v5162_v20   ;;  %2086 = vperm.xlu0 %4115, %v5465_v63  }
 0x333   :  { %v5697_v62 = vpop.permute.xlu1 %1679  ;;  %v5699_v3 = vpop.permute.xlu0 %1766 }
 0x334   :  { %10242 = vst [vmem:[#allocation317_spill] sm:$0xff] %v5697_v62  ;;  %10243 = vst [vmem:[#allocation318_spill] sm:$0xff] %v5699_v3 }
 0x336   :  { %1993 = vperm.xlu1 %4114, %v5173_v22   ;;  %4116 = vset.pattern.permute.xlu0 %v4266_v61 }
 0x337   :  { %v5702_v23 = vpop.permute.xlu1 %1685  ;;  %2126 = vperm.xlu0 %4116, %v5118_v10  }
 0x338   :  { %10244 = vst [vmem:[#allocation319_spill] sm:$0xff] %v5702_v23  ;;  %v5705_v33 = vpop.permute.xlu0 %1806 }
 0x339   :  { %10245 = vst [vmem:[#allocation320_spill] sm:$0xff] %v5705_v33 }
 0x33a   :  { %1999 = vperm.xlu1 %4114, %v5184_v24  }
 0x33b   :  { %v5708_v2 = vpop.permute.xlu1 %1691  ;;  %2135 = vperm.xlu0 %4116, %v5140_v16  }
 0x33c   :  { %10246 = vst [vmem:[#allocation321_spill] sm:$0xff] %v5708_v2  ;;  %v5711_v36 = vpop.permute.xlu0 %1815 }
 0x33d   :  { %10247 = vst [vmem:[#allocation322_spill] sm:$0xff] %v5711_v36 }
 0x33e   :  { %2005 = vperm.xlu1 %4114, %v5195_v26  }
 0x33f   :  { %v5714_v62 = vpop.permute.xlu1 %1714  ;;  %2141 = vperm.xlu0 %4116, %v5151_v18  }
 0x340   :  { %10248 = vst [vmem:[#allocation323_spill] sm:$0xff] %v5714_v62  ;;  %v5717_v3 = vpop.permute.xlu0 %1821 }
 0x341   :  { %10249 = vst [vmem:[#allocation324_spill] sm:$0xff] %v5717_v3 }
 0x342   :  { %2011 = vperm.xlu1 %4114, %v5206_v28  }
 0x343   :  { %v5720_v23 = vpop.permute.xlu1 %1722  ;;  %2147 = vperm.xlu0 %4116, %v5162_v20  }
 0x344   :  { %10250 = vst [vmem:[#allocation325_spill] sm:$0xff] %v5720_v23  ;;  %v5723_v33 = vpop.permute.xlu0 %1827 }
 0x345   :  { %10251 = vst [vmem:[#allocation326_spill] sm:$0xff] %v5723_v33 }
 0x346   :  { %2034 = vperm.xlu1 %4114, %v5217_v30  }
 0x347   :  { %v5726_v2 = vpop.permute.xlu1 %1730  ;;  %2153 = vperm.xlu0 %4116, %v5173_v22  }
 0x348   :  { %10252 = vst [vmem:[#allocation327_spill] sm:$0xff] %v5726_v2  ;;  %v5729_v36 = vpop.permute.xlu0 %1833 }
 0x349   :  { %10253 = vst [vmem:[#allocation328_spill] sm:$0xff] %v5729_v36 }
 0x34a   :  { %2042 = vperm.xlu1 %4114, %v5228_v32  }
 0x34b   :  { %v5732_v62 = vpop.permute.xlu1 %1738  ;;  %2159 = vperm.xlu0 %4116, %v5184_v24  }
 0x34c   :  { %10254 = vst [vmem:[#allocation329_spill] sm:$0xff] %v5732_v62  ;;  %v5735_v3 = vpop.permute.xlu0 %1839 }
 0x34d   :  { %10255 = vst [vmem:[#allocation330_spill] sm:$0xff] %v5735_v3 }
 0x34e   :  { %2050 = vperm.xlu1 %4114, %v5239_v27  }
 0x34f   :  { %v5738_v23 = vpop.permute.xlu1 %1746  ;;  %2165 = vperm.xlu0 %4116, %v5195_v26  }
 0x350   :  { %10256 = vst [vmem:[#allocation331_spill] sm:$0xff] %v5738_v23  ;;  %v5741_v33 = vpop.permute.xlu0 %1845 }
 0x351   :  { %10257 = vst [vmem:[#allocation332_spill] sm:$0xff] %v5741_v33 }
 0x352   :  { %2058 = vperm.xlu1 %4114, %v5250_v12  }
 0x353   :  { %v5744_v2 = vpop.permute.xlu1 %1754  ;;  %2171 = vperm.xlu0 %4116, %v5206_v28  }
 0x354   :  { %10258 = vst [vmem:[#allocation333_spill] sm:$0xff] %v5744_v2  ;;  %v5747_v36 = vpop.permute.xlu0 %1851 }
 0x355   :  { %10259 = vst [vmem:[#allocation334_spill] sm:$0xff] %v5747_v36 }
 0x356   :  { %2066 = vperm.xlu1 %4114, %v5261_v25  }
 0x357   :  { %v5750_v62 = vpop.permute.xlu1 %1762  ;;  %2194 = vperm.xlu0 %4116, %v5217_v30  }
 0x358   :  { %10260 = vst [vmem:[#allocation335_spill] sm:$0xff] %v5750_v62  ;;  %v5753_v3 = vpop.permute.xlu0 %1874 }
 0x359   :  { %10261 = vst [vmem:[#allocation336_spill] sm:$0xff] %v5753_v3 }
 0x35a   :  { %2074 = vperm.xlu1 %4114, %v5272_v31  }
 0x35b   :  { %v5756_v23 = vpop.permute.xlu1 %1770  ;;  %2202 = vperm.xlu0 %4116, %v5228_v32  }
 0x35c   :  { %10262 = vst [vmem:[#allocation337_spill] sm:$0xff] %v5756_v23  ;;  %v5759_v33 = vpop.permute.xlu0 %1882 }
 0x35d   :  { %10263 = vst [vmem:[#allocation338_spill] sm:$0xff] %v5759_v33 }
 0x35e   :  { %2082 = vperm.xlu1 %4114, %v5283_v8  }
 0x35f   :  { %2210 = vperm.xlu0 %4116, %v5239_v27  }
 0x360   :  { %v5763_v36 = vpop.permute.xlu1 %1809  ;;  %v5765_v2 = vpop.permute.xlu0 %1890 }
 0x361   :  { %10264 = vst [vmem:[#allocation339_spill] sm:$0xff] %v5763_v36  ;;  %10265 = vst [vmem:[#allocation340_spill] sm:$0xff] %v5765_v2 }
 0x362   :  { %2090 = vperm.xlu1 %4114, %v5294_v6  }
 0x363   :  { %2218 = vperm.xlu0 %4116, %v5250_v12  }
 0x364   :  { %v5769_v3 = vpop.permute.xlu1 %1812  ;;  %v5771_v62 = vpop.permute.xlu0 %1898 }
 0x365   :  { %10266 = vst [vmem:[#allocation341_spill] sm:$0xff] %v5769_v3  ;;  %10267 = vst [vmem:[#allocation342_spill] sm:$0xff] %v5771_v62 }
 0x366   :  { %4117 = vset.pattern.permute.xlu1 %v4266_v61 }
 0x367   :  { %2129 = vperm.xlu1 %4117, %v5305_v4   ;;  %2226 = vperm.xlu0 %4116, %v5261_v25  }
 0x368   :  { %v5775_v33 = vpop.permute.xlu1 %1818  ;;  %v5777_v23 = vpop.permute.xlu0 %1906 }
 0x369   :  { %10268 = vst [vmem:[#allocation343_spill] sm:$0xff] %v5775_v33  ;;  %10269 = vst [vmem:[#allocation344_spill] sm:$0xff] %v5777_v23 }
 0x36b   :  { %2132 = vperm.xlu1 %4117, %v5129_v14   ;;  %2234 = vperm.xlu0 %4116, %v5272_v31  }
 0x36c   :  { %v5781_v2 = vpop.permute.xlu1 %1824  ;;  %v5783_v36 = vpop.permute.xlu0 %1914 }
 0x36d   :  { %10270 = vst [vmem:[#allocation345_spill] sm:$0xff] %v5781_v2  ;;  %10271 = vst [vmem:[#allocation346_spill] sm:$0xff] %v5783_v36  ;;  %v4267_v2 = vmov 14  }
 0x36f   :  { %2138 = vperm.xlu1 %4117, %v5322_v15   ;;  %2242 = vperm.xlu0 %4116, %v5283_v8  }
 0x370   :  { %v5787_v61 = vpop.permute.xlu1 %1830  ;;  %v5789_v3 = vpop.permute.xlu0 %1922 }
 0x371   :  { %10272 = vst [vmem:[#allocation347_spill] sm:$0xff] %v5787_v61  ;;  %10273 = vst [vmem:[#allocation348_spill] sm:$0xff] %v5789_v3 }
 0x373   :  { %2144 = vperm.xlu1 %4117, %v5333_v21   ;;  %2250 = vperm.xlu0 %4116, %v5294_v6  }
 0x374   :  { %v5793_v33 = vpop.permute.xlu1 %1836  ;;  %v5795_v23 = vpop.permute.xlu0 %1930 }
 0x375   :  { %10274 = vst [vmem:[#allocation349_spill] sm:$0xff] %v5793_v33  ;;  %10275 = vst [vmem:[#allocation350_spill] sm:$0xff] %v5795_v23 }
 0x377   :  { %2150 = vperm.xlu1 %4117, %v5344_v19   ;;  %4119 = vset.pattern.permute.xlu0 %v4267_v2 }
 0x378   :  { %v5798_v36 = vpop.permute.xlu1 %1842  ;;  %2289 = vperm.xlu0 %4119, %v5305_v4  }
 0x379   :  { %10276 = vst [vmem:[#allocation351_spill] sm:$0xff] %v5798_v36  ;;  %v5801_v62 = vpop.permute.xlu0 %1969 }
 0x37a   :  { %10277 = vst [vmem:[#allocation352_spill] sm:$0xff] %v5801_v62 }
 0x37b   :  { %2156 = vperm.xlu1 %4117, %v5355_v0  }
 0x37c   :  { %v5804_v61 = vpop.permute.xlu1 %1848  ;;  %2298 = vperm.xlu0 %4119, %v5322_v15  }
 0x37d   :  { %10278 = vst [vmem:[#allocation353_spill] sm:$0xff] %v5804_v61  ;;  %v5807_v3 = vpop.permute.xlu0 %1978 }
 0x37e   :  { %10279 = vst [vmem:[#allocation354_spill] sm:$0xff] %v5807_v3 }
 0x37f   :  { %2162 = vperm.xlu1 %4117, %v5366_v11  }
 0x380   :  { %v5810_v33 = vpop.permute.xlu1 %1870  ;;  %2304 = vperm.xlu0 %4119, %v5333_v21  }
 0x381   :  { %10280 = vst [vmem:[#allocation355_spill] sm:$0xff] %v5810_v33  ;;  %v5813_v23 = vpop.permute.xlu0 %1984 }
 0x382   :  { %10281 = vst [vmem:[#allocation356_spill] sm:$0xff] %v5813_v23 }
 0x383   :  { %2168 = vperm.xlu1 %4117, %v5377_v60  }
 0x384   :  { %v5816_v36 = vpop.permute.xlu1 %1878  ;;  %2310 = vperm.xlu0 %4119, %v5344_v19  }
 0x385   :  { %10282 = vst [vmem:[#allocation357_spill] sm:$0xff] %v5816_v36  ;;  %v5819_v62 = vpop.permute.xlu0 %1990 }
 0x386   :  { %10283 = vst [vmem:[#allocation358_spill] sm:$0xff] %v5819_v62 }
 0x387   :  { %2190 = vperm.xlu1 %4117, %v5388_v9  }
 0x388   :  { %v5822_v61 = vpop.permute.xlu1 %1886  ;;  %2316 = vperm.xlu0 %4119, %v5355_v0  }
 0x389   :  { %10284 = vst [vmem:[#allocation359_spill] sm:$0xff] %v5822_v61  ;;  %v5825_v3 = vpop.permute.xlu0 %1996 }
 0x38a   :  { %10285 = vst [vmem:[#allocation360_spill] sm:$0xff] %v5825_v3 }
 0x38b   :  { %2198 = vperm.xlu1 %4117, %v5399_v13  }
 0x38c   :  { %v5828_v33 = vpop.permute.xlu1 %1894  ;;  %2322 = vperm.xlu0 %4119, %v5366_v11  }
 0x38d   :  { %10286 = vst [vmem:[#allocation361_spill] sm:$0xff] %v5828_v33  ;;  %v5831_v23 = vpop.permute.xlu0 %2002 }
 0x38e   :  { %10287 = vst [vmem:[#allocation362_spill] sm:$0xff] %v5831_v23 }
 0x38f   :  { %2206 = vperm.xlu1 %4117, %v5410_v17  }
 0x390   :  { %v5834_v36 = vpop.permute.xlu1 %1902  ;;  %2328 = vperm.xlu0 %4119, %v5377_v60  }
 0x391   :  { %10288 = vst [vmem:[#allocation363_spill] sm:$0xff] %v5834_v36  ;;  %v5837_v62 = vpop.permute.xlu0 %2008 }
 0x392   :  { %10289 = vst [vmem:[#allocation364_spill] sm:$0xff] %v5837_v62 }
 0x393   :  { %2214 = vperm.xlu1 %4117, %v5421_v29  }
 0x394   :  { %v5840_v61 = vpop.permute.xlu1 %1910  ;;  %2350 = vperm.xlu0 %4119, %v5388_v9  }
 0x395   :  { %10290 = vst [vmem:[#allocation365_spill] sm:$0xff] %v5840_v61  ;;  %v5843_v3 = vpop.permute.xlu0 %2030 }
 0x396   :  { %10291 = vst [vmem:[#allocation366_spill] sm:$0xff] %v5843_v3 }
 0x397   :  { %2222 = vperm.xlu1 %4117, %v5432_v7  }
 0x398   :  { %v5846_v33 = vpop.permute.xlu1 %1918  ;;  %2358 = vperm.xlu0 %4119, %v5399_v13  }
 0x399   :  { %10292 = vst [vmem:[#allocation367_spill] sm:$0xff] %v5846_v33  ;;  %v5849_v23 = vpop.permute.xlu0 %2038 }
 0x39a   :  { %10293 = vst [vmem:[#allocation368_spill] sm:$0xff] %v5849_v23 }
 0x39b   :  { %2230 = vperm.xlu1 %4117, %v5443_v1  }
 0x39c   :  { %v5852_v36 = vpop.permute.xlu1 %1926  ;;  %2366 = vperm.xlu0 %4119, %v5410_v17  }
 0x39d   :  { %10294 = vst [vmem:[#allocation369_spill] sm:$0xff] %v5852_v36  ;;  %v5855_v62 = vpop.permute.xlu0 %2046 }
 0x39e   :  { %10295 = vst [vmem:[#allocation370_spill] sm:$0xff] %v5855_v62 }
 0x39f   :  { %2238 = vperm.xlu1 %4117, %v5454_v5  }
 0x3a0   :  { %2374 = vperm.xlu0 %4119, %v5421_v29  }
 0x3a1   :  { %v5859_v3 = vpop.permute.xlu1 %1966  ;;  %v5861_v61 = vpop.permute.xlu0 %2054 }
 0x3a2   :  { %10296 = vst [vmem:[#allocation371_spill] sm:$0xff] %v5859_v3  ;;  %10297 = vst [vmem:[#allocation372_spill] sm:$0xff] %v5861_v61 }
 0x3a3   :  { %2246 = vperm.xlu1 %4117, %v5465_v63  }
 0x3a4   :  { %2382 = vperm.xlu0 %4119, %v5432_v7  }
 0x3a5   :  { %v5865_v23 = vpop.permute.xlu1 %1972  ;;  %v5867_v33 = vpop.permute.xlu0 %2062 }
 0x3a6   :  { %10298 = vst [vmem:[#allocation373_spill] sm:$0xff] %v5865_v23  ;;  %10299 = vst [vmem:[#allocation374_spill] sm:$0xff] %v5867_v33 }
 0x3a7   :  { %4118 = vset.pattern.permute.xlu1 %v4267_v2 }
 0x3a8   :  { %2286 = vperm.xlu1 %4118, %v5118_v10   ;;  %2390 = vperm.xlu0 %4119, %v5443_v1  }
 0x3a9   :  { %v5871_v62 = vpop.permute.xlu1 %1975  ;;  %v5873_v36 = vpop.permute.xlu0 %2070 }
 0x3aa   :  { %10300 = vst [vmem:[#allocation375_spill] sm:$0xff] %v5871_v62  ;;  %10301 = vst [vmem:[#allocation376_spill] sm:$0xff] %v5873_v36  ;;  %v4268_v62 = vmov 15  }
 0x3ac   :  { %2292 = vperm.xlu1 %4118, %v5129_v14   ;;  %2398 = vperm.xlu0 %4119, %v5454_v5  }
 0x3ad   :  { %v5877_v61 = vpop.permute.xlu1 %1981  ;;  %v5879_v3 = vpop.permute.xlu0 %2078 }
 0x3ae   :  { %10302 = vst [vmem:[#allocation377_spill] sm:$0xff] %v5877_v61  ;;  %10303 = vst [vmem:[#allocation378_spill] sm:$0xff] %v5879_v3 }
 0x3b0   :  { %2295 = vperm.xlu1 %4118, %v5140_v16   ;;  %2406 = vperm.xlu0 %4119, %v5465_v63  }
 0x3b1   :  { %v5883_v2 = vpop.permute.xlu1 %1987  ;;  %v5885_v33 = vpop.permute.xlu0 %2086 }
 0x3b2   :  { %10304 = vst [vmem:[#allocation379_spill] sm:$0xff] %v5883_v2  ;;  %10305 = vst [vmem:[#allocation380_spill] sm:$0xff] %v5885_v33 }
 0x3b4   :  { %2301 = vperm.xlu1 %4118, %v5151_v18   ;;  %4120 = vset.pattern.permute.xlu0 %v4268_v62 }
 0x3b5   :  { %v5888_v36 = vpop.permute.xlu1 %1993  ;;  %2446 = vperm.xlu0 %4120, %v5118_v10  }
 0x3b6   :  { %10306 = vst [vmem:[#allocation381_spill] sm:$0xff] %v5888_v36  ;;  %v5891_v23 = vpop.permute.xlu0 %2126  ;;  %v10433_v36 = vmov 18  }
 0x3b7   :  { %10307 = vst [vmem:[#allocation382_spill] sm:$0xff] %v5891_v23 }
 0x3b8   :  { %2307 = vperm.xlu1 %4118, %v5162_v20  }
 0x3b9   :  { %v5894_v61 = vpop.permute.xlu1 %1999  ;;  %2455 = vperm.xlu0 %4120, %v5140_v16  }
 0x3ba   :  { %10308 = vst [vmem:[#allocation383_spill] sm:$0xff] %v5894_v61  ;;  %v5897_v3 = vpop.permute.xlu0 %2135 }
 0x3bb   :  { %10309 = vst [vmem:[#allocation384_spill] sm:$0xff] %v5897_v3 }
 0x3bc   :  { %2313 = vperm.xlu1 %4118, %v5173_v22  }
 0x3bd   :  { %v5900_v2 = vpop.permute.xlu1 %2005  ;;  %2461 = vperm.xlu0 %4120, %v5151_v18  }
 0x3be   :  { %10310 = vst [vmem:[#allocation385_spill] sm:$0xff] %v5900_v2  ;;  %v5903_v33 = vpop.permute.xlu0 %2141 }
 0x3bf   :  { %10311 = vst [vmem:[#allocation386_spill] sm:$0xff] %v5903_v33 }
 0x3c0   :  { %2319 = vperm.xlu1 %4118, %v5184_v24  }
 0x3c1   :  { %v5906_v10 = vpop.permute.xlu1 %2011  ;;  %2467 = vperm.xlu0 %4120, %v5162_v20  }
 0x3c2   :  { %10312 = vst [vmem:[#allocation387_spill] sm:$0xff] %v5906_v10  ;;  %v5909_v23 = vpop.permute.xlu0 %2147 }
 0x3c3   :  { %10313 = vst [vmem:[#allocation388_spill] sm:$0xff] %v5909_v23 }
 0x3c4   :  { %2325 = vperm.xlu1 %4118, %v5195_v26  }
 0x3c5   :  { %v5912_v16 = vpop.permute.xlu1 %2034  ;;  %2473 = vperm.xlu0 %4120, %v5173_v22  }
 0x3c6   :  { %10314 = vst [vmem:[#allocation389_spill] sm:$0xff] %v5912_v16  ;;  %v5915_v3 = vpop.permute.xlu0 %2153 }
 0x3c7   :  { %10315 = vst [vmem:[#allocation390_spill] sm:$0xff] %v5915_v3 }
 0x3c8   :  { %2331 = vperm.xlu1 %4118, %v5206_v28  }
 0x3c9   :  { %v5918_v18 = vpop.permute.xlu1 %2042  ;;  %2479 = vperm.xlu0 %4120, %v5184_v24  }
 0x3ca   :  { %10316 = vst [vmem:[#allocation391_spill] sm:$0xff] %v5918_v18  ;;  %v5921_v33 = vpop.permute.xlu0 %2159  ;;  %v9883_v18 = vmov 19  }
 0x3cb   :  { %10317 = vst [vmem:[#allocation392_spill] sm:$0xff] %v5921_v33 }
 0x3cc   :  { %2354 = vperm.xlu1 %4118, %v5217_v30  }
 0x3cd   :  { %v5924_v20 = vpop.permute.xlu1 %2050  ;;  %2485 = vperm.xlu0 %4120, %v5195_v26  }
 0x3ce   :  { %10318 = vst [vmem:[#allocation393_spill] sm:$0xff] %v5924_v20  ;;  %v5927_v23 = vpop.permute.xlu0 %2165  ;;  %v6415_v20 = vld [vmem:[%s9675_s1 + $0x70] sm:$0xff] }
 0x3cf   :  { %10319 = vst [vmem:[#allocation394_spill] sm:$0xff] %v5927_v23 }
 0x3d0   :  { %2362 = vperm.xlu1 %4118, %v5228_v32  }
 0x3d1   :  { %v5930_v22 = vpop.permute.xlu1 %2058  ;;  %2491 = vperm.xlu0 %4120, %v5206_v28  }
 0x3d2   :  { %10320 = vst [vmem:[#allocation395_spill] sm:$0xff] %v5930_v22  ;;  %v5933_v3 = vpop.permute.xlu0 %2171 }
 0x3d3   :  { %10321 = vst [vmem:[#allocation396_spill] sm:$0xff] %v5933_v3 }
 0x3d4   :  { %2370 = vperm.xlu1 %4118, %v5239_v27  }
 0x3d5   :  { %v5936_v24 = vpop.permute.xlu1 %2066  ;;  %2514 = vperm.xlu0 %4120, %v5217_v30  }
 0x3d6   :  { %10322 = vst [vmem:[#allocation397_spill] sm:$0xff] %v5936_v24  ;;  %v5939_v33 = vpop.permute.xlu0 %2194 }
 0x3d7   :  { %10323 = vst [vmem:[#allocation398_spill] sm:$0xff] %v5939_v33 }
 0x3d8   :  { %2378 = vperm.xlu1 %4118, %v5250_v12  }
 0x3d9   :  { %v5942_v26 = vpop.permute.xlu1 %2074  ;;  %2522 = vperm.xlu0 %4120, %v5228_v32  }
 0x3da   :  { %10324 = vst [vmem:[#allocation399_spill] sm:$0xff] %v5942_v26  ;;  %v5945_v23 = vpop.permute.xlu0 %2202 }
 0x3db   :  { %10325 = vst [vmem:[#allocation400_spill] sm:$0xff] %v5945_v23 }
 0x3dc   :  { %2386 = vperm.xlu1 %4118, %v5261_v25  }
 0x3dd   :  { %v5948_v28 = vpop.permute.xlu1 %2082  ;;  %2530 = vperm.xlu0 %4120, %v5239_v27  }
 0x3de   :  { %10326 = vst [vmem:[#allocation401_spill] sm:$0xff] %v5948_v28  ;;  %v5951_v3 = vpop.permute.xlu0 %2210 }
 0x3df   :  { %10327 = vst [vmem:[#allocation402_spill] sm:$0xff] %v5951_v3 }
 0x3e0   :  { %2394 = vperm.xlu1 %4118, %v5272_v31  }
 0x3e1   :  { %v5954_v30 = vpop.permute.xlu1 %2090  ;;  %2538 = vperm.xlu0 %4120, %v5250_v12  }
 0x3e2   :  { %10328 = vst [vmem:[#allocation403_spill] sm:$0xff] %v5954_v30  ;;  %v5957_v33 = vpop.permute.xlu0 %2218 }
 0x3e3   :  { %10329 = vst [vmem:[#allocation404_spill] sm:$0xff] %v5957_v33 }
 0x3e4   :  { %2402 = vperm.xlu1 %4118, %v5283_v8  }
 0x3e5   :  { %2546 = vperm.xlu0 %4120, %v5261_v25  }
 0x3e6   :  { %v5961_v32 = vpop.permute.xlu1 %2129  ;;  %v5963_v23 = vpop.permute.xlu0 %2226 }
 0x3e7   :  { %10330 = vst [vmem:[#allocation405_spill] sm:$0xff] %v5961_v32  ;;  %10331 = vst [vmem:[#allocation406_spill] sm:$0xff] %v5963_v23 }
 0x3e8   :  { %2410 = vperm.xlu1 %4118, %v5294_v6  }
 0x3e9   :  { %2554 = vperm.xlu0 %4120, %v5272_v31  }
 0x3ea   :  { %v5967_v27 = vpop.permute.xlu1 %2132  ;;  %v5969_v3 = vpop.permute.xlu0 %2234 }
 0x3eb   :  { %10332 = vst [vmem:[#allocation407_spill] sm:$0xff] %v5967_v27  ;;  %10333 = vst [vmem:[#allocation408_spill] sm:$0xff] %v5969_v3  ;;  %v4269_v27 = vmov 16  }
 0x3ec   :  { %4121 = vset.pattern.permute.xlu1 %v4268_v62 }
 0x3ed   :  { %2449 = vperm.xlu1 %4121, %v5305_v4   ;;  %2562 = vperm.xlu0 %4120, %v5283_v8  }
 0x3ee   :  { %v5973_v12 = vpop.permute.xlu1 %2138  ;;  %v5975_v25 = vpop.permute.xlu0 %2242 }
 0x3ef   :  { %10334 = vst [vmem:[#allocation409_spill] sm:$0xff] %v5973_v12  ;;  %10335 = vst [vmem:[#allocation410_spill] sm:$0xff] %v5975_v25 }
 0x3f1   :  { %2452 = vperm.xlu1 %4121, %v5129_v14   ;;  %2570 = vperm.xlu0 %4120, %v5294_v6  }
 0x3f2   :  { %v5979_v23 = vpop.permute.xlu1 %2144  ;;  %v5981_v31 = vpop.permute.xlu0 %2250 }
 0x3f3   :  { %10336 = vst [vmem:[#allocation411_spill] sm:$0xff] %v5979_v23  ;;  %10337 = vst [vmem:[#allocation412_spill] sm:$0xff] %v5981_v31 }
 0x3f5   :  { %2458 = vperm.xlu1 %4121, %v5322_v15   ;;  %4123 = vset.pattern.permute.xlu0 %v4269_v27 }
 0x3f6   :  { %v5984_v62 = vpop.permute.xlu1 %2150  ;;  %2609 = vperm.xlu0 %4123, %v5305_v4  }
 0x3f7   :  { %10338 = vst [vmem:[#allocation413_spill] sm:$0xff] %v5984_v62  ;;  %v5987_v8 = vpop.permute.xlu0 %2289 }
 0x3f8   :  { %10339 = vst [vmem:[#allocation414_spill] sm:$0xff] %v5987_v8  ;;  %v10400_v8 = vmov 17  }
 0x3f9   :  { %2464 = vperm.xlu1 %4121, %v5333_v21  }
 0x3fa   :  { %v5990_v12 = vpop.permute.xlu1 %2156  ;;  %2618 = vperm.xlu0 %4123, %v5322_v15  }
 0x3fb   :  { %10340 = vst [vmem:[#allocation415_spill] sm:$0xff] %v5990_v12  ;;  %v5993_v6 = vpop.permute.xlu0 %2298 }
 0x3fc   :  { %10341 = vst [vmem:[#allocation416_spill] sm:$0xff] %v5993_v6 }
 0x3fd   :  { %2470 = vperm.xlu1 %4121, %v5344_v19  }
 0x3fe   :  { %v5996_v14 = vpop.permute.xlu1 %2162  ;;  %2624 = vperm.xlu0 %4123, %v5333_v21  }
 0x3ff   :  { %10342 = vst [vmem:[#allocation417_spill] sm:$0xff] %v5996_v14  ;;  %v5999_v23 = vpop.permute.xlu0 %2304 }
 0x400   :  { %10343 = vst [vmem:[#allocation418_spill] sm:$0xff] %v5999_v23 }
 0x401   :  { %2476 = vperm.xlu1 %4121, %v5355_v0  }
 0x402   :  { %v6002_v4 = vpop.permute.xlu1 %2168  ;;  %2630 = vperm.xlu0 %4123, %v5344_v19  }
 0x403   :  { %10344 = vst [vmem:[#allocation419_spill] sm:$0xff] %v6002_v4  ;;  %v6005_v62 = vpop.permute.xlu0 %2310  ;;  %v6137_v4 = vld [vmem:[%s9674_s0 + $0x58] sm:$0xff] }
 0x404   :  { %10345 = vst [vmem:[#allocation420_spill] sm:$0xff] %v6005_v62 }
 0x405   :  { %2482 = vperm.xlu1 %4121, %v5366_v11  }
 0x406   :  { %v6008_v15 = vpop.permute.xlu1 %2190  ;;  %2636 = vperm.xlu0 %4123, %v5355_v0  }
 0x407   :  { %10346 = vst [vmem:[#allocation421_spill] sm:$0xff] %v6008_v15  ;;  %v6011_v6 = vpop.permute.xlu0 %2316  ;;  %v6148_v15 = vld [vmem:[%s9674_s0 + $0x68] sm:$0xff] }
 0x408   :  { %10347 = vst [vmem:[#allocation422_spill] sm:$0xff] %v6011_v6 }
 0x409   :  { %2488 = vperm.xlu1 %4121, %v5377_v60  }
 0x40a   :  { %v6014_v21 = vpop.permute.xlu1 %2198  ;;  %2642 = vperm.xlu0 %4123, %v5366_v11  }
 0x40b   :  { %10348 = vst [vmem:[#allocation423_spill] sm:$0xff] %v6014_v21  ;;  %v6017_v23 = vpop.permute.xlu0 %2322  ;;  %v6126_v21 = vld [vmem:[%s9674_s0 + $0x48] sm:$0xff] }
 0x40c   :  { %10349 = vst [vmem:[#allocation424_spill] sm:$0xff] %v6017_v23 }
 0x40d   :  { %2510 = vperm.xlu1 %4121, %v5388_v9  }
 0x40e   :  { %v6020_v19 = vpop.permute.xlu1 %2206  ;;  %2648 = vperm.xlu0 %4123, %v5377_v60  }
 0x40f   :  { %10350 = vst [vmem:[#allocation425_spill] sm:$0xff] %v6020_v19  ;;  %v6023_v62 = vpop.permute.xlu0 %2328 }
 0x410   :  { %10351 = vst [vmem:[#allocation426_spill] sm:$0xff] %v6023_v62 }
 0x411   :  { %2518 = vperm.xlu1 %4121, %v5399_v13  }
 0x412   :  { %v6026_v0 = vpop.permute.xlu1 %2214  ;;  %2670 = vperm.xlu0 %4123, %v5388_v9  }
 0x413   :  { %10352 = vst [vmem:[#allocation427_spill] sm:$0xff] %v6026_v0  ;;  %v6029_v6 = vpop.permute.xlu0 %2350 }
 0x414   :  { %10353 = vst [vmem:[#allocation428_spill] sm:$0xff] %v6029_v6 }
 0x415   :  { %2526 = vperm.xlu1 %4121, %v5410_v17  }
 0x416   :  { %v6032_v11 = vpop.permute.xlu1 %2222  ;;  %2678 = vperm.xlu0 %4123, %v5399_v13  }
 0x417   :  { %10354 = vst [vmem:[#allocation429_spill] sm:$0xff] %v6032_v11  ;;  %v6035_v23 = vpop.permute.xlu0 %2358 }
 0x418   :  { %10355 = vst [vmem:[#allocation430_spill] sm:$0xff] %v6035_v23 }
 0x419   :  { %2534 = vperm.xlu1 %4121, %v5421_v29  }
 0x41a   :  { %v6038_v60 = vpop.permute.xlu1 %2230  ;;  %2686 = vperm.xlu0 %4123, %v5410_v17  }
 0x41b   :  { %10356 = vst [vmem:[#allocation431_spill] sm:$0xff] %v6038_v60  ;;  %v6041_v62 = vpop.permute.xlu0 %2366 }
 0x41c   :  { %10357 = vst [vmem:[#allocation432_spill] sm:$0xff] %v6041_v62 }
 0x41d   :  { %2542 = vperm.xlu1 %4121, %v5432_v7  }
 0x41e   :  { %v6044_v9 = vpop.permute.xlu1 %2238  ;;  %2694 = vperm.xlu0 %4123, %v5421_v29  }
 0x41f   :  { %10358 = vst [vmem:[#allocation433_spill] sm:$0xff] %v6044_v9  ;;  %v6047_v6 = vpop.permute.xlu0 %2374 }
 0x420   :  { %10359 = vst [vmem:[#allocation434_spill] sm:$0xff] %v6047_v6 }
 0x421   :  { %2550 = vperm.xlu1 %4121, %v5443_v1  }
 0x422   :  { %v6050_v13 = vpop.permute.xlu1 %2246  ;;  %2702 = vperm.xlu0 %4123, %v5432_v7   ;;  %v6070_v7 = vld [vmem:[%s9674_s0] sm:$0xff] }
 0x423   :  { %10360 = vst [vmem:[#allocation435_spill] sm:$0xff] %v6050_v13  ;;  %v6053_v23 = vpop.permute.xlu0 %2382 }
 0x424   :  { %10361 = vst [vmem:[#allocation436_spill] sm:$0xff] %v6053_v23 }
 0x425   :  { %2558 = vperm.xlu1 %4121, %v5454_v5  }
 0x426   :  { %2710 = vperm.xlu0 %4123, %v5443_v1  }
 0x427   :  { %v6057_v17 = vpop.permute.xlu1 %2286  ;;  %v6059_v62 = vpop.permute.xlu0 %2390 }
 0x428   :  { %10362 = vst [vmem:[#allocation437_spill] sm:$0xff] %v6057_v17  ;;  %10363 = vst [vmem:[#allocation438_spill] sm:$0xff] %v6059_v62 }
 0x429   :  { %2566 = vperm.xlu1 %4121, %v5465_v63  }
 0x42a   :  { %2718 = vperm.xlu0 %4123, %v5454_v5   ;;  %v6081_v5 = vld [vmem:[%s9674_s0 + $0x10] sm:$0xff] }
 0x42b   :  { %v6063_v29 = vpop.permute.xlu1 %2292  ;;  %v6065_v6 = vpop.permute.xlu0 %2398 }
 0x42c   :  { %10364 = vst [vmem:[#allocation439_spill] sm:$0xff] %v6063_v29  ;;  %10365 = vst [vmem:[#allocation440_spill] sm:$0xff] %v6065_v6  ;;  %v6115_v29 = vld [vmem:[%s9674_s0 + $0x38] sm:$0xff] }
 0x42d   :  { %4122 = vset.pattern.permute.xlu1 %v4269_v27  ;;  %v9856_v27 = vmov 17  }
 0x42e   :  { %2606 = vperm.xlu1 %4122, %v6070_v7   ;;  %2726 = vperm.xlu0 %4123, %v5465_v63   ;;  %v6093_v63 = vld [vmem:[%s9674_s0 + $0x18] sm:$0xff] }
 0x42f   :  { %v6074_v1 = vpop.permute.xlu1 %2295  ;;  %v6076_v62 = vpop.permute.xlu0 %2406 }
 0x430   :  { %10366 = vst [vmem:[#allocation441_spill] sm:$0xff] %v6074_v1  ;;  %10367 = vst [vmem:[#allocation442_spill] sm:$0xff] %v6076_v62 }
 0x432   :  { %2612 = vperm.xlu1 %4122, %v6081_v5   ;;  %4124 = vset.pattern.permute.xlu0 %v9856_v27  ;;  %v6104_v27 = vld [vmem:[%s9674_s0 + $0x28] sm:$0xff] }
 0x433   :  { %v6085_v6 = vpop.permute.xlu1 %2301  ;;  %2766 = vperm.xlu0 %4124, %v6070_v7  }
 0x434   :  { %10368 = vst [vmem:[#allocation443_spill] sm:$0xff] %v6085_v6  ;;  %v6088_v23 = vpop.permute.xlu0 %2446 }
 0x435   :  { %10369 = vst [vmem:[#allocation444_spill] sm:$0xff] %v6088_v23 }
 0x436   :  { %2615 = vperm.xlu1 %4122, %v6093_v63  }
 0x437   :  { %v6096_v62 = vpop.permute.xlu1 %2307  ;;  %2775 = vperm.xlu0 %4124, %v6093_v63  }
 0x438   :  { %10370 = vst [vmem:[#allocation445_spill] sm:$0xff] %v6096_v62  ;;  %v6099_v13 = vpop.permute.xlu0 %2455 }
 0x439   :  { %10371 = vst [vmem:[#allocation446_spill] sm:$0xff] %v6099_v13 }
 0x43a   :  { %2621 = vperm.xlu1 %4122, %v6104_v27  }
 0x43b   :  { %v6107_v23 = vpop.permute.xlu1 %2313  ;;  %2781 = vperm.xlu0 %4124, %v6104_v27  }
 0x43c   :  { %10372 = vst [vmem:[#allocation447_spill] sm:$0xff] %v6107_v23  ;;  %v6110_v9 = vpop.permute.xlu0 %2461 }
 0x43d   :  { %10373 = vst [vmem:[#allocation448_spill] sm:$0xff] %v6110_v9 }
 0x43e   :  { %2627 = vperm.xlu1 %4122, %v6115_v29  }
 0x43f   :  { %v6118_v17 = vpop.permute.xlu1 %2319  ;;  %2787 = vperm.xlu0 %4124, %v6115_v29  }
 0x440   :  { %10374 = vst [vmem:[#allocation449_spill] sm:$0xff] %v6118_v17  ;;  %v6121_v60 = vpop.permute.xlu0 %2467 }
 0x441   :  { %10375 = vst [vmem:[#allocation450_spill] sm:$0xff] %v6121_v60  ;;  %v6170_v60 = vld [vmem:[%s9675_s1 + $0x8] sm:$0xff] }
 0x442   :  { %2633 = vperm.xlu1 %4122, %v6126_v21  }
 0x443   :  { %v6129_v11 = vpop.permute.xlu1 %2325  ;;  %2793 = vperm.xlu0 %4124, %v6126_v21  }
 0x444   :  { %10376 = vst [vmem:[#allocation451_spill] sm:$0xff] %v6129_v11  ;;  %v6132_v0 = vpop.permute.xlu0 %2473 }
 0x445   :  { %10377 = vst [vmem:[#allocation452_spill] sm:$0xff] %v6132_v0 }
 0x446   :  { %2639 = vperm.xlu1 %4122, %v6137_v4  }
 0x447   :  { %v6140_v19 = vpop.permute.xlu1 %2331  ;;  %2799 = vperm.xlu0 %4124, %v6137_v4  }
 0x448   :  { %10378 = vst [vmem:[#allocation453_spill] sm:$0xff] %v6140_v19  ;;  %v6143_v14 = vpop.permute.xlu0 %2479  ;;  %v6159_v19 = vld [vmem:[%s9674_s0 + $0x78] sm:$0xff] }
 0x449   :  { %10379 = vst [vmem:[#allocation454_spill] sm:$0xff] %v6143_v14 }
 0x44a   :  { %2645 = vperm.xlu1 %4122, %v6148_v15  }
 0x44b   :  { %v6151_v12 = vpop.permute.xlu1 %2354  ;;  %2805 = vperm.xlu0 %4124, %v6148_v15  }
 0x44c   :  { %10380 = vst [vmem:[#allocation455_spill] sm:$0xff] %v6151_v12  ;;  %v6154_v0 = vpop.permute.xlu0 %2485 }
 0x44d   :  { %10381 = vst [vmem:[#allocation456_spill] sm:$0xff] %v6154_v0 }
 0x44e   :  { %2651 = vperm.xlu1 %4122, %v6159_v19  }
 0x44f   :  { %v6162_v14 = vpop.permute.xlu1 %2362  ;;  %2811 = vperm.xlu0 %4124, %v6159_v19  }
 0x450   :  { %10382 = vst [vmem:[#allocation457_spill] sm:$0xff] %v6162_v14  ;;  %v6165_v11 = vpop.permute.xlu0 %2491  ;;  %v6181_v14 = vld [vmem:[%s9675_s1 + $0x18] sm:$0xff] }
 0x451   :  { %10383 = vst [vmem:[#allocation458_spill] sm:$0xff] %v6165_v11 }
 0x452   :  { %2674 = vperm.xlu1 %4122, %v6170_v60  }
 0x453   :  { %v6173_v0 = vpop.permute.xlu1 %2370  ;;  %2834 = vperm.xlu0 %4124, %v6170_v60  }
 0x454   :  { %10384 = vst [vmem:[#allocation459_spill] sm:$0xff] %v6173_v0  ;;  %v6176_v17 = vpop.permute.xlu0 %2514  ;;  %v6192_v0 = vld [vmem:[%s9675_s1 + $0x28] sm:$0xff] }
 0x455   :  { %10385 = vst [vmem:[#allocation460_spill] sm:$0xff] %v6176_v17 }
 0x456   :  { %2682 = vperm.xlu1 %4122, %v6181_v14  }
 0x457   :  { %v6184_v11 = vpop.permute.xlu1 %2378  ;;  %2842 = vperm.xlu0 %4124, %v6181_v14  }
 0x458   :  { %10386 = vst [vmem:[#allocation461_spill] sm:$0xff] %v6184_v11  ;;  %v6187_v9 = vpop.permute.xlu0 %2522  ;;  %v6203_v11 = vld [vmem:[%s9675_s1 + $0x38] sm:$0xff] }
 0x459   :  { %10387 = vst [vmem:[#allocation462_spill] sm:$0xff] %v6187_v9 }
 0x45a   :  { %2690 = vperm.xlu1 %4122, %v6192_v0  }
 0x45b   :  { %v6195_v17 = vpop.permute.xlu1 %2386  ;;  %2850 = vperm.xlu0 %4124, %v6192_v0  }
 0x45c   :  { %10388 = vst [vmem:[#allocation463_spill] sm:$0xff] %v6195_v17  ;;  %v6198_v12 = vpop.permute.xlu0 %2530  ;;  %v6214_v17 = vld [vmem:[%s9675_s1 + $0x48] sm:$0xff] }
 0x45d   :  { %10389 = vst [vmem:[#allocation464_spill] sm:$0xff] %v6198_v12 }
 0x45e   :  { %2698 = vperm.xlu1 %4122, %v6203_v11  }
 0x45f   :  { %v6206_v9 = vpop.permute.xlu1 %2394  ;;  %2858 = vperm.xlu0 %4124, %v6203_v11  }
 0x460   :  { %10390 = vst [vmem:[#allocation465_spill] sm:$0xff] %v6206_v9  ;;  %v6209_v23 = vpop.permute.xlu0 %2538  ;;  %v6225_v9 = vld [vmem:[%s9675_s1 + $0x58] sm:$0xff] }
 0x461   :  { %10391 = vst [vmem:[#allocation466_spill] sm:$0xff] %v6209_v23 }
 0x462   :  { %2706 = vperm.xlu1 %4122, %v6214_v17  }
 0x463   :  { %v6217_v12 = vpop.permute.xlu1 %2402  ;;  %2866 = vperm.xlu0 %4124, %v6214_v17  }
 0x464   :  { %10392 = vst [vmem:[#allocation467_spill] sm:$0xff] %v6217_v12  ;;  %v6220_v13 = vpop.permute.xlu0 %2546  ;;  %v6236_v12 = vld [vmem:[%s9675_s1 + $0x68] sm:$0xff] }
 0x465   :  { %10393 = vst [vmem:[#allocation468_spill] sm:$0xff] %v6220_v13 }
 0x466   :  { %2714 = vperm.xlu1 %4122, %v6225_v9  }
 0x467   :  { %v6228_v23 = vpop.permute.xlu1 %2410  ;;  %2874 = vperm.xlu0 %4124, %v6225_v9  }
 0x468   :  { %10394 = vst [vmem:[#allocation469_spill] sm:$0xff] %v6228_v23  ;;  %v6231_v62 = vpop.permute.xlu0 %2554  ;;  %v6247_v23 = vld [vmem:[%s9675_s1 + $0x78] sm:$0xff] }
 0x469   :  { %10395 = vst [vmem:[#allocation470_spill] sm:$0xff] %v6231_v62 }
 0x46a   :  { %2722 = vperm.xlu1 %4122, %v6236_v12  }
 0x46b   :  { %2882 = vperm.xlu0 %4124, %v6236_v12  }
 0x46c   :  { %v6240_v13 = vpop.permute.xlu1 %2449  ;;  %v6242_v6 = vpop.permute.xlu0 %2562 }
 0x46d   :  { %10396 = vst [vmem:[#allocation471_spill] sm:$0xff] %v6240_v13  ;;  %10397 = vst [vmem:[#allocation472_spill] sm:$0xff] %v6242_v6  ;;  %v6259_v13 = vld [vmem:[%s9674_s0 + $0x8] sm:$0xff]  ;;  %v9872_v6 = vmov 18  }
 0x46e   :  { %2730 = vperm.xlu1 %4122, %v6247_v23  }
 0x46f   :  { %2890 = vperm.xlu0 %4124, %v6247_v23  }
 0x470   :  { %v6251_v62 = vpop.permute.xlu1 %2452  ;;  %v6253_v1 = vpop.permute.xlu0 %2570 }
 0x471   :  { %10398 = vst [vmem:[#allocation473_spill] sm:$0xff] %v6251_v62  ;;  %10399 = vst [vmem:[#allocation474_spill] sm:$0xff] %v6253_v1 }
 0x472   :  { %4125 = vset.pattern.permute.xlu1 %v10400_v8  ;;  %v6274_v8 = vld [vmem:[%s9674_s0 + $0x20] sm:$0xff] }
 0x473   :  { %2769 = vperm.xlu1 %4125, %v6259_v13   ;;  %4127 = vset.pattern.permute.xlu0 %v9872_v6 }
 0x474   :  { %v6263_v31 = vpop.permute.xlu1 %2458  ;;  %2929 = vperm.xlu0 %4127, %v6259_v13  }
 0x475   :  { %10401 = vst [vmem:[#allocation475_spill] sm:$0xff] %v6263_v31  ;;  %v6266_v25 = vpop.permute.xlu0 %2609  ;;  %v6285_v31 = vld [vmem:[%s9674_s0 + $0x30] sm:$0xff] }
 0x476   :  { %10402 = vst [vmem:[#allocation476_spill] sm:$0xff] %v6266_v25 }
 0x477   :  { %2772 = vperm.xlu1 %4125, %v6081_v5  }
 0x478   :  { %v6269_v62 = vpop.permute.xlu1 %2464  ;;  %2938 = vperm.xlu0 %4127, %v6274_v8  }
 0x479   :  { %10403 = vst [vmem:[#allocation477_spill] sm:$0xff] %v6269_v62  ;;  %v6277_v1 = vpop.permute.xlu0 %2618 }
 0x47a   :  { %10404 = vst [vmem:[#allocation478_spill] sm:$0xff] %v6277_v1  ;;  %v6296_v1 = vld [vmem:[%s9674_s0 + $0x40] sm:$0xff] }
 0x47b   :  { %2778 = vperm.xlu1 %4125, %v6274_v8  }
 0x47c   :  { %v6280_v6 = vpop.permute.xlu1 %2470  ;;  %2944 = vperm.xlu0 %4127, %v6285_v31  }
 0x47d   :  { %10405 = vst [vmem:[#allocation479_spill] sm:$0xff] %v6280_v6  ;;  %v6288_v62 = vpop.permute.xlu0 %2624 }
 0x47e   :  { %10406 = vst [vmem:[#allocation480_spill] sm:$0xff] %v6288_v62  ;;  %v6307_v62 = vld [vmem:[%s9674_s0 + $0x50] sm:$0xff] }
 0x47f   :  { %2784 = vperm.xlu1 %4125, %v6285_v31  }
 0x480   :  { %v6291_v25 = vpop.permute.xlu1 %2476  ;;  %2950 = vperm.xlu0 %4127, %v6296_v1  }
 0x481   :  { %10407 = vst [vmem:[#allocation481_spill] sm:$0xff] %v6291_v25  ;;  %v6299_v6 = vpop.permute.xlu0 %2630 }
 0x482   :  { %10408 = vst [vmem:[#allocation482_spill] sm:$0xff] %v6299_v6  ;;  %v6318_v6 = vld [vmem:[%s9674_s0 + $0x60] sm:$0xff] }
 0x483   :  { %2790 = vperm.xlu1 %4125, %v6296_v1  }
 0x484   :  { %v6302_v3 = vpop.permute.xlu1 %2482  ;;  %2956 = vperm.xlu0 %4127, %v6307_v62  }
 0x485   :  { %10409 = vst [vmem:[#allocation483_spill] sm:$0xff] %v6302_v3  ;;  %v6310_v25 = vpop.permute.xlu0 %2636 }
 0x486   :  { %10410 = vst [vmem:[#allocation484_spill] sm:$0xff] %v6310_v25  ;;  %v6329_v25 = vld [vmem:[%s9674_s0 + $0x70] sm:$0xff] }
 0x487   :  { %2796 = vperm.xlu1 %4125, %v6307_v62  }
 0x488   :  { %v6313_v33 = vpop.permute.xlu1 %2488  ;;  %2962 = vperm.xlu0 %4127, %v6318_v6  }
 0x489   :  { %10411 = vst [vmem:[#allocation485_spill] sm:$0xff] %v6313_v33  ;;  %v6321_v3 = vpop.permute.xlu0 %2642 }
 0x48a   :  { %10412 = vst [vmem:[#allocation486_spill] sm:$0xff] %v6321_v3  ;;  %v6340_v3 = vld [vmem:[%s9675_s1] sm:$0xff] }
 0x48b   :  { %2802 = vperm.xlu1 %4125, %v6318_v6  }
 0x48c   :  { %v6324_v30 = vpop.permute.xlu1 %2510  ;;  %2968 = vperm.xlu0 %4127, %v6329_v25  }
 0x48d   :  { %10413 = vst [vmem:[#allocation487_spill] sm:$0xff] %v6324_v30  ;;  %v6332_v33 = vpop.permute.xlu0 %2648 }
 0x48e   :  { %10414 = vst [vmem:[#allocation488_spill] sm:$0xff] %v6332_v33  ;;  %v6351_v33 = vld [vmem:[%s9675_s1 + $0x10] sm:$0xff] }
 0x48f   :  { %2808 = vperm.xlu1 %4125, %v6329_v25  }
 0x490   :  { %v6335_v28 = vpop.permute.xlu1 %2518  ;;  %2990 = vperm.xlu0 %4127, %v6340_v3  }
 0x491   :  { %10415 = vst [vmem:[#allocation489_spill] sm:$0xff] %v6335_v28  ;;  %v6343_v30 = vpop.permute.xlu0 %2670 }
 0x492   :  { %10416 = vst [vmem:[#allocation490_spill] sm:$0xff] %v6343_v30  ;;  %v6362_v30 = vld [vmem:[%s9675_s1 + $0x20] sm:$0xff] }
 0x493   :  { %2830 = vperm.xlu1 %4125, %v6340_v3  }
 0x494   :  { %v6346_v32 = vpop.permute.xlu1 %2526  ;;  %2998 = vperm.xlu0 %4127, %v6351_v33  }
 0x495   :  { %10417 = vst [vmem:[#allocation491_spill] sm:$0xff] %v6346_v32  ;;  %v6354_v28 = vpop.permute.xlu0 %2678 }
 0x496   :  { %10418 = vst [vmem:[#allocation492_spill] sm:$0xff] %v6354_v28  ;;  %v6373_v28 = vld [vmem:[%s9675_s1 + $0x30] sm:$0xff] }
 0x497   :  { %2838 = vperm.xlu1 %4125, %v6351_v33  }
 0x498   :  { %v6357_v26 = vpop.permute.xlu1 %2534  ;;  %3006 = vperm.xlu0 %4127, %v6362_v30  }
 0x499   :  { %10419 = vst [vmem:[#allocation493_spill] sm:$0xff] %v6357_v26  ;;  %v6365_v32 = vpop.permute.xlu0 %2686 }
 0x49a   :  { %10420 = vst [vmem:[#allocation494_spill] sm:$0xff] %v6365_v32  ;;  %v6384_v32 = vld [vmem:[%s9675_s1 + $0x40] sm:$0xff] }
 0x49b   :  { %2846 = vperm.xlu1 %4125, %v6362_v30  }
 0x49c   :  { %v6368_v24 = vpop.permute.xlu1 %2542  ;;  %3014 = vperm.xlu0 %4127, %v6373_v28  }
 0x49d   :  { %10421 = vst [vmem:[#allocation495_spill] sm:$0xff] %v6368_v24  ;;  %v6376_v26 = vpop.permute.xlu0 %2694 }
 0x49e   :  { %10422 = vst [vmem:[#allocation496_spill] sm:$0xff] %v6376_v26  ;;  %v6395_v26 = vld [vmem:[%s9675_s1 + $0x50] sm:$0xff] }
 0x49f   :  { %2854 = vperm.xlu1 %4125, %v6373_v28  }
 0x4a0   :  { %v6379_v10 = vpop.permute.xlu1 %2550  ;;  %3022 = vperm.xlu0 %4127, %v6384_v32  }
 0x4a1   :  { %10423 = vst [vmem:[#allocation497_spill] sm:$0xff] %v6379_v10  ;;  %v6387_v24 = vpop.permute.xlu0 %2702 }
 0x4a2   :  { %10424 = vst [vmem:[#allocation498_spill] sm:$0xff] %v6387_v24  ;;  %v6406_v24 = vld [vmem:[%s9675_s1 + $0x60] sm:$0xff] }
 0x4a3   :  { %2862 = vperm.xlu1 %4125, %v6384_v32  }
 0x4a4   :  { %v6390_v22 = vpop.permute.xlu1 %2558  ;;  %3030 = vperm.xlu0 %4127, %v6395_v26  }
 0x4a5   :  { %10425 = vst [vmem:[#allocation499_spill] sm:$0xff] %v6390_v22  ;;  %v6398_v10 = vpop.permute.xlu0 %2710 }
 0x4a6   :  { %10426 = vst [vmem:[#allocation500_spill] sm:$0xff] %v6398_v10 }
 0x4a7   :  { %2870 = vperm.xlu1 %4125, %v6395_v26  }
 0x4a8   :  { %v6401_v2 = vpop.permute.xlu1 %2566  ;;  %3038 = vperm.xlu0 %4127, %v6406_v24  }
 0x4a9   :  { %10427 = vst [vmem:[#allocation501_spill] sm:$0xff] %v6401_v2  ;;  %v6409_v22 = vpop.permute.xlu0 %2718 }
 0x4aa   :  { %10428 = vst [vmem:[#allocation502_spill] sm:$0xff] %v6409_v22 }
 0x4ab   :  { %2878 = vperm.xlu1 %4125, %v6406_v24  }
 0x4ac   :  { %3046 = vperm.xlu0 %4127, %v6415_v20  }
 0x4ad   :  { %v6418_v10 = vpop.permute.xlu1 %2606  ;;  %v6420_v2 = vpop.permute.xlu0 %2726 }
 0x4ae   :  { %10429 = vst [vmem:[#allocation503_spill] sm:$0xff] %v6418_v10  ;;  %10430 = vst [vmem:[#allocation504_spill] sm:$0xff] %v6420_v2 }
 0x4af   :  { %2886 = vperm.xlu1 %4125, %v6415_v20  }
 0x4b0   :  { %4128 = vset.pattern.permute.xlu0 %v9883_v18 }
 0x4b1   :  { %v6424_v61 = vpop.permute.xlu1 %2612  ;;  %3086 = vperm.xlu0 %4128, %v6070_v7  }
 0x4b2   :  { %10431 = vst [vmem:[#allocation505_spill] sm:$0xff] %v6424_v61  ;;  %v6427_v22 = vpop.permute.xlu0 %2766 }
 0x4b3   :  { %10432 = vst [vmem:[#allocation506_spill] sm:$0xff] %v6427_v22  ;;  %4126 = vset.pattern.permute.xlu1 %v10433_v36 }
 0x4b4   :  { %2926 = vperm.xlu1 %4126, %v6070_v7  }
 0x4b5   :  { %v6431_v16 = vpop.permute.xlu1 %2615  ;;  %3095 = vperm.xlu0 %4128, %v6093_v63  }
 0x4b6   :  { %10434 = vst [vmem:[#allocation507_spill] sm:$0xff] %v6431_v16  ;;  %v6434_v2 = vpop.permute.xlu0 %2775 }
 0x4b7   :  { %10435 = vst [vmem:[#allocation508_spill] sm:$0xff] %v6434_v2 }
 0x4b8   :  { %2932 = vperm.xlu1 %4126, %v6081_v5  }
 0x4b9   :  { %v6437_v10 = vpop.permute.xlu1 %2621  ;;  %3101 = vperm.xlu0 %4128, %v6104_v27  }
 0x4ba   :  { %10436 = vst [vmem:[#allocation509_spill] sm:$0xff] %v6437_v10  ;;  %v6440_v18 = vpop.permute.xlu0 %2781 }
 0x4bb   :  { %10437 = vst [vmem:[#allocation510_spill] sm:$0xff] %v6440_v18 }
 0x4bc   :  { %2935 = vperm.xlu1 %4126, %v6093_v63  }
 0x4bd   :  { %v6443_v61 = vpop.permute.xlu1 %2627  ;;  %3107 = vperm.xlu0 %4128, %v6115_v29  }
 0x4be   :  { %10438 = vst [vmem:[#allocation511_spill] sm:$0xff] %v6443_v61  ;;  %v6446_v36 = vpop.permute.xlu0 %2787 }
 0x4bf   :  { %10439 = vst [vmem:[#allocation512_spill] sm:$0xff] %v6446_v36 }
 0x4c0   :  { %2941 = vperm.xlu1 %4126, %v6104_v27  }
 0x4c1   :  { %v6449_v22 = vpop.permute.xlu1 %2633  ;;  %3113 = vperm.xlu0 %4128, %v6126_v21  }
 0x4c2   :  { %10440 = vst [vmem:[#allocation513_spill] sm:$0xff] %v6449_v22  ;;  %v6452_v2 = vpop.permute.xlu0 %2793 }
 0x4c3   :  { %10441 = vst [vmem:[#allocation514_spill] sm:$0xff] %v6452_v2 }
 0x4c4   :  { %2947 = vperm.xlu1 %4126, %v6115_v29  }
 0x4c5   :  { %v6455_v10 = vpop.permute.xlu1 %2639  ;;  %3119 = vperm.xlu0 %4128, %v6137_v4  }
 0x4c6   :  { %10442 = vst [vmem:[#allocation515_spill] sm:$0xff] %v6455_v10  ;;  %v6458_v18 = vpop.permute.xlu0 %2799 }
 0x4c7   :  { %10443 = vst [vmem:[#allocation516_spill] sm:$0xff] %v6458_v18 }
 0x4c8   :  { %2953 = vperm.xlu1 %4126, %v6126_v21  }
 0x4c9   :  { %v6461_v61 = vpop.permute.xlu1 %2645  ;;  %3125 = vperm.xlu0 %4128, %v6148_v15  }
 0x4ca   :  { %10444 = vst [vmem:[#allocation517_spill] sm:$0xff] %v6461_v61  ;;  %v6464_v36 = vpop.permute.xlu0 %2805 }
 0x4cb   :  { %10445 = vst [vmem:[#allocation518_spill] sm:$0xff] %v6464_v36 }
 0x4cc   :  { %2959 = vperm.xlu1 %4126, %v6137_v4  }
 0x4cd   :  { %v6467_v22 = vpop.permute.xlu1 %2651  ;;  %3131 = vperm.xlu0 %4128, %v6159_v19  }
 0x4ce   :  { %10446 = vst [vmem:[#allocation519_spill] sm:$0xff] %v6467_v22  ;;  %v6470_v2 = vpop.permute.xlu0 %2811 }
 0x4cf   :  { %10447 = vst [vmem:[#allocation520_spill] sm:$0xff] %v6470_v2 }
 0x4d0   :  { %2965 = vperm.xlu1 %4126, %v6148_v15  }
 0x4d1   :  { %v6473_v10 = vpop.permute.xlu1 %2674  ;;  %3154 = vperm.xlu0 %4128, %v6170_v60  }
 0x4d2   :  { %10448 = vst [vmem:[#allocation521_spill] sm:$0xff] %v6473_v10  ;;  %v6476_v18 = vpop.permute.xlu0 %2834 }
 0x4d3   :  { %10449 = vst [vmem:[#allocation522_spill] sm:$0xff] %v6476_v18 }
 0x4d4   :  { %2971 = vperm.xlu1 %4126, %v6159_v19  }
 0x4d5   :  { %v6479_v61 = vpop.permute.xlu1 %2682  ;;  %3162 = vperm.xlu0 %4128, %v6181_v14  }
 0x4d6   :  { %10450 = vst [vmem:[#allocation523_spill] sm:$0xff] %v6479_v61  ;;  %v6482_v36 = vpop.permute.xlu0 %2842 }
 0x4d7   :  { %10451 = vst [vmem:[#allocation524_spill] sm:$0xff] %v6482_v36 }
 0x4d8   :  { %2994 = vperm.xlu1 %4126, %v6170_v60  }
 0x4d9   :  { %v6485_v22 = vpop.permute.xlu1 %2690  ;;  %3170 = vperm.xlu0 %4128, %v6192_v0  }
 0x4da   :  { %10452 = vst [vmem:[#allocation525_spill] sm:$0xff] %v6485_v22  ;;  %v6488_v2 = vpop.permute.xlu0 %2850 }
 0x4db   :  { %10453 = vst [vmem:[#allocation526_spill] sm:$0xff] %v6488_v2 }
 0x4dc   :  { %3002 = vperm.xlu1 %4126, %v6181_v14  }
 0x4dd   :  { %v6491_v10 = vpop.permute.xlu1 %2698  ;;  %3178 = vperm.xlu0 %4128, %v6203_v11  }
 0x4de   :  { %10454 = vst [vmem:[#allocation527_spill] sm:$0xff] %v6491_v10  ;;  %v6494_v18 = vpop.permute.xlu0 %2858 }
 0x4df   :  { %10455 = vst [vmem:[#allocation528_spill] sm:$0xff] %v6494_v18 }
 0x4e0   :  { %3010 = vperm.xlu1 %4126, %v6192_v0  }
 0x4e1   :  { %v6497_v61 = vpop.permute.xlu1 %2706  ;;  %3186 = vperm.xlu0 %4128, %v6214_v17  }
 0x4e2   :  { %10456 = vst [vmem:[#allocation529_spill] sm:$0xff] %v6497_v61  ;;  %v6500_v36 = vpop.permute.xlu0 %2866 }
 0x4e3   :  { %10457 = vst [vmem:[#allocation530_spill] sm:$0xff] %v6500_v36 }
 0x4e4   :  { %3018 = vperm.xlu1 %4126, %v6203_v11  }
 0x4e5   :  { %v6503_v22 = vpop.permute.xlu1 %2714  ;;  %3194 = vperm.xlu0 %4128, %v6225_v9  }
 0x4e6   :  { %10458 = vst [vmem:[#allocation531_spill] sm:$0xff] %v6503_v22  ;;  %v6506_v2 = vpop.permute.xlu0 %2874  ;;  %v9896_v22 = vmov 20  }
 0x4e7   :  { %10459 = vst [vmem:[#allocation532_spill] sm:$0xff] %v6506_v2 }
 0x4e8   :  { %3026 = vperm.xlu1 %4126, %v6214_v17  }
 0x4e9   :  { %v6509_v10 = vpop.permute.xlu1 %2722  ;;  %3202 = vperm.xlu0 %4128, %v6236_v12  }
 0x4ea   :  { %10460 = vst [vmem:[#allocation533_spill] sm:$0xff] %v6509_v10  ;;  %v6512_v18 = vpop.permute.xlu0 %2882 }
 0x4eb   :  { %10461 = vst [vmem:[#allocation534_spill] sm:$0xff] %v6512_v18 }
 0x4ec   :  { %3034 = vperm.xlu1 %4126, %v6225_v9  }
 0x4ed   :  { %v6515_v61 = vpop.permute.xlu1 %2730  ;;  %3210 = vperm.xlu0 %4128, %v6247_v23  }
 0x4ee   :  { %10462 = vst [vmem:[#allocation535_spill] sm:$0xff] %v6515_v61  ;;  %v6518_v36 = vpop.permute.xlu0 %2890 }
 0x4ef   :  { %10463 = vst [vmem:[#allocation536_spill] sm:$0xff] %v6518_v36  ;;  %v10468_v36 = vmov 19  }
 0x4f0   :  { %3042 = vperm.xlu1 %4126, %v6236_v12  }
 0x4f1   :  { %4131 = vset.pattern.permute.xlu0 %v9896_v22 }
 0x4f2   :  { %v6522_v2 = vpop.permute.xlu1 %2769  ;;  %3249 = vperm.xlu0 %4131, %v6259_v13  }
 0x4f3   :  { %10464 = vst [vmem:[#allocation537_spill] sm:$0xff] %v6522_v2  ;;  %v6525_v10 = vpop.permute.xlu0 %2929 }
 0x4f4   :  { %10465 = vst [vmem:[#allocation538_spill] sm:$0xff] %v6525_v10  ;;  %3050 = vperm.xlu1 %4126, %v6247_v23  }
 0x4f6   :  { %v6528_v18 = vpop.permute.xlu1 %2772  ;;  %3258 = vperm.xlu0 %4131, %v6274_v8  }
 0x4f7   :  { %10466 = vst [vmem:[#allocation539_spill] sm:$0xff] %v6528_v18  ;;  %v6531_v61 = vpop.permute.xlu0 %2938 }
 0x4f8   :  { %10467 = vst [vmem:[#allocation540_spill] sm:$0xff] %v6531_v61  ;;  %4129 = vset.pattern.permute.xlu1 %v10468_v36 }
 0x4f9   :  { %3089 = vperm.xlu1 %4129, %v6259_v13  }
 0x4fa   :  { %v6535_v16 = vpop.permute.xlu1 %2778  ;;  %3264 = vperm.xlu0 %4131, %v6285_v31  }
 0x4fb   :  { %10469 = vst [vmem:[#allocation541_spill] sm:$0xff] %v6535_v16  ;;  %v6538_v22 = vpop.permute.xlu0 %2944 }
 0x4fc   :  { %10470 = vst [vmem:[#allocation542_spill] sm:$0xff] %v6538_v22 }
 0x4fd   :  { %3092 = vperm.xlu1 %4129, %v6081_v5  }
 0x4fe   :  { %v6541_v10 = vpop.permute.xlu1 %2784  ;;  %3270 = vperm.xlu0 %4131, %v6296_v1  }
 0x4ff   :  { %10471 = vst [vmem:[#allocation543_spill] sm:$0xff] %v6541_v10  ;;  %v6544_v18 = vpop.permute.xlu0 %2950 }
 0x500   :  { %10472 = vst [vmem:[#allocation544_spill] sm:$0xff] %v6544_v18 }
 0x501   :  { %3098 = vperm.xlu1 %4129, %v6274_v8  }
 0x502   :  { %v6547_v61 = vpop.permute.xlu1 %2790  ;;  %3276 = vperm.xlu0 %4131, %v6307_v62  }
 0x503   :  { %10473 = vst [vmem:[#allocation545_spill] sm:$0xff] %v6547_v61  ;;  %v6550_v36 = vpop.permute.xlu0 %2956 }
 0x504   :  { %10474 = vst [vmem:[#allocation546_spill] sm:$0xff] %v6550_v36 }
 0x505   :  { %3104 = vperm.xlu1 %4129, %v6285_v31  }
 0x506   :  { %v6553_v16 = vpop.permute.xlu1 %2796  ;;  %3282 = vperm.xlu0 %4131, %v6318_v6  }
 0x507   :  { %10475 = vst [vmem:[#allocation547_spill] sm:$0xff] %v6553_v16  ;;  %v6556_v22 = vpop.permute.xlu0 %2962 }
 0x508   :  { %10476 = vst [vmem:[#allocation548_spill] sm:$0xff] %v6556_v22 }
 0x509   :  { %3110 = vperm.xlu1 %4129, %v6296_v1  }
 0x50a   :  { %v6559_v10 = vpop.permute.xlu1 %2802  ;;  %3288 = vperm.xlu0 %4131, %v6329_v25  }
 0x50b   :  { %10477 = vst [vmem:[#allocation549_spill] sm:$0xff] %v6559_v10  ;;  %v6562_v18 = vpop.permute.xlu0 %2968 }
 0x50c   :  { %10478 = vst [vmem:[#allocation550_spill] sm:$0xff] %v6562_v18 }
 0x50d   :  { %3116 = vperm.xlu1 %4129, %v6307_v62  }
 0x50e   :  { %v6565_v61 = vpop.permute.xlu1 %2808  ;;  %3310 = vperm.xlu0 %4131, %v6340_v3  }
 0x50f   :  { %10479 = vst [vmem:[#allocation551_spill] sm:$0xff] %v6565_v61  ;;  %v6568_v36 = vpop.permute.xlu0 %2990 }
 0x510   :  { %10480 = vst [vmem:[#allocation552_spill] sm:$0xff] %v6568_v36 }
 0x511   :  { %3122 = vperm.xlu1 %4129, %v6318_v6  }
 0x512   :  { %v6571_v16 = vpop.permute.xlu1 %2830  ;;  %3318 = vperm.xlu0 %4131, %v6351_v33  }
 0x513   :  { %10481 = vst [vmem:[#allocation553_spill] sm:$0xff] %v6571_v16  ;;  %v6574_v22 = vpop.permute.xlu0 %2998 }
 0x514   :  { %10482 = vst [vmem:[#allocation554_spill] sm:$0xff] %v6574_v22 }
 0x515   :  { %3128 = vperm.xlu1 %4129, %v6329_v25  }
 0x516   :  { %v6577_v10 = vpop.permute.xlu1 %2838  ;;  %3326 = vperm.xlu0 %4131, %v6362_v30  }
 0x517   :  { %10483 = vst [vmem:[#allocation555_spill] sm:$0xff] %v6577_v10  ;;  %v6580_v18 = vpop.permute.xlu0 %3006 }
 0x518   :  { %10484 = vst [vmem:[#allocation556_spill] sm:$0xff] %v6580_v18 }
 0x519   :  { %3150 = vperm.xlu1 %4129, %v6340_v3  }
 0x51a   :  { %v6583_v61 = vpop.permute.xlu1 %2846  ;;  %3334 = vperm.xlu0 %4131, %v6373_v28  }
 0x51b   :  { %10485 = vst [vmem:[#allocation557_spill] sm:$0xff] %v6583_v61  ;;  %v6586_v36 = vpop.permute.xlu0 %3014 }
 0x51c   :  { %10486 = vst [vmem:[#allocation558_spill] sm:$0xff] %v6586_v36 }
 0x51d   :  { %3158 = vperm.xlu1 %4129, %v6351_v33  }
 0x51e   :  { %v6589_v16 = vpop.permute.xlu1 %2854  ;;  %3342 = vperm.xlu0 %4131, %v6384_v32  }
 0x51f   :  { %10487 = vst [vmem:[#allocation559_spill] sm:$0xff] %v6589_v16  ;;  %v6592_v22 = vpop.permute.xlu0 %3022 }
 0x520   :  { %10488 = vst [vmem:[#allocation560_spill] sm:$0xff] %v6592_v22 }
 0x521   :  { %3166 = vperm.xlu1 %4129, %v6362_v30  }
 0x522   :  { %v6595_v10 = vpop.permute.xlu1 %2862  ;;  %3350 = vperm.xlu0 %4131, %v6395_v26  }
 0x523   :  { %10489 = vst [vmem:[#allocation561_spill] sm:$0xff] %v6595_v10  ;;  %v6598_v18 = vpop.permute.xlu0 %3030 }
 0x524   :  { %10490 = vst [vmem:[#allocation562_spill] sm:$0xff] %v6598_v18  ;;  %v9907_v18 = vmov 21  }
 0x525   :  { %3174 = vperm.xlu1 %4129, %v6373_v28  }
 0x526   :  { %v6601_v61 = vpop.permute.xlu1 %2870  ;;  %3358 = vperm.xlu0 %4131, %v6406_v24  }
 0x527   :  { %10491 = vst [vmem:[#allocation563_spill] sm:$0xff] %v6601_v61  ;;  %v6604_v36 = vpop.permute.xlu0 %3038 }
 0x528   :  { %10492 = vst [vmem:[#allocation564_spill] sm:$0xff] %v6604_v36 }
 0x529   :  { %3182 = vperm.xlu1 %4129, %v6384_v32  }
 0x52a   :  { %v6607_v16 = vpop.permute.xlu1 %2878  ;;  %3366 = vperm.xlu0 %4131, %v6415_v20  }
 0x52b   :  { %10493 = vst [vmem:[#allocation565_spill] sm:$0xff] %v6607_v16  ;;  %v6610_v22 = vpop.permute.xlu0 %3046 }
 0x52c   :  { %10494 = vst [vmem:[#allocation566_spill] sm:$0xff] %v6610_v22 }
 0x52d   :  { %3190 = vperm.xlu1 %4129, %v6395_v26  }
 0x52e   :  { %v6613_v10 = vpop.permute.xlu1 %2886  ;;  %4132 = vset.pattern.permute.xlu0 %v9907_v18  ;;  %v10501_v18 = vmov 20  }
 0x52f   :  { %10495 = vst [vmem:[#allocation567_spill] sm:$0xff] %v6613_v10  ;;  %3406 = vperm.xlu0 %4132, %v6070_v7  }
 0x530   :  { %v6617_v61 = vpop.permute.xlu0 %3086 }
 0x531   :  { %10496 = vst [vmem:[#allocation568_spill] sm:$0xff] %v6617_v61  ;;  %3198 = vperm.xlu1 %4129, %v6406_v24  }
 0x533   :  { %v6620_v36 = vpop.permute.xlu1 %2926  ;;  %3415 = vperm.xlu0 %4132, %v6093_v63  }
 0x534   :  { %10497 = vst [vmem:[#allocation569_spill] sm:$0xff] %v6620_v36  ;;  %v6623_v16 = vpop.permute.xlu0 %3095 }
 0x535   :  { %10498 = vst [vmem:[#allocation570_spill] sm:$0xff] %v6623_v16  ;;  %3206 = vperm.xlu1 %4129, %v6415_v20  }
 0x537   :  { %v6626_v22 = vpop.permute.xlu1 %2932  ;;  %3421 = vperm.xlu0 %4132, %v6104_v27  }
 0x538   :  { %10499 = vst [vmem:[#allocation571_spill] sm:$0xff] %v6626_v22  ;;  %v6629_v10 = vpop.permute.xlu0 %3101 }
 0x539   :  { %10500 = vst [vmem:[#allocation572_spill] sm:$0xff] %v6629_v10  ;;  %4130 = vset.pattern.permute.xlu1 %v10501_v18 }
 0x53a   :  { %3246 = vperm.xlu1 %4130, %v6070_v7  }
 0x53b   :  { %v6633_v61 = vpop.permute.xlu1 %2935  ;;  %3427 = vperm.xlu0 %4132, %v6115_v29  }
 0x53c   :  { %v6636_v36 = vpop.permute.xlu0 %3107 }
 0x53d   :  { %10502 = vst [vmem:[#allocation573_spill] sm:$0xff] %v6636_v36 }
 0x53e   :  { %3252 = vperm.xlu1 %4130, %v6081_v5  }
 0x53f   :  { %v6639_v2 = vpop.permute.xlu1 %2941  ;;  %3433 = vperm.xlu0 %4132, %v6126_v21  }
 0x540   :  { %10503 = vst [vmem:[#allocation574_spill] sm:$0xff] %v6639_v2  ;;  %v6642_v22 = vpop.permute.xlu0 %3113 }
 0x541   :  { %10504 = vst [vmem:[#allocation575_spill] sm:$0xff] %v6642_v22 }
 0x542   :  { %3255 = vperm.xlu1 %4130, %v6093_v63  }
 0x543   :  { %v6645_v10 = vpop.permute.xlu1 %2947  ;;  %3439 = vperm.xlu0 %4132, %v6137_v4  }
 0x544   :  { %10505 = vst [vmem:[#allocation576_spill] sm:$0xff] %v6645_v10  ;;  %v6648_v18 = vpop.permute.xlu0 %3119 }
 0x545   :  { %10506 = vst [vmem:[#allocation577_spill] sm:$0xff] %v6648_v18 }
 0x546   :  { %3261 = vperm.xlu1 %4130, %v6104_v27  }
 0x547   :  { %v6651_v16 = vpop.permute.xlu1 %2953  ;;  %3445 = vperm.xlu0 %4132, %v6148_v15  }
 0x548   :  { %10507 = vst [vmem:[#allocation578_spill] sm:$0xff] %v6651_v16  ;;  %v6654_v36 = vpop.permute.xlu0 %3125 }
 0x549   :  { %10508 = vst [vmem:[#allocation579_spill] sm:$0xff] %v6654_v36 }
 0x54a   :  { %3267 = vperm.xlu1 %4130, %v6115_v29  }
 0x54b   :  { %v6657_v2 = vpop.permute.xlu1 %2959  ;;  %3451 = vperm.xlu0 %4132, %v6159_v19  }
 0x54c   :  { %10509 = vst [vmem:[#allocation580_spill] sm:$0xff] %v6657_v2  ;;  %v6660_v22 = vpop.permute.xlu0 %3131 }
 0x54d   :  { %10510 = vst [vmem:[#allocation581_spill] sm:$0xff] %v6660_v22 }
 0x54e   :  { %3273 = vperm.xlu1 %4130, %v6126_v21  }
 0x54f   :  { %v6663_v10 = vpop.permute.xlu1 %2965  ;;  %3474 = vperm.xlu0 %4132, %v6170_v60  }
 0x550   :  { %10511 = vst [vmem:[#allocation582_spill] sm:$0xff] %v6663_v10  ;;  %v6666_v18 = vpop.permute.xlu0 %3154 }
 0x551   :  { %10512 = vst [vmem:[#allocation583_spill] sm:$0xff] %v6666_v18 }
 0x552   :  { %3279 = vperm.xlu1 %4130, %v6137_v4  }
 0x553   :  { %v6669_v16 = vpop.permute.xlu1 %2971  ;;  %3482 = vperm.xlu0 %4132, %v6181_v14  }
 0x554   :  { %10513 = vst [vmem:[#allocation584_spill] sm:$0xff] %v6669_v16  ;;  %v6672_v36 = vpop.permute.xlu0 %3162 }
 0x556   :  { %3285 = vperm.xlu1 %4130, %v6148_v15  }
 0x557   :  { %v6675_v2 = vpop.permute.xlu1 %2994  ;;  %3490 = vperm.xlu0 %4132, %v6192_v0  }
 0x558   :  { %10514 = vst [vmem:[#allocation585_spill] sm:$0xff] %v6675_v2  ;;  %v6678_v22 = vpop.permute.xlu0 %3170 }
 0x55a   :  { %3291 = vperm.xlu1 %4130, %v6159_v19  }
 0x55b   :  { %v6681_v10 = vpop.permute.xlu1 %3002  ;;  %3498 = vperm.xlu0 %4132, %v6203_v11  }
 0x55c   :  { %v6684_v4 = vpop.permute.xlu0 %3178 }
 0x55d   :  { %10515 = vst [vmem:[#allocation586_spill] sm:$0xff] %v6684_v4 }
 0x55e   :  { %3314 = vperm.xlu1 %4130, %v6170_v60  }
 0x55f   :  { %v6687_v18 = vpop.permute.xlu1 %3010  ;;  %3506 = vperm.xlu0 %4132, %v6214_v17  }
 0x560   :  { %v6690_v15 = vpop.permute.xlu0 %3186 }
 0x561   :  { %10516 = vst [vmem:[#allocation587_spill] sm:$0xff] %v6690_v15 }
 0x562   :  { %3322 = vperm.xlu1 %4130, %v6181_v14  }
 0x563   :  { %v6693_v2 = vpop.permute.xlu1 %3018  ;;  %3514 = vperm.xlu0 %4132, %v6225_v9  }
 0x564   :  { %v6696_v19 = vpop.permute.xlu0 %3194 }
 0x565   :  { %10517 = vst [vmem:[#allocation588_spill] sm:$0xff] %v6696_v19  ;;  %v9917_v19 = vmov 22  }
 0x566   :  { %3330 = vperm.xlu1 %4130, %v6192_v0  }
 0x567   :  { %v6699_v16 = vpop.permute.xlu1 %3026  ;;  %3522 = vperm.xlu0 %4132, %v6236_v12  }
 0x568   :  { %v6702_v60 = vpop.permute.xlu0 %3202 }
 0x569   :  { %10518 = vst [vmem:[#allocation589_spill] sm:$0xff] %v6702_v60 }
 0x56a   :  { %3338 = vperm.xlu1 %4130, %v6203_v11  }
 0x56b   :  { %v6705_v4 = vpop.permute.xlu1 %3034  ;;  %3530 = vperm.xlu0 %4132, %v6247_v23  }
 0x56c   :  { %10519 = vst [vmem:[#allocation590_spill] sm:$0xff] %v6705_v4  ;;  %v6708_v14 = vpop.permute.xlu0 %3210  ;;  %v10797_v4 = vld [vmem:[#allocation220_spill] sm:$0xff] }
 0x56d   :  { %10520 = vst [vmem:[#allocation591_spill] sm:$0xff] %v6708_v14 }
 0x56e   :  { %3346 = vperm.xlu1 %4130, %v6214_v17  }
 0x56f   :  { %v6711_v15 = vpop.permute.xlu1 %3042  ;;  %4135 = vset.pattern.permute.xlu0 %v9917_v19 }
 0x570   :  { %10521 = vst [vmem:[#allocation592_spill] sm:$0xff] %v6711_v15  ;;  %3569 = vperm.xlu0 %4135, %v6259_v13  }
 0x571   :  { %v6715_v0 = vpop.permute.xlu0 %3249 }
 0x572   :  { %10522 = vst [vmem:[#allocation593_spill] sm:$0xff] %v6715_v0  ;;  %3354 = vperm.xlu1 %4130, %v6225_v9   ;;  %v10529_v0 = vmov 21  }
 0x573   :  { %v6718_v11 = vpop.permute.xlu1 %3050 }
 0x574   :  { %10523 = vst [vmem:[#allocation594_spill] sm:$0xff] %v6718_v11  ;;  %3578 = vperm.xlu0 %4135, %v6274_v8  }
 0x575   :  { %v6721_v60 = vpop.permute.xlu0 %3258 }
 0x576   :  { %10524 = vst [vmem:[#allocation595_spill] sm:$0xff] %v6721_v60  ;;  %3362 = vperm.xlu1 %4130, %v6236_v12  }
 0x578   :  { %v6724_v17 = vpop.permute.xlu1 %3089  ;;  %3584 = vperm.xlu0 %4135, %v6285_v31  }
 0x579   :  { %10525 = vst [vmem:[#allocation596_spill] sm:$0xff] %v6724_v17  ;;  %v6727_v14 = vpop.permute.xlu0 %3264  ;;  %v10688_v17 = vld [vmem:[#allocation119_spill] sm:$0xff] }
 0x57a   :  { %10526 = vst [vmem:[#allocation597_spill] sm:$0xff] %v6727_v14  ;;  %3370 = vperm.xlu1 %4130, %v6247_v23  }
 0x57c   :  { %v6730_v19 = vpop.permute.xlu1 %3092  ;;  %3590 = vperm.xlu0 %4135, %v6296_v1  }
 0x57d   :  { %10527 = vst [vmem:[#allocation598_spill] sm:$0xff] %v6730_v19  ;;  %v6733_v9 = vpop.permute.xlu0 %3270 }
 0x57e   :  { %10528 = vst [vmem:[#allocation599_spill] sm:$0xff] %v6733_v9  ;;  %4133 = vset.pattern.permute.xlu1 %v10529_v0 }
 0x57f   :  { %3409 = vperm.xlu1 %4133, %v6259_v13  }
 0x580   :  { %v6737_v60 = vpop.permute.xlu1 %3098  ;;  %3596 = vperm.xlu0 %4135, %v6307_v62  }
 0x581   :  { %10530 = vst [vmem:[#allocation600_spill] sm:$0xff] %v6737_v60  ;;  %v6740_v12 = vpop.permute.xlu0 %3276 }
 0x582   :  { %10531 = vst [vmem:[#allocation601_spill] sm:$0xff] %v6740_v12 }
 0x583   :  { %3412 = vperm.xlu1 %4133, %v6081_v5  }
 0x584   :  { %v6743_v14 = vpop.permute.xlu1 %3104  ;;  %3602 = vperm.xlu0 %4135, %v6318_v6  }
 0x585   :  { %10532 = vst [vmem:[#allocation602_spill] sm:$0xff] %v6743_v14  ;;  %v6746_v23 = vpop.permute.xlu0 %3282 }
 0x586   :  { %10533 = vst [vmem:[#allocation603_spill] sm:$0xff] %v6746_v23 }
 0x587   :  { %3418 = vperm.xlu1 %4133, %v6274_v8  }
 0x588   :  { %v6749_v19 = vpop.permute.xlu1 %3110  ;;  %3608 = vperm.xlu0 %4135, %v6329_v25  }
 0x589   :  { %10534 = vst [vmem:[#allocation604_spill] sm:$0xff] %v6749_v19  ;;  %v6752_v13 = vpop.permute.xlu0 %3288 }
 0x58a   :  { %10535 = vst [vmem:[#allocation605_spill] sm:$0xff] %v6752_v13 }
 0x58b   :  { %3424 = vperm.xlu1 %4133, %v6285_v31  }
 0x58c   :  { %v6755_v0 = vpop.permute.xlu1 %3116  ;;  %3630 = vperm.xlu0 %4135, %v6340_v3  }
 0x58d   :  { %10536 = vst [vmem:[#allocation606_spill] sm:$0xff] %v6755_v0  ;;  %v6758_v5 = vpop.permute.xlu0 %3310 }
 0x58e   :  { %10537 = vst [vmem:[#allocation607_spill] sm:$0xff] %v6758_v5  ;;  %v10654_v5 = vld [vmem:[#allocation93_spill] sm:$0xff] }
 0x58f   :  { %3430 = vperm.xlu1 %4133, %v6296_v1  }
 0x590   :  { %v6761_v12 = vpop.permute.xlu1 %3122  ;;  %3638 = vperm.xlu0 %4135, %v6351_v33  }
 0x591   :  { %10538 = vst [vmem:[#allocation608_spill] sm:$0xff] %v6761_v12  ;;  %v6764_v8 = vpop.permute.xlu0 %3318  ;;  %v11_v12 = vlaneseq }
 0x592   :  { %10539 = vst [vmem:[#allocation609_spill] sm:$0xff] %v6764_v8 }
 0x593   :  { %3436 = vperm.xlu1 %4133, %v6307_v62  }
 0x594   :  { %v6767_v23 = vpop.permute.xlu1 %3128  ;;  %3646 = vperm.xlu0 %4135, %v6362_v30  }
 0x595   :  { %10540 = vst [vmem:[#allocation610_spill] sm:$0xff] %v6767_v23  ;;  %v6770_v31 = vpop.permute.xlu0 %3326  ;;  %v6784_v23 = vand.u32 127, %v11_v12 }
 0x596   :  { %10541 = vst [vmem:[#allocation611_spill] sm:$0xff] %v6770_v31  ;;  %v10582_v31 = vld [vmem:[#allocation29_spill] sm:$0xff] }
 0x597   :  { %3442 = vperm.xlu1 %4133, %v6318_v6   ;;  %vm79_vm0 = vcmp.eq.s32.totalorder %v4517_v34, %v6784_v23  ;;  %vm77_vm1 = vcmp.eq.s32.totalorder %v4519_v35, %v6784_v23  ;;  %vm80_vm2 = vcmp.eq.s32.totalorder %v4523_v37, %v6784_v23  ;;  %vm78_vm3 = vcmp.eq.s32.totalorder %v4525_v38, %v6784_v23 }
 0x598   :  { %v6773_v13 = vpop.permute.xlu1 %3150  ;;  %3654 = vperm.xlu0 %4135, %v6373_v28   ;;  %vm82_vm4 = vcmp.eq.s32.totalorder %v4529_v39, %v6784_v23  ;;  %vm81_vm5 = vcmp.eq.s32.totalorder %v4531_v40, %v6784_v23  ;;  %vm84_vm6 = vcmp.eq.s32.totalorder %v4535_v41, %v6784_v23  ;;  %vm83_vm7 = vcmp.eq.s32.totalorder %v4537_v42, %v6784_v23  ;;  %v10551_v40 = vld [vmem:[#allocation2_spill] sm:$0xff] }
 0x599   :  { %10542 = vst [vmem:[#allocation612_spill] sm:$0xff] %v6773_v13  ;;  %v6776_v1 = vpop.permute.xlu0 %3334  ;;  %vm86_vm8 = vcmp.eq.s32.totalorder %v4541_v43, %v6784_v23  ;;  %vm85_vm9 = vcmp.eq.s32.totalorder %v4543_v44, %v6784_v23  ;;  %vm88_vm10 = vcmp.eq.s32.totalorder %v4547_v45, %v6784_v23  ;;  %vm87_vm11 = vcmp.eq.s32.totalorder %v4549_v46, %v6784_v23  ;;  %v10555_v44 = vld [vmem:[#allocation10_spill] sm:$0xff]  ;;  %v10662_v13 = vld [vmem:[#allocation99_spill] sm:$0xff] }
 0x59a   :  { %10543 = vst [vmem:[#allocation613_spill] sm:$0xff] %v6776_v1  ;;  %vm90_vm12 = vcmp.eq.s32.totalorder %v4553_v47, %v6784_v23  ;;  %vm89_vm13 = vcmp.eq.s32.totalorder %v4555_v48, %v6784_v23  ;;  %vm92_vm14 = vcmp.eq.s32.totalorder %v4559_v49, %v6784_v23  ;;  %vm91_vm15 = vcmp.eq.s32.totalorder %v4561_v50, %v6784_v23  ;;  %v10562_v48 = vld [vmem:[#allocation11_spill] sm:$0xff]  ;;  %v10564_v49 = vld [vmem:[#allocation14_spill] sm:$0xff] }
 0x59b   :  { %3448 = vperm.xlu1 %4133, %v6329_v25   ;;  %v190_v25 = vsel %vm78_vm3, %v4565_v51, 0.0  ;;  %v189_v12 = vsel %vm77_vm1, %v4567_v52, 0.0  ;;  %v194_v38 = vsel %vm82_vm4, %v4577_v55, 0.0  ;;  %v193_v35 = vsel %vm81_vm5, %v4579_v56, 0.0  ;;  %v10552_v52 = vld [vmem:[#allocation3_spill] sm:$0xff]  ;;  %v10554_v55 = vld [vmem:[#allocation5_spill] sm:$0xff] }
 0x59c   :  { %v6779_v8 = vpop.permute.xlu1 %3158  ;;  %3662 = vperm.xlu0 %4135, %v6384_v32   ;;  %v6859_v37 = vsel %vm84_vm6, %v4583_v57, 0.0  ;;  %v195_v34 = vsel %vm83_vm7, %v4585_v58, 0.0  ;;  %v198_v39 = vsel %vm86_vm8, %v4589_v59, 0.0  ;;  %v197_v41 = vsel %vm85_vm9, %v10551_v40, 0.0  ;;  %v10557_v57 = vld [vmem:[#allocation6_spill] sm:$0xff]  ;;  %v10558_v58 = vld [vmem:[#allocation7_spill] sm:$0xff] }
 0x59d   :  { %10544 = vst [vmem:[#allocation614_spill] sm:$0xff] %v6779_v8  ;;  %v6782_v62 = vpop.permute.xlu0 %3342  ;;  %v192_v8 = vsel %vm80_vm2, %v4571_v53, 0.0  ;;  %v6880_v53 = vsel %vm88_vm10, %v10552_v52, 0.0  ;;  %v6890_v43 = vsel %vm90_vm12, %v10554_v55, 0.0  ;;  %v201_v45 = vsel %vm89_vm13, %v10557_v57, 0.0  ;;  %v10559_v59 = vld [vmem:[#allocation8_spill] sm:$0xff] }
 0x59e   :  { %10545 = vst [vmem:[#allocation615_spill] sm:$0xff] %v6782_v62  ;;  %v204_v46 = vsel %vm92_vm14, %v10558_v58, 0.0  ;;  %v203_v47 = vsel %vm91_vm15, %v10559_v59, 0.0  ;;  %v10561_v40 = vld [vmem:[#allocation9_spill] sm:$0xff]  ;;  %vm255_vm3 = vcmp.eq.s32.totalorder %v10562_v48, %v6784_v23  ;;  %vm258_vm5 = vcmp.eq.s32.totalorder %v10564_v49, %v6784_v23  ;;  %v10566_v55 = vld [vmem:[#allocation15_spill] sm:$0xff]  ;;  %v10569_v59 = vld [vmem:[#allocation26_spill] sm:$0xff] }
 0x59f   :  { %3470 = vperm.xlu1 %4133, %v6340_v3   ;;  %vm254_vm2 = vcmp.eq.s32.totalorder %v10561_v40, %v6784_v23  ;;  %v10563_v52 = vld [vmem:[#allocation13_spill] sm:$0xff]  ;;  %v9922_v50 = vmov 23   ;;  %vm259_vm6 = vcmp.eq.s32.totalorder %v10566_v55, %v6784_v23 }
 0x5a0   :  { %v6787_v6 = vpop.permute.xlu1 %3166  ;;  %3670 = vperm.xlu0 %4135, %v6395_v26   ;;  %vm257_vm4 = vcmp.eq.s32.totalorder %v10563_v52, %v6784_v23  ;;  %v10568_v57 = vld [vmem:[#allocation25_spill] sm:$0xff]  ;;  %v334_v40 = vsel %vm254_vm2, %v10569_v59, 0.0  ;;  %v10578_v59 = vld [vmem:[#allocation22_spill] sm:$0xff]  ;;  %v10589_v52 = vld [vmem:[#allocation36_spill] sm:$0xff] }
 0x5a1   :  { %10546 = vst [vmem:[#allocation616_spill] sm:$0xff] %v6787_v6  ;;  %v6790_v0 = vpop.permute.xlu0 %3350  ;;  %v10570_v48 = vld [vmem:[#allocation17_spill] sm:$0xff]  ;;  %vm266_vm13 = vcmp.eq.s32.totalorder %v10578_v59, %v6784_v23  ;;  %v337_v14 = vsel %vm257_vm4, %v10582_v31, 0.0  ;;  %v10583_v6 = vld [vmem:[#allocation30_spill] sm:$0xff] }
 0x5a2   :  { %10547 = vst [vmem:[#allocation617_spill] sm:$0xff] %v6790_v0  ;;  %vm261_vm8 = vcmp.eq.s32.totalorder %v10570_v48, %v6784_v23  ;;  %v10590_v55 = vld [vmem:[#allocation37_spill] sm:$0xff] }
 0x5a3   :  { %3478 = vperm.xlu1 %4133, %v6351_v33  }
 0x5a4   :  { %v6807_v3 = vpop.permute.xlu1 %3174  ;;  %3678 = vperm.xlu0 %4135, %v6406_v24  }
 0x5a5   :  { %10548 = vst [vmem:[#allocation618_spill] sm:$0xff] %v6807_v3  ;;  %v6818_v33 = vpop.permute.xlu0 %3358 }
 0x5a6   :  { %10549 = vst [vmem:[#allocation619_spill] sm:$0xff] %v6818_v33  ;;  %v191_v33 = vsel %vm79_vm0, %v4573_v54, 0.0  ;;  %v10553_v54 = vld [vmem:[#allocation4_spill] sm:$0xff]  ;;  %vm253_vm0 = vcmp.eq.s32.totalorder %v10555_v44, %v6784_v23  ;;  %v10575_v44 = vld [vmem:[#allocation19_spill] sm:$0xff] }
 0x5a7   :  { %3486 = vperm.xlu1 %4133, %v6362_v30   ;;  %v199_v42 = vsel %vm87_vm11, %v10553_v54, 0.0  ;;  %v10560_v30 = vld [vmem:[#allocation12_spill] sm:$0xff]  ;;  %v333_v58 = vsel %vm253_vm0, %v10568_v57, 0.0  ;;  %vm263_vm10 = vcmp.eq.s32.totalorder %v10575_v44, %v6784_v23  ;;  %v10577_v57 = vld [vmem:[#allocation21_spill] sm:$0xff]  ;;  %v10592_v44 = vld [vmem:[#allocation39_spill] sm:$0xff] }
 0x5a8   :  { %v6861_v51 = vpop.permute.xlu1 %3182  ;;  %3686 = vperm.xlu0 %4135, %v6415_v20   ;;  %vm256_vm1 = vcmp.eq.s32.totalorder %v10560_v30, %v6784_v23  ;;  %vm265_vm12 = vcmp.eq.s32.totalorder %v10577_v57, %v6784_v23  ;;  %v10580_v30 = vld [vmem:[#allocation24_spill] sm:$0xff] }
 0x5a9   :  { %10550 = vst [vmem:[#allocation620_spill] sm:$0xff] %v6861_v51  ;;  %v6894_v56 = vpop.permute.xlu0 %3366  ;;  %vm268_vm15 = vcmp.eq.s32.totalorder %v10580_v30, %v6784_v23  ;;  %v350_v51 = vadd.f32 %v334_v40, %v190_v25  ;;  %v353_v40 = vadd.f32 %v337_v14, %v193_v35 }
 0x5aa   :  { %10556 = vst [vmem:[#allocation2_spill] sm:$0xff] %v6894_v56  ;;  %v10572_v56 = vld [vmem:[#allocation27_spill] sm:$0xff] }
 0x5ab   :  { %3494 = vperm.xlu1 %4133, %v6373_v28   ;;  %v10567_v28 = vld [vmem:[#allocation16_spill] sm:$0xff]  ;;  %v335_v0 = vsel %vm255_vm3, %v10572_v56, 0.0  ;;  %v10579_v56 = vld [vmem:[#allocation23_spill] sm:$0xff] }
 0x5ac   :  { %v6919_v54 = vpop.permute.xlu1 %3190  ;;  %4136 = vset.pattern.permute.xlu0 %v9922_v50  ;;  %vm260_vm7 = vcmp.eq.s32.totalorder %v10567_v28, %v6784_v23  ;;  %v10571_v50 = vld [vmem:[#allocation18_spill] sm:$0xff]  ;;  %vm267_vm14 = vcmp.eq.s32.totalorder %v10579_v56, %v6784_v23  ;;  %v351_v19 = vadd.f32 %v335_v0, %v191_v33  ;;  %v10585_v0 = vld [vmem:[#allocation32_spill] sm:$0xff]  ;;  %v345_v28 = vsel %vm265_vm12, %v10590_v55, 0.0 }
 0x5ad   :  { %10565 = vst [vmem:[#allocation3_spill] sm:$0xff] %v6919_v54  ;;  %3726 = vperm.xlu0 %4136, %v6070_v7   ;;  %vm262_vm9 = vcmp.eq.s32.totalorder %v10571_v50, %v6784_v23  ;;  %v10573_v54 = vld [vmem:[#allocation28_spill] sm:$0xff]  ;;  %v10587_v33 = vld [vmem:[#allocation34_spill] sm:$0xff]  ;;  %v361_v35 = vadd.f32 %v345_v28, %v201_v45 }
 0x5ae   :  { %v336_v62 = vsel %vm256_vm1, %v10573_v54, 0.0  ;;  %v6941_v9 = vpop.permute.xlu0 %3406  ;;  %v10576_v7 = vld [vmem:[#allocation20_spill] sm:$0xff]  ;;  %v349_v54 = vadd.f32 %v333_v58, %v189_v12  ;;  %v10588_v12 = vld [vmem:[#allocation35_spill] sm:$0xff]  ;;  %v10591_v58 = vld [vmem:[#allocation38_spill] sm:$0xff] }
 0x5af   :  { %10574 = vst [vmem:[#allocation4_spill] sm:$0xff] %v6941_v9  ;;  %vm264_vm11 = vcmp.eq.s32.totalorder %v10576_v7, %v6784_v23  ;;  %3502 = vperm.xlu1 %4133, %v6384_v32   ;;  %v6958_v3 = vadd.f32 %v336_v62, %v192_v8  ;;  %v338_v32 = vsel %vm258_vm5, %v10583_v6, 0.0  ;;  %v10584_v9 = vld [vmem:[#allocation31_spill] sm:$0xff]  ;;  %v340_v8 = vsel %vm260_vm7, %v10585_v0, 0.0  ;;  %v10586_v62 = vld [vmem:[#allocation33_spill] sm:$0xff]  ;;  %v10593_v0 = vld [vmem:[#allocation40_spill] sm:$0xff] }
 0x5b0   :  { %v6956_v1 = vpop.permute.xlu1 %3198  ;;  %v339_v25 = vsel %vm259_vm6, %v10584_v9, 0.0  ;;  %v341_v31 = vsel %vm261_vm8, %v10586_v62, 0.0  ;;  %v343_v9 = vsel %vm263_vm10, %v10588_v12, 0.0  ;;  %v344_v49 = vsel %vm264_vm11, %v10589_v52, 0.0  ;;  %v10602_v45 = vld [vmem:[#allocation48_spill] sm:$0xff] }
 0x5b1   :  { %10581 = vst [vmem:[#allocation5_spill] sm:$0xff] %v6956_v1  ;;  %3735 = vperm.xlu0 %4136, %v6093_v63   ;;  %v342_v63 = vsel %vm262_vm9, %v10587_v33, 0.0  ;;  %v346_v50 = vsel %vm266_vm13, %v10591_v58, 0.0  ;;  %v7004_v48 = vadd.f32 %v338_v32, %v194_v38  ;;  %v347_v7 = vsel %vm267_vm14, %v10592_v44, 0.0  ;;  %v10611_v58 = vld [vmem:[#allocation51_spill] sm:$0xff]  ;;  %v10613_v44 = vld [vmem:[#allocation53_spill] sm:$0xff] }
 0x5b2   :  { %v6985_v6 = vpop.permute.xlu0 %3415  ;;  %v348_v57 = vsel %vm268_vm15, %v10593_v0, 0.0  ;;  %v355_v33 = vadd.f32 %v339_v25, %v195_v34  ;;  %v356_v59 = vadd.f32 %v340_v8, %v6859_v37  ;;  %v357_v12 = vadd.f32 %v341_v31, %v197_v41  ;;  %v10595_v37 = vld [vmem:[#allocation42_spill] sm:$0xff]  ;;  %v10598_v41 = vld [vmem:[#allocation43_spill] sm:$0xff]  ;;  %v4208_v1 = vld [vmem:[%s9674_s0 + $0x18] sm:$0xff] }
 0x5b3   :  { %3510 = vperm.xlu1 %4133, %v6395_v26   ;;  %v7017_v26 = vadd.f32 %v342_v63, %v198_v39  ;;  %v359_v14 = vadd.f32 %v343_v9, %v199_v42  ;;  %v7021_v38 = vadd.f32 %v344_v49, %v6880_v53  ;;  %v7024_v56 = vadd.f32 %v346_v50, %v6890_v43  ;;  %v10596_v39 = vld [vmem:[#allocation44_spill] sm:$0xff]  ;;  %v10599_v53 = vld [vmem:[#allocation45_spill] sm:$0xff]  ;;  %v10600_v42 = vld [vmem:[#allocation46_spill] sm:$0xff] }
 0x5b4   :  { %v7014_v62 = vpop.permute.xlu1 %3206  ;;  %v7028_v32 = vadd.f32 %v347_v7, %v203_v47  ;;  %v7030_v34 = vadd.f32 %v348_v57, %v204_v46  ;;  %vm414_vm0 = vcmp.eq.s32.totalorder %v10595_v37, %v6784_v23  ;;  %vm417_vm1 = vcmp.eq.s32.totalorder %v10596_v39, %v6784_v23  ;;  %v10601_v43 = vld [vmem:[#allocation47_spill] sm:$0xff]  ;;  %v10604_v46 = vld [vmem:[#allocation56_spill] sm:$0xff]  ;;  %v10606_v8 = vld [vmem:[#allocation50_spill] sm:$0xff] }
 0x5b5   :  { %10594 = vst [vmem:[#allocation10_spill] sm:$0xff] %v7014_v62  ;;  %3741 = vperm.xlu0 %4136, %v6104_v27   ;;  %v10597_v27 = vld [vmem:[#allocation41_spill] sm:$0xff]  ;;  %vm415_vm3 = vcmp.eq.s32.totalorder %v10598_v41, %v6784_v23  ;;  %vm416_vm4 = vcmp.eq.s32.totalorder %v10599_v53, %v6784_v23  ;;  %vm419_vm5 = vcmp.eq.s32.totalorder %v10600_v42, %v6784_v23  ;;  %v10607_v31 = vld [vmem:[#allocation58_spill] sm:$0xff]  ;;  %v10608_v9 = vld [vmem:[#allocation59_spill] sm:$0xff] }
 0x5b6   :  { %v7026_v30 = vpop.permute.xlu0 %3421  ;;  %vm413_vm2 = vcmp.eq.s32.totalorder %v10597_v27, %v6784_v23  ;;  %vm418_vm6 = vcmp.eq.s32.totalorder %v10601_v43, %v6784_v23  ;;  %vm421_vm7 = vcmp.eq.s32.totalorder %v10602_v45, %v6784_v23  ;;  %vm423_vm9 = vcmp.eq.s32.totalorder %v10606_v8, %v6784_v23  ;;  %v10609_v49 = vld [vmem:[#allocation60_spill] sm:$0xff]  ;;  %v10615_v7 = vld [vmem:[#allocation55_spill] sm:$0xff]  ;;  %v10616_v57 = vld [vmem:[#allocation57_spill] sm:$0xff] }
 0x5b7   :  { %3518 = vperm.xlu1 %4133, %v6406_v24   ;;  %v10603_v24 = vld [vmem:[#allocation49_spill] sm:$0xff]  ;;  %v493_v47 = vsel %vm413_vm2, %v10604_v46, 0.0  ;;  %v495_v63 = vsel %vm415_vm3, %v10607_v31, 0.0  ;;  %v494_v52 = vsel %vm414_vm0, %v10608_v9, 0.0  ;;  %v497_v55 = vsel %vm417_vm1, %v10609_v49, 0.0  ;;  %v10612_v50 = vld [vmem:[#allocation52_spill] sm:$0xff] }
 0x5b8   :  { %vm420_vm8 = vcmp.eq.s32.totalorder %v10603_v24, %v6784_v23  ;;  %vm422_vm10 = vcmp.eq.s32.totalorder %v10611_v58, %v6784_v23  ;;  %vm425_vm11 = vcmp.eq.s32.totalorder %v10612_v50, %v6784_v23  ;;  %vm424_vm12 = vcmp.eq.s32.totalorder %v10613_v44, %v6784_v23  ;;  %v10617_v37 = vld [vmem:[#allocation61_spill] sm:$0xff]  ;;  %v10618_v31 = vld [vmem:[#allocation62_spill] sm:$0xff]  ;;  %v10621_v9 = vld [vmem:[#allocation64_spill] sm:$0xff] }
 0x5b9   :  { %v7052_v25 = vpop.permute.xlu1 %3246  ;;  %3747 = vperm.xlu0 %4136, %v6115_v29   ;;  %v10614_v29 = vld [vmem:[#allocation54_spill] sm:$0xff]  ;;  %vm426_vm14 = vcmp.eq.s32.totalorder %v10615_v7, %v6784_v23  ;;  %v7073_v0 = vadd.f32 %v493_v47, %v349_v54  ;;  %vm428_vm15 = vcmp.eq.s32.totalorder %v10616_v57, %v6784_v23  ;;  %v496_v39 = vsel %vm416_vm4, %v10617_v37, 0.0  ;;  %v10620_v47 = vld [vmem:[#allocation63_spill] sm:$0xff]  ;;  %v10626_v49 = vld [vmem:[#allocation68_spill] sm:$0xff] }
 0x5ba   :  { %10605 = vst [vmem:[#allocation6_spill] sm:$0xff] %v7052_v25  ;;  %v7060_v28 = vpop.permute.xlu0 %3427  ;;  %vm427_vm13 = vcmp.eq.s32.totalorder %v10614_v29, %v6784_v23  ;;  %v7081_v27 = vadd.f32 %v495_v63, %v351_v19  ;;  %v510_v41 = vadd.f32 %v494_v52, %v350_v51  ;;  %v7083_v46 = vadd.f32 %v497_v55, %v353_v40  ;;  %v10622_v51 = vld [vmem:[#allocation65_spill] sm:$0xff]  ;;  %v10623_v42 = vld [vmem:[#allocation66_spill] sm:$0xff]  ;;  %v10625_v52 = vld [vmem:[#allocation67_spill] sm:$0xff] }
 0x5bb   :  { %10610 = vst [vmem:[#allocation7_spill] sm:$0xff] %v7060_v28  ;;  %3526 = vperm.xlu1 %4133, %v6415_v20   ;;  %v499_v20 = vsel %vm419_vm5, %v10618_v31, 0.0  ;;  %v498_v53 = vsel %vm418_vm6, %v10620_v47, 0.0  ;;  %v501_v19 = vsel %vm421_vm7, %v10621_v9, 0.0  ;;  %v500_v40 = vsel %vm420_vm8, %v10622_v51, 0.0  ;;  %v10627_v55 = vld [vmem:[#allocation69_spill] sm:$0xff] }
 0x5bc   :  { %v512_v43 = vadd.f32 %v496_v39, %v6958_v3  ;;  %v502_v45 = vsel %vm422_vm10, %v10625_v52, 0.0  ;;  %v505_v24 = vsel %vm425_vm11, %v10626_v49, 0.0  ;;  %v504_v8 = vsel %vm424_vm12, %v10627_v55, 0.0  ;;  %v10629_v3 = vld [vmem:[#allocation70_spill] sm:$0xff]  ;;  %v10630_v39 = vld [vmem:[#allocation71_spill] sm:$0xff]  ;;  %v10631_v47 = vld [vmem:[#allocation73_spill] sm:$0xff] }
 0x5bd   :  { %v7089_v54 = vpop.permute.xlu1 %3252  ;;  %3753 = vperm.xlu0 %4136, %v6126_v21   ;;  %v503_v21 = vsel %vm423_vm9, %v10623_v42, 0.0  ;;  %v10628_v37 = vmov 22   ;;  %v7124_v31 = vadd.f32 %v499_v20, %v355_v33  ;;  %v507_v58 = vsel %vm427_vm13, %v10629_v3, 0.0  ;;  %v4204_v33 = vld [vmem:[%s9674_s0] sm:$0xff]  ;;  %v7151_v7 = vld [vmem:[%s9674_s0 + $0x58] sm:$0xff] }
 0x5be   :  { %10619 = vst [vmem:[#allocation8_spill] sm:$0xff] %v7089_v54  ;;  %v7108_v63 = vpop.permute.xlu0 %3433  ;;  %v506_v50 = vsel %vm426_vm14, %v10630_v39, 0.0  ;;  %v508_v44 = vsel %vm428_vm15, %v10631_v47, 0.0  ;;  %v514_v20 = vadd.f32 %v498_v53, %v7004_v48  ;;  %v7142_v9 = vadd.f32 %v501_v19, %v357_v12  ;;  %v10632_v12 = vld [vmem:[#allocation74_spill] sm:$0xff]  ;;  %v10634_v19 = vld [vmem:[#allocation72_spill] sm:$0xff]  ;;  %v10643_v3 = vld [vmem:[#allocation81_spill] sm:$0xff] }
 0x5bf   :  { %10624 = vst [vmem:[#allocation12_spill] sm:$0xff] %v7108_v63  ;;  %4134 = vset.pattern.permute.xlu1 %v10628_v37  ;;  %v516_v29 = vadd.f32 %v500_v40, %v356_v59  ;;  %v7144_v51 = vadd.f32 %v503_v21, %v359_v14  ;;  %v518_v57 = vadd.f32 %v502_v45, %v7017_v26  ;;  %v10635_v26 = vld [vmem:[#allocation75_spill] sm:$0xff]  ;;  %v10638_v21 = vld [vmem:[#allocation78_spill] sm:$0xff]  ;;  %v10641_v45 = vld [vmem:[#allocation88_spill] sm:$0xff] }
 0x5c0   :  { %3566 = vperm.xlu1 %4134, %v4204_v33   ;;  %v7155_v52 = vadd.f32 %v505_v24, %v361_v35  ;;  %v520_v48 = vadd.f32 %v504_v8, %v7021_v38  ;;  %vm576_vm0 = vcmp.eq.s32.totalorder %v10632_v12, %v6784_v23  ;;  %v7163_v14 = vadd.f32 %v507_v58, %v7028_v32  ;;  %v10636_v38 = vld [vmem:[#allocation76_spill] sm:$0xff]  ;;  %v10637_v35 = vld [vmem:[#allocation77_spill] sm:$0xff]  ;;  %v10639_v32 = vld [vmem:[#allocation79_spill] sm:$0xff] }
 0x5c1   :  { %v7146_v42 = vpop.permute.xlu1 %3255  ;;  %3759 = vperm.xlu0 %4136, %v7151_v7   ;;  %v522_v53 = vadd.f32 %v506_v50, %v7024_v56  ;;  %vm573_vm1 = vcmp.eq.s32.totalorder %v10634_v19, %v6784_v23  ;;  %v524_v40 = vadd.f32 %v508_v44, %v7030_v34  ;;  %vm574_vm2 = vcmp.eq.s32.totalorder %v10635_v26, %v6784_v23  ;;  %v7180_v56 = vld [vmem:[%s9674_s0 + $0x10] sm:$0xff]  ;;  %v10642_v24 = vld [vmem:[#allocation90_spill] sm:$0xff]  ;;  %v7194_v37 = vld [vmem:[%s9674_s0 + $0x68] sm:$0xff] }
 0x5c2   :  { %v7160_v59 = vpop.permute.xlu0 %3439  ;;  %vm578_vm3 = vcmp.eq.s32.totalorder %v10636_v38, %v6784_v23  ;;  %vm575_vm4 = vcmp.eq.s32.totalorder %v10637_v35, %v6784_v23  ;;  %vm580_vm5 = vcmp.eq.s32.totalorder %v10638_v21, %v6784_v23  ;;  %vm577_vm6 = vcmp.eq.s32.totalorder %v10639_v32, %v6784_v23  ;;  %v10640_v34 = vld [vmem:[#allocation80_spill] sm:$0xff]  ;;  %v10644_v58 = vld [vmem:[#allocation82_spill] sm:$0xff]  ;;  %v10645_v39 = vld [vmem:[#allocation83_spill] sm:$0xff] }
 0x5c3   :  { %10633 = vst [vmem:[#allocation9_spill] sm:$0xff] %v7160_v59  ;;  %vm582_vm7 = vcmp.eq.s32.totalorder %v10640_v34, %v6784_v23  ;;  %v654_v49 = vsel %vm574_vm2, %v10641_v45, 0.0  ;;  %v656_v55 = vsel %vm576_vm0, %v10642_v24, 0.0  ;;  %vm579_vm8 = vcmp.eq.s32.totalorder %v10643_v3, %v6784_v23  ;;  %v10646_v50 = vld [vmem:[#allocation91_spill] sm:$0xff]  ;;  %v10648_v33 = vld [vmem:[#allocation84_spill] sm:$0xff]  ;;  %v10649_v12 = vld [vmem:[#allocation85_spill] sm:$0xff] }
 0x5c4   :  { %3572 = vperm.xlu1 %4134, %v7180_v56   ;;  %vm584_vm9 = vcmp.eq.s32.totalorder %v10644_v58, %v6784_v23  ;;  %vm581_vm10 = vcmp.eq.s32.totalorder %v10645_v39, %v6784_v23  ;;  %v653_v47 = vsel %vm573_vm1, %v10646_v50, 0.0  ;;  %vm586_vm11 = vcmp.eq.s32.totalorder %v10648_v33, %v6784_v23  ;;  %v10650_v26 = vld [vmem:[#allocation86_spill] sm:$0xff]  ;;  %v10651_v45 = vld [vmem:[#allocation92_spill] sm:$0xff]  ;;  %v10652_v54 = vld [vmem:[#allocation87_spill] sm:$0xff] }
 0x5c5   :  { %v7189_v8 = vpop.permute.xlu1 %3261  ;;  %3765 = vperm.xlu0 %4136, %v7194_v37   ;;  %vm583_vm12 = vcmp.eq.s32.totalorder %v10649_v12, %v6784_v23  ;;  %vm588_vm13 = vcmp.eq.s32.totalorder %v10650_v26, %v6784_v23  ;;  %v658_v24 = vsel %vm578_vm3, %v10651_v45, 0.0  ;;  %vm585_vm14 = vcmp.eq.s32.totalorder %v10652_v54, %v6784_v23  ;;  %v10653_v50 = vld [vmem:[#allocation89_spill] sm:$0xff]  ;;  %v10655_v45 = vld [vmem:[#allocation94_spill] sm:$0xff]  ;;  %v10666_v39 = vld [vmem:[#allocation103_spill] sm:$0xff] }
 0x5c6   :  { %v7207_v44 = vpop.permute.xlu0 %3445  ;;  %v7221_v19 = vadd.f32 %v654_v49, %v510_v41  ;;  %vm587_vm15 = vcmp.eq.s32.totalorder %v10653_v50, %v6784_v23  ;;  %v7225_v62 = vadd.f32 %v656_v55, %v512_v43  ;;  %v669_v60 = vadd.f32 %v653_v47, %v7073_v0  ;;  %v10656_v49 = vld [vmem:[#allocation95_spill] sm:$0xff]  ;;  %v10658_v0 = vld [vmem:[#allocation96_spill] sm:$0xff]  ;;  %v10659_v21 = vld [vmem:[#allocation97_spill] sm:$0xff] }
 0x5c7   :  { %10647 = vst [vmem:[#allocation11_spill] sm:$0xff] %v7207_v44  ;;  %v655_v38 = vsel %vm575_vm4, %v10654_v5, 0.0  ;;  %v660_v41 = vsel %vm580_vm5, %v10655_v45, 0.0  ;;  %v657_v43 = vsel %vm577_vm6, %v10656_v49, 0.0  ;;  %v7251_v5 = vadd.f32 %v658_v24, %v514_v20  ;;  %v10660_v47 = vld [vmem:[#allocation98_spill] sm:$0xff]  ;;  %v10663_v24 = vld [vmem:[#allocation100_spill] sm:$0xff] }
 0x5c8   :  { %3575 = vperm.xlu1 %4134, %v4208_v1   ;;  %v7248_v1 = vld [vmem:[%s9674_s0 + $0x78] sm:$0xff]  ;;  %v662_v35 = vsel %vm582_vm7, %v10658_v0, 0.0  ;;  %v659_v32 = vsel %vm579_vm8, %v10659_v21, 0.0  ;;  %v664_v45 = vsel %vm584_vm9, %v10660_v47, 0.0  ;;  %v661_v20 = vsel %vm581_vm10, %v10662_v13, 0.0  ;;  %v10665_v21 = vld [vmem:[#allocation102_spill] sm:$0xff] }
 0x5c9   :  { %v7243_v55 = vpop.permute.xlu1 %3267  ;;  %3771 = vperm.xlu0 %4136, %v7248_v1   ;;  %v666_v34 = vsel %vm586_vm11, %v10663_v24, 0.0  ;;  %v10664_v0 = vld [vmem:[#allocation101_spill] sm:$0xff]  ;;  %v668_v58 = vsel %vm588_vm13, %v10665_v21, 0.0  ;;  %v671_v47 = vadd.f32 %v655_v38, %v7081_v27  ;;  %v7284_v25 = vadd.f32 %v660_v41, %v516_v29  ;;  %v4210_v12 = vld [vmem:[%s9674_s0 + $0x28] sm:$0xff]  ;;  %v10693_v59 = vld [vmem:[#allocation128_spill] sm:$0xff] }
 0x5ca   :  { %10657 = vst [vmem:[#allocation13_spill] sm:$0xff] %v7243_v55  ;;  %v7265_v49 = vpop.permute.xlu0 %3451  ;;  %v663_v3 = vsel %vm583_vm12, %v10664_v0, 0.0  ;;  %v673_v13 = vadd.f32 %v657_v43, %v7083_v46  ;;  %v665_v33 = vsel %vm585_vm14, %v10666_v39, 0.0  ;;  %v7294_v24 = vadd.f32 %v662_v35, %v518_v57  ;;  %v10667_v27 = vld [vmem:[#allocation105_spill] sm:$0xff]  ;;  %v7308_v54 = vld [vmem:[%s9675_s1 + $0x8] sm:$0xff]  ;;  %v10670_v43 = vld [vmem:[#allocation104_spill] sm:$0xff] }
 0x5cb   :  { %10661 = vst [vmem:[#allocation14_spill] sm:$0xff] %v7265_v49  ;;  %v675_v26 = vadd.f32 %v659_v32, %v7124_v31  ;;  %v7297_v0 = vadd.f32 %v664_v45, %v520_v48  ;;  %v667_v46 = vsel %vm587_vm15, %v10667_v27, 0.0  ;;  %v677_v57 = vadd.f32 %v661_v20, %v7142_v9  ;;  %v10671_v35 = vld [vmem:[#allocation106_spill] sm:$0xff]  ;;  %v10672_v32 = vld [vmem:[#allocation107_spill] sm:$0xff]  ;;  %v7347_v39 = vld [vmem:[%s9675_s1 + $0x18] sm:$0xff] }
 0x5cc   :  { %3581 = vperm.xlu1 %4134, %v4210_v12   ;;  %v7312_v38 = vadd.f32 %v666_v34, %v522_v53  ;;  %v679_v31 = vadd.f32 %v663_v3, %v7144_v51  ;;  %v7315_v48 = vadd.f32 %v668_v58, %v524_v40  ;;  %v681_v50 = vadd.f32 %v665_v33, %v7155_v52  ;;  %v10673_v53 = vld [vmem:[#allocation108_spill] sm:$0xff]  ;;  %v10674_v51 = vld [vmem:[#allocation109_spill] sm:$0xff]  ;;  %v10675_v40 = vld [vmem:[#allocation118_spill] sm:$0xff] }
 0x5cd   :  { %v7303_v29 = vpop.permute.xlu1 %3273  ;;  %3794 = vperm.xlu0 %4136, %v7308_v54   ;;  %vm734_vm0 = vcmp.eq.s32.totalorder %v10670_v43, %v6784_v23  ;;  %vm737_vm1 = vcmp.eq.s32.totalorder %v10671_v35, %v6784_v23  ;;  %vm733_vm2 = vcmp.eq.s32.totalorder %v10672_v32, %v6784_v23  ;;  %v683_v9 = vadd.f32 %v667_v46, %v7163_v14  ;;  %v4212_v52 = vld [vmem:[%s9674_s0 + $0x38] sm:$0xff]  ;;  %v10676_v20 = vld [vmem:[#allocation110_spill] sm:$0xff]  ;;  %v10677_v34 = vld [vmem:[#allocation111_spill] sm:$0xff] }
 0x5ce   :  { %10668 = vst [vmem:[#allocation15_spill] sm:$0xff] %v7303_v29  ;;  %v7317_v41 = vpop.permute.xlu0 %3474  ;;  %vm739_vm3 = vcmp.eq.s32.totalorder %v10673_v53, %v6784_v23  ;;  %vm735_vm4 = vcmp.eq.s32.totalorder %v10674_v51, %v6784_v23  ;;  %v813_v45 = vsel %vm733_vm2, %v10675_v40, 0.0  ;;  %vm741_vm5 = vcmp.eq.s32.totalorder %v10676_v20, %v6784_v23  ;;  %v10678_v14 = vld [vmem:[#allocation112_spill] sm:$0xff]  ;;  %v10681_v33 = vld [vmem:[#allocation113_spill] sm:$0xff]  ;;  %v10682_v12 = vld [vmem:[#allocation114_spill] sm:$0xff] }
 0x5cf   :  { %10669 = vst [vmem:[#allocation16_spill] sm:$0xff] %v7317_v41  ;;  %vm736_vm6 = vcmp.eq.s32.totalorder %v10677_v34, %v6784_v23  ;;  %vm743_vm7 = vcmp.eq.s32.totalorder %v10678_v14, %v6784_v23  ;;  %v10679_v3 = vld [vmem:[#allocation120_spill] sm:$0xff]  ;;  %vm738_vm8 = vcmp.eq.s32.totalorder %v10681_v33, %v6784_v23  ;;  %vm745_vm9 = vcmp.eq.s32.totalorder %v10682_v12, %v6784_v23  ;;  %v10683_v27 = vld [vmem:[#allocation115_spill] sm:$0xff]  ;;  %v10684_v46 = vld [vmem:[#allocation122_spill] sm:$0xff] }
 0x5d0   :  { %3587 = vperm.xlu1 %4134, %v4212_v52   ;;  %v815_v21 = vsel %vm735_vm4, %v10679_v3, 0.0  ;;  %vm740_vm10 = vcmp.eq.s32.totalorder %v10683_v27, %v6784_v23  ;;  %v817_v32 = vsel %vm737_vm1, %v10684_v46, 0.0  ;;  %v10685_v40 = vld [vmem:[#allocation116_spill] sm:$0xff]  ;;  %v10686_v52 = vld [vmem:[#allocation117_spill] sm:$0xff]  ;;  %v7366_v3 = vadd.f32 %v813_v45, %v669_v60  ;;  %v4214_v60 = vld [vmem:[%s9674_s0 + $0x48] sm:$0xff] }
 0x5d1   :  { %v7342_v58 = vpop.permute.xlu1 %3279  ;;  %3802 = vperm.xlu0 %4136, %v7347_v39   ;;  %vm747_vm11 = vcmp.eq.s32.totalorder %v10685_v40, %v6784_v23  ;;  %vm742_vm12 = vcmp.eq.s32.totalorder %v10686_v52, %v6784_v23  ;;  %v10687_v41 = vld [vmem:[#allocation124_spill] sm:$0xff]  ;;  %vm744_vm13 = vcmp.eq.s32.totalorder %v10688_v17, %v6784_v23  ;;  %v7374_v35 = vadd.f32 %v815_v21, %v671_v47  ;;  %v10689_v46 = vld [vmem:[#allocation121_spill] sm:$0xff]  ;;  %v10692_v45 = vld [vmem:[#allocation127_spill] sm:$0xff] }
 0x5d2   :  { %10680 = vst [vmem:[#allocation25_spill] sm:$0xff] %v7342_v58  ;;  %v7360_v51 = vpop.permute.xlu0 %3482  ;;  %v819_v49 = vsel %vm739_vm3, %v10687_v41, 0.0  ;;  %vm746_vm14 = vcmp.eq.s32.totalorder %v10689_v46, %v6784_v23  ;;  %v10690_v44 = vld [vmem:[#allocation125_spill] sm:$0xff]  ;;  %v7385_v53 = vadd.f32 %v817_v32, %v673_v13  ;;  %v10691_v41 = vld [vmem:[#allocation126_spill] sm:$0xff]  ;;  %v816_v21 = vsel %vm736_vm6, %v10692_v45, 0.0  ;;  %v7404_v13 = vld [vmem:[%s9675_s1 + $0x28] sm:$0xff] }
 0x5d3   :  { %v814_v11 = vsel %vm734_vm0, %v10690_v44, 0.0  ;;  %v821_v47 = vsel %vm741_vm5, %v10691_v41, 0.0  ;;  %v823_v44 = vsel %vm743_vm7, %v10693_v59, 0.0  ;;  %v10695_v20 = vld [vmem:[#allocation123_spill] sm:$0xff]  ;;  %v7409_v32 = vadd.f32 %v819_v49, %v675_v26  ;;  %v10696_v34 = vld [vmem:[#allocation129_spill] sm:$0xff]  ;;  %v10697_v59 = vld [vmem:[#allocation130_spill] sm:$0xff] }
 0x5d4   :  { %3593 = vperm.xlu1 %4134, %v4214_v60   ;;  %vm748_vm15 = vcmp.eq.s32.totalorder %v10695_v20, %v6784_v23  ;;  %v818_v14 = vsel %vm738_vm8, %v10696_v34, 0.0  ;;  %v825_v60 = vsel %vm745_vm9, %v10697_v59, 0.0  ;;  %v830_v45 = vadd.f32 %v814_v11, %v7221_v19  ;;  %v10700_v26 = vld [vmem:[#allocation132_spill] sm:$0xff]  ;;  %v10701_v34 = vld [vmem:[#allocation133_spill] sm:$0xff]  ;;  %v10702_v19 = vld [vmem:[#allocation135_spill] sm:$0xff] }
 0x5d5   :  { %v7399_v43 = vpop.permute.xlu1 %3285  ;;  %3810 = vperm.xlu0 %4136, %v7404_v13   ;;  %v827_v33 = vsel %vm747_vm11, %v10700_v26, 0.0  ;;  %v822_v12 = vsel %vm742_vm12, %v10701_v34, 0.0  ;;  %v7434_v59 = vadd.f32 %v821_v47, %v677_v57  ;;  %v832_v58 = vadd.f32 %v816_v21, %v7225_v62  ;;  %v10703_v26 = vld [vmem:[#allocation137_spill] sm:$0xff]  ;;  %v10704_v52 = vld [vmem:[#allocation139_spill] sm:$0xff]  ;;  %v10706_v46 = vld [vmem:[#allocation136_spill] sm:$0xff] }
 0x5d6   :  { %10694 = vst [vmem:[#allocation26_spill] sm:$0xff] %v7399_v43  ;;  %v7419_v41 = vpop.permute.xlu0 %3490  ;;  %v10699_v43 = vld [vmem:[#allocation131_spill] sm:$0xff]  ;;  %v7437_v11 = vadd.f32 %v823_v44, %v679_v31  ;;  %v824_v27 = vsel %vm744_vm13, %v10702_v19, 0.0  ;;  %v834_v40 = vadd.f32 %v818_v14, %v7251_v5  ;;  %v826_v57 = vsel %vm746_vm14, %v10703_v26, 0.0  ;;  %v7460_v17 = vld [vmem:[%s9675_s1 + $0x38] sm:$0xff]  ;;  %v10708_v21 = vld [vmem:[#allocation134_spill] sm:$0xff] }
 0x5d7   :  { %10698 = vst [vmem:[#allocation17_spill] sm:$0xff] %v7419_v41  ;;  %v820_v49 = vsel %vm740_vm10, %v10699_v43, 0.0  ;;  %v7445_v43 = vadd.f32 %v825_v60, %v681_v50  ;;  %v828_v62 = vsel %vm748_vm15, %v10704_v52, 0.0  ;;  %v7464_v5 = vadd.f32 %v827_v33, %v683_v9  ;;  %v10709_v20 = vld [vmem:[#allocation138_spill] sm:$0xff]  ;;  %v10710_v14 = vld [vmem:[#allocation141_spill] sm:$0xff]  ;;  %v10711_v9 = vld [vmem:[#allocation140_spill] sm:$0xff] }
 0x5d8   :  { %3599 = vperm.xlu1 %4134, %v7151_v7   ;;  %v836_v7 = vadd.f32 %v820_v49, %v7284_v25  ;;  %v838_v50 = vadd.f32 %v822_v12, %v7294_v24  ;;  %vm896_vm0 = vcmp.eq.s32.totalorder %v10706_v46, %v6784_v23  ;;  %vm893_vm1 = vcmp.eq.s32.totalorder %v10708_v21, %v6784_v23  ;;  %v10712_v60 = vld [vmem:[#allocation150_spill] sm:$0xff]  ;;  %v10715_v34 = vld [vmem:[#allocation144_spill] sm:$0xff]  ;;  %v10720_v26 = vld [vmem:[#allocation147_spill] sm:$0xff] }
 0x5d9   :  { %v7455_v31 = vpop.permute.xlu1 %3291  ;;  %3818 = vperm.xlu0 %4136, %v7460_v17   ;;  %v840_v44 = vadd.f32 %v824_v27, %v7297_v0  ;;  %vm898_vm2 = vcmp.eq.s32.totalorder %v10709_v20, %v6784_v23  ;;  %vm894_vm3 = vcmp.eq.s32.totalorder %v10710_v14, %v6784_v23  ;;  %v842_v25 = vadd.f32 %v826_v57, %v7312_v38  ;;  %v10713_v33 = vld [vmem:[#allocation142_spill] sm:$0xff]  ;;  %v10714_v0 = vld [vmem:[#allocation143_spill] sm:$0xff]  ;;  %v10716_v12 = vld [vmem:[#allocation152_spill] sm:$0xff] }
 0x5da   :  { %10705 = vst [vmem:[#allocation18_spill] sm:$0xff] %v7455_v31  ;;  %v7469_v47 = vpop.permute.xlu0 %3498  ;;  %v844_v24 = vadd.f32 %v828_v62, %v7315_v48  ;;  %vm900_vm4 = vcmp.eq.s32.totalorder %v10711_v9, %v6784_v23  ;;  %v974_v49 = vsel %vm894_vm3, %v10712_v60, 0.0  ;;  %vm902_vm5 = vcmp.eq.s32.totalorder %v10713_v33, %v6784_v23  ;;  %v7496_v48 = vld [vmem:[%s9675_s1 + $0x48] sm:$0xff]  ;;  %v10719_v27 = vld [vmem:[#allocation146_spill] sm:$0xff]  ;;  %v10723_v46 = vld [vmem:[#allocation148_spill] sm:$0xff] }
 0x5db   :  { %10707 = vst [vmem:[#allocation27_spill] sm:$0xff] %v7469_v47  ;;  %vm895_vm6 = vcmp.eq.s32.totalorder %v10714_v0, %v6784_v23  ;;  %vm904_vm7 = vcmp.eq.s32.totalorder %v10715_v34, %v6784_v23  ;;  %v976_v38 = vsel %vm896_vm0, %v10716_v12, 0.0  ;;  %vm906_vm9 = vcmp.eq.s32.totalorder %v10719_v27, %v6784_v23  ;;  %v10721_v57 = vld [vmem:[#allocation154_spill] sm:$0xff]  ;;  %v10724_v14 = vld [vmem:[#allocation149_spill] sm:$0xff]  ;;  %v10725_v12 = vld [vmem:[#allocation156_spill] sm:$0xff] }
 0x5dc   :  { %3605 = vperm.xlu1 %4134, %v7194_v37   ;;  %v10718_v37 = vld [vmem:[#allocation145_spill] sm:$0xff]  ;;  %vm899_vm10 = vcmp.eq.s32.totalorder %v10720_v26, %v6784_v23  ;;  %v978_v52 = vsel %vm898_vm2, %v10721_v57, 0.0  ;;  %vm908_vm11 = vcmp.eq.s32.totalorder %v10723_v46, %v6784_v23  ;;  %vm901_vm12 = vcmp.eq.s32.totalorder %v10724_v14, %v6784_v23  ;;  %v10726_v31 = vld [vmem:[#allocation151_spill] sm:$0xff]  ;;  %v10732_v21 = vld [vmem:[#allocation160_spill] sm:$0xff] }
 0x5dd   :  { %v7491_v19 = vpop.permute.xlu1 %3314  ;;  %3826 = vperm.xlu0 %4136, %v7496_v48   ;;  %vm897_vm8 = vcmp.eq.s32.totalorder %v10718_v37, %v6784_v23  ;;  %v7515_v60 = vadd.f32 %v974_v49, %v830_v45  ;;  %vm903_vm13 = vcmp.eq.s32.totalorder %v10726_v31, %v6784_v23  ;;  %v7523_v20 = vadd.f32 %v976_v38, %v832_v58  ;;  %v10727_v57 = vld [vmem:[#allocation153_spill] sm:$0xff]  ;;  %v10729_v9 = vld [vmem:[#allocation155_spill] sm:$0xff]  ;;  %v10730_v49 = vld [vmem:[#allocation158_spill] sm:$0xff] }
 0x5de   :  { %10717 = vst [vmem:[#allocation28_spill] sm:$0xff] %v7491_v19  ;;  %v7509_v62 = vpop.permute.xlu0 %3506  ;;  %v980_v19 = vsel %vm900_vm4, %v10725_v12, 0.0  ;;  %vm905_vm14 = vcmp.eq.s32.totalorder %v10727_v57, %v6784_v23  ;;  %v7532_v45 = vadd.f32 %v978_v52, %v834_v40  ;;  %vm907_vm15 = vcmp.eq.s32.totalorder %v10729_v9, %v6784_v23  ;;  %v10731_v38 = vld [vmem:[#allocation159_spill] sm:$0xff]  ;;  %v10733_v52 = vld [vmem:[#allocation161_spill] sm:$0xff]  ;;  %v10845_v41 = vld [vmem:[#allocation258_spill] sm:$0xff] }
 0x5df   :  { %10722 = vst [vmem:[#allocation19_spill] sm:$0xff] %v7509_v62  ;;  %v10728_v62 = vld [vmem:[#allocation157_spill] sm:$0xff]  ;;  %v982_v58 = vsel %vm902_vm5, %v10730_v49, 0.0  ;;  %v975_v12 = vsel %vm895_vm6, %v10731_v38, 0.0  ;;  %v7552_v40 = vadd.f32 %v980_v19, %v836_v7  ;;  %v984_v33 = vsel %vm904_vm7, %v10732_v21, 0.0  ;;  %v10736_v19 = vld [vmem:[#allocation163_spill] sm:$0xff] }
 0x5e0   :  { %v973_v15 = vsel %vm893_vm1, %v10728_v62, 0.0  ;;  %3611 = vperm.xlu1 %4134, %v7248_v1   ;;  %v7549_v1 = vld [vmem:[%s9675_s1 + $0x58] sm:$0xff]  ;;  %v977_v0 = vsel %vm897_vm8, %v10733_v52, 0.0  ;;  %v10734_v62 = vld [vmem:[#allocation162_spill] sm:$0xff]  ;;  %v979_v34 = vsel %vm899_vm10, %v10736_v19, 0.0  ;;  %v10737_v21 = vld [vmem:[#allocation164_spill] sm:$0xff]  ;;  %v7593_v19 = vadd.f32 %v984_v33, %v840_v44 }
 0x5e1   :  { %v7544_v63 = vpop.permute.xlu1 %3322  ;;  %3834 = vperm.xlu0 %4136, %v7549_v1   ;;  %v986_v49 = vsel %vm906_vm9, %v10734_v62, 0.0  ;;  %v989_v7 = vadd.f32 %v973_v15, %v7366_v3  ;;  %v988_v37 = vsel %vm908_vm11, %v10737_v21, 0.0  ;;  %v10738_v52 = vld [vmem:[#allocation165_spill] sm:$0xff]  ;;  %v7581_v62 = vadd.f32 %v982_v58, %v838_v50  ;;  %v10739_v15 = vld [vmem:[#allocation167_spill] sm:$0xff]  ;;  %v10744_v33 = vld [vmem:[#allocation168_spill] sm:$0xff] }
 0x5e2   :  { %v7566_v38 = vpop.permute.xlu0 %3514  ;;  %v981_v27 = vsel %vm901_vm12, %v10738_v52, 0.0  ;;  %v983_v3 = vsel %vm903_vm13, %v10739_v15, 0.0  ;;  %v10740_v26 = vld [vmem:[#allocation169_spill] sm:$0xff]  ;;  %v993_v14 = vadd.f32 %v977_v0, %v7385_v53  ;;  %v7596_v50 = vadd.f32 %v986_v49, %v842_v25  ;;  %v10741_v58 = vld [vmem:[#allocation171_spill] sm:$0xff]  ;;  %v10742_v25 = vld [vmem:[#allocation166_spill] sm:$0xff] }
 0x5e3   :  { %10735 = vst [vmem:[#allocation20_spill] sm:$0xff] %v7566_v38  ;;  %v991_v38 = vadd.f32 %v975_v12, %v7374_v35  ;;  %v985_v46 = vsel %vm905_vm14, %v10740_v26, 0.0  ;;  %v987_v35 = vsel %vm907_vm15, %v10741_v58, 0.0  ;;  %v7607_v57 = vld [vmem:[%s9675_s1 + $0x68] sm:$0xff]  ;;  %v7611_v44 = vadd.f32 %v988_v37, %v844_v24  ;;  %v10745_v49 = vld [vmem:[#allocation173_spill] sm:$0xff]  ;;  %v10751_v37 = vld [vmem:[#allocation176_spill] sm:$0xff] }
 0x5e4   :  { %3634 = vperm.xlu1 %4134, %v7308_v54   ;;  %v995_v54 = vadd.f32 %v979_v34, %v7409_v32  ;;  %v997_v53 = vadd.f32 %v981_v27, %v7434_v59  ;;  %vm1054_vm0 = vcmp.eq.s32.totalorder %v10742_v25, %v6784_v23  ;;  %v999_v12 = vadd.f32 %v983_v3, %v7437_v11  ;;  %v10746_v32 = vld [vmem:[#allocation170_spill] sm:$0xff]  ;;  %v10747_v24 = vld [vmem:[#allocation175_spill] sm:$0xff]  ;;  %v10748_v34 = vld [vmem:[#allocation180_spill] sm:$0xff] }
 0x5e5   :  { %v7602_v31 = vpop.permute.xlu1 %3330  ;;  %3842 = vperm.xlu0 %4136, %v7607_v57   ;;  %vm1057_vm1 = vcmp.eq.s32.totalorder %v10744_v33, %v6784_v23  ;;  %v1001_v0 = vadd.f32 %v985_v46, %v7445_v43  ;;  %vm1053_vm2 = vcmp.eq.s32.totalorder %v10745_v49, %v6784_v23  ;;  %vm1059_vm3 = vcmp.eq.s32.totalorder %v10746_v32, %v6784_v23  ;;  %v10749_v11 = vld [vmem:[#allocation172_spill] sm:$0xff]  ;;  %v10750_v43 = vld [vmem:[#allocation174_spill] sm:$0xff]  ;;  %v10757_v58 = vld [vmem:[#allocation179_spill] sm:$0xff] }
 0x5e6   :  { %v7616_v9 = vpop.permute.xlu0 %3522  ;;  %v1003_v59 = vadd.f32 %v987_v35, %v7464_v5  ;;  %vm1055_vm4 = vcmp.eq.s32.totalorder %v10747_v24, %v6784_v23  ;;  %v1133_v21 = vsel %vm1053_vm2, %v10748_v34, 0.0  ;;  %vm1061_vm5 = vcmp.eq.s32.totalorder %v10749_v11, %v6784_v23  ;;  %v10752_v52 = vld [vmem:[#allocation182_spill] sm:$0xff]  ;;  %v7643_v5 = vld [vmem:[%s9675_s1 + $0x78] sm:$0xff]  ;;  %v10756_v26 = vld [vmem:[#allocation184_spill] sm:$0xff] }
 0x5e7   :  { %10743 = vst [vmem:[#allocation21_spill] sm:$0xff] %v7616_v9  ;;  %vm1063_vm6 = vcmp.eq.s32.totalorder %v10750_v43, %v6784_v23  ;;  %vm1065_vm7 = vcmp.eq.s32.totalorder %v10751_v37, %v6784_v23  ;;  %v1135_v27 = vsel %vm1055_vm4, %v10752_v52, 0.0  ;;  %v10755_v3 = vld [vmem:[#allocation178_spill] sm:$0xff]  ;;  %v1137_v46 = vsel %vm1057_vm1, %v10756_v26, 0.0  ;;  %v10758_v49 = vld [vmem:[#allocation181_spill] sm:$0xff]  ;;  %v10761_v33 = vld [vmem:[#allocation183_spill] sm:$0xff] }
 0x5e8   :  { %3642 = vperm.xlu1 %4134, %v7347_v39   ;;  %v10754_v39 = vld [vmem:[#allocation177_spill] sm:$0xff]  ;;  %vm1067_vm9 = vcmp.eq.s32.totalorder %v10755_v3, %v6784_v23  ;;  %vm1058_vm10 = vcmp.eq.s32.totalorder %v10757_v58, %v6784_v23  ;;  %v7656_v35 = vadd.f32 %v1133_v21, %v989_v7  ;;  %vm1060_vm11 = vcmp.eq.s32.totalorder %v10758_v49, %v6784_v23  ;;  %v10759_v24 = vld [vmem:[#allocation186_spill] sm:$0xff]  ;;  %v10762_v26 = vld [vmem:[#allocation188_spill] sm:$0xff] }
 0x5e9   :  { %v7638_v15 = vpop.permute.xlu1 %3338  ;;  %3850 = vperm.xlu0 %4136, %v7643_v5   ;;  %vm1056_vm8 = vcmp.eq.s32.totalorder %v10754_v39, %v6784_v23  ;;  %v1139_v34 = vsel %vm1059_vm3, %v10759_v24, 0.0  ;;  %v7666_v9 = vadd.f32 %v1135_v27, %v991_v38  ;;  %vm1062_vm12 = vcmp.eq.s32.totalorder %v10761_v33, %v6784_v23  ;;  %v10763_v21 = vld [vmem:[#allocation190_spill] sm:$0xff]  ;;  %v10764_v38 = vld [vmem:[#allocation185_spill] sm:$0xff]  ;;  %v10765_v27 = vld [vmem:[#allocation191_spill] sm:$0xff] }
 0x5ea   :  { %10753 = vst [vmem:[#allocation22_spill] sm:$0xff] %v7638_v15  ;;  %v7664_v52 = vpop.permute.xlu0 %3530  ;;  %v1141_v7 = vsel %vm1061_vm5, %v10762_v26, 0.0  ;;  %v1143_v47 = vsel %vm1063_vm6, %v10763_v21, 0.0  ;;  %v7679_v32 = vadd.f32 %v1137_v46, %v993_v14  ;;  %vm1064_vm13 = vcmp.eq.s32.totalorder %v10764_v38, %v6784_v23  ;;  %v10768_v14 = vld [vmem:[#allocation187_spill] sm:$0xff]  ;;  %v10769_v46 = vld [vmem:[#allocation193_spill] sm:$0xff]  ;;  %v10770_v21 = vld [vmem:[#allocation194_spill] sm:$0xff] }
 0x5eb   :  { %10760 = vst [vmem:[#allocation23_spill] sm:$0xff] %v7664_v52  ;;  %v1134_v24 = vsel %vm1054_vm0, %v10765_v27, 0.0  ;;  %v10766_v52 = vld [vmem:[#allocation192_spill] sm:$0xff]  ;;  %v9925_v43 = vmov 24   ;;  %vm1066_vm14 = vcmp.eq.s32.totalorder %v10768_v14, %v6784_v23  ;;  %v1136_v25 = vsel %vm1056_vm8, %v10769_v46, 0.0  ;;  %v10772_v39 = vld [vmem:[#allocation195_spill] sm:$0xff] }
 0x5ec   :  { %3650 = vperm.xlu1 %4134, %v7404_v13   ;;  %v1145_v11 = vsel %vm1065_vm7, %v10766_v52, 0.0  ;;  %v7694_v13 = vadd.f32 %v1139_v34, %v995_v54  ;;  %v1147_v37 = vsel %vm1067_vm9, %v10770_v21, 0.0  ;;  %v7709_v52 = vld [vmem:[%s9674_s0 + $0x8] sm:$0xff]  ;;  %v7712_v54 = vadd.f32 %v1141_v7, %v997_v53  ;;  %v10771_v34 = vld [vmem:[#allocation189_spill] sm:$0xff]  ;;  %v10857_v55 = vld [vmem:[#allocation274_spill] sm:$0xff] }
 0x5ed   :  { %v7691_v26 = vpop.permute.xlu1 %3346  ;;  %4139 = vset.pattern.permute.xlu0 %v9925_v43  ;;  %vm1068_vm15 = vcmp.eq.s32.totalorder %v10771_v34, %v6784_v23  ;;  %v7716_v27 = vadd.f32 %v1143_v47, %v999_v12  ;;  %v1138_v3 = vsel %vm1058_vm10, %v10772_v39, 0.0  ;;  %v1150_v21 = vadd.f32 %v1134_v24, %v7515_v60  ;;  %v10774_v7 = vld [vmem:[#allocation199_spill] sm:$0xff]  ;;  %v10775_v39 = vld [vmem:[#allocation201_spill] sm:$0xff] }
 0x5ee   :  { %10767 = vst [vmem:[#allocation24_spill] sm:$0xff] %v7691_v26  ;;  %3889 = vperm.xlu0 %4139, %v7709_v52   ;;  %v7725_v43 = vadd.f32 %v1145_v11, %v1001_v0  ;;  %v10773_v26 = vld [vmem:[#allocation197_spill] sm:$0xff]  ;;  %v1142_v47 = vsel %vm1062_vm12, %v10774_v7, 0.0  ;;  %v1152_v12 = vadd.f32 %v1136_v25, %v7523_v20  ;;  %v7737_v58 = vadd.f32 %v1147_v37, %v1003_v59  ;;  %v10776_v0 = vld [vmem:[#allocation203_spill] sm:$0xff]  ;;  %v10779_v20 = vld [vmem:[#allocation200_spill] sm:$0xff] }
 0x5ef   :  { %v7722_v46 = vpop.permute.xlu0 %3569  ;;  %v1140_v53 = vsel %vm1060_vm11, %v10773_v26, 0.0  ;;  %v1144_v60 = vsel %vm1064_vm13, %v10775_v39, 0.0  ;;  %v1146_v49 = vsel %vm1066_vm14, %v10776_v0, 0.0  ;;  %v1154_v33 = vadd.f32 %v1138_v3, %v7532_v45  ;;  %v10780_v59 = vld [vmem:[#allocation205_spill] sm:$0xff]  ;;  %v7761_v11 = vld [vmem:[%s9674_s0 + $0x20] sm:$0xff]  ;;  %v10781_v45 = vld [vmem:[#allocation196_spill] sm:$0xff] }
 0x5f0   :  { %3658 = vperm.xlu1 %4134, %v7460_v17   ;;  %v10778_v17 = vld [vmem:[#allocation198_spill] sm:$0xff]  ;;  %vm1218_vm1 = vcmp.eq.s32.totalorder %v10779_v20, %v6784_v23  ;;  %v1148_v38 = vsel %vm1068_vm15, %v10780_v59, 0.0  ;;  %vm1213_vm2 = vcmp.eq.s32.totalorder %v10781_v45, %v6784_v23  ;;  %v1156_v26 = vadd.f32 %v1140_v53, %v7552_v40  ;;  %v10782_v25 = vld [vmem:[#allocation207_spill] sm:$0xff]  ;;  %v10784_v39 = vld [vmem:[#allocation212_spill] sm:$0xff] }
 0x5f1   :  { %v7747_v24 = vpop.permute.xlu1 %3354  ;;  %vm1216_vm0 = vcmp.eq.s32.totalorder %v10778_v17, %v6784_v23  ;;  %v1158_v14 = vadd.f32 %v1142_v47, %v7581_v62  ;;  %vm1214_vm3 = vcmp.eq.s32.totalorder %v10782_v25, %v6784_v23  ;;  %v1160_v34 = vadd.f32 %v1144_v60, %v7593_v19  ;;  %v10783_v3 = vld [vmem:[#allocation202_spill] sm:$0xff]  ;;  %v10785_v40 = vld [vmem:[#allocation204_spill] sm:$0xff]  ;;  %v10793_v20 = vld [vmem:[#allocation211_spill] sm:$0xff] }
 0x5f2   :  { %10777 = vst [vmem:[#allocation29_spill] sm:$0xff] %v7747_v24  ;;  %3898 = vperm.xlu0 %4139, %v7761_v11   ;;  %vm1220_vm4 = vcmp.eq.s32.totalorder %v10783_v3, %v6784_v23  ;;  %v1162_v7 = vadd.f32 %v1146_v49, %v7596_v50  ;;  %v1294_v0 = vsel %vm1214_vm3, %v10784_v39, 0.0  ;;  %vm1222_vm5 = vcmp.eq.s32.totalorder %v10785_v40, %v6784_v23  ;;  %v10786_v53 = vld [vmem:[#allocation214_spill] sm:$0xff]  ;;  %v10787_v19 = vld [vmem:[#allocation216_spill] sm:$0xff]  ;;  %v10794_v25 = vld [vmem:[#allocation213_spill] sm:$0xff] }
 0x5f3   :  { %v7770_v37 = vpop.permute.xlu0 %3578  ;;  %v1164_v62 = vadd.f32 %v1148_v38, %v7611_v44  ;;  %v1296_v47 = vsel %vm1216_vm0, %v10786_v53, 0.0  ;;  %v1298_v60 = vsel %vm1218_vm1, %v10787_v19, 0.0  ;;  %v10789_v49 = vld [vmem:[#allocation206_spill] sm:$0xff]  ;;  %v10791_v44 = vld [vmem:[#allocation209_spill] sm:$0xff]  ;;  %v7802_v17 = vld [vmem:[%s9674_s0 + $0x30] sm:$0xff]  ;;  %vm1217_vm10 = vcmp.eq.s32.totalorder %v10793_v20, %v6784_v23 }
 0x5f4   :  { %3666 = vperm.xlu1 %4134, %v7496_v48   ;;  %vm1224_vm6 = vcmp.eq.s32.totalorder %v10789_v49, %v6784_v23  ;;  %v10790_v48 = vld [vmem:[#allocation208_spill] sm:$0xff]  ;;  %vm1215_vm8 = vcmp.eq.s32.totalorder %v10791_v44, %v6784_v23  ;;  %v10792_v59 = vld [vmem:[#allocation210_spill] sm:$0xff]  ;;  %v7807_v38 = vadd.f32 %v1294_v0, %v1150_v21  ;;  %vm1219_vm11 = vcmp.eq.s32.totalorder %v10794_v25, %v6784_v23  ;;  %v10796_v24 = vld [vmem:[#allocation215_spill] sm:$0xff] }
 0x5f5   :  { %v7789_v50 = vpop.permute.xlu1 %3362  ;;  %vm1226_vm7 = vcmp.eq.s32.totalorder %v10790_v48, %v6784_v23  ;;  %vm1228_vm9 = vcmp.eq.s32.totalorder %v10792_v59, %v6784_v23  ;;  %v10795_v39 = vld [vmem:[#allocation218_spill] sm:$0xff]  ;;  %vm1221_vm12 = vcmp.eq.s32.totalorder %v10796_v24, %v6784_v23  ;;  %v7821_v29 = vadd.f32 %v1298_v60, %v1154_v33  ;;  %v10798_v0 = vld [vmem:[#allocation217_spill] sm:$0xff]  ;;  %v10801_v60 = vld [vmem:[#allocation224_spill] sm:$0xff] }
 0x5f6   :  { %10788 = vst [vmem:[#allocation30_spill] sm:$0xff] %v7789_v50  ;;  %3904 = vperm.xlu0 %4139, %v7802_v17   ;;  %v1300_v53 = vsel %vm1220_vm4, %v10795_v39, 0.0  ;;  %v7817_v50 = vadd.f32 %v1296_v47, %v1152_v12  ;;  %v1302_v21 = vsel %vm1222_vm5, %v10797_v4, 0.0  ;;  %vm1223_vm13 = vcmp.eq.s32.totalorder %v10798_v0, %v6784_v23  ;;  %v10799_v3 = vld [vmem:[#allocation222_spill] sm:$0xff]  ;;  %v10800_v47 = vld [vmem:[#allocation223_spill] sm:$0xff]  ;;  %v10803_v39 = vld [vmem:[#allocation225_spill] sm:$0xff] }
 0x5f7   :  { %v7815_v19 = vpop.permute.xlu0 %3584  ;;  %v1304_v12 = vsel %vm1224_vm6, %v10799_v3, 0.0  ;;  %v1293_v33 = vsel %vm1213_vm2, %v10800_v47, 0.0  ;;  %v1306_v4 = vsel %vm1226_vm7, %v10801_v60, 0.0  ;;  %v1295_v49 = vsel %vm1215_vm8, %v10803_v39, 0.0  ;;  %v10804_v3 = vld [vmem:[#allocation226_spill] sm:$0xff]  ;;  %v10805_v47 = vld [vmem:[#allocation227_spill] sm:$0xff] }
 0x5f8   :  { %3674 = vperm.xlu1 %4134, %v7549_v1   ;;  %v7844_v1 = vadd.f32 %v1300_v53, %v1156_v26  ;;  %v1308_v45 = vsel %vm1228_vm9, %v10804_v3, 0.0  ;;  %v1297_v48 = vsel %vm1217_vm10, %v10805_v47, 0.0  ;;  %v7861_v26 = vld [vmem:[%s9674_s0 + $0x40] sm:$0xff]  ;;  %v10806_v44 = vld [vmem:[#allocation219_spill] sm:$0xff]  ;;  %v7866_v53 = vadd.f32 %v1302_v21, %v1158_v14  ;;  %v10807_v60 = vld [vmem:[#allocation229_spill] sm:$0xff] }
 0x5f9   :  { %v7842_v40 = vpop.permute.xlu1 %3370  ;;  %vm1225_vm14 = vcmp.eq.s32.totalorder %v10806_v44, %v6784_v23  ;;  %v1299_v59 = vsel %vm1219_vm11, %v10807_v60, 0.0  ;;  %v10808_v39 = vld [vmem:[#allocation231_spill] sm:$0xff]  ;;  %v10809_v47 = vld [vmem:[#allocation221_spill] sm:$0xff]  ;;  %v1309_v14 = vadd.f32 %v1293_v33, %v7656_v35  ;;  %v7883_v21 = vadd.f32 %v1306_v4, %v1162_v7  ;;  %v10821_v44 = vld [vmem:[#allocation242_spill] sm:$0xff] }
 0x5fa   :  { %10802 = vst [vmem:[#allocation31_spill] sm:$0xff] %v7842_v40  ;;  %3910 = vperm.xlu0 %4139, %v7861_v26   ;;  %v1301_v20 = vsel %vm1221_vm12, %v10808_v39, 0.0  ;;  %vm1227_vm15 = vcmp.eq.s32.totalorder %v10809_v47, %v6784_v23  ;;  %v7880_v40 = vadd.f32 %v1304_v12, %v1160_v34  ;;  %v1311_v25 = vadd.f32 %v1295_v49, %v7666_v9  ;;  %v10810_v39 = vld [vmem:[#allocation228_spill] sm:$0xff]  ;;  %v10811_v34 = vld [vmem:[#allocation230_spill] sm:$0xff]  ;;  %v10812_v7 = vld [vmem:[#allocation233_spill] sm:$0xff] }
 0x5fb   :  { %v7876_v3 = vpop.permute.xlu0 %3590  ;;  %v7887_v60 = vadd.f32 %v1308_v45, %v1164_v62  ;;  %v1313_v24 = vadd.f32 %v1297_v48, %v7679_v32  ;;  %vm1374_vm0 = vcmp.eq.s32.totalorder %v10810_v39, %v6784_v23  ;;  %v1315_v28 = vadd.f32 %v1299_v59, %v7694_v13  ;;  %v7905_v32 = vld [vmem:[%s9674_s0 + $0x50] sm:$0xff]  ;;  %v10815_v62 = vld [vmem:[#allocation235_spill] sm:$0xff]  ;;  %v10816_v12 = vld [vmem:[#allocation237_spill] sm:$0xff] }
 0x5fc   :  { %3682 = vperm.xlu1 %4134, %v7607_v57   ;;  %vm1377_vm1 = vcmp.eq.s32.totalorder %v10811_v34, %v6784_v23  ;;  %v1317_v35 = vadd.f32 %v1301_v20, %v7712_v54  ;;  %v1303_v57 = vsel %vm1223_vm13, %v10812_v7, 0.0  ;;  %v10814_v13 = vld [vmem:[#allocation232_spill] sm:$0xff]  ;;  %v1305_v54 = vsel %vm1225_vm14, %v10815_v62, 0.0  ;;  %v10817_v33 = vld [vmem:[#allocation239_spill] sm:$0xff]  ;;  %v10818_v49 = vld [vmem:[#allocation234_spill] sm:$0xff] }
 0x5fd   :  { %vm1379_vm2 = vcmp.eq.s32.totalorder %v10814_v13, %v6784_v23  ;;  %v1307_v0 = vsel %vm1227_vm15, %v10816_v12, 0.0  ;;  %vm1373_vm3 = vcmp.eq.s32.totalorder %v10817_v33, %v6784_v23  ;;  %vm1381_vm4 = vcmp.eq.s32.totalorder %v10818_v49, %v6784_v23  ;;  %v10819_v45 = vld [vmem:[#allocation236_spill] sm:$0xff]  ;;  %v10820_v48 = vld [vmem:[#allocation241_spill] sm:$0xff]  ;;  %v10822_v47 = vld [vmem:[#allocation238_spill] sm:$0xff] }
 0x5fe   :  { %v7900_v9 = vpop.permute.xlu1 %3409  ;;  %3916 = vperm.xlu0 %4139, %v7905_v32   ;;  %vm1383_vm5 = vcmp.eq.s32.totalorder %v10819_v45, %v6784_v23  ;;  %vm1375_vm6 = vcmp.eq.s32.totalorder %v10820_v48, %v6784_v23  ;;  %v1453_v59 = vsel %vm1373_vm3, %v10821_v44, 0.0  ;;  %v1319_v20 = vadd.f32 %v1303_v57, %v7716_v27  ;;  %v10823_v7 = vld [vmem:[#allocation244_spill] sm:$0xff]  ;;  %v10824_v12 = vld [vmem:[#allocation246_spill] sm:$0xff]  ;;  %v10834_v15 = vld [vmem:[#allocation247_spill] sm:$0xff] }
 0x5ff   :  { %10813 = vst [vmem:[#allocation32_spill] sm:$0xff] %v7900_v9  ;;  %v7920_v4 = vpop.permute.xlu0 %3596  ;;  %vm1385_vm7 = vcmp.eq.s32.totalorder %v10822_v47, %v6784_v23  ;;  %v1455_v62 = vsel %vm1375_vm6, %v10823_v7, 0.0  ;;  %v1457_v33 = vsel %vm1377_vm1, %v10824_v12, 0.0  ;;  %v1321_v9 = vadd.f32 %v1305_v54, %v7725_v43  ;;  %v10825_v44 = vld [vmem:[#allocation240_spill] sm:$0xff]  ;;  %v7951_v7 = vld [vmem:[%s9674_s0 + $0x60] sm:$0xff]  ;;  %v10837_v47 = vld [vmem:[#allocation249_spill] sm:$0xff] }
 0x600   :  { %3690 = vperm.xlu1 %4134, %v7643_v5   ;;  %v1323_v48 = vadd.f32 %v1307_v0, %v7737_v58  ;;  %vm1387_vm8 = vcmp.eq.s32.totalorder %v10825_v44, %v6784_v23  ;;  %v10826_v5 = vld [vmem:[#allocation248_spill] sm:$0xff]  ;;  %v7954_v43 = vadd.f32 %v1453_v59, %v1309_v14  ;;  %v10828_v58 = vld [vmem:[#allocation243_spill] sm:$0xff]  ;;  %v10829_v34 = vld [vmem:[#allocation250_spill] sm:$0xff]  ;;  %v7972_v59 = vadd.f32 %v1457_v33, %v1313_v24 }
 0x601   :  { %v1459_v27 = vsel %vm1379_vm2, %v10826_v5, 0.0  ;;  %vm1376_vm9 = vcmp.eq.s32.totalorder %v10828_v58, %v6784_v23  ;;  %v1461_v13 = vsel %vm1381_vm4, %v10829_v34, 0.0  ;;  %v10830_v54 = vld [vmem:[#allocation252_spill] sm:$0xff]  ;;  %v7968_v5 = vadd.f32 %v1455_v62, %v1311_v25  ;;  %v10831_v14 = vld [vmem:[#allocation245_spill] sm:$0xff] }
 0x602   :  { %v7946_v57 = vpop.permute.xlu1 %3412  ;;  %3922 = vperm.xlu0 %4139, %v7951_v7   ;;  %v1463_v0 = vsel %vm1383_vm5, %v10830_v54, 0.0  ;;  %vm1378_vm10 = vcmp.eq.s32.totalorder %v10831_v14, %v6784_v23  ;;  %v10833_v34 = vmov 23   ;;  %vm1380_vm11 = vcmp.eq.s32.totalorder %v10834_v15, %v6784_v23  ;;  %v10835_v54 = vld [vmem:[#allocation256_spill] sm:$0xff]  ;;  %v10836_v62 = vld [vmem:[#allocation257_spill] sm:$0xff]  ;;  %v10849_v15 = vld [vmem:[#allocation262_spill] sm:$0xff] }
 0x603   :  { %10827 = vst [vmem:[#allocation33_spill] sm:$0xff] %v7946_v57  ;;  %v7966_v12 = vpop.permute.xlu0 %3602  ;;  %v10832_v57 = vld [vmem:[#allocation254_spill] sm:$0xff]  ;;  %v7981_v45 = vadd.f32 %v1459_v27, %v1315_v28  ;;  %v1467_v25 = vsel %vm1387_vm8, %v10835_v54, 0.0  ;;  %v1454_v24 = vsel %vm1374_vm0, %v10836_v62, 0.0  ;;  %vm1382_vm12 = vcmp.eq.s32.totalorder %v10837_v47, %v6784_v23  ;;  %v10838_v28 = vld [vmem:[#allocation251_spill] sm:$0xff]  ;;  %v8005_v44 = vld [vmem:[%s9674_s0 + $0x70] sm:$0xff] }
 0x604   :  { %v1465_v49 = vsel %vm1385_vm7, %v10832_v57, 0.0  ;;  %4137 = vset.pattern.permute.xlu1 %v10833_v34  ;;  %v7994_v33 = vadd.f32 %v1461_v13, %v1317_v35  ;;  %vm1384_vm13 = vcmp.eq.s32.totalorder %v10838_v28, %v6784_v23  ;;  %v7998_v27 = vadd.f32 %v1463_v0, %v1319_v20  ;;  %v10841_v35 = vld [vmem:[#allocation255_spill] sm:$0xff]  ;;  %v10843_v62 = vld [vmem:[#allocation261_spill] sm:$0xff]  ;;  %v10846_v58 = vld [vmem:[#allocation260_spill] sm:$0xff] }
 0x605   :  { %3729 = vperm.xlu1 %4137, %v7709_v52   ;;  %v10840_v52 = vld [vmem:[#allocation253_spill] sm:$0xff]  ;;  %v8010_v39 = vadd.f32 %v1465_v49, %v1321_v9  ;;  %vm1388_vm15 = vcmp.eq.s32.totalorder %v10841_v35, %v6784_v23  ;;  %v10842_v13 = vld [vmem:[#allocation259_spill] sm:$0xff]  ;;  %v8020_v34 = vadd.f32 %v1467_v25, %v1323_v48  ;;  %v1470_v54 = vadd.f32 %v1454_v24, %v7807_v38  ;;  %v10853_v28 = vld [vmem:[#allocation264_spill] sm:$0xff] }
 0x606   :  { %v8000_v57 = vpop.permute.xlu1 %3418  ;;  %3928 = vperm.xlu0 %4139, %v8005_v44   ;;  %vm1386_vm14 = vcmp.eq.s32.totalorder %v10840_v52, %v6784_v23  ;;  %v1456_v20 = vsel %vm1376_vm9, %v10842_v13, 0.0  ;;  %v1458_v9 = vsel %vm1378_vm10, %v10843_v62, 0.0  ;;  %v10844_v49 = vld [vmem:[#allocation263_spill] sm:$0xff]  ;;  %vm1533_vm0 = vcmp.eq.s32.totalorder %v10845_v41, %v6784_v23  ;;  %v10847_v48 = vld [vmem:[#allocation265_spill] sm:$0xff] }
 0x607   :  { %10839 = vst [vmem:[#allocation34_spill] sm:$0xff] %v8000_v57  ;;  %v8018_v0 = vpop.permute.xlu0 %3608  ;;  %v1460_v57 = vsel %vm1380_vm11, %v10844_v49, 0.0  ;;  %vm1536_vm1 = vcmp.eq.s32.totalorder %v10846_v58, %v6784_v23  ;;  %v1462_v38 = vsel %vm1382_vm12, %v10847_v48, 0.0  ;;  %v10848_v25 = vld [vmem:[#allocation273_spill] sm:$0xff]  ;;  %v1472_v14 = vadd.f32 %v1456_v20, %v7817_v50  ;;  %v10850_v24 = vld [vmem:[#allocation267_spill] sm:$0xff] }
 0x608   :  { %vm1534_vm2 = vcmp.eq.s32.totalorder %v10848_v25, %v6784_v23  ;;  %vm1538_vm3 = vcmp.eq.s32.totalorder %v10849_v15, %v6784_v23  ;;  %v1464_v13 = vsel %vm1384_vm13, %v10850_v24, 0.0  ;;  %v10851_v62 = vld [vmem:[#allocation269_spill] sm:$0xff]  ;;  %v1474_v50 = vadd.f32 %v1458_v9, %v7821_v29  ;;  %v10854_v48 = vld [vmem:[#allocation271_spill] sm:$0xff]  ;;  %v10859_v9 = vld [vmem:[#allocation268_spill] sm:$0xff] }
 0x609   :  { %3732 = vperm.xlu1 %4137, %v7180_v56   ;;  %v1466_v47 = vsel %vm1386_vm14, %v10851_v62, 0.0  ;;  %v8058_v56 = vld [vmem:[%s9675_s1] sm:$0xff]  ;;  %v1476_v20 = vadd.f32 %v1460_v57, %v7844_v1  ;;  %vm1540_vm4 = vcmp.eq.s32.totalorder %v10853_v28, %v6784_v23  ;;  %v1468_v52 = vsel %vm1388_vm15, %v10854_v48, 0.0  ;;  %v10858_v1 = vld [vmem:[#allocation276_spill] sm:$0xff]  ;;  %v10865_v15 = vld [vmem:[#allocation275_spill] sm:$0xff] }
 0x60a   :  { %v8053_v49 = vpop.permute.xlu1 %3424  ;;  %3950 = vperm.xlu0 %4139, %v8058_v56   ;;  %v1478_v62 = vadd.f32 %v1462_v38, %v7866_v53  ;;  %v1614_v29 = vsel %vm1534_vm2, %v10857_v55, 0.0  ;;  %v1616_v57 = vsel %vm1536_vm1, %v10858_v1, 0.0  ;;  %v1480_v35 = vadd.f32 %v1464_v13, %v7880_v40  ;;  %v10860_v38 = vld [vmem:[#allocation278_spill] sm:$0xff]  ;;  %v10862_v25 = vld [vmem:[#allocation272_spill] sm:$0xff] }
 0x60b   :  { %10852 = vst [vmem:[#allocation35_spill] sm:$0xff] %v8053_v49  ;;  %v8069_v24 = vpop.permute.xlu0 %3630  ;;  %v10856_v49 = vld [vmem:[#allocation266_spill] sm:$0xff]  ;;  %vm1544_vm6 = vcmp.eq.s32.totalorder %v10859_v9, %v6784_v23  ;;  %v1482_v53 = vadd.f32 %v1466_v47, %v7883_v21  ;;  %v1618_v28 = vsel %vm1538_vm3, %v10860_v38, 0.0  ;;  %v1484_v58 = vadd.f32 %v1468_v52, %v7887_v60  ;;  %v10863_v40 = vld [vmem:[#allocation280_spill] sm:$0xff]  ;;  %v10867_v38 = vld [vmem:[#allocation277_spill] sm:$0xff] }
 0x60c   :  { %10855 = vst [vmem:[#allocation36_spill] sm:$0xff] %v8069_v24  ;;  %vm1542_vm5 = vcmp.eq.s32.totalorder %v10856_v49, %v6784_v23  ;;  %v10861_v55 = vld [vmem:[#allocation270_spill] sm:$0xff]  ;;  %vm1548_vm8 = vcmp.eq.s32.totalorder %v10862_v25, %v6784_v23  ;;  %v1620_v13 = vsel %vm1540_vm4, %v10863_v40, 0.0  ;;  %v8102_v21 = vld [vmem:[%s9675_s1 + $0x10] sm:$0xff]  ;;  %vm1535_vm9 = vcmp.eq.s32.totalorder %v10865_v15, %v6784_v23  ;;  %v10870_v49 = vld [vmem:[#allocation281_spill] sm:$0xff] }
 0x60d   :  { %3738 = vperm.xlu1 %4137, %v7761_v11   ;;  %vm1546_vm7 = vcmp.eq.s32.totalorder %v10861_v55, %v6784_v23  ;;  %v8105_v11 = vadd.f32 %v1614_v29, %v1470_v54  ;;  %v8109_v60 = vadd.f32 %v1616_v57, %v1472_v14  ;;  %v10866_v47 = vld [vmem:[#allocation282_spill] sm:$0xff]  ;;  %vm1537_vm10 = vcmp.eq.s32.totalorder %v10867_v38, %v6784_v23  ;;  %v10868_v54 = vld [vmem:[#allocation279_spill] sm:$0xff]  ;;  %v10869_v29 = vld [vmem:[#allocation284_spill] sm:$0xff] }
 0x60e   :  { %v8097_v48 = vpop.permute.xlu1 %3430  ;;  %3958 = vperm.xlu0 %4139, %v8102_v21   ;;  %v1622_v52 = vsel %vm1542_vm5, %v10866_v47, 0.0  ;;  %v8119_v40 = vadd.f32 %v1618_v28, %v1474_v50  ;;  %vm1539_vm11 = vcmp.eq.s32.totalorder %v10868_v54, %v6784_v23  ;;  %v1624_v14 = vsel %vm1544_vm6, %v10869_v29, 0.0  ;;  %v10871_v47 = vld [vmem:[#allocation286_spill] sm:$0xff]  ;;  %v10872_v9 = vld [vmem:[#allocation283_spill] sm:$0xff]  ;;  %v10883_v54 = vld [vmem:[#allocation292_spill] sm:$0xff] }
 0x60f   :  { %10864 = vst [vmem:[#allocation37_spill] sm:$0xff] %v8097_v48  ;;  %v8115_v1 = vpop.permute.xlu0 %3638  ;;  %v8127_v57 = vadd.f32 %v1620_v13, %v1476_v20  ;;  %vm1541_vm12 = vcmp.eq.s32.totalorder %v10870_v49, %v6784_v23  ;;  %v1626_v48 = vsel %vm1546_vm7, %v10871_v47, 0.0  ;;  %vm3617_vm13 = vcmp.eq.s32.totalorder %v7770_v37, %v6784_v23  ;;  %v10873_v20 = vld [vmem:[#allocation288_spill] sm:$0xff]  ;;  %v10874_v13 = vld [vmem:[#allocation289_spill] sm:$0xff]  ;;  %v10877_v25 = vld [vmem:[#allocation291_spill] sm:$0xff] }
 0x610   :  { %v8138_v50 = vadd.f32 %v1622_v52, %v1478_v62  ;;  %vm1543_vm14 = vcmp.eq.s32.totalorder %v10872_v9, %v6784_v23  ;;  %v1628_v28 = vsel %vm1548_vm8, %v10873_v20, 0.0  ;;  %v1613_v55 = vsel %vm1533_vm0, %v10874_v13, 0.0  ;;  %v10876_v52 = vld [vmem:[#allocation285_spill] sm:$0xff]  ;;  %v10879_v24 = vld [vmem:[#allocation287_spill] sm:$0xff] }
 0x611   :  { %3744 = vperm.xlu1 %4137, %v7802_v17   ;;  %v8155_v17 = vld [vmem:[%s9675_s1 + $0x20] sm:$0xff]  ;;  %v8158_v62 = vadd.f32 %v1624_v14, %v1480_v35  ;;  %vm1545_vm15 = vcmp.eq.s32.totalorder %v10876_v52, %v6784_v23  ;;  %v1615_v41 = vsel %vm1535_vm9, %v10877_v25, 0.0  ;;  %v10878_v47 = vld [vmem:[#allocation293_spill] sm:$0xff]  ;;  %vm1547_vm0 = vcmp.eq.s32.totalorder %v10879_v24, %v6784_v23  ;;  %v10880_v35 = vld [vmem:[#allocation295_spill] sm:$0xff] }
 0x612   :  { %v8150_v29 = vpop.permute.xlu1 %3436  ;;  %3966 = vperm.xlu0 %4139, %v8155_v17   ;;  %v1617_v20 = vsel %vm1537_vm10, %v10878_v47, 0.0  ;;  %v1619_v14 = vsel %vm1539_vm11, %v10880_v35, 0.0  ;;  %v8183_v25 = vadd.f32 %v1628_v28, %v1484_v58  ;;  %v1629_v38 = vadd.f32 %v1613_v55, %v7954_v43  ;;  %v10884_v47 = vld [vmem:[#allocation297_spill] sm:$0xff]  ;;  %v8204_v28 = vld [vmem:[%s9675_s1 + $0x30] sm:$0xff]  ;;  %v8252_v24 = vld [vmem:[%s9675_s1 + $0x40] sm:$0xff] }
 0x613   :  { %10875 = vst [vmem:[#allocation38_spill] sm:$0xff] %v8150_v29  ;;  %v3647_v13 = vpop.permute.xlu0 %3646  ;;  %v8170_v29 = vadd.f32 %v1626_v48, %v1482_v53  ;;  %v10882_v53 = vld [vmem:[#allocation290_spill] sm:$0xff]  ;;  %vm3619_vm2 = vcmp.eq.s32.totalorder %v7815_v19, %v6784_v23  ;;  %v1631_v48 = vadd.f32 %v1615_v41, %v7968_v5  ;;  %vm1697_vm3 = vcmp.eq.s32.totalorder %v10883_v54, %v6784_v23  ;;  %v10888_v55 = vld [vmem:[#allocation305_spill] sm:$0xff]  ;;  %v10895_v19 = vld [vmem:[#allocation300_spill] sm:$0xff] }
 0x614   :  { %v8181_v15 = vsel %vm3617_vm13, %v3647_v13, 0.0  ;;  %vm1694_vm1 = vcmp.eq.s32.totalorder %v10882_v53, %v6784_v23  ;;  %v1633_v37 = vadd.f32 %v1617_v20, %v7972_v59  ;;  %v1621_v43 = vsel %vm1541_vm12, %v10884_v47, 0.0  ;;  %v10887_v59 = vld [vmem:[#allocation299_spill] sm:$0xff]  ;;  %v10889_v20 = vld [vmem:[#allocation296_spill] sm:$0xff]  ;;  %v10890_v13 = vld [vmem:[#allocation301_spill] sm:$0xff] }
 0x615   :  { %10881 = vst [vmem:[#allocation39_spill] sm:$0xff] %v8181_v15  ;;  %3750 = vperm.xlu1 %4137, %v7861_v26   ;;  %v10886_v26 = vld [vmem:[#allocation294_spill] sm:$0xff]  ;;  %v1635_v5 = vadd.f32 %v1619_v14, %v7981_v45  ;;  %v1623_v49 = vsel %vm1543_vm14, %v10887_v59, 0.0  ;;  %vm1693_vm5 = vcmp.eq.s32.totalorder %v10888_v55, %v6784_v23  ;;  %vm1701_vm6 = vcmp.eq.s32.totalorder %v10889_v20, %v6784_v23  ;;  %v10891_v47 = vld [vmem:[#allocation307_spill] sm:$0xff] }
 0x616   :  { %v8199_v58 = vpop.permute.xlu1 %3442  ;;  %3974 = vperm.xlu0 %4139, %v8204_v28   ;;  %vm1699_vm4 = vcmp.eq.s32.totalorder %v10886_v26, %v6784_v23  ;;  %v1625_v35 = vsel %vm1545_vm15, %v10890_v13, 0.0  ;;  %vm1695_vm7 = vcmp.eq.s32.totalorder %v10891_v47, %v6784_v23  ;;  %v1637_v9 = vadd.f32 %v1621_v43, %v7994_v33  ;;  %v10893_v14 = vld [vmem:[#allocation298_spill] sm:$0xff]  ;;  %v10894_v59 = vld [vmem:[#allocation303_spill] sm:$0xff]  ;;  %v10897_v43 = vld [vmem:[#allocation308_spill] sm:$0xff] }
 0x617   :  { %10885 = vst [vmem:[#allocation40_spill] sm:$0xff] %v8199_v58  ;;  %v3655_v41 = vpop.permute.xlu0 %3654  ;;  %vm1703_vm8 = vcmp.eq.s32.totalorder %v10893_v14, %v6784_v23  ;;  %v1627_v55 = vsel %vm1547_vm0, %v10894_v59, 0.0  ;;  %vm3621_vm9 = vcmp.eq.s32.totalorder %v7876_v3, %v6784_v23  ;;  %v1639_v52 = vadd.f32 %v1623_v49, %v7998_v27  ;;  %v10899_v27 = vld [vmem:[#allocation302_spill] sm:$0xff]  ;;  %v10906_v3 = vld [vmem:[#allocation309_spill] sm:$0xff]  ;;  %v10916_v53 = vld [vmem:[#allocation319_spill] sm:$0xff] }
 0x618   :  { %v8227_v45 = vsel %vm3619_vm2, %v3655_v41, 0.0  ;;  %vm1705_vm10 = vcmp.eq.s32.totalorder %v10895_v19, %v6784_v23  ;;  %v10896_v41 = vld [vmem:[#allocation304_spill] sm:$0xff]  ;;  %v1777_v13 = vsel %vm1697_vm3, %v10897_v43, 0.0  ;;  %vm1707_vm11 = vcmp.eq.s32.totalorder %v10899_v27, %v6784_v23  ;;  %v10900_v49 = vld [vmem:[#allocation306_spill] sm:$0xff]  ;;  %v10911_v27 = vld [vmem:[#allocation315_spill] sm:$0xff] }
 0x619   :  { %10892 = vst [vmem:[#allocation42_spill] sm:$0xff] %v8227_v45  ;;  %3756 = vperm.xlu1 %4137, %v7905_v32   ;;  %v1773_v33 = vsel %vm1693_vm5, %v10896_v41, 0.0  ;;  %v1641_v32 = vadd.f32 %v1625_v35, %v8010_v39  ;;  %v1775_v54 = vsel %vm1695_vm7, %v10900_v49, 0.0  ;;  %v10901_v59 = vld [vmem:[#allocation310_spill] sm:$0xff]  ;;  %v10902_v45 = vld [vmem:[#allocation312_spill] sm:$0xff]  ;;  %v8282_v49 = vadd.f32 %v1777_v13, %v1633_v37 }
 0x61a   :  { %v8247_v58 = vpop.permute.xlu1 %3448  ;;  %3982 = vperm.xlu0 %4139, %v8252_v24   ;;  %v1779_v41 = vsel %vm1699_vm4, %v10901_v59, 0.0  ;;  %v1781_v39 = vsel %vm1701_vm6, %v10902_v45, 0.0  ;;  %v10903_v35 = vld [vmem:[#allocation314_spill] sm:$0xff]  ;;  %v8280_v26 = vadd.f32 %v1773_v33, %v1629_v38  ;;  %vm3623_vm12 = vcmp.eq.s32.totalorder %v7920_v4, %v6784_v23  ;;  %v8306_v19 = vld [vmem:[%s9675_s1 + $0x50] sm:$0xff]  ;;  %v10912_v59 = vld [vmem:[#allocation323_spill] sm:$0xff] }
 0x61b   :  { %10898 = vst [vmem:[#allocation44_spill] sm:$0xff] %v8247_v58  ;;  %v3663_v43 = vpop.permute.xlu0 %3662  ;;  %v1643_v58 = vadd.f32 %v1627_v55, %v8020_v34  ;;  %v1783_v15 = vsel %vm1703_vm8, %v10903_v35, 0.0  ;;  %v10905_v34 = vld [vmem:[#allocation316_spill] sm:$0xff]  ;;  %v8291_v45 = vadd.f32 %v1775_v54, %v1631_v48  ;;  %vm1696_vm13 = vcmp.eq.s32.totalorder %v10906_v3, %v6784_v23  ;;  %v10907_v38 = vld [vmem:[#allocation318_spill] sm:$0xff] }
 0x61c   :  { %v8278_v47 = vsel %vm3621_vm9, %v3663_v43, 0.0  ;;  %v1785_v20 = vsel %vm1705_vm10, %v10905_v34, 0.0  ;;  %v8295_v14 = vadd.f32 %v1779_v41, %v1635_v5  ;;  %v1787_v37 = vsel %vm1707_vm11, %v10907_v38, 0.0  ;;  %v10910_v5 = vld [vmem:[#allocation313_spill] sm:$0xff]  ;;  %v10917_v4 = vld [vmem:[#allocation320_spill] sm:$0xff] }
 0x61d   :  { %10904 = vst [vmem:[#allocation41_spill] sm:$0xff] %v8278_v47  ;;  %3762 = vperm.xlu1 %4137, %v7951_v7   ;;  %v10909_v7 = vld [vmem:[#allocation311_spill] sm:$0xff]  ;;  %v8311_v48 = vadd.f32 %v1781_v39, %v1637_v9  ;;  %vm1700_vm15 = vcmp.eq.s32.totalorder %v10910_v5, %v6784_v23  ;;  %v8315_v33 = vadd.f32 %v1783_v15, %v1639_v52  ;;  %v1774_v41 = vsel %vm1694_vm1, %v10912_v59, 0.0  ;;  %v10914_v43 = vld [vmem:[#allocation317_spill] sm:$0xff]  ;;  %v10922_v38 = vld [vmem:[#allocation324_spill] sm:$0xff] }
 0x61e   :  { %v8301_v55 = vpop.permute.xlu1 %3470  ;;  %3990 = vperm.xlu0 %4139, %v8306_v19   ;;  %vm1698_vm14 = vcmp.eq.s32.totalorder %v10909_v7, %v6784_v23  ;;  %vm1702_vm0 = vcmp.eq.s32.totalorder %v10911_v27, %v6784_v23  ;;  %v8319_v54 = vadd.f32 %v1785_v20, %v1641_v32  ;;  %vm1704_vm2 = vcmp.eq.s32.totalorder %v10914_v43, %v6784_v23  ;;  %v10915_v52 = vld [vmem:[#allocation325_spill] sm:$0xff]  ;;  %v10921_v20 = vld [vmem:[#allocation322_spill] sm:$0xff]  ;;  %v10927_v5 = vld [vmem:[#allocation328_spill] sm:$0xff] }
 0x61f   :  { %10908 = vst [vmem:[#allocation43_spill] sm:$0xff] %v8301_v55  ;;  %v3671_v13 = vpop.permute.xlu0 %3670  ;;  %v8332_v15 = vadd.f32 %v1787_v37, %v1643_v58  ;;  %v1776_v32 = vsel %vm1696_vm13, %v10915_v52, 0.0  ;;  %vm3625_vm3 = vcmp.eq.s32.totalorder %v7966_v12, %v6784_v23  ;;  %vm1706_vm1 = vcmp.eq.s32.totalorder %v10916_v53, %v6784_v23  ;;  %v10918_v39 = vld [vmem:[#allocation321_spill] sm:$0xff]  ;;  %v10919_v58 = vld [vmem:[#allocation327_spill] sm:$0xff]  ;;  %v10924_v52 = vld [vmem:[#allocation326_spill] sm:$0xff] }
 0x620   :  { %v8328_v9 = vsel %vm3623_vm12, %v3671_v13, 0.0  ;;  %vm1853_vm4 = vcmp.eq.s32.totalorder %v10917_v4, %v6784_v23  ;;  %vm1708_vm5 = vcmp.eq.s32.totalorder %v10918_v39, %v6784_v23  ;;  %v1778_v35 = vsel %vm1698_vm14, %v10919_v58, 0.0  ;;  %v10923_v37 = vld [vmem:[#allocation329_spill] sm:$0xff]  ;;  %v10925_v58 = vld [vmem:[#allocation331_spill] sm:$0xff]  ;;  %v10941_v47 = vld [vmem:[#allocation344_spill] sm:$0xff] }
 0x621   :  { %10913 = vst [vmem:[#allocation45_spill] sm:$0xff] %v8328_v9  ;;  %3768 = vperm.xlu1 %4137, %v8005_v44   ;;  %v8356_v44 = vld [vmem:[%s9675_s1 + $0x60] sm:$0xff]  ;;  %vm1856_vm6 = vcmp.eq.s32.totalorder %v10921_v20, %v6784_v23  ;;  %v1790_v3 = vadd.f32 %v1774_v41, %v8105_v11  ;;  %vm1858_vm7 = vcmp.eq.s32.totalorder %v10922_v38, %v6784_v23  ;;  %v1780_v7 = vsel %vm1700_vm15, %v10923_v37, 0.0  ;;  %v10930_v12 = vld [vmem:[#allocation333_spill] sm:$0xff]  ;;  %v10936_v9 = vld [vmem:[#allocation332_spill] sm:$0xff] }
 0x622   :  { %v8351_v34 = vpop.permute.xlu1 %3478  ;;  %3998 = vperm.xlu0 %4139, %v8356_v44   ;;  %v1792_v59 = vadd.f32 %v1776_v32, %v8109_v60  ;;  %vm1860_vm8 = vcmp.eq.s32.totalorder %v10924_v52, %v6784_v23  ;;  %v1794_v41 = vadd.f32 %v1778_v35, %v8119_v40  ;;  %vm1862_vm9 = vcmp.eq.s32.totalorder %v10927_v5, %v6784_v23  ;;  %v10928_v60 = vld [vmem:[#allocation339_spill] sm:$0xff]  ;;  %v10929_v32 = vld [vmem:[#allocation330_spill] sm:$0xff]  ;;  %v10944_v5 = vld [vmem:[#allocation341_spill] sm:$0xff] }
 0x623   :  { %10920 = vst [vmem:[#allocation46_spill] sm:$0xff] %v8351_v34  ;;  %v3679_v13 = vpop.permute.xlu0 %3678  ;;  %v1782_v34 = vsel %vm1702_vm0, %v10925_v58, 0.0  ;;  %vm1854_vm10 = vcmp.eq.s32.totalorder %v10928_v60, %v6784_v23  ;;  %vm3627_vm11 = vcmp.eq.s32.totalorder %v8018_v0, %v6784_v23  ;;  %v1796_v27 = vadd.f32 %v1780_v7, %v8127_v57  ;;  %v10931_v35 = vld [vmem:[#allocation335_spill] sm:$0xff]  ;;  %v10933_v7 = vld [vmem:[#allocation337_spill] sm:$0xff]  ;;  %v10934_v58 = vld [vmem:[#allocation338_spill] sm:$0xff] }
 0x624   :  { %v8378_v11 = vsel %vm3625_vm3, %v3679_v13, 0.0  ;;  %vm1864_vm12 = vcmp.eq.s32.totalorder %v10929_v32, %v6784_v23  ;;  %v1784_v40 = vsel %vm1704_vm2, %v10930_v12, 0.0  ;;  %v1786_v37 = vsel %vm1706_vm1, %v10931_v35, 0.0  ;;  %v10935_v12 = vld [vmem:[#allocation340_spill] sm:$0xff]  ;;  %v10947_v32 = vld [vmem:[#allocation343_spill] sm:$0xff] }
 0x625   :  { %10926 = vst [vmem:[#allocation47_spill] sm:$0xff] %v8378_v11  ;;  %3790 = vperm.xlu1 %4137, %v8058_v56   ;;  %v8404_v56 = vld [vmem:[%s9675_s1 + $0x70] sm:$0xff]  ;;  %v1798_v57 = vadd.f32 %v1782_v34, %v8138_v50  ;;  %v1788_v43 = vsel %vm1708_vm5, %v10933_v7, 0.0  ;;  %v1936_v53 = vsel %vm1856_vm6, %v10934_v58, 0.0  ;;  %v1938_v35 = vsel %vm1858_vm7, %v10935_v12, 0.0  ;;  %v10937_v50 = vld [vmem:[#allocation334_spill] sm:$0xff] }
 0x626   :  { %v8399_v13 = vpop.permute.xlu1 %3486  ;;  %4006 = vperm.xlu0 %4139, %v8404_v56   ;;  %vm1866_vm13 = vcmp.eq.s32.totalorder %v10936_v9, %v6784_v23  ;;  %vm1868_vm14 = vcmp.eq.s32.totalorder %v10937_v50, %v6784_v23  ;;  %v10938_v34 = vld [vmem:[#allocation336_spill] sm:$0xff]  ;;  %v1800_v38 = vadd.f32 %v1784_v40, %v8158_v62  ;;  %v1802_v7 = vadd.f32 %v1786_v37, %v8170_v29  ;;  %v10940_v58 = vld [vmem:[#allocation342_spill] sm:$0xff]  ;;  %v10948_v37 = vld [vmem:[#allocation345_spill] sm:$0xff] }
 0x627   :  { %10932 = vst [vmem:[#allocation48_spill] sm:$0xff] %v8399_v13  ;;  %v3687_v11 = vpop.permute.xlu0 %3686  ;;  %v1934_v39 = vsel %vm1854_vm10, %v10938_v34, 0.0  ;;  %v1940_v12 = vsel %vm1860_vm8, %v10940_v58, 0.0  ;;  %v1942_v60 = vsel %vm1862_vm9, %v10941_v47, 0.0  ;;  %v1804_v0 = vadd.f32 %v1788_v43, %v8183_v25  ;;  %v10942_v62 = vld [vmem:[#allocation346_spill] sm:$0xff]  ;;  %v10945_v47 = vld [vmem:[#allocation348_spill] sm:$0xff] }
 0x628   :  { %v8431_v20 = vsel %vm3627_vm11, %v3687_v11, 0.0  ;;  %v8445_v11 = vadd.f32 %v1936_v53, %v1792_v59  ;;  %v8447_v34 = vadd.f32 %v1938_v35, %v1794_v41  ;;  %v1944_v29 = vsel %vm1864_vm12, %v10942_v62, 0.0  ;;  %v10946_v25 = vld [vmem:[#allocation350_spill] sm:$0xff]  ;;  %v10950_v9 = vld [vmem:[#allocation347_spill] sm:$0xff]  ;;  %v10952_v50 = vld [vmem:[#allocation357_spill] sm:$0xff] }
 0x629   :  { %10939 = vst [vmem:[#allocation49_spill] sm:$0xff] %v8431_v20  ;;  %3798 = vperm.xlu1 %4137, %v8102_v21   ;;  %v8455_v40 = vadd.f32 %v1934_v39, %v1790_v3  ;;  %vm1855_vm15 = vcmp.eq.s32.totalorder %v10944_v5, %v6784_v23  ;;  %v1946_v21 = vsel %vm1866_vm13, %v10945_v47, 0.0  ;;  %v1948_v59 = vsel %vm1868_vm14, %v10946_v25, 0.0  ;;  %v10951_v35 = vld [vmem:[#allocation355_spill] sm:$0xff]  ;;  %v10953_v58 = vld [vmem:[#allocation349_spill] sm:$0xff]  ;;  %v10957_v4 = vld [vmem:[#allocation352_spill] sm:$0xff] }
 0x62a   :  { %v8453_v52 = vpop.permute.xlu1 %3494  ;;  %v8467_v41 = vadd.f32 %v1940_v12, %v1796_v27  ;;  %vm1857_vm0 = vcmp.eq.s32.totalorder %v10947_v32, %v6784_v23  ;;  %v8471_v3 = vadd.f32 %v1942_v60, %v1798_v57  ;;  %vm1859_vm2 = vcmp.eq.s32.totalorder %v10948_v37, %v6784_v23  ;;  %v10958_v5 = vld [vmem:[#allocation353_spill] sm:$0xff]  ;;  %v10960_v47 = vld [vmem:[#allocation354_spill] sm:$0xff]  ;;  %v10975_v20 = vld [vmem:[#allocation372_spill] sm:$0xff] }
 0x62b   :  { %10943 = vst [vmem:[#allocation56_spill] sm:$0xff] %v8453_v52  ;;  %v8477_v53 = vadd.f32 %v1944_v29, %v1800_v38  ;;  %vm1861_vm3 = vcmp.eq.s32.totalorder %v10950_v9, %v6784_v23  ;;  %v1933_v27 = vsel %vm1853_vm4, %v10951_v35, 0.0  ;;  %v1935_v39 = vsel %vm1855_vm15, %v10952_v50, 0.0  ;;  %v10954_v38 = vld [vmem:[#allocation359_spill] sm:$0xff]  ;;  %v10962_v32 = vld [vmem:[#allocation358_spill] sm:$0xff]  ;;  %v10963_v35 = vld [vmem:[#allocation360_spill] sm:$0xff] }
 0x62c   :  { %v8475_v43 = vpop.permute.xlu0 %3726  ;;  %v8487_v57 = vadd.f32 %v1946_v21, %v1802_v7  ;;  %vm1863_vm1 = vcmp.eq.s32.totalorder %v10953_v58, %v6784_v23  ;;  %v8491_v12 = vadd.f32 %v1948_v59, %v1804_v0  ;;  %v1937_v60 = vsel %vm1857_vm0, %v10954_v38, 0.0  ;;  %v10956_v29 = vld [vmem:[#allocation351_spill] sm:$0xff]  ;;  %v10961_v21 = vld [vmem:[#allocation356_spill] sm:$0xff]  ;;  %v10967_v38 = vld [vmem:[#allocation373_spill] sm:$0xff] }
 0x62d   :  { %10949 = vst [vmem:[#allocation50_spill] sm:$0xff] %v8475_v43  ;;  %3806 = vperm.xlu1 %4137, %v8155_v17   ;;  %vm1865_vm5 = vcmp.eq.s32.totalorder %v10956_v29, %v6784_v23  ;;  %vm2014_vm4 = vcmp.eq.s32.totalorder %v10957_v4, %v6784_v23  ;;  %vm1867_vm6 = vcmp.eq.s32.totalorder %v10958_v5, %v6784_v23  ;;  %v10959_v17 = vld [vmem:[#allocation361_spill] sm:$0xff]  ;;  %v10964_v50 = vld [vmem:[#allocation371_spill] sm:$0xff]  ;;  %v10978_v52 = vld [vmem:[#allocation376_spill] sm:$0xff] }
 0x62e   :  { %v8494_v62 = vpop.permute.xlu1 %3502  ;;  %v1939_v7 = vsel %vm1859_vm2, %v10959_v17, 0.0  ;;  %vm2017_vm7 = vcmp.eq.s32.totalorder %v10960_v47, %v6784_v23  ;;  %v1949_v0 = vadd.f32 %v1933_v27, %v8280_v26  ;;  %vm2019_vm8 = vcmp.eq.s32.totalorder %v10961_v21, %v6784_v23  ;;  %v10965_v27 = vld [vmem:[#allocation363_spill] sm:$0xff]  ;;  %v10969_v17 = vld [vmem:[#allocation362_spill] sm:$0xff]  ;;  %v10977_v47 = vld [vmem:[#allocation368_spill] sm:$0xff] }
 0x62f   :  { %10955 = vst [vmem:[#allocation58_spill] sm:$0xff] %v8494_v62  ;;  %v1951_v25 = vadd.f32 %v1935_v39, %v8291_v45  ;;  %vm2021_vm9 = vcmp.eq.s32.totalorder %v10962_v32, %v6784_v23  ;;  %v1953_v37 = vadd.f32 %v1937_v60, %v8282_v49  ;;  %vm2023_vm10 = vcmp.eq.s32.totalorder %v10963_v35, %v6784_v23  ;;  %v10966_v39 = vld [vmem:[#allocation365_spill] sm:$0xff]  ;;  %v10976_v62 = vld [vmem:[#allocation374_spill] sm:$0xff]  ;;  %v10980_v32 = vld [vmem:[#allocation380_spill] sm:$0xff] }
 0x630   :  { %v8509_v59 = vpop.permute.xlu0 %3735  ;;  %vm2013_vm11 = vcmp.eq.s32.totalorder %v10964_v50, %v6784_v23  ;;  %v1955_v26 = vadd.f32 %v1939_v7, %v8295_v14  ;;  %v1941_v45 = vsel %vm1861_vm3, %v10965_v27, 0.0  ;;  %v1943_v49 = vsel %vm1863_vm1, %v10966_v39, 0.0  ;;  %v10971_v14 = vld [vmem:[#allocation367_spill] sm:$0xff]  ;;  %v10972_v7 = vld [vmem:[#allocation369_spill] sm:$0xff]  ;;  %v10973_v50 = vld [vmem:[#allocation370_spill] sm:$0xff] }
 0x631   :  { %3814 = vperm.xlu1 %4137, %v8204_v28   ;;  %vm2015_vm12 = vcmp.eq.s32.totalorder %v10967_v38, %v6784_v23  ;;  %vm2025_vm13 = vcmp.eq.s32.totalorder %v10969_v17, %v6784_v23  ;;  %v10970_v28 = vld [vmem:[#allocation364_spill] sm:$0xff]  ;;  %v1945_v9 = vsel %vm1865_vm5, %v10971_v14, 0.0  ;;  %v1947_v58 = vsel %vm1867_vm6, %v10972_v7, 0.0  ;;  %v10974_v39 = vld [vmem:[#allocation366_spill] sm:$0xff]  ;;  %v10996_v4 = vld [vmem:[#allocation385_spill] sm:$0xff] }
 0x632   :  { %v8530_v60 = vpop.permute.xlu1 %3510  ;;  %vm2027_vm14 = vcmp.eq.s32.totalorder %v10970_v28, %v6784_v23  ;;  %v2097_v27 = vsel %vm2017_vm7, %v10973_v50, 0.0  ;;  %v2093_v38 = vsel %vm2013_vm11, %v10974_v39, 0.0  ;;  %v2101_v29 = vsel %vm2021_vm9, %v10976_v62, 0.0  ;;  %v10979_v62 = vld [vmem:[#allocation378_spill] sm:$0xff]  ;;  %v10985_v28 = vld [vmem:[#allocation377_spill] sm:$0xff] }
 0x633   :  { %10968 = vst [vmem:[#allocation59_spill] sm:$0xff] %v8530_v60  ;;  %v2099_v60 = vsel %vm2019_vm8, %v10975_v20, 0.0  ;;  %v1957_v5 = vadd.f32 %v1941_v45, %v8311_v48  ;;  %v1959_v7 = vadd.f32 %v1943_v49, %v8315_v33  ;;  %v2095_v50 = vsel %vm2015_vm12, %v10977_v47, 0.0  ;;  %v10983_v49 = vld [vmem:[#allocation375_spill] sm:$0xff] }
 0x634   :  { %v8557_v14 = vpop.permute.xlu0 %3741  ;;  %v2103_v39 = vsel %vm2023_vm10, %v10978_v52, 0.0  ;;  %v1961_v20 = vadd.f32 %v1945_v9, %v8319_v54  ;;  %v1963_v21 = vadd.f32 %v1947_v58, %v8332_v15  ;;  %v2105_v48 = vsel %vm2025_vm13, %v10979_v62, 0.0  ;;  %v10990_v58 = vld [vmem:[#allocation381_spill] sm:$0xff]  ;;  %v11000_v62 = vld [vmem:[#allocation388_spill] sm:$0xff] }
 0x635   :  { %3822 = vperm.xlu1 %4137, %v8252_v24   ;;  %v2107_v33 = vsel %vm2027_vm14, %v10980_v32, 0.0  ;;  %v8579_v35 = vadd.f32 %v2097_v27, %v1953_v37  ;;  %v8581_v52 = vadd.f32 %v2093_v38, %v1949_v0  ;;  %v8583_v24 = vadd.f32 %v2099_v60, %v1955_v26  ;;  %v10987_v0 = vld [vmem:[#allocation379_spill] sm:$0xff]  ;;  %v10989_v60 = vld [vmem:[#allocation389_spill] sm:$0xff]  ;;  %v11001_v32 = vld [vmem:[#allocation390_spill] sm:$0xff] }
 0x636   :  { %v8577_v45 = vpop.permute.xlu1 %3518  ;;  %v8585_v54 = vadd.f32 %v2101_v29, %v1957_v5  ;;  %v8587_v15 = vadd.f32 %v2095_v50, %v1951_v25  ;;  %vm2016_vm15 = vcmp.eq.s32.totalorder %v10983_v49, %v6784_v23  ;;  %v8591_v17 = vadd.f32 %v2103_v39, %v1959_v7  ;;  %v10991_v27 = vld [vmem:[#allocation383_spill] sm:$0xff]  ;;  %v10993_v5 = vld [vmem:[#allocation393_spill] sm:$0xff]  ;;  %v10995_v50 = vld [vmem:[#allocation384_spill] sm:$0xff] }
 0x637   :  { %10981 = vst [vmem:[#allocation60_spill] sm:$0xff] %v8577_v45  ;;  %vm2018_vm0 = vcmp.eq.s32.totalorder %v10985_v28, %v6784_v23  ;;  %v8597_v37 = vadd.f32 %v2105_v48, %v1961_v20  ;;  %vm2020_vm2 = vcmp.eq.s32.totalorder %v10987_v0, %v6784_v23  ;;  %v8601_v26 = vadd.f32 %v2107_v33, %v1963_v21  ;;  %v10992_v38 = vld [vmem:[#allocation391_spill] sm:$0xff]  ;;  %v11002_v28 = vld [vmem:[#allocation392_spill] sm:$0xff] }
 0x638   :  { %10982 = vst [vmem:[#allocation51_spill] sm:$0xff] %v8587_v15  ;;  %10984 = vst [vmem:[#allocation52_spill] sm:$0xff] %v8591_v17  ;;  %v8595_v9 = vpop.permute.xlu0 %3747  ;;  %v2094_v25 = vsel %vm2014_vm4, %v10989_v60, 0.0  ;;  %vm2022_vm3 = vcmp.eq.s32.totalorder %v10990_v58, %v6784_v23  ;;  %vm2024_vm1 = vcmp.eq.s32.totalorder %v10991_v27, %v6784_v23  ;;  %v2096_v29 = vsel %vm2016_vm15, %v10992_v38, 0.0  ;;  %v10998_v39 = vld [vmem:[#allocation395_spill] sm:$0xff]  ;;  %v11003_v60 = vld [vmem:[#allocation397_spill] sm:$0xff] }
 0x639   :  { %10986 = vst [vmem:[#allocation53_spill] sm:$0xff] %v8597_v37  ;;  %10988 = vst [vmem:[#allocation54_spill] sm:$0xff] %v8601_v26  ;;  %3830 = vperm.xlu1 %4137, %v8306_v19   ;;  %v2098_v7 = vsel %vm2018_vm0, %v10993_v5, 0.0  ;;  %vm2176_vm5 = vcmp.eq.s32.totalorder %v10995_v50, %v6784_v23  ;;  %vm2026_vm4 = vcmp.eq.s32.totalorder %v10996_v4, %v6784_v23  ;;  %v10997_v19 = vld [vmem:[#allocation386_spill] sm:$0xff]  ;;  %v2100_v20 = vsel %vm2020_vm2, %v10998_v39, 0.0  ;;  %v10999_v21 = vld [vmem:[#allocation387_spill] sm:$0xff] }
 0x63a   :  { %v8614_v47 = vpop.permute.xlu1 %3526  ;;  %vm2178_vm6 = vcmp.eq.s32.totalorder %v10997_v19, %v6784_v23  ;;  %vm2028_vm7 = vcmp.eq.s32.totalorder %v10999_v21, %v6784_v23  ;;  %vm2180_vm8 = vcmp.eq.s32.totalorder %v11000_v62, %v6784_v23  ;;  %v2110_v48 = vadd.f32 %v2094_v25, %v8455_v40  ;;  %v11004_v40 = vld [vmem:[#allocation394_spill] sm:$0xff]  ;;  %v11005_v5 = vld [vmem:[#allocation399_spill] sm:$0xff]  ;;  %v11008_v58 = vld [vmem:[#allocation400_spill] sm:$0xff] }
 0x63b   :  { %10994 = vst [vmem:[#allocation55_spill] sm:$0xff] %v8614_v47  ;;  %vm2182_vm9 = vcmp.eq.s32.totalorder %v11001_v32, %v6784_v23  ;;  %v2112_v49 = vadd.f32 %v2096_v29, %v8445_v11  ;;  %vm2184_vm10 = vcmp.eq.s32.totalorder %v11002_v28, %v6784_v23  ;;  %v2114_v0 = vadd.f32 %v2098_v7, %v8447_v34  ;;  %v11006_v29 = vld [vmem:[#allocation405_spill] sm:$0xff]  ;;  %v11007_v34 = vld [vmem:[#allocation396_spill] sm:$0xff]  ;;  %v11010_v39 = vld [vmem:[#allocation402_spill] sm:$0xff] }
 0x63c   :  { %v8630_v33 = vpop.permute.xlu0 %3753  ;;  %v2102_v38 = vsel %vm2022_vm3, %v11003_v60, 0.0  ;;  %vm2186_vm11 = vcmp.eq.s32.totalorder %v11004_v40, %v6784_v23  ;;  %v2116_v25 = vadd.f32 %v2100_v20, %v8467_v41  ;;  %v2104_v11 = vsel %vm2024_vm1, %v11005_v5, 0.0  ;;  %v11009_v7 = vld [vmem:[#allocation401_spill] sm:$0xff]  ;;  %v11012_v5 = vld [vmem:[#allocation403_spill] sm:$0xff]  ;;  %v11016_v47 = vld [vmem:[#allocation408_spill] sm:$0xff] }
 0x63d   :  { %3838 = vperm.xlu1 %4137, %v8356_v44   ;;  %vm2174_vm12 = vcmp.eq.s32.totalorder %v11006_v29, %v6784_v23  ;;  %vm2188_vm13 = vcmp.eq.s32.totalorder %v11007_v34, %v6784_v23  ;;  %v2256_v44 = vsel %vm2176_vm5, %v11008_v58, 0.0  ;;  %v2106_v41 = vsel %vm2026_vm4, %v11009_v7, 0.0  ;;  %v11013_v29 = vld [vmem:[#allocation404_spill] sm:$0xff]  ;;  %v11014_v58 = vld [vmem:[#allocation406_spill] sm:$0xff]  ;;  %v4240_v26 = vld [vmem:[%s9674_s0 + $0x38] sm:$0xff] }
 0x63e   :  { %v2258_v27 = vsel %vm2178_vm6, %v11010_v39, 0.0  ;;  %v2118_v60 = vadd.f32 %v2102_v38, %v8471_v3  ;;  %v2108_v50 = vsel %vm2028_vm7, %v11012_v5, 0.0  ;;  %v2260_v4 = vsel %vm2180_vm8, %v11013_v29, 0.0  ;;  %v11015_v3 = vld [vmem:[#allocation398_spill] sm:$0xff]  ;;  %v11018_v45 = vld [vmem:[#allocation412_spill] sm:$0xff] }
 0x63f   :  { %v8664_v20 = vpop.permute.xlu1 %3566  ;;  %v2262_v19 = vsel %vm2182_vm9, %v11014_v58, 0.0  ;;  %v2120_v39 = vadd.f32 %v2104_v11, %v8477_v53  ;;  %v2254_v38 = vsel %vm2174_vm12, %v11015_v3, 0.0  ;;  %v2264_v21 = vsel %vm2184_vm10, %v11016_v47, 0.0  ;;  %v11017_v5 = vld [vmem:[#allocation410_spill] sm:$0xff] }
 0x640   :  { %11011 = vst [vmem:[#allocation57_spill] sm:$0xff] %v8664_v20  ;;  %v8679_v7 = vpop.permute.xlu0 %3759  ;;  %v2266_v62 = vsel %vm2186_vm11, %v11017_v5, 0.0  ;;  %v2272_v32 = vadd.f32 %v2256_v44, %v2112_v49  ;;  %v2122_v29 = vadd.f32 %v2106_v41, %v8487_v57  ;;  %v2274_v58 = vadd.f32 %v2258_v27, %v2114_v0  ;;  %v11019_v3 = vld [vmem:[#allocation414_spill] sm:$0xff]  ;;  %v11020_v0 = vld [vmem:[#allocation441_spill] sm:$0xff]  ;;  %v11026_v44 = vld [vmem:[#allocation447_spill] sm:$0xff] }
 0x641   :  { %3846 = vperm.xlu1 %4137, %v8404_v56   ;;  %v2268_v53 = vsel %vm2188_vm13, %v11018_v45, 0.0  ;;  %v2124_v11 = vadd.f32 %v2108_v50, %v8491_v12  ;;  %v2276_v28 = vadd.f32 %v2260_v4, %v2116_v25  ;;  %v2278_v47 = vadd.f32 %v2262_v19, %v2118_v60  ;;  %v11021_v45 = vld [vmem:[#allocation443_spill] sm:$0xff]  ;;  %v11025_v34 = vld [vmem:[#allocation446_spill] sm:$0xff]  ;;  %v11029_v50 = vld [vmem:[#allocation449_spill] sm:$0xff] }
 0x642   :  { %vm2334_vm14 = vcmp.eq.s32.totalorder %v11019_v3, %v6784_v23  ;;  %v2270_v5 = vadd.f32 %v2254_v38, %v2110_v48  ;;  %v2280_v13 = vadd.f32 %v2264_v21, %v2120_v39  ;;  %v2282_v56 = vadd.f32 %v2266_v62, %v2122_v29  ;;  %v11024_v48 = vld [vmem:[#allocation445_spill] sm:$0xff]  ;;  %v11027_v41 = vld [vmem:[#allocation455_spill] sm:$0xff]  ;;  %v4236_v60 = vld [vmem:[%s9674_s0] sm:$0xff] }
 0x643   :  { %v3573_v40 = vpop.permute.xlu1 %3572  ;;  %v2284_v49 = vadd.f32 %v2268_v53, %v2124_v11  ;;  %vm2336_vm0 = vcmp.eq.s32.totalorder %v11020_v0, %v6784_v23  ;;  %vm2338_vm2 = vcmp.eq.s32.totalorder %v11021_v45, %v6784_v23  ;;  %v11023_v25 = vmov 24   ;;  %v11030_v4 = vld [vmem:[#allocation457_spill] sm:$0xff]  ;;  %v11031_v39 = vld [vmem:[#allocation459_spill] sm:$0xff]  ;;  %v11032_v62 = vld [vmem:[#allocation450_spill] sm:$0xff] }
 0x644   :  { %vm3615_vm15 = vcmp.eq.s32.totalorder %v3573_v40, %v6784_v23  ;;  %v8701_v57 = vpop.permute.xlu0 %3765  ;;  %vm2340_vm3 = vcmp.eq.s32.totalorder %v11024_v48, %v6784_v23  ;;  %vm2496_vm1 = vcmp.eq.s32.totalorder %v11025_v34, %v6784_v23  ;;  %vm2342_vm5 = vcmp.eq.s32.totalorder %v11026_v44, %v6784_v23  ;;  %v11033_v29 = vld [vmem:[#allocation451_spill] sm:$0xff]  ;;  %v11034_v53 = vld [vmem:[#allocation452_spill] sm:$0xff]  ;;  %v11035_v11 = vld [vmem:[#allocation461_spill] sm:$0xff] }
 0x645   :  { %v8708_v12 = vsel %vm3615_vm15, %v8115_v1, 0.0  ;;  %4138 = vset.pattern.permute.xlu1 %v11023_v25  ;;  %v2414_v27 = vsel %vm2334_vm14, %v11027_v41, 0.0  ;;  %v11028_v1 = vld [vmem:[#allocation448_spill] sm:$0xff]  ;;  %vm2344_vm6 = vcmp.eq.s32.totalorder %v11029_v50, %v6784_v23  ;;  %v2416_v19 = vsel %vm2336_vm0, %v11030_v4, 0.0  ;;  %v11036_v0 = vld [vmem:[#allocation453_spill] sm:$0xff]  ;;  %v11037_v45 = vld [vmem:[#allocation454_spill] sm:$0xff] }
 0x646   :  { %11022 = vst [vmem:[#allocation61_spill] sm:$0xff] %v8708_v12  ;;  %3886 = vperm.xlu1 %4138, %v4236_v60   ;;  %vm2498_vm4 = vcmp.eq.s32.totalorder %v11028_v1, %v6784_v23  ;;  %v2418_v38 = vsel %vm2338_vm2, %v11031_v39, 0.0  ;;  %vm2500_vm7 = vcmp.eq.s32.totalorder %v11032_v62, %v6784_v23  ;;  %vm2346_vm8 = vcmp.eq.s32.totalorder %v11033_v29, %v6784_v23  ;;  %v11038_v48 = vld [vmem:[#allocation463_spill] sm:$0xff]  ;;  %v11039_v60 = vld [vmem:[#allocation456_spill] sm:$0xff]  ;;  %v11040_v39 = vld [vmem:[#allocation458_spill] sm:$0xff] }
 0x647   :  { %v8727_v21 = vpop.permute.xlu1 %3575  ;;  %vm2502_vm9 = vcmp.eq.s32.totalorder %v11034_v53, %v6784_v23  ;;  %v2420_v3 = vsel %vm2340_vm3, %v11035_v11, 0.0  ;;  %vm2348_vm10 = vcmp.eq.s32.totalorder %v11036_v0, %v6784_v23  ;;  %vm2504_vm11 = vcmp.eq.s32.totalorder %v11037_v45, %v6784_v23  ;;  %v4237_v12 = vld [vmem:[%s9674_s0 + $0x10] sm:$0xff]  ;;  %v11045_v34 = vld [vmem:[#allocation466_spill] sm:$0xff]  ;;  %v11046_v50 = vld [vmem:[#allocation469_spill] sm:$0xff] }
 0x648   :  { %v8736_v40 = vpop.permute.xlu0 %3771  ;;  %v8742_v25 = vadd.f32 %v2414_v27, %v2270_v5  ;;  %v2422_v41 = vsel %vm2342_vm5, %v11038_v48, 0.0  ;;  %vm2506_vm12 = vcmp.eq.s32.totalorder %v11039_v60, %v6784_v23  ;;  %v2432_v4 = vadd.f32 %v2416_v19, %v2272_v32  ;;  %v11041_v27 = vld [vmem:[#allocation462_spill] sm:$0xff]  ;;  %v11042_v48 = vld [vmem:[#allocation465_spill] sm:$0xff]  ;;  %v11043_v19 = vld [vmem:[#allocation467_spill] sm:$0xff] }
 0x649   :  { %vm2508_vm13 = vcmp.eq.s32.totalorder %v11040_v39, %v6784_v23  ;;  %v2434_v11 = vadd.f32 %v2418_v38, %v2274_v58  ;;  %v2436_v5 = vadd.f32 %v2420_v3, %v2276_v28  ;;  %v2576_v44 = vsel %vm2496_vm1, %v11041_v27, 0.0  ;;  %v11050_v62 = vld [vmem:[#allocation471_spill] sm:$0xff]  ;;  %v4238_v45 = vld [vmem:[%s9674_s0 + $0x18] sm:$0xff]  ;;  %v11054_v20 = vld [vmem:[#allocation476_spill] sm:$0xff] }
 0x64a   :  { %3892 = vperm.xlu1 %4138, %v4237_v12   ;;  %v2424_v32 = vsel %vm2344_vm6, %v11042_v48, 0.0  ;;  %v2426_v58 = vsel %vm2346_vm8, %v11043_v19, 0.0  ;;  %v2438_v43 = vadd.f32 %v2422_v41, %v2278_v47  ;;  %v11044_v12 = vld [vmem:[#allocation464_spill] sm:$0xff]  ;;  %v2580_v3 = vsel %vm2500_vm7, %v11045_v34, 0.0  ;;  %v11049_v41 = vld [vmem:[#allocation470_spill] sm:$0xff] }
 0x64b   :  { %v8767_v38 = vpop.permute.xlu1 %3581  ;;  %v2578_v28 = vsel %vm2498_vm4, %v11044_v12, 0.0  ;;  %v2428_v27 = vsel %vm2348_vm10, %v11046_v50, 0.0  ;;  %v11048_v48 = vld [vmem:[#allocation468_spill] sm:$0xff]  ;;  %v2584_v1 = vsel %vm2504_vm11, %v11049_v41, 0.0  ;;  %vm2494_vm14 = vcmp.eq.s32.totalorder %v11050_v62, %v6784_v23  ;;  %v11052_v50 = vld [vmem:[#allocation474_spill] sm:$0xff] }
 0x64c   :  { %v8781_v29 = vpop.permute.xlu0 %3794  ;;  %v2582_v47 = vsel %vm2502_vm9, %v11048_v48, 0.0  ;;  %v11051_v19 = vld [vmem:[#allocation472_spill] sm:$0xff]  ;;  %v2440_v12 = vadd.f32 %v2424_v32, %v2280_v13  ;;  %v2442_v34 = vadd.f32 %v2426_v58, %v2282_v56  ;;  %v2588_v53 = vsel %vm2508_vm13, %v11052_v50, 0.0 }
 0x64d   :  { %11047 = vst [vmem:[#allocation62_spill] sm:$0xff] %v8781_v29  ;;  %v2586_v0 = vsel %vm2506_vm12, %v11051_v19, 0.0  ;;  %vm3776_vm15 = vcmp.eq.s32.totalorder %v8509_v59, %v6784_v23  ;;  %v2592_v48 = vadd.f32 %v2576_v44, %v2432_v4  ;;  %v2594_v41 = vadd.f32 %v2578_v28, %v2434_v11  ;;  %v11053_v32 = vld [vmem:[#allocation460_spill] sm:$0xff]  ;;  %v11057_v4 = vld [vmem:[#allocation509_spill] sm:$0xff]  ;;  %v11058_v11 = vld [vmem:[#allocation510_spill] sm:$0xff] }
 0x64e   :  { %3895 = vperm.xlu1 %4138, %v4238_v45   ;;  %v2596_v62 = vadd.f32 %v2580_v3, %v2436_v5  ;;  %v2444_v60 = vadd.f32 %v2428_v27, %v2284_v49  ;;  %v2598_v13 = vadd.f32 %v2582_v47, %v2438_v43  ;;  %v2600_v56 = vadd.f32 %v2584_v1, %v2440_v12  ;;  %v11055_v45 = vld [vmem:[#allocation507_spill] sm:$0xff]  ;;  %v11056_v43 = vld [vmem:[#allocation508_spill] sm:$0xff]  ;;  %v11061_v28 = vld [vmem:[#allocation513_spill] sm:$0xff] }
 0x64f   :  { %v8806_v19 = vpop.permute.xlu1 %3587  ;;  %v8809_v58 = vsel %vm2494_vm14, %v11053_v32, 0.0  ;;  %v2602_v39 = vadd.f32 %v2586_v0, %v2442_v34  ;;  %vm2654_vm0 = vcmp.eq.s32.totalorder %v11054_v20, %v6784_v23  ;;  %vm2656_vm2 = vcmp.eq.s32.totalorder %v11055_v45, %v6784_v23  ;;  %v4239_v5 = vld [vmem:[%s9674_s0 + $0x28] sm:$0xff]  ;;  %v11060_v44 = vld [vmem:[#allocation512_spill] sm:$0xff]  ;;  %v11063_v1 = vld [vmem:[#allocation514_spill] sm:$0xff] }
 0x650   :  { %v3803_v50 = vpop.permute.xlu0 %3802  ;;  %v8811_v55 = vadd.f32 %v2588_v53, %v2444_v60  ;;  %vm2816_vm3 = vcmp.eq.s32.totalorder %v11056_v43, %v6784_v23  ;;  %vm2658_vm1 = vcmp.eq.s32.totalorder %v11057_v4, %v6784_v23  ;;  %vm2818_vm5 = vcmp.eq.s32.totalorder %v11058_v11, %v6784_v23  ;;  %v11059_v59 = vld [vmem:[#allocation511_spill] sm:$0xff]  ;;  %v11065_v12 = vld [vmem:[#allocation516_spill] sm:$0xff]  ;;  %v11066_v34 = vld [vmem:[#allocation525_spill] sm:$0xff] }
 0x651   :  { %v8820_v49 = vsel %vm3776_vm15, %v3803_v50, 0.0  ;;  %vm3778_vm4 = vcmp.eq.s32.totalorder %v8557_v14, %v6784_v23  ;;  %vm2660_vm6 = vcmp.eq.s32.totalorder %v11059_v59, %v6784_v23  ;;  %vm2820_vm7 = vcmp.eq.s32.totalorder %v11060_v44, %v6784_v23  ;;  %v11062_v3 = vld [vmem:[#allocation523_spill] sm:$0xff]  ;;  %v11067_v32 = vld [vmem:[#allocation517_spill] sm:$0xff]  ;;  %v11068_v50 = vld [vmem:[#allocation518_spill] sm:$0xff] }
 0x652   :  { %3901 = vperm.xlu1 %4138, %v4239_v5   ;;  %vm2662_vm8 = vcmp.eq.s32.totalorder %v11061_v28, %v6784_v23  ;;  %v2736_v27 = vsel %vm2656_vm2, %v11062_v3, 0.0  ;;  %vm2822_vm9 = vcmp.eq.s32.totalorder %v11063_v1, %v6784_v23  ;;  %v11064_v0 = vld [vmem:[#allocation515_spill] sm:$0xff]  ;;  %vm2824_vm11 = vcmp.eq.s32.totalorder %v11065_v12, %v6784_v23  ;;  %v11071_v3 = vld [vmem:[#allocation520_spill] sm:$0xff]  ;;  %v11084_v1 = vld [vmem:[#allocation574_spill] sm:$0xff] }
 0x653   :  { %v8840_v47 = vpop.permute.xlu1 %3593  ;;  %vm2664_vm10 = vcmp.eq.s32.totalorder %v11064_v0, %v6784_v23  ;;  %v2738_v53 = vsel %vm2658_vm1, %v11066_v34, 0.0  ;;  %vm2666_vm12 = vcmp.eq.s32.totalorder %v11067_v32, %v6784_v23  ;;  %vm2826_vm13 = vcmp.eq.s32.totalorder %v11068_v50, %v6784_v23  ;;  %v11069_v45 = vld [vmem:[#allocation527_spill] sm:$0xff]  ;;  %v4242_v50 = vld [vmem:[%s9674_s0 + $0x58] sm:$0xff] }
 0x654   :  { %v3811_v60 = vpop.permute.xlu0 %3810  ;;  %v2740_v4 = vsel %vm2660_vm6, %v11069_v45, 0.0  ;;  %v11070_v59 = vld [vmem:[#allocation519_spill] sm:$0xff]  ;;  %vm2828_vm15 = vcmp.eq.s32.totalorder %v11071_v3, %v6784_v23  ;;  %v2752_v34 = vadd.f32 %v2736_v27, %v2592_v48  ;;  %vm3780_vm2 = vcmp.eq.s32.totalorder %v8595_v9, %v6784_v23  ;;  %v11072_v45 = vld [vmem:[#allocation521_spill] sm:$0xff] }
 0x655   :  { %v8857_v5 = vsel %vm3778_vm4, %v3811_v60, 0.0  ;;  %vm2668_vm14 = vcmp.eq.s32.totalorder %v11070_v59, %v6784_v23  ;;  %v8872_v14 = vsel %vm2654_vm0, %v11072_v45, 0.0  ;;  %v11073_v60 = vld [vmem:[#allocation524_spill] sm:$0xff]  ;;  %v2754_v48 = vadd.f32 %v2738_v53, %v2594_v41  ;;  %v11074_v27 = vld [vmem:[#allocation529_spill] sm:$0xff]  ;;  %v11076_v29 = vld [vmem:[#allocation531_spill] sm:$0xff] }
 0x656   :  { %3907 = vperm.xlu1 %4138, %v4240_v26   ;;  %v2896_v37 = vsel %vm2816_vm3, %v11073_v60, 0.0  ;;  %v2742_v15 = vsel %vm2662_vm8, %v11074_v27, 0.0  ;;  %v11075_v26 = vld [vmem:[#allocation526_spill] sm:$0xff]  ;;  %v2756_v45 = vadd.f32 %v2740_v4, %v2596_v62  ;;  %v2744_v43 = vsel %vm2664_vm10, %v11076_v29, 0.0  ;;  %v11077_v53 = vld [vmem:[#allocation528_spill] sm:$0xff]  ;;  %v11078_v60 = vld [vmem:[#allocation533_spill] sm:$0xff] }
 0x657   :  { %v8882_v17 = vpop.permute.xlu1 %3599  ;;  %v2898_v20 = vsel %vm2818_vm5, %v11075_v26, 0.0  ;;  %vm2976_vm0 = vcmp.eq.s32.totalorder %v6633_v61, %v6784_v23  ;;  %v2900_v28 = vsel %vm2820_vm7, %v11077_v53, 0.0  ;;  %v2746_v11 = vsel %vm2666_vm12, %v11078_v60, 0.0  ;;  %v11079_v4 = vld [vmem:[#allocation570_spill] sm:$0xff]  ;;  %v4241_v44 = vld [vmem:[%s9674_s0 + $0x48] sm:$0xff]  ;;  %v11082_v26 = vld [vmem:[#allocation532_spill] sm:$0xff] }
 0x658   :  { %v3819_v41 = vpop.permute.xlu0 %3818  ;;  %v3056_v62 = vsel %vm2976_vm0, %v6681_v10, 0.0  ;;  %v2912_v0 = vadd.f32 %v2896_v37, %v2752_v34  ;;  %v2758_v61 = vadd.f32 %v2742_v15, %v2598_v13  ;;  %vm3136_vm3 = vcmp.eq.s32.totalorder %v11079_v4, %v6784_v23  ;;  %v11080_v10 = vld [vmem:[#allocation530_spill] sm:$0xff]  ;;  %v11081_v37 = vld [vmem:[#allocation535_spill] sm:$0xff] }
 0x659   :  { %v8906_v29 = vsel %vm3780_vm2, %v3819_v41, 0.0  ;;  %vm3782_vm1 = vcmp.eq.s32.totalorder %v8630_v33, %v6784_v23  ;;  %v2914_v32 = vadd.f32 %v2898_v20, %v2754_v48  ;;  %v2902_v9 = vsel %vm2822_vm9, %v11080_v10, 0.0  ;;  %v11083_v60 = vld [vmem:[#allocation534_spill] sm:$0xff] }
 0x65a   :  { %3913 = vperm.xlu1 %4138, %v4241_v44   ;;  %v2760_v27 = vadd.f32 %v2744_v43, %v2600_v56  ;;  %v2748_v15 = vsel %vm2668_vm14, %v11081_v37, 0.0  ;;  %v2916_v34 = vadd.f32 %v2900_v28, %v2756_v45  ;;  %v2904_v41 = vsel %vm2824_vm11, %v11082_v26, 0.0 }
 0x65b   :  { %v8923_v13 = vpop.permute.xlu1 %3605  ;;  %v2762_v48 = vadd.f32 %v2746_v11, %v2602_v39  ;;  %v3072_v20 = vadd.f32 %v3056_v62, %v2912_v0  ;;  %v2906_v56 = vsel %vm2826_vm13, %v11083_v60, 0.0  ;;  %vm2978_vm5 = vcmp.eq.s32.totalorder %v11084_v1, %v6784_v23  ;;  %v11086_v11 = vld [vmem:[#allocation572_spill] sm:$0xff]  ;;  %v11094_v1 = vld [vmem:[#allocation17_spill] sm:$0xff] }
 0x65c   :  { %v3827_v53 = vpop.permute.xlu0 %3826  ;;  %v3216_v59 = vsel %vm3136_vm3, %v6672_v36, 0.0  ;;  %v2918_v39 = vadd.f32 %v2902_v9, %v2758_v61  ;;  %v2764_v45 = vadd.f32 %v2748_v15, %v8811_v55  ;;  %v3058_v43 = vsel %vm2978_vm5, %v6687_v18, 0.0  ;;  %v11085_v36 = vld [vmem:[#allocation536_spill] sm:$0xff]  ;;  %v11088_v9 = vld [vmem:[#allocation573_spill] sm:$0xff] }
 0x65d   :  { %v8942_v12 = vsel %vm3782_vm1, %v3827_v53, 0.0  ;;  %vm3784_vm4 = vcmp.eq.s32.totalorder %v8679_v7, %v6784_v23  ;;  %v8951_v28 = vadd.f32 %v2904_v41, %v2760_v27  ;;  %v2908_v33 = vsel %vm2828_vm15, %v11085_v36, 0.0  ;;  %v11087_v62 = vld [vmem:[#allocation576_spill] sm:$0xff] }
 0x65e   :  { %3919 = vperm.xlu1 %4138, %v4242_v50   ;;  %vm3138_vm6 = vcmp.eq.s32.totalorder %v11086_v11, %v6784_v23  ;;  %vm3296_vm7 = vcmp.eq.s32.totalorder %v7146_v42, %v6784_v23  ;;  %v8963_v55 = vadd.f32 %v2906_v56, %v2762_v48  ;;  %vm2980_vm8 = vcmp.eq.s32.totalorder %v11087_v62, %v6784_v23  ;;  %v11090_v48 = vld [vmem:[#allocation586_spill] sm:$0xff] }
 0x65f   :  { %v8961_v18 = vpop.permute.xlu1 %3611  ;;  %v3232_v0 = vadd.f32 %v3216_v59, %v3072_v20  ;;  %v3376_v61 = vsel %vm3296_vm7, %v7544_v63, 0.0  ;;  %v3074_v44 = vadd.f32 %v3058_v43, %v2914_v32  ;;  %v3060_v3 = vsel %vm2980_vm8, %v6693_v2, 0.0  ;;  %v4243_v2 = vld [vmem:[%s9674_s0 + $0x68] sm:$0xff]  ;;  %v11095_v59 = vld [vmem:[#allocation22_spill] sm:$0xff] }
 0x660   :  { %v3835_v4 = vpop.permute.xlu0 %3834  ;;  %vm3456_vm9 = vcmp.eq.s32.totalorder %v6985_v6, %v6784_v23  ;;  %v8976_v10 = vadd.f32 %v2908_v33, %v2764_v45  ;;  %vm3140_vm10 = vcmp.eq.s32.totalorder %v11088_v9, %v6784_v23  ;;  %v3218_v27 = vsel %vm3138_vm6, %v6678_v22, 0.0  ;;  %v11089_v6 = vld [vmem:[#allocation578_spill] sm:$0xff]  ;;  %v11096_v33 = vld [vmem:[#allocation7_spill] sm:$0xff] }
 0x661   :  { %v8974_v42 = vsel %vm3784_vm4, %v3835_v4, 0.0  ;;  %vm3786_vm11 = vcmp.eq.s32.totalorder %v8701_v57, %v6784_v23  ;;  %vm2982_vm12 = vcmp.eq.s32.totalorder %v11089_v6, %v6784_v23  ;;  %vm3298_vm13 = vcmp.eq.s32.totalorder %v7189_v8, %v6784_v23  ;;  %v11093_v57 = vld [vmem:[#allocation13_spill] sm:$0xff]  ;;  %v11099_v4 = vld [vmem:[#allocation590_spill] sm:$0xff] }
 0x662   :  { %3925 = vperm.xlu1 %4138, %v4243_v2   ;;  %v3392_v63 = vadd.f32 %v3376_v61, %v3232_v0  ;;  %vm3614_vm14 = vcmp.eq.s32.totalorder %v7722_v46, %v6784_v23  ;;  %v3076_v22 = vadd.f32 %v3060_v3, %v2916_v34  ;;  %v3536_v32 = vsel %vm3456_vm9, %v7360_v51, 0.0  ;;  %v11091_v51 = vld [vmem:[#allocation575_spill] sm:$0xff]  ;;  %v11101_v3 = vld [vmem:[#allocation537_spill] sm:$0xff] }
 0x663   :  { %v3635_v7 = vpop.permute.xlu1 %3634  ;;  %v3378_v37 = vsel %vm3298_vm13, %v7602_v31, 0.0  ;;  %v3234_v41 = vadd.f32 %v3218_v27, %v3074_v44  ;;  %v3220_v20 = vsel %vm3140_vm10, %v11090_v48, 0.0  ;;  %vm3458_vm15 = vcmp.eq.s32.totalorder %v7026_v30, %v6784_v23  ;;  %v11092_v31 = vld [vmem:[#allocation580_spill] sm:$0xff]  ;;  %v4244_v30 = vld [vmem:[%s9674_s0 + $0x78] sm:$0xff]  ;;  %v11098_v0 = vld [vmem:[#allocation587_spill] sm:$0xff] }
 0x664   :  { %v8994_v15 = vsel %vm3614_vm14, %v3635_v7, 0.0  ;;  %v3843_v26 = vpop.permute.xlu0 %3842  ;;  %vm3142_vm2 = vcmp.eq.s32.totalorder %v11091_v51, %v6784_v23  ;;  %vm2984_vm0 = vcmp.eq.s32.totalorder %v11092_v31, %v6784_v23  ;;  %v3062_v46 = vsel %vm2982_vm12, %v6699_v16, 0.0  ;;  %v11100_v44 = vld [vmem:[#allocation15_spill] sm:$0xff]  ;;  %v11107_v31 = vld [vmem:[#allocation588_spill] sm:$0xff] }
 0x665   :  { %v9005_v8 = vsel %vm3786_vm11, %v3843_v26, 0.0  ;;  %vm3788_vm3 = vcmp.eq.s32.totalorder %v8736_v40, %v6784_v23  ;;  %vm3300_vm1 = vcmp.eq.s32.totalorder %v11093_v57, %v6784_v23  ;;  %v3552_v34 = vadd.f32 %v3536_v32, %v3392_v63  ;;  %v4245_v40 = vld [vmem:[%s9675_s1 + $0x8] sm:$0xff]  ;;  %v11102_v63 = vld [vmem:[#allocation582_spill] sm:$0xff]  ;;  %v11104_v32 = vld [vmem:[#allocation24_spill] sm:$0xff] }
 0x666   :  { %3931 = vperm.xlu1 %4138, %v4244_v30   ;;  %v3394_v53 = vadd.f32 %v3378_v37, %v3234_v41  ;;  %vm3616_vm5 = vcmp.eq.s32.totalorder %v8727_v21, %v6784_v23  ;;  %v3236_v56 = vadd.f32 %v3220_v20, %v3076_v22  ;;  %v3538_v16 = vsel %vm3458_vm15, %v11094_v1, 0.0  ;;  %v11097_v21 = vld [vmem:[#allocation577_spill] sm:$0xff]  ;;  %v11103_v7 = vld [vmem:[#allocation27_spill] sm:$0xff]  ;;  %v11108_v30 = vld [vmem:[#allocation592_spill] sm:$0xff] }
 0x667   :  { %v3643_v60 = vpop.permute.xlu1 %3642  ;;  %v3380_v45 = vsel %vm3300_vm1, %v11095_v59, 0.0  ;;  %v3078_v36 = vadd.f32 %v3062_v46, %v2918_v39  ;;  %vm3460_vm4 = vcmp.eq.s32.totalorder %v11096_v33, %v6784_v23  ;;  %vm3144_vm6 = vcmp.eq.s32.totalorder %v11097_v21, %v6784_v23  ;;  %v11106_v51 = vld [vmem:[#allocation579_spill] sm:$0xff]  ;;  %v11113_v21 = vld [vmem:[#allocation9_spill] sm:$0xff] }
 0x668   :  { %v3696_v43 = vsel %vm3616_vm5, %v3643_v60, 0.0  ;;  %v3851_v50 = vpop.permute.xlu0 %3850  ;;  %v3222_v61 = vsel %vm3142_vm2, %v11098_v0, 0.0  ;;  %v3064_v39 = vsel %vm2984_vm0, %v11099_v4, 0.0  ;;  %vm3302_vm7 = vcmp.eq.s32.totalorder %v11100_v44, %v6784_v23  ;;  %v11111_v59 = vld [vmem:[#allocation19_spill] sm:$0xff] }
 0x669   :  { %v3712_v11 = vadd.f32 %v3696_v43, %v3552_v34  ;;  %v9031_v62 = vsel %vm3788_vm3, %v3851_v50, 0.0  ;;  %vm2814_vm8 = vcmp.eq.s32.totalorder %v11101_v3, %v6784_v23  ;;  %v3554_v9 = vadd.f32 %v3538_v16, %v3394_v53  ;;  %v11109_v34 = vld [vmem:[#allocation25_spill] sm:$0xff]  ;;  %v11110_v16 = vld [vmem:[#allocation584_spill] sm:$0xff] }
 0x66a   :  { %3954 = vperm.xlu1 %4138, %v4245_v40   ;;  %v3396_v27 = vadd.f32 %v3380_v45, %v3236_v56  ;;  %vm3618_vm9 = vcmp.eq.s32.totalorder %v8767_v38, %v6784_v23  ;;  %vm2986_vm10 = vcmp.eq.s32.totalorder %v11102_v63, %v6784_v23  ;;  %v3540_v22 = vsel %vm3460_vm4, %v11103_v7, 0.0  ;;  %v11105_v38 = vld [vmem:[#allocation12_spill] sm:$0xff]  ;;  %v11112_v43 = vld [vmem:[#allocation29_spill] sm:$0xff]  ;;  %v11117_v40 = vld [vmem:[#allocation26_spill] sm:$0xff] }
 0x66b   :  { %v9053_v2 = vadd.f32 %v8820_v49, %v3712_v11  ;;  %v3651_v6 = vpop.permute.xlu1 %3650  ;;  %v3382_v37 = vsel %vm3302_vm7, %v11104_v32, 0.0  ;;  %v3238_v41 = vadd.f32 %v3222_v61, %v3078_v36  ;;  %v3080_v48 = vadd.f32 %v3064_v39, %v8951_v28  ;;  %v4246_v28 = vld [vmem:[%s9675_s1 + $0x18] sm:$0xff]  ;;  %v11116_v39 = vld [vmem:[#allocation594_spill] sm:$0xff] }
 0x66c   :  { %v3698_v26 = vsel %vm3618_vm9, %v3651_v6, 0.0  ;;  %vm3462_vm11 = vcmp.eq.s32.totalorder %v11105_v38, %v6784_v23  ;;  %vm3146_vm12 = vcmp.eq.s32.totalorder %v11106_v51, %v6784_v23  ;;  %v3224_v46 = vsel %vm3144_vm6, %v11107_v31, 0.0  ;;  %v11115_v61 = vld [vmem:[#allocation589_spill] sm:$0xff] }
 0x66d   :  { %v3714_v49 = vadd.f32 %v3698_v26, %v3554_v9  ;;  %v9065_v20 = vpop.permute.xlu0 %3889  ;;  %v3066_v57 = vsel %vm2986_vm10, %v11108_v30, 0.0  ;;  %vm3304_vm13 = vcmp.eq.s32.totalorder %v11109_v34, %v6784_v23  ;;  %v3556_v53 = vadd.f32 %v3540_v22, %v3396_v27  ;;  %v11118_v22 = vld [vmem:[#allocation20_spill] sm:$0xff] }
 0x66e   :  { %3962 = vperm.xlu1 %4138, %v4246_v28   ;;  %v3398_v60 = vadd.f32 %v3382_v37, %v3238_v41  ;;  %vm3620_vm14 = vcmp.eq.s32.totalorder %v8806_v19, %v6784_v23  ;;  %vm2988_vm15 = vcmp.eq.s32.totalorder %v11110_v16, %v6784_v23  ;;  %v3542_v45 = vsel %vm3462_vm11, %v11111_v59, 0.0  ;;  %v11119_v37 = vld [vmem:[#allocation30_spill] sm:$0xff] }
 0x66f   :  { %v9082_v56 = vadd.f32 %v8857_v5, %v3714_v49  ;;  %v3659_v1 = vpop.permute.xlu1 %3658  ;;  %v3384_v50 = vsel %vm3304_vm13, %v11112_v43, 0.0  ;;  %v3240_v33 = vadd.f32 %v3224_v46, %v3080_v48  ;;  %v3082_v11 = vadd.f32 %v3066_v57, %v8963_v55  ;;  %v11114_v5 = vld [vmem:[#allocation581_spill] sm:$0xff]  ;;  %v4247_v55 = vld [vmem:[%s9675_s1 + $0x28] sm:$0xff]  ;;  %v11123_v46 = vld [vmem:[#allocation18_spill] sm:$0xff] }
 0x670   :  { %v3700_v36 = vsel %vm3620_vm14, %v3659_v1, 0.0  ;;  %vm3464_vm2 = vcmp.eq.s32.totalorder %v11113_v21, %v6784_v23  ;;  %vm3148_vm0 = vcmp.eq.s32.totalorder %v11114_v5, %v6784_v23  ;;  %v3226_v4 = vsel %vm3146_vm12, %v11115_v61, 0.0  ;;  %v11120_v49 = vld [vmem:[#allocation11_spill] sm:$0xff]  ;;  %v11124_v28 = vld [vmem:[#allocation538_spill] sm:$0xff]  ;;  %v11127_v43 = vld [vmem:[#allocation596_spill] sm:$0xff] }
 0x671   :  { %v3716_v0 = vadd.f32 %v3700_v36, %v3556_v53  ;;  %v9091_v19 = vpop.permute.xlu0 %3898  ;;  %v3068_v44 = vsel %vm2988_vm15, %v11116_v39, 0.0  ;;  %vm3306_vm3 = vcmp.eq.s32.totalorder %v11117_v40, %v6784_v23  ;;  %v3558_v9 = vadd.f32 %v3542_v45, %v3398_v60  ;;  %v11125_v53 = vld [vmem:[#allocation21_spill] sm:$0xff]  ;;  %v11126_v1 = vld [vmem:[#allocation31_spill] sm:$0xff] }
 0x672   :  { %3970 = vperm.xlu1 %4138, %v4247_v55   ;;  %v3400_v27 = vadd.f32 %v3384_v50, %v3240_v33  ;;  %vm3622_vm1 = vcmp.eq.s32.totalorder %v8840_v47, %v6784_v23  ;;  %v2590_v7 = vadd.f32 %v8809_v58, %v8742_v25  ;;  %v3544_v32 = vsel %vm3464_vm2, %v11118_v22, 0.0  ;;  %v11122_v25 = vld [vmem:[#allocation591_spill] sm:$0xff]  ;;  %v11128_v50 = vld [vmem:[#allocation14_spill] sm:$0xff]  ;;  %v11130_v36 = vld [vmem:[#allocation409_spill] sm:$0xff] }
 0x673   :  { %v9108_v6 = vadd.f32 %v8906_v29, %v3716_v0  ;;  %v3667_v63 = vpop.permute.xlu1 %3666  ;;  %v3386_v26 = vsel %vm3306_vm3, %v11119_v37, 0.0  ;;  %v3242_v48 = vadd.f32 %v3226_v4, %v3082_v11  ;;  %v3084_v38 = vadd.f32 %v3068_v44, %v8976_v10  ;;  %v11121_v29 = vld [vmem:[#allocation522_spill] sm:$0xff]  ;;  %v4248_v10 = vld [vmem:[%s9675_s1 + $0x38] sm:$0xff]  ;;  %v4249_v0 = vld [vmem:[%s9675_s1 + $0x48] sm:$0xff] }
 0x674   :  { %v3702_v41 = vsel %vm3622_vm1, %v3667_v63, 0.0  ;;  %vm3466_vm5 = vcmp.eq.s32.totalorder %v11120_v49, %v6784_v23  ;;  %v2750_v47 = vadd.f32 %v8872_v14, %v2590_v7  ;;  %v2894_v31 = vsel %vm2814_vm8, %v11121_v29, 0.0  ;;  %v11131_v11 = vld [vmem:[#allocation585_spill] sm:$0xff]  ;;  %v11132_v5 = vld [vmem:[#allocation407_spill] sm:$0xff]  ;;  %v11141_v49 = vld [vmem:[#allocation28_spill] sm:$0xff] }
 0x675   :  { %v3718_v51 = vadd.f32 %v3702_v41, %v3558_v9  ;;  %v3228_v58 = vsel %vm3148_vm0, %v11122_v25, 0.0  ;;  %vm3308_vm4 = vcmp.eq.s32.totalorder %v11123_v46, %v6784_v23  ;;  %v9131_v30 = vpop.permute.xlu0 %3904  ;;  %v3560_v14 = vadd.f32 %v3544_v32, %v3400_v27  ;;  %v11133_v40 = vld [vmem:[#allocation411_spill] sm:$0xff]  ;;  %v11137_v32 = vld [vmem:[#allocation32_spill] sm:$0xff] }
 0x676   :  { %3978 = vperm.xlu1 %4138, %v4248_v10   ;;  %v3402_v57 = vadd.f32 %v3386_v26, %v3242_v48  ;;  %vm3624_vm6 = vcmp.eq.s32.totalorder %v8882_v17, %v6784_v23  ;;  %vm2974_vm7 = vcmp.eq.s32.totalorder %v11124_v28, %v6784_v23  ;;  %v3546_v60 = vsel %vm3466_vm5, %v11125_v53, 0.0  ;;  %v11134_v55 = vld [vmem:[#allocation583_spill] sm:$0xff]  ;;  %v11138_v26 = vld [vmem:[#allocation413_spill] sm:$0xff]  ;;  %v11142_v46 = vld [vmem:[#allocation416_spill] sm:$0xff] }
 0x677   :  { %v9136_v3 = vadd.f32 %v8942_v12, %v3718_v51  ;;  %v3675_v34 = vpop.permute.xlu1 %3674  ;;  %v3388_v16 = vsel %vm3308_vm4, %v11126_v1, 0.0  ;;  %v3244_v45 = vadd.f32 %v3228_v58, %v3084_v38  ;;  %vm3134_vm8 = vcmp.eq.s32.totalorder %v11127_v43, %v6784_v23  ;;  %v11129_v12 = vld [vmem:[#allocation382_spill] sm:$0xff]  ;;  %v11135_v27 = vld [vmem:[#allocation23_spill] sm:$0xff]  ;;  %v11140_v48 = vld [vmem:[#allocation421_spill] sm:$0xff] }
 0x678   :  { %v3704_v59 = vsel %vm3624_vm6, %v3675_v34, 0.0  ;;  %vm3468_vm9 = vcmp.eq.s32.totalorder %v11128_v50, %v6784_v23  ;;  %vm2173_vm10 = vcmp.eq.s32.totalorder %v11129_v12, %v6784_v23  ;;  %vm2177_vm11 = vcmp.eq.s32.totalorder %v11130_v36, %v6784_v23  ;;  %v11139_v41 = vld [vmem:[#allocation415_spill] sm:$0xff]  ;;  %v11143_v10 = vld [vmem:[#allocation417_spill] sm:$0xff]  ;;  %v11145_v28 = vld [vmem:[#allocation418_spill] sm:$0xff] }
 0x679   :  { %v3720_v17 = vadd.f32 %v3704_v59, %v3560_v14  ;;  %v2910_v33 = vadd.f32 %v2894_v31, %v2750_v47  ;;  %v3054_v21 = vsel %vm2974_vm7, %v11131_v11, 0.0  ;;  %vm2175_vm12 = vcmp.eq.s32.totalorder %v11132_v5, %v6784_v23  ;;  %v9171_v22 = vpop.permute.xlu0 %3910  ;;  %v4250_v47 = vld [vmem:[%s9675_s1 + $0x58] sm:$0xff]  ;;  %v11144_v14 = vld [vmem:[#allocation16_spill] sm:$0xff]  ;;  %v11147_v1 = vld [vmem:[#allocation419_spill] sm:$0xff] }
 0x67a   :  { %3986 = vperm.xlu1 %4138, %v4249_v0   ;;  %v3562_v61 = vadd.f32 %v3546_v60, %v3402_v57  ;;  %v3404_v4 = vadd.f32 %v3388_v16, %v3244_v45  ;;  %vm3626_vm13 = vcmp.eq.s32.totalorder %v8923_v13, %v6784_v23  ;;  %vm2179_vm14 = vcmp.eq.s32.totalorder %v11133_v40, %v6784_v23  ;;  %v11146_v53 = vld [vmem:[#allocation425_spill] sm:$0xff]  ;;  %v11148_v16 = vld [vmem:[#allocation420_spill] sm:$0xff]  ;;  %v11149_v45 = vld [vmem:[#allocation427_spill] sm:$0xff] }
 0x67b   :  { %v9159_v39 = vadd.f32 %v8974_v42, %v3720_v17  ;;  %v3683_v44 = vpop.permute.xlu1 %3682  ;;  %v3214_v9 = vsel %vm3134_vm8, %v11134_v55, 0.0  ;;  %v3548_v63 = vsel %vm3468_vm9, %v11135_v27, 0.0  ;;  %v3070_v13 = vadd.f32 %v3054_v21, %v2910_v33  ;;  %v11136_v42 = vld [vmem:[#allocation593_spill] sm:$0xff]  ;;  %v4251_v50 = vld [vmem:[%s9675_s1 + $0x68] sm:$0xff]  ;;  %v11150_v12 = vld [vmem:[#allocation422_spill] sm:$0xff] }
 0x67c   :  { %v3706_v7 = vsel %vm3626_vm13, %v3683_v44, 0.0  ;;  %vm3294_vm15 = vcmp.eq.s32.totalorder %v11136_v42, %v6784_v23  ;;  %vm3454_vm2 = vcmp.eq.s32.totalorder %v11137_v32, %v6784_v23  ;;  %vm2181_vm0 = vcmp.eq.s32.totalorder %v11138_v26, %v6784_v23  ;;  %v11151_v36 = vld [vmem:[#allocation429_spill] sm:$0xff]  ;;  %v11152_v21 = vld [vmem:[#allocation423_spill] sm:$0xff] }
 0x67d   :  { %v3722_v37 = vadd.f32 %v3706_v7, %v3562_v61  ;;  %vm2183_vm3 = vcmp.eq.s32.totalorder %v11139_v41, %v6784_v23  ;;  %v2253_v38 = vsel %vm2173_vm10, %v11140_v48, 0.0  ;;  %v3374_v51 = vsel %vm3294_vm15, %v11141_v49, 0.0  ;;  %v9217_v17 = vpop.permute.xlu0 %3916  ;;  %v11153_v61 = vld [vmem:[#allocation424_spill] sm:$0xff]  ;;  %v11154_v44 = vld [vmem:[#allocation431_spill] sm:$0xff]  ;;  %v11158_v7 = vld [vmem:[#allocation62_spill] sm:$0xff] }
 0x67e   :  { %3994 = vperm.xlu1 %4138, %v4250_v47   ;;  %v3230_v29 = vadd.f32 %v3214_v9, %v3070_v13  ;;  %v3564_v31 = vadd.f32 %v3548_v63, %v3404_v4  ;;  %vm3628_vm1 = vcmp.eq.s32.totalorder %v8961_v18, %v6784_v23  ;;  %vm2337_vm5 = vcmp.eq.s32.totalorder %v11142_v46, %v6784_v23  ;;  %v11155_v9 = vld [vmem:[#allocation426_spill] sm:$0xff]  ;;  %v11156_v63 = vld [vmem:[#allocation437_spill] sm:$0xff]  ;;  %v11162_v48 = vld [vmem:[#allocation432_spill] sm:$0xff] }
 0x67f   :  { %v9192_v25 = vadd.f32 %v9005_v8, %v3722_v37  ;;  %v3691_v58 = vpop.permute.xlu1 %3690  ;;  %vm2185_vm4 = vcmp.eq.s32.totalorder %v11143_v10, %v6784_v23  ;;  %v3534_v57 = vsel %vm3454_vm2, %v11144_v14, 0.0  ;;  %vm2339_vm6 = vcmp.eq.s32.totalorder %v11145_v28, %v6784_v23  ;;  %v4252_v42 = vld [vmem:[%s9675_s1 + $0x78] sm:$0xff]  ;;  %v11161_v37 = vld [vmem:[#allocation435_spill] sm:$0xff]  ;;  %v11163_v49 = vld [vmem:[#allocation434_spill] sm:$0xff] }
 0x680   :  { %v3708_v34 = vsel %vm3628_vm1, %v3691_v58, 0.0  ;;  %v2257_v18 = vsel %vm2177_vm11, %v11146_v53, 0.0  ;;  %v3390_v8 = vadd.f32 %v3374_v51, %v3230_v29  ;;  %vm2187_vm7 = vcmp.eq.s32.totalorder %v11147_v1, %v6784_v23  ;;  %v11164_v47 = vld [vmem:[#allocation436_spill] sm:$0xff]  ;;  %v11170_v1 = vld [vmem:[#allocation51_spill] sm:$0xff] }
 0x681   :  { %v3724_v60 = vadd.f32 %v3708_v34, %v3564_v31  ;;  %vm2341_vm8 = vcmp.eq.s32.totalorder %v11148_v16, %v6784_v23  ;;  %v2269_v59 = vadd.f32 %v2253_v38, %v8581_v52  ;;  %v2259_v43 = vsel %vm2179_vm14, %v11149_v45, 0.0  ;;  %v11165_v31 = vld [vmem:[#allocation438_spill] sm:$0xff]  ;;  %v9282_v14 = vpop.permute.xlu0 %3922  ;;  %v11166_v46 = vld [vmem:[#allocation428_spill] sm:$0xff]  ;;  %v11171_v45 = vld [vmem:[#allocation53_spill] sm:$0xff] }
 0x682   :  { %4002 = vperm.xlu1 %4138, %v4251_v50   ;;  %vm2343_vm9 = vcmp.eq.s32.totalorder %v11150_v12, %v6784_v23  ;;  %v2261_v52 = vsel %vm2181_vm0, %v11151_v36, 0.0  ;;  %v3550_v33 = vadd.f32 %v3534_v57, %v3390_v8  ;;  %v2255_v0 = vsel %vm2175_vm12, %v11152_v21, 0.0  ;;  %v11167_v34 = vld [vmem:[#allocation430_spill] sm:$0xff]  ;;  %v11168_v28 = vld [vmem:[#allocation440_spill] sm:$0xff] }
 0x683   :  { %v9226_v11 = vadd.f32 %v9031_v62, %v3724_v60  ;;  %vm2345_vm10 = vcmp.eq.s32.totalorder %v11153_v61, %v6784_v23  ;;  %v2273_v4 = vadd.f32 %v2257_v18, %v8579_v35  ;;  %v2263_v40 = vsel %vm2183_vm3, %v11154_v44, 0.0  ;;  %v11157_v35 = vld [vmem:[#allocation439_spill] sm:$0xff]  ;;  %v11169_v8 = vld [vmem:[#allocation442_spill] sm:$0xff]  ;;  %v11173_v36 = vld [vmem:[#allocation444_spill] sm:$0xff] }
 0x684   :  { %v3730_v55 = vpop.permute.xlu1 %3729  ;;  %vm2347_vm11 = vcmp.eq.s32.totalorder %v11155_v9, %v6784_v23  ;;  %v2275_v62 = vadd.f32 %v2259_v43, %v8583_v24  ;;  %v3710_v27 = vadd.f32 %v8994_v15, %v3550_v33  ;;  %v2277_v5 = vadd.f32 %v2261_v52, %v8585_v54  ;;  %v11159_v24 = vld [vmem:[#allocation52_spill] sm:$0xff]  ;;  %v11160_v15 = vld [vmem:[#allocation433_spill] sm:$0xff]  ;;  %v11172_v50 = vld [vmem:[#allocation54_spill] sm:$0xff] }
 0x685   :  { %vm3774_vm12 = vcmp.eq.s32.totalorder %v3730_v55, %v6784_v23  ;;  %vm2333_vm13 = vcmp.eq.s32.totalorder %v11156_v63, %v6784_v23  ;;  %vm2335_vm14 = vcmp.eq.s32.totalorder %v11157_v35, %v6784_v23  ;;  %v2279_v32 = vadd.f32 %v2263_v40, %v11159_v24  ;;  %v11175_v63 = vld [vmem:[#allocation477_spill] sm:$0xff]  ;;  %v11176_v35 = vld [vmem:[#allocation478_spill] sm:$0xff] }
 0x686   :  { %v3854_v13 = vsel %vm3774_vm12, %v11158_v7, 0.0  ;;  %4010 = vperm.xlu1 %4138, %v4252_v42   ;;  %v2265_v54 = vsel %vm2185_vm4, %v11160_v15, 0.0  ;;  %v2267_v26 = vsel %vm2187_vm7, %v11161_v37, 0.0  ;;  %v2417_v38 = vsel %vm2337_vm5, %v11162_v48, 0.0  ;;  %v11180_v7 = vld [vmem:[#allocation491_spill] sm:$0xff]  ;;  %v11181_v42 = vld [vmem:[#allocation493_spill] sm:$0xff] }
 0x687   :  { %v9262_v41 = vadd.f32 %v3854_v13, %v3710_v27  ;;  %v2419_v51 = vsel %vm2339_vm6, %v11163_v49, 0.0  ;;  %v2421_v29 = vsel %vm2341_vm8, %v11164_v47, 0.0  ;;  %v2423_v58 = vsel %vm2343_vm9, %v11165_v31, 0.0  ;;  %v11182_v15 = vld [vmem:[#allocation481_spill] sm:$0xff]  ;;  %v11184_v37 = vld [vmem:[#allocation483_spill] sm:$0xff]  ;;  %v11189_v31 = vld [vmem:[#allocation488_spill] sm:$0xff] }
 0x688   :  { %v9280_v10 = vpop.permute.xlu1 %3732  ;;  %v2413_v57 = vsel %vm2333_vm13, %v11166_v46, 0.0  ;;  %v2415_v53 = vsel %vm2335_vm14, %v11167_v34, 0.0  ;;  %v2425_v18 = vsel %vm2345_vm10, %v11168_v28, 0.0  ;;  %v2427_v60 = vsel %vm2347_vm11, %v11169_v8, 0.0  ;;  %v11186_v48 = vld [vmem:[#allocation485_spill] sm:$0xff] }
 0x689   :  { %v2271_v16 = vadd.f32 %v2255_v0, %v11170_v1  ;;  %v2281_v43 = vadd.f32 %v2265_v54, %v11171_v45  ;;  %v2283_v12 = vadd.f32 %v2267_v26, %v11172_v50  ;;  %vm2493_vm15 = vcmp.eq.s32.totalorder %v11173_v36, %v6784_v23  ;;  %v11174_v0 = vld [vmem:[#allocation475_spill] sm:$0xff]  ;;  %v11183_v54 = vld [vmem:[#allocation482_spill] sm:$0xff]  ;;  %v11185_v26 = vld [vmem:[#allocation484_spill] sm:$0xff] }
 0x68a   :  { %v2433_v52 = vadd.f32 %v2417_v38, %v2273_v4  ;;  %v2435_v33 = vadd.f32 %v2419_v51, %v2275_v62  ;;  %v2437_v21 = vadd.f32 %v2421_v29, %v2277_v5  ;;  %v2439_v44 = vadd.f32 %v2423_v58, %v2279_v32  ;;  %v11177_v4 = vld [vmem:[#allocation487_spill] sm:$0xff]  ;;  %v9316_v32 = vpop.permute.xlu0 %3928  ;;  %v11187_v38 = vld [vmem:[#allocation486_spill] sm:$0xff] }
 0x68b   :  { %v2429_v61 = vadd.f32 %v2413_v57, %v2269_v59  ;;  %v9299_v40 = vadd.f32 %v2415_v53, %v2271_v16  ;;  %v2441_v55 = vadd.f32 %v2425_v18, %v2281_v43  ;;  %v2443_v27 = vadd.f32 %v2427_v60, %v2283_v12  ;;  %v11178_v5 = vld [vmem:[#allocation479_spill] sm:$0xff]  ;;  %v11179_v59 = vld [vmem:[#allocation480_spill] sm:$0xff]  ;;  %v11190_v57 = vld [vmem:[#allocation497_spill] sm:$0xff] }
 0x68c   :  { %v9301_v9 = vpop.permute.xlu1 %3738  ;;  %vm2497_vm2 = vcmp.eq.s32.totalorder %v11174_v0, %v6784_v23  ;;  %vm2499_vm0 = vcmp.eq.s32.totalorder %v11175_v63, %v6784_v23  ;;  %vm2657_vm3 = vcmp.eq.s32.totalorder %v11176_v35, %v6784_v23  ;;  %v2573_v62 = vsel %vm2493_vm15, %v11177_v4, 0.0  ;;  %v11188_v51 = vld [vmem:[#allocation495_spill] sm:$0xff]  ;;  %v11191_v53 = vld [vmem:[#allocation494_spill] sm:$0xff]  ;;  %v11193_v60 = vld [vmem:[#allocation501_spill] sm:$0xff] }
 0x68d   :  { %vm2501_vm1 = vcmp.eq.s32.totalorder %v11178_v5, %v6784_v23  ;;  %vm2659_vm5 = vcmp.eq.s32.totalorder %v11179_v59, %v6784_v23  ;;  %v2577_v13 = vsel %vm2497_vm2, %v11180_v7, 0.0  ;;  %v2579_v24 = vsel %vm2499_vm0, %v11181_v42, 0.0  ;;  %v11192_v18 = vld [vmem:[#allocation499_spill] sm:$0xff]  ;;  %v11195_v43 = vld [vmem:[#allocation496_spill] sm:$0xff]  ;;  %v11196_v12 = vld [vmem:[#allocation498_spill] sm:$0xff] }
 0x68e   :  { %vm2503_vm4 = vcmp.eq.s32.totalorder %v11182_v15, %v6784_v23  ;;  %vm2661_vm6 = vcmp.eq.s32.totalorder %v11183_v54, %v6784_v23  ;;  %vm2505_vm7 = vcmp.eq.s32.totalorder %v11184_v37, %v6784_v23  ;;  %vm2663_vm8 = vcmp.eq.s32.totalorder %v11185_v26, %v6784_v23  ;;  %v11194_v16 = vld [vmem:[#allocation503_spill] sm:$0xff]  ;;  %v11198_v0 = vld [vmem:[#allocation502_spill] sm:$0xff]  ;;  %v11199_v63 = vld [vmem:[#allocation504_spill] sm:$0xff]  ;;  %v9365_v5 = vpop.permute.xlu0 %3950 }
 0x68f   :  { %vm2507_vm9 = vcmp.eq.s32.totalorder %v11186_v48, %v6784_v23  ;;  %vm2665_vm10 = vcmp.eq.s32.totalorder %v11187_v38, %v6784_v23  ;;  %v2589_v49 = vadd.f32 %v2573_v62, %v2429_v61  ;;  %v2581_v47 = vsel %vm2501_vm1, %v11188_v51, 0.0  ;;  %v11200_v4 = vld [vmem:[#allocation506_spill] sm:$0xff]  ;;  %v11202_v37 = vld [vmem:[#allocation569_spill] sm:$0xff] }
 0x690   :  { %v9331_v29 = vpop.permute.xlu1 %3744  ;;  %vm2667_vm11 = vcmp.eq.s32.totalorder %v11189_v31, %v6784_v23  ;;  %v2593_v58 = vadd.f32 %v2577_v13, %v2433_v52  ;;  %v2595_v46 = vadd.f32 %v2579_v24, %v2435_v33  ;;  %v2583_v34 = vsel %vm2503_vm4, %v11190_v57, 0.0  ;;  %v11197_v52 = vld [vmem:[#allocation500_spill] sm:$0xff]  ;;  %v11201_v42 = vld [vmem:[#allocation490_spill] sm:$0xff]  ;;  %v11203_v38 = vld [vmem:[#allocation541_spill] sm:$0xff] }
 0x691   :  { %v2737_v28 = vsel %vm2657_vm3, %v11191_v53, 0.0  ;;  %v2585_v8 = vsel %vm2505_vm7, %v11192_v18, 0.0  ;;  %v2587_v1 = vsel %vm2507_vm9, %v11193_v60, 0.0  ;;  %vm2653_vm12 = vcmp.eq.s32.totalorder %v11194_v16, %v6784_v23  ;;  %v11204_v51 = vld [vmem:[#allocation553_spill] sm:$0xff]  ;;  %v11212_v60 = vld [vmem:[#allocation559_spill] sm:$0xff]  ;;  %v11213_v16 = vld [vmem:[#allocation568_spill] sm:$0xff] }
 0x692   :  { %v2597_v45 = vadd.f32 %v2581_v47, %v2437_v21  ;;  %v2739_v50 = vsel %vm2659_vm5, %v11195_v43, 0.0  ;;  %v2741_v36 = vsel %vm2661_vm6, %v11196_v12, 0.0  ;;  %v2743_v33 = vsel %vm2663_vm8, %v11197_v52, 0.0  ;;  %v11209_v53 = vld [vmem:[#allocation545_spill] sm:$0xff]  ;;  %v9396_v43 = vpop.permute.xlu0 %3958  ;;  %v11216_v12 = vld [vmem:[#allocation546_spill] sm:$0xff]  ;;  %v11217_v52 = vld [vmem:[#allocation612_spill] sm:$0xff] }
 0x693   :  { %v2599_v61 = vadd.f32 %v2583_v34, %v2439_v44  ;;  %v2745_v21 = vsel %vm2665_vm10, %v11198_v0, 0.0  ;;  %v2747_v35 = vsel %vm2667_vm11, %v11199_v63, 0.0  ;;  %vm2813_vm13 = vcmp.eq.s32.totalorder %v11200_v4, %v6784_v23  ;;  %v11208_v34 = vld [vmem:[#allocation543_spill] sm:$0xff]  ;;  %v11219_v0 = vld [vmem:[#allocation548_spill] sm:$0xff] }
 0x694   :  { %v9363_v62 = vpop.permute.xlu1 %3750  ;;  %v2753_v59 = vadd.f32 %v2737_v28, %v2593_v58  ;;  %v2601_v7 = vadd.f32 %v2585_v8, %v2441_v55  ;;  %v2603_v13 = vadd.f32 %v2587_v1, %v2443_v27  ;;  %v2733_v24 = vsel %vm2653_vm12, %v11201_v42, 0.0  ;;  %v11205_v55 = vld [vmem:[#allocation540_spill] sm:$0xff]  ;;  %v11206_v27 = vld [vmem:[#allocation542_spill] sm:$0xff]  ;;  %v11207_v58 = vld [vmem:[#allocation557_spill] sm:$0xff] }
 0x695   :  { %v2755_v44 = vadd.f32 %v2739_v50, %v2595_v46  ;;  %v2757_v15 = vadd.f32 %v2741_v36, %v2597_v45  ;;  %v2759_v54 = vadd.f32 %v2743_v33, %v2599_v61  ;;  %vm2973_vm14 = vcmp.eq.s32.totalorder %v11202_v37, %v6784_v23  ;;  %v11210_v28 = vld [vmem:[#allocation544_spill] sm:$0xff]  ;;  %v11214_v45 = vld [vmem:[#allocation6_spill] sm:$0xff]  ;;  %v11215_v50 = vld [vmem:[#allocation547_spill] sm:$0xff] }
 0x696   :  { %v9370_v26 = vadd.f32 %v2745_v21, %v2601_v7  ;;  %v9372_v48 = vadd.f32 %v2747_v35, %v2603_v13  ;;  %vm2817_vm15 = vcmp.eq.s32.totalorder %v11203_v38, %v6784_v23  ;;  %v2893_v47 = vsel %vm2813_vm13, %v11204_v51, 0.0  ;;  %v11218_v61 = vld [vmem:[#allocation549_spill] sm:$0xff]  ;;  %v11220_v21 = vld [vmem:[#allocation556_spill] sm:$0xff]  ;;  %v11221_v7 = vld [vmem:[#allocation550_spill] sm:$0xff] }
 0x697   :  { %v2749_v31 = vadd.f32 %v2733_v24, %v2589_v49  ;;  %vm2977_vm2 = vcmp.eq.s32.totalorder %v11205_v55, %v6784_v23  ;;  %vm2979_vm0 = vcmp.eq.s32.totalorder %v11206_v27, %v6784_v23  ;;  %v2897_v46 = vsel %vm2817_vm15, %v11207_v58, 0.0  ;;  %v11211_v49 = vld [vmem:[#allocation552_spill] sm:$0xff]  ;;  %v11222_v13 = vld [vmem:[#allocation558_spill] sm:$0xff]  ;;  %v11223_v24 = vld [vmem:[#allocation561_spill] sm:$0xff] }
 0x698   :  { %v9382_v57 = vpop.permute.xlu1 %3756  ;;  %vm2819_vm3 = vcmp.eq.s32.totalorder %v11208_v34, %v6784_v23  ;;  %vm2821_vm1 = vcmp.eq.s32.totalorder %v11209_v53, %v6784_v23  ;;  %vm2981_vm5 = vcmp.eq.s32.totalorder %v11210_v28, %v6784_v23  ;;  %v3053_v18 = vsel %vm2973_vm14, %v11211_v49, 0.0  ;;  %v11224_v38 = vld [vmem:[#allocation607_spill] sm:$0xff]  ;;  %v11226_v55 = vld [vmem:[#allocation4_spill] sm:$0xff] }
 0x699   :  { %v2909_v8 = vadd.f32 %v2893_v47, %v2749_v31  ;;  %v2899_v1 = vsel %vm2819_vm3, %v11212_v60, 0.0  ;;  %vm3133_vm4 = vcmp.eq.s32.totalorder %v11213_v16, %v6784_v23  ;;  %vm3293_vm6 = vcmp.eq.s32.totalorder %v11214_v45, %v6784_v23  ;;  %v11225_v47 = vld [vmem:[#allocation600_spill] sm:$0xff]  ;;  %v11228_v27 = vld [vmem:[#allocation551_spill] sm:$0xff] }
 0x69a   :  { %vm2823_vm7 = vcmp.eq.s32.totalorder %v11215_v50, %v6784_v23  ;;  %vm2983_vm8 = vcmp.eq.s32.totalorder %v11216_v12, %v6784_v23  ;;  %v2913_v36 = vadd.f32 %v2897_v46, %v2753_v59  ;;  %v3213_v33 = vsel %vm3133_vm4, %v11217_v52, 0.0  ;;  %v11229_v46 = vld [vmem:[#allocation616_spill] sm:$0xff]  ;;  %v11230_v53 = vld [vmem:[#allocation43_spill] sm:$0xff] }
 0x69b   :  { %vm2825_vm9 = vcmp.eq.s32.totalorder %v11218_v61, %v6784_v23  ;;  %vm2985_vm10 = vcmp.eq.s32.totalorder %v11219_v0, %v6784_v23  ;;  %v3057_v63 = vsel %vm2977_vm2, %v11220_v21, 0.0  ;;  %v3069_v35 = vadd.f32 %v3053_v18, %v2909_v8  ;;  %v11231_v18 = vld [vmem:[#allocation473_spill] sm:$0xff]  ;;  %v11232_v8 = vld [vmem:[#allocation560_spill] sm:$0xff]  ;;  %v11234_v45 = vld [vmem:[#allocation595_spill] sm:$0xff] }
 0x69c   :  { %v9411_v4 = vpop.permute.xlu1 %3762  ;;  %vm2987_vm11 = vcmp.eq.s32.totalorder %v11221_v7, %v6784_v23  ;;  %v2915_v59 = vadd.f32 %v2899_v1, %v2755_v44  ;;  %v3059_v42 = vsel %vm2979_vm0, %v11222_v13, 0.0  ;;  %v2901_v37 = vsel %vm2821_vm1, %v11223_v24, 0.0  ;;  %v11227_v44 = vld [vmem:[#allocation57_spill] sm:$0xff]  ;;  %v11233_v1 = vld [vmem:[#allocation563_spill] sm:$0xff]  ;;  %v11236_v13 = vld [vmem:[#allocation36_spill] sm:$0xff] }
 0x69d   :  { %v3373_v51 = vsel %vm3293_vm6, %v11224_v38, 0.0  ;;  %vm3137_vm12 = vcmp.eq.s32.totalorder %v11225_v47, %v6784_v23  ;;  %v3229_v31 = vadd.f32 %v3213_v33, %v3069_v35  ;;  %vm3453_vm13 = vcmp.eq.s32.totalorder %v11226_v55, %v6784_v23  ;;  %v3967_v33 = vpop.permute.xlu0 %3966  ;;  %v11235_v35 = vld [vmem:[#allocation562_spill] sm:$0xff]  ;;  %v11237_v38 = vld [vmem:[#allocation565_spill] sm:$0xff]  ;;  %v11240_v12 = vld [vmem:[#allocation611_spill] sm:$0xff] }
 0x69e   :  { %vm3613_vm14 = vcmp.eq.s32.totalorder %v11227_v44, %v6784_v23  ;;  %vm2827_vm15 = vcmp.eq.s32.totalorder %v11228_v27, %v6784_v23  ;;  %v3073_v58 = vadd.f32 %v3057_v63, %v2913_v36  ;;  %v3217_v34 = vsel %vm3137_vm12, %v11229_v46, 0.0  ;;  %v11238_v47 = vld [vmem:[#allocation602_spill] sm:$0xff]  ;;  %v11242_v46 = vld [vmem:[#allocation597_spill] sm:$0xff] }
 0x69f   :  { %v3533_v49 = vsel %vm3453_vm13, %v11230_v53, 0.0  ;;  %vm2495_vm2 = vcmp.eq.s32.totalorder %v11231_v18, %v6784_v23  ;;  %v3061_v60 = vsel %vm2981_vm5, %v11232_v8, 0.0  ;;  %v2903_v16 = vsel %vm2823_vm7, %v11233_v1, 0.0  ;;  %v11243_v61 = vld [vmem:[#allocation34_spill] sm:$0xff]  ;;  %v11246_v8 = vld [vmem:[#allocation48_spill] sm:$0xff]  ;;  %v11258_v18 = vld [vmem:[#allocation3_spill] sm:$0xff] }
 0x6a0   :  { %vm3297_vm0 = vcmp.eq.s32.totalorder %v11234_v45, %v6784_v23  ;;  %v3389_v36 = vadd.f32 %v3373_v51, %v3229_v31  ;;  %v9446_v52 = vpop.permute.xlu1 %3768  ;;  %v3075_v21 = vadd.f32 %v3059_v42, %v2915_v59  ;;  %v2917_v63 = vadd.f32 %v2901_v37, %v2757_v15  ;;  %v11239_v59 = vld [vmem:[#allocation567_spill] sm:$0xff]  ;;  %v11241_v37 = vld [vmem:[#allocation618_spill] sm:$0xff]  ;;  %v11247_v45 = vld [vmem:[#allocation604_spill] sm:$0xff] }
 0x6a1   :  { %v3063_v28 = vsel %vm2983_vm8, %v11235_v35, 0.0  ;;  %v3693_v24 = vsel %vm3613_vm14, %v11236_v13, 0.0  ;;  %v2905_v50 = vsel %vm2825_vm9, %v11237_v38, 0.0  ;;  %vm3139_vm3 = vcmp.eq.s32.totalorder %v11238_v47, %v6784_v23  ;;  %v11244_v53 = vld [vmem:[#allocation50_spill] sm:$0xff]  ;;  %v3975_v38 = vpop.permute.xlu0 %3974 }
 0x6a2   :  { %v3233_v51 = vadd.f32 %v3217_v34, %v3073_v58  ;;  %v3549_v31 = vadd.f32 %v3533_v49, %v3389_v36  ;;  %v2919_v55 = vadd.f32 %v2903_v16, %v2759_v54  ;;  %v2907_v15 = vsel %vm2827_vm15, %v11239_v59, 0.0  ;;  %v11245_v49 = vld [vmem:[#allocation564_spill] sm:$0xff]  ;;  %v11250_v59 = vld [vmem:[#allocation566_spill] sm:$0xff] }
 0x6a3   :  { %v3377_v42 = vsel %vm3297_vm0, %v11240_v12, 0.0  ;;  %v3219_v44 = vsel %vm3139_vm3, %v11241_v37, 0.0  ;;  %vm3299_vm1 = vcmp.eq.s32.totalorder %v11242_v46, %v6784_v23  ;;  %vm3457_vm5 = vcmp.eq.s32.totalorder %v11243_v61, %v6784_v23  ;;  %v11255_v7 = vld [vmem:[#allocation606_spill] sm:$0xff] }
 0x6a4   :  { %vm3773_vm4 = vcmp.eq.s32.totalorder %v11244_v53, %v6784_v23  ;;  %v3791_v58 = vpop.permute.xlu1 %3790  ;;  %v3709_v54 = vadd.f32 %v3693_v24, %v3549_v31  ;;  %v2921_v34 = vadd.f32 %v2905_v50, %v9370_v26  ;;  %v3065_v27 = vsel %vm2985_vm10, %v11245_v49, 0.0  ;;  %v11248_v26 = vld [vmem:[#allocation613_spill] sm:$0xff]  ;;  %v11249_v50 = vld [vmem:[#allocation620_spill] sm:$0xff]  ;;  %v11257_v49 = vld [vmem:[#allocation615_spill] sm:$0xff] }
 0x6a5   :  { %v3537_v1 = vsel %vm3457_vm5, %v11246_v8, 0.0  ;;  %v3853_v16 = vsel %vm3773_vm4, %v3791_v58, 0.0  ;;  %vm3141_vm6 = vcmp.eq.s32.totalorder %v11247_v45, %v6784_v23  ;;  %v3393_v36 = vadd.f32 %v3377_v42, %v3233_v51  ;;  %v11252_v51 = vld [vmem:[#allocation35_spill] sm:$0xff]  ;;  %v3983_v45 = vpop.permute.xlu0 %3982 }
 0x6a6   :  { %v3235_v35 = vadd.f32 %v3219_v44, %v3075_v21  ;;  %v9479_v13 = vadd.f32 %v3853_v16, %v3709_v54  ;;  %v3077_v47 = vadd.f32 %v3061_v60, %v2917_v63  ;;  %v2923_v24 = vadd.f32 %v2907_v15, %v9372_v48  ;;  %v11251_v21 = vld [vmem:[#allocation599_spill] sm:$0xff]  ;;  %v11253_v63 = vld [vmem:[#allocation489_spill] sm:$0xff]  ;;  %v11254_v44 = vld [vmem:[#allocation56_spill] sm:$0xff] }
 0x6a7   :  { %v3379_v0 = vsel %vm3299_vm1, %v11248_v26, 0.0  ;;  %v3221_v31 = vsel %vm3141_vm6, %v11249_v50, 0.0  ;;  %v3067_v12 = vsel %vm2987_vm11, %v11250_v59, 0.0  ;;  %vm3301_vm7 = vcmp.eq.s32.totalorder %v11251_v21, %v6784_v23  ;;  %v11256_v54 = vld [vmem:[#allocation601_spill] sm:$0xff]  ;;  %v11264_v59 = vld [vmem:[#allocation603_spill] sm:$0xff] }
 0x6a8   :  { %vm3459_vm8 = vcmp.eq.s32.totalorder %v11252_v51, %v6784_v23  ;;  %v3553_v60 = vadd.f32 %v3537_v1, %v3393_v36  ;;  %v9495_v48 = vpop.permute.xlu1 %3798  ;;  %v2575_v15 = vsel %vm2495_vm2, %v11253_v63, 0.0  ;;  %v3079_v42 = vadd.f32 %v3063_v28, %v2919_v55  ;;  %v11259_v28 = vld [vmem:[#allocation505_spill] sm:$0xff]  ;;  %v11262_v36 = vld [vmem:[#allocation608_spill] sm:$0xff] }
 0x6a9   :  { %v3081_v37 = vadd.f32 %v3065_v27, %v2921_v34  ;;  %v3539_v46 = vsel %vm3459_vm8, %v11254_v44, 0.0  ;;  %vm3143_vm9 = vcmp.eq.s32.totalorder %v11255_v7, %v6784_v23  ;;  %v3395_v61 = vadd.f32 %v3379_v0, %v3235_v35  ;;  %v11260_v55 = vld [vmem:[#allocation37_spill] sm:$0xff]  ;;  %v11261_v34 = vld [vmem:[#allocation39_spill] sm:$0xff]  ;;  %v11263_v35 = vld [vmem:[#allocation58_spill] sm:$0xff] }
 0x6aa   :  { %v3237_v53 = vadd.f32 %v3221_v31, %v3077_v47  ;;  %vm3937_vm10 = vcmp.eq.s32.totalorder %v9091_v19, %v6784_v23  ;;  %v3083_v58 = vadd.f32 %v3067_v12, %v2923_v24  ;;  %vm3303_vm11 = vcmp.eq.s32.totalorder %v11256_v54, %v6784_v23  ;;  %v11265_v12 = vld [vmem:[#allocation617_spill] sm:$0xff]  ;;  %v11270_v7 = vld [vmem:[#allocation59_spill] sm:$0xff] }
 0x6ab   :  { %v3381_v8 = vsel %vm3301_vm7, %v11257_v49, 0.0  ;;  %v3223_v1 = vsel %vm3143_vm9, %v11258_v18, 0.0  ;;  %vm2655_vm12 = vcmp.eq.s32.totalorder %v11259_v28, %v6784_v23  ;;  %vm3461_vm13 = vcmp.eq.s32.totalorder %v11260_v55, %v6784_v23  ;;  %v11266_v21 = vld [vmem:[#allocation5_spill] sm:$0xff]  ;;  %v11272_v55 = vld [vmem:[#allocation619_spill] sm:$0xff] }
 0x6ac   :  { %v3713_v27 = vadd.f32 %v11261_v34, %v3553_v60  ;;  %v3555_v16 = vadd.f32 %v3539_v46, %v3395_v61  ;;  %vm3777_vm14 = vcmp.eq.s32.totalorder %v9301_v9, %v6784_v23  ;;  %v3807_v19 = vpop.permute.xlu1 %3806  ;;  %vm3145_vm15 = vcmp.eq.s32.totalorder %v11262_v36, %v6784_v23  ;;  %v11267_v60 = vld [vmem:[#allocation38_spill] sm:$0xff] }
 0x6ad   :  { %v3541_v47 = vsel %vm3461_vm13, %v11263_v35, 0.0  ;;  %v3857_v24 = vsel %vm3777_vm14, %v3807_v19, 0.0  ;;  %v4017_v26 = vsel %vm3937_vm10, %v3967_v33, 0.0  ;;  %v3397_v0 = vadd.f32 %v3381_v8, %v3237_v53  ;;  %v11268_v33 = vld [vmem:[#allocation42_spill] sm:$0xff] }
 0x6ae   :  { %v3239_v50 = vadd.f32 %v3223_v1, %v3079_v42  ;;  %vm3939_vm2 = vcmp.eq.s32.totalorder %v9131_v30, %v6784_v23  ;;  %v3873_v31 = vadd.f32 %v3857_v24, %v3713_v27  ;;  %vm3305_vm0 = vcmp.eq.s32.totalorder %v11264_v59, %v6784_v23  ;;  %v11269_v46 = vld [vmem:[#allocation610_spill] sm:$0xff]  ;;  %v11271_v1 = vld [vmem:[#allocation605_spill] sm:$0xff] }
 0x6af   :  { %v3383_v9 = vsel %vm3303_vm11, %v11265_v12, 0.0  ;;  %v3225_v51 = vsel %vm3145_vm15, %v11266_v21, 0.0  ;;  %vm3463_vm3 = vcmp.eq.s32.totalorder %v11267_v60, %v6784_v23  ;;  %v3715_v63 = vadd.f32 %v11268_v33, %v3555_v16  ;;  %v11275_v16 = vld [vmem:[#allocation41_spill] sm:$0xff] }
 0x6b0   :  { %v3557_v42 = vadd.f32 %v3541_v47, %v3397_v0  ;;  %vm3779_vm1 = vcmp.eq.s32.totalorder %v9331_v29, %v6784_v23  ;;  %v4033_v30 = vadd.f32 %v4017_v26, %v3873_v31  ;;  %v3815_v44 = vpop.permute.xlu1 %3814  ;;  %vm3147_vm5 = vcmp.eq.s32.totalorder %v11269_v46, %v6784_v23  ;;  %v3991_v29 = vpop.permute.xlu0 %3990  ;;  %v11276_v26 = vld [vmem:[#allocation60_spill] sm:$0xff]  ;;  %v11281_v21 = vld [vmem:[#allocation45_spill] sm:$0xff] }
 0x6b1   :  { %v3543_v61 = vsel %vm3463_vm3, %v11270_v7, 0.0  ;;  %v3859_v53 = vsel %vm3779_vm1, %v3815_v44, 0.0  ;;  %v4019_v54 = vsel %vm3939_vm2, %v3975_v38, 0.0  ;;  %v3399_v49 = vadd.f32 %v3383_v9, %v3239_v50  ;;  %v11273_v38 = vld [vmem:[#allocation10_spill] sm:$0xff]  ;;  %v11277_v9 = vld [vmem:[#allocation492_spill] sm:$0xff]  ;;  %v11283_v44 = vld [vmem:[#allocation55_spill] sm:$0xff] }
 0x6b2   :  { %v3241_v8 = vadd.f32 %v3225_v51, %v3081_v37  ;;  %vm3941_vm4 = vcmp.eq.s32.totalorder %v9171_v22, %v6784_v23  ;;  %4049 = vst [vmem:[%s9676_s2 + $0x20] sm:$0xff] %v4033_v30  ;;  %v3875_v18 = vadd.f32 %v3859_v53, %v3715_v63  ;;  %vm3307_vm6 = vcmp.eq.s32.totalorder %v11271_v1, %v6784_v23  ;;  %v11274_v37 = vld [vmem:[#allocation40_spill] sm:$0xff]  ;;  %v11279_v22 = vld [vmem:[#allocation2_spill] sm:$0xff]  ;;  %v11284_v53 = vld [vmem:[#allocation571_spill] sm:$0xff] }
 0x6b3   :  { %v3385_v34 = vsel %vm3305_vm0, %v11272_v55, 0.0  ;;  %v3227_v27 = vsel %vm3147_vm5, %v11273_v38, 0.0  ;;  %vm3465_vm7 = vcmp.eq.s32.totalorder %v11274_v37, %v6784_v23  ;;  %v3717_v19 = vadd.f32 %v11275_v16, %v3557_v42  ;;  %v11282_v42 = vld [vmem:[#allocation555_spill] sm:$0xff]  ;;  %v11288_v16 = vld [vmem:[#allocation8_spill] sm:$0xff] }
 0x6b4   :  { %v3559_v36 = vadd.f32 %v3543_v61, %v3399_v49  ;;  %vm3781_vm8 = vcmp.eq.s32.totalorder %v9363_v62, %v6784_v23  ;;  %v4035_v35 = vadd.f32 %v4019_v54, %v3875_v18  ;;  %v3823_v47 = vpop.permute.xlu1 %3822  ;;  %v2591_v24 = vadd.f32 %v2575_v15, %v9299_v40  ;;  %v11278_v15 = vld [vmem:[#allocation539_spill] sm:$0xff]  ;;  %v3999_v63 = vpop.permute.xlu0 %3998 }
 0x6b5   :  { %v3545_v0 = vsel %vm3465_vm7, %v11276_v26, 0.0  ;;  %v3861_v50 = vsel %vm3781_vm8, %v3823_v47, 0.0  ;;  %v4021_v31 = vsel %vm3941_vm4, %v3983_v45, 0.0  ;;  %v3401_v59 = vadd.f32 %v3385_v34, %v3241_v8  ;;  %v11280_v45 = vld [vmem:[#allocation44_spill] sm:$0xff]  ;;  %v11285_v8 = vld [vmem:[#allocation47_spill] sm:$0xff]  ;;  %v11286_v34 = vld [vmem:[#allocation554_spill] sm:$0xff] }
 0x6b6   :  { %v3243_v12 = vadd.f32 %v3227_v27, %v3083_v58  ;;  %vm3943_vm9 = vcmp.eq.s32.totalorder %v9217_v17, %v6784_v23  ;;  %4051 = vst [vmem:[%s9676_s2 + $0x30] sm:$0xff] %v4035_v35  ;;  %v3877_v62 = vadd.f32 %v3861_v50, %v3717_v19  ;;  %v2735_v40 = vsel %vm2655_vm12, %v11277_v9, 0.0  ;;  %v11292_v9 = vld [vmem:[#allocation33_spill] sm:$0xff] }
 0x6b7   :  { %vm2815_vm10 = vcmp.eq.s32.totalorder %v11278_v15, %v6784_v23  ;;  %v3387_v58 = vsel %vm3307_vm6, %v11279_v22, 0.0  ;;  %vm3467_vm11 = vcmp.eq.s32.totalorder %v11280_v45, %v6784_v23  ;;  %v3719_v51 = vadd.f32 %v11281_v21, %v3559_v36  ;;  %v11289_v36 = vld [vmem:[#allocation614_spill] sm:$0xff] }
 0x6b8   :  { %v3561_v60 = vadd.f32 %v3545_v0, %v3401_v59  ;;  %vm3783_vm13 = vcmp.eq.s32.totalorder %v9382_v57, %v6784_v23  ;;  %v4037_v33 = vadd.f32 %v4021_v31, %v3877_v62  ;;  %v3831_v28 = vpop.permute.xlu1 %3830  ;;  %v2895_v30 = vsel %vm2815_vm10, %v11282_v42, 0.0  ;;  %v4007_v19 = vpop.permute.xlu0 %4006  ;;  %v11291_v31 = vld [vmem:[#allocation609_spill] sm:$0xff]  ;;  %v11293_v15 = vld [vmem:[#allocation46_spill] sm:$0xff] }
 0x6b9   :  { %v3547_v46 = vsel %vm3467_vm11, %v11283_v44, 0.0  ;;  %v3863_v7 = vsel %vm3783_vm13, %v3831_v28, 0.0  ;;  %v4023_v61 = vsel %vm3943_vm9, %v3991_v29, 0.0  ;;  %vm2975_vm12 = vcmp.eq.s32.totalorder %v11284_v53, %v6784_v23 }
 0x6ba   :  { %v3403_v54 = vadd.f32 %v3387_v58, %v3243_v12  ;;  %vm3945_vm14 = vcmp.eq.s32.totalorder %v9282_v14, %v6784_v23  ;;  %4053 = vst [vmem:[%s9676_s2 + $0x40] sm:$0xff] %v4037_v33  ;;  %v3879_v57 = vadd.f32 %v3863_v7, %v3719_v51  ;;  %v2751_v49 = vadd.f32 %v2735_v40, %v2591_v24  ;;  %v11287_v14 = vld [vmem:[#allocation598_spill] sm:$0xff]  ;;  %v11290_v24 = vld [vmem:[#allocation49_spill] sm:$0xff] }
 0x6bb   :  { %v3721_v18 = vadd.f32 %v11285_v8, %v3561_v60  ;;  %vm3785_vm15 = vcmp.eq.s32.totalorder %v9411_v4, %v6784_v23  ;;  %v3055_v38 = vsel %vm2975_vm12, %v11286_v34, 0.0  ;;  %v4025_v37 = vsel %vm3945_vm14, %v3999_v63, 0.0  ;;  %v11294_v33 = vld [vmem:[#allocation61_spill] sm:$0xff] }
 0x6bc   :  { %v3563_v1 = vadd.f32 %v3547_v46, %v3403_v54  ;;  %v4039_v17 = vadd.f32 %v4023_v61, %v3879_v57  ;;  %v3839_v29 = vpop.permute.xlu1 %3838  ;;  %v2911_v55 = vadd.f32 %v2895_v30, %v2751_v49  ;;  %vm3135_vm2 = vcmp.eq.s32.totalorder %v11287_v14, %v6784_v23 }
 0x6bd   :  { %v3865_v27 = vsel %vm3785_vm15, %v3839_v29, 0.0  ;;  %vm3295_vm0 = vcmp.eq.s32.totalorder %v11288_v16, %v6784_v23  ;;  %vm3947_vm3 = vcmp.eq.s32.totalorder %v9316_v32, %v6784_v23  ;;  %v3215_v35 = vsel %vm3135_vm2, %v11289_v36, 0.0 }
 0x6be   :  { %4055 = vst [vmem:[%s9676_s2 + $0x50] sm:$0xff] %v4039_v17  ;;  %v3881_v4 = vadd.f32 %v3865_v27, %v3721_v18  ;;  %v3071_v47 = vadd.f32 %v3055_v38, %v2911_v55  ;;  %v3723_v26 = vadd.f32 %v11290_v24, %v3563_v1  ;;  %vm3787_vm1 = vcmp.eq.s32.totalorder %v9446_v52, %v6784_v23 }
 0x6bf   :  { %v3375_v59 = vsel %vm3295_vm0, %v11291_v31, 0.0  ;;  %v4027_v32 = vsel %vm3947_vm3, %v4007_v19, 0.0  ;;  %vm3455_vm5 = vcmp.eq.s32.totalorder %v11292_v9, %v6784_v23  ;;  %vm3775_vm4 = vcmp.eq.s32.totalorder %v9280_v10, %v6784_v23 }
 0x6c0   :  { %v4041_v0 = vadd.f32 %v4025_v37, %v3881_v4  ;;  %v3847_v50 = vpop.permute.xlu1 %3846  ;;  %v3231_v62 = vadd.f32 %v3215_v35, %v3071_v47  ;;  %v3535_v22 = vsel %vm3455_vm5, %v11293_v15, 0.0  ;;  %v3855_v51 = vsel %vm3775_vm4, %v9495_v48, 0.0 }
 0x6c1   :  { %v3867_v12 = vsel %vm3787_vm1, %v3847_v50, 0.0  ;;  %vm3934_vm8 = vcmp.eq.s32.totalorder %v9065_v20, %v6784_v23 }
 0x6c2   :  { %4057 = vst [vmem:[%s9676_s2 + $0x60] sm:$0xff] %v4041_v0  ;;  %v3883_v40 = vadd.f32 %v3867_v12, %v3723_v26  ;;  %v3391_v58 = vadd.f32 %v3375_v59, %v3231_v62 }
 0x6c4   :  { %v4043_v45 = vadd.f32 %v4027_v32, %v3883_v40  ;;  %v3551_v21 = vadd.f32 %v3535_v22, %v3391_v58 }
 0x6c5   :  { %v3887_v52 = vpop.permute.xlu1 %3886 }
 0x6c6   :  { %4059 = vst [vmem:[%s9676_s2 + $0x70] sm:$0xff] %v4043_v45  ;;  %vm3933_vm6 = vcmp.eq.s32.totalorder %v3887_v52, %v6784_v23  ;;  %v3711_v28 = vadd.f32 %v11294_v33, %v3551_v21 }
 0x6c7   :  { %v4013_v60 = vsel %vm3933_vm6, %v9365_v5, 0.0 }
 0x6c8   :  { %v4029_v63 = vadd.f32 %v4013_v60, %v9479_v13  ;;  %v3871_v30 = vadd.f32 %v3855_v51, %v3711_v28 }
 0x6c9   :  { %v3893_v42 = vpop.permute.xlu1 %3892 }
 0x6ca   :  { %4045 = vst [vmem:[%s9676_s2] sm:$0xff] %v4029_v63  ;;  %vm3935_vm7 = vcmp.eq.s32.totalorder %v3893_v42, %v6784_v23 }
 0x6cb   :  { %v4015_v10 = vsel %vm3935_vm7, %v9396_v43, 0.0 }
 0x6cc   :  { %v4031_v44 = vadd.f32 %v4015_v10, %v3871_v30 }
 0x6cd   :  { %v3896_v46 = vpop.permute.xlu1 %3895 }
 0x6ce   :  { %4047 = vst [vmem:[%s9676_s2 + $0x10] sm:$0xff] %v4031_v44  ;;  %vm3936_vm9 = vcmp.eq.s32.totalorder %v3896_v46, %v6784_v23 }
 0x6d1   :  { %v3902_v5 = vpop.permute.xlu1 %3901 }
 0x6d2   :  { %vm3938_vm10 = vcmp.eq.s32.totalorder %v3902_v5, %v6784_v23 }
 0x6d5   :  { %v3908_v48 = vpop.permute.xlu1 %3907 }
 0x6d6   :  { %vm3940_vm11 = vcmp.eq.s32.totalorder %v3908_v48, %v6784_v23 }
 0x6d9   :  { %v3914_v7 = vpop.permute.xlu1 %3913 }
 0x6da   :  { %vm3942_vm13 = vcmp.eq.s32.totalorder %v3914_v7, %v6784_v23 }
 0x6dd   :  { %v3920_v13 = vpop.permute.xlu1 %3919 }
 0x6de   :  { %vm3944_vm12 = vcmp.eq.s32.totalorder %v3920_v13, %v6784_v23 }
 0x6e1   :  { %v3926_v61 = vpop.permute.xlu1 %3925 }
 0x6e2   :  { %vm3946_vm14 = vcmp.eq.s32.totalorder %v3926_v61, %v6784_v23 }
 0x6e5   :  { %v3932_v53 = vpop.permute.xlu1 %3931 }
 0x6e6   :  { %vm3948_vm15 = vcmp.eq.s32.totalorder %v3932_v53, %v6784_v23 }
 0x6e9   :  { %v3955_v54 = vpop.permute.xlu1 %3954 }
 0x6ea   :  { %v4014_v57 = vsel %vm3934_vm8, %v3955_v54, 0.0 }
 0x6eb   :  { %v4030_v49 = vadd.f32 %v4014_v57, %v9262_v41 }
 0x6ed   :  { %4046 = vst [vmem:[%s9676_s2 + $0x8] sm:$0xff] %v4030_v49  ;;  %v3963_v43 = vpop.permute.xlu1 %3962 }
 0x6ee   :  { %v4016_v8 = vsel %vm3936_vm9, %v3963_v43, 0.0 }
 0x6ef   :  { %v4032_v18 = vadd.f32 %v4016_v8, %v9053_v2 }
 0x6f1   :  { %4048 = vst [vmem:[%s9676_s2 + $0x18] sm:$0xff] %v4032_v18  ;;  %v3971_v20 = vpop.permute.xlu1 %3970 }
 0x6f2   :  { %v4018_v1 = vsel %vm3938_vm10, %v3971_v20, 0.0 }
 0x6f3   :  { %v4034_v41 = vadd.f32 %v4018_v1, %v9082_v56 }
 0x6f5   :  { %4050 = vst [vmem:[%s9676_s2 + $0x28] sm:$0xff] %v4034_v41  ;;  %v3979_v17 = vpop.permute.xlu1 %3978 }
 0x6f6   :  { %v4020_v29 = vsel %vm3940_vm11, %v3979_v17, 0.0 }
 0x6f7   :  { %v4036_v2 = vadd.f32 %v4020_v29, %v9108_v6 }
 0x6f9   :  { %4052 = vst [vmem:[%s9676_s2 + $0x38] sm:$0xff] %v4036_v2  ;;  %v3987_v55 = vpop.permute.xlu1 %3986 }
 0x6fa   :  { %v4022_v34 = vsel %vm3942_vm13, %v3987_v55, 0.0 }
 0x6fb   :  { %v4038_v56 = vadd.f32 %v4022_v34, %v9136_v3 }
 0x6fd   :  { %4054 = vst [vmem:[%s9676_s2 + $0x48] sm:$0xff] %v4038_v56  ;;  %v3995_v38 = vpop.permute.xlu1 %3994 }
 0x6fe   :  { %v4024_v27 = vsel %vm3944_vm12, %v3995_v38, 0.0 }
 0x6ff   :  { %v4040_v6 = vadd.f32 %v4024_v27, %v9159_v39 }
 0x701   :  { %4056 = vst [vmem:[%s9676_s2 + $0x58] sm:$0xff] %v4040_v6  ;;  %v4003_v37 = vpop.permute.xlu1 %4002 }
 0x702   :  { %v4026_v14 = vsel %vm3946_vm14, %v4003_v37, 0.0 }
 0x703   :  { %v4042_v3 = vadd.f32 %v4026_v14, %v9192_v25 }
 0x705   :  { %4058 = vst [vmem:[%s9676_s2 + $0x68] sm:$0xff] %v4042_v3  ;;  %v4011_v16 = vpop.permute.xlu1 %4010 }
 0x706   :  { %v4028_v4 = vsel %vm3948_vm15, %v4011_v16, 0.0 }
 0x707   :  { %v4044_v39 = vadd.f32 %v4028_v4, %v9226_v11 }
 0x709   :  { %4060 = vst [vmem:[%s9676_s2 + $0x78] sm:$0xff] %v4044_v39 }

</bundles_post_ra>
